<compile_context>
chip_gen: v7x
topology: tpu7x:2x2x1
jax: 0.10.0
libtpu: 0.0.40
codegen_flags: <defaults>
</compile_context>

<pallas_src>
import jax
import jax.numpy as jnp
from jax.experimental import pallas as pl
from jax.experimental.pallas import tpu as pltpu

# Network geometry (fixed by the module for a (B, 1, 49, 10) MFCC input).
H, W = 25, 5          # conv1 output spatial map
HP, WP = 32, 8        # padded spatial grid (extra zero rows/cols = 'same' pad)
NROW = HP * WP        # 256 rows; row index = h * WP + w
C = 64                # channels everywhere after conv1
KP = 40               # conv1 im2col patch length (10 * 4)
NCLS = 12             # fc1 outputs


# ---------------------------------------------------------------------------
# Fused Pallas kernel: whole network for one sample per grid step
# ---------------------------------------------------------------------------

def _dscnn_kernel(p_ref,
                  w1_ref, t1_ref,
                  wd2_ref, td2_ref, wp3_ref, tp3_ref,
                  wd4_ref, td4_ref, wp5_ref, tp5_ref,
                  wd6_ref, td6_ref, wp7_ref, tp7_ref,
                  wd8_ref, td8_ref, wp9_ref, tp9_ref,
                  wfc_ref, o_ref):
    # Validity mask over the padded (HP, WP) spatial grid flattened into rows.
    r = jax.lax.broadcasted_iota(jnp.int32, (NROW, C), 0)
    valid = jnp.logical_and((r & (WP - 1)) < W, r < H * WP)

    def act(y, t_ref):
        # folded-BN shift + ReLU, then re-zero the padding rows/cols so the
        # zero-pad invariant required by the depthwise rolls always holds.
        return jnp.where(valid, jnp.maximum(y + t_ref[...], 0.0), 0.0)

    def pointwise(a, w_ref, t_ref):
        # 1x1 conv == (256, 64) @ (64, 64) matmul on the MXU.
        y = jnp.dot(a, w_ref[...], preferred_element_type=jnp.float32)
        return act(y, t_ref)

    def depthwise(a, w_ref, t_ref):
        # 3x3 depthwise (groups=64, 'same' zero padding). Each tap is one
        # sublane roll of the whole activation (XLU) + broadcast multiply-add.
        # Row layout row = h*WP + w with zero pad rows/cols guarantees that
        # every out-of-bounds neighbour lands on a zero row.
        w = w_ref[...]                                   # (9, C), tap = kh*3+kw
        acc = a * w[4:5, :]                              # centre tap (kh=kw=1)
        for dh in (-1, 0, 1):
            for dw in (-1, 0, 1):
                if dh == 0 and dw == 0:
                    continue
                tap = (dh + 1) * 3 + (dw + 1)
                # rolled[row] = a[row + dh*WP + dw]  (jnp.roll semantics)
                s = (-(dh * WP + dw)) % NROW
                acc = acc + pltpu.roll(a, s, axis=0) * w[tap:tap + 1, :]
        return act(acc, t_ref)

    # conv1 as im2col matmul (BN1 scale already folded into w1).
    a = pointwise(p_ref[0], w1_ref, t1_ref)              # (256, 64)

    # Four depthwise-separable blocks (conv2..conv9 with BN+ReLU).
    a = pointwise(depthwise(a, wd2_ref, td2_ref), wp3_ref, tp3_ref)
    a = pointwise(depthwise(a, wd4_ref, td4_ref), wp5_ref, tp5_ref)
    a = pointwise(depthwise(a, wd6_ref, td6_ref), wp7_ref, tp7_ref)
    a = pointwise(depthwise(a, wd8_ref, td8_ref), wp9_ref, tp9_ref)

    # AvgPool2d((25, 5)) + flatten + fc1 (no bias). Pad rows are zero, so a
    # plain sum over all 256 rows equals the sum over the 125 valid positions.
    pooled = jnp.sum(a, axis=0, keepdims=True) * (1.0 / float(H * W))  # (1, 64)
    o_ref[0] = jnp.dot(pooled, wfc_ref[...], preferred_element_type=jnp.float32)


# ---------------------------------------------------------------------------
# Parameters (deterministic, synthetic) with BN scale folded into the weights
# ---------------------------------------------------------------------------

def _bn_fold(key, c, eps=1e-5):
    k1, k2, k3, k4 = jax.random.split(key, 4)
    gamma = 1.0 + 0.1 * jax.random.normal(k1, (c,), jnp.float32)
    beta = 0.1 * jax.random.normal(k2, (c,), jnp.float32)
    mean = 0.1 * jax.random.normal(k3, (c,), jnp.float32)
    var = jnp.abs(jax.random.normal(k4, (c,), jnp.float32)) + 0.5
    scale = gamma / jnp.sqrt(var + eps)
    shift = beta - mean * scale
    return scale, shift


def init_params(key):
    ks = iter(jax.random.split(key, 32))
    p = {}
    # conv1: torch (64,1,10,4) -> (kh,kw,cout) -> (40,64); fold BN1 scale.
    w1 = 0.1 * jax.random.normal(next(ks), (10, 4, 64), jnp.float32)
    s1, t1 = _bn_fold(next(ks), C)
    p["w1"] = (w1 * s1).reshape(KP, C)
    p["t1"] = t1.reshape(1, C)
    # depthwise 3x3 (groups=64): torch (64,1,3,3) -> (9,64), fold BN scale.
    for layer in (2, 4, 6, 8):
        wd = 0.1 * jax.random.normal(next(ks), (3, 3, C), jnp.float32)
        s, t = _bn_fold(next(ks), C)
        p[f"w{layer}"] = (wd * s).reshape(9, C)
        p[f"t{layer}"] = t.reshape(1, C)
    # pointwise 1x1: stored (Cin, Cout), fold BN scale on Cout.
    for layer in (3, 5, 7, 9):
        wp = 0.1 * jax.random.normal(next(ks), (C, C), jnp.float32)
        s, t = _bn_fold(next(ks), C)
        p[f"w{layer}"] = wp * s[None, :]
        p[f"t{layer}"] = t.reshape(1, C)
    # fc1: torch (12, 64) -> stored (64, 12), no bias.
    p["wfc"] = 0.1 * jax.random.normal(next(ks), (C, NCLS), jnp.float32)
    return p


# ---------------------------------------------------------------------------
# Forward pass: im2col glue in JAX (static slices only) + one fused pallas_call
# ---------------------------------------------------------------------------

def dscnn_forward(x_nchw, params):
    B = x_nchw.shape[0]
    x = x_nchw[:, 0]                                    # (B, 49, 10), Cin = 1
    # pad1 = ConstantPad2d((left=1, right=1, top=5, bottom=5))
    xp = jnp.pad(x, ((0, 0), (5, 5), (1, 1)))           # (B, 59, 12)

    # conv1 im2col via static strided slices (no gather): tap k = kh*4 + kw,
    # output (h, w) reads xp[2h+kh, 2w+kw].
    taps = [xp[:, kh:kh + 2 * H - 1:2, kw:kw + 2 * W - 1:2]
            for kh in range(10) for kw in range(4)]     # 40 x (B, 25, 5)
    patches = jnp.stack(taps, axis=-1)                  # (B, 25, 5, 40)
    patches = jnp.pad(patches, ((0, 0), (0, HP - H), (0, WP - W), (0, 0)))
    patches = patches.reshape(B, NROW, KP)              # row = h*8 + w

    def rep(shape):  # weight block: full array, resident across all grid steps
        return pl.BlockSpec(shape, lambda b: (0,) * len(shape))

    in_specs = [pl.BlockSpec((1, NROW, KP), lambda b: (b, 0, 0)),
                rep((KP, C)), rep((1, C))]
    for _ in range(4):
        in_specs += [rep((9, C)), rep((1, C)), rep((C, C)), rep((1, C))]
    in_specs.append(rep((C, NCLS)))

    out = pl.pallas_call(
        _dscnn_kernel,
        out_shape=jax.ShapeDtypeStruct((B, 1, NCLS), jnp.float32),
        grid=(B,),
        in_specs=in_specs,
        out_specs=pl.BlockSpec((1, 1, NCLS), lambda b: (b, 0, 0)),
        compiler_params=pltpu.CompilerParams(dimension_semantics=("parallel",)),
    )(patches,
      params["w1"], params["t1"],
      params["w2"], params["t2"], params["w3"], params["t3"],
      params["w4"], params["t4"], params["w5"], params["t5"],
      params["w6"], params["t6"], params["w7"], params["t7"],
      params["w8"], params["t8"], params["w9"], params["t9"],
      params["wfc"])
    return out.reshape(B, NCLS)


# ---------------------------------------------------------------------------
# Main
# ---------------------------------------------------------------------------

if __name__ == "__main__":
    key = jax.random.PRNGKey(0)
    k_x, k_p = jax.random.split(key)
    # Canonical DSCNN/KWS input: (B, C=1, H=49 time frames, W=10 MFCC bins).
    x = jax.random.normal(k_x, (2, 1, 49, 10), dtype=jnp.float32)
    params = init_params(k_p)

    fwd = jax.jit(dscnn_forward)
    out = jax.block_until_ready(fwd(x, params))
    assert out.shape == (2, NCLS), out.shape
    assert bool(jnp.all(jnp.isfinite(out)))
    print("KERNEL_OK")
</pallas_src>

<mosaic_0001>
module attributes {stable_mosaic.version = 11 : i64} {
  func.func @_dscnn_kernel(%arg0: i32, %arg1: memref<1x256x40xf32, #tpu.memory_space<vmem>>, %arg2: memref<40x64xf32, #tpu.memory_space<vmem>>, %arg3: memref<1x64xf32, #tpu.memory_space<vmem>>, %arg4: memref<9x64xf32, #tpu.memory_space<vmem>>, %arg5: memref<1x64xf32, #tpu.memory_space<vmem>>, %arg6: memref<64x64xf32, #tpu.memory_space<vmem>>, %arg7: memref<1x64xf32, #tpu.memory_space<vmem>>, %arg8: memref<9x64xf32, #tpu.memory_space<vmem>>, %arg9: memref<1x64xf32, #tpu.memory_space<vmem>>, %arg10: memref<64x64xf32, #tpu.memory_space<vmem>>, %arg11: memref<1x64xf32, #tpu.memory_space<vmem>>, %arg12: memref<9x64xf32, #tpu.memory_space<vmem>>, %arg13: memref<1x64xf32, #tpu.memory_space<vmem>>, %arg14: memref<64x64xf32, #tpu.memory_space<vmem>>, %arg15: memref<1x64xf32, #tpu.memory_space<vmem>>, %arg16: memref<9x64xf32, #tpu.memory_space<vmem>>, %arg17: memref<1x64xf32, #tpu.memory_space<vmem>>, %arg18: memref<64x64xf32, #tpu.memory_space<vmem>>, %arg19: memref<1x64xf32, #tpu.memory_space<vmem>>, %arg20: memref<64x12xf32, #tpu.memory_space<vmem>>, %arg21: memref<1x1x12xf32, #tpu.memory_space<vmem>>) attributes {dimension_semantics = [#tpu.dimension_semantics<parallel>], iteration_bounds = array<i64: 2>, scalar_prefetch = 0 : i64, scratch_operands = 0 : i64, tpu.core_type = #tpu.core_type<tc>, window_params = [{transform_indices = @transform_0, window_bounds = array<i64: 1, 256, 40>}, {pipeline_mode = #tpu.pipeline_mode<synchronous>, transform_indices = @transform_1, window_bounds = array<i64: 40, 64>}, {pipeline_mode = #tpu.pipeline_mode<synchronous>, transform_indices = @transform_2, window_bounds = array<i64: 1, 64>}, {pipeline_mode = #tpu.pipeline_mode<synchronous>, transform_indices = @transform_3, window_bounds = array<i64: 9, 64>}, {pipeline_mode = #tpu.pipeline_mode<synchronous>, transform_indices = @transform_4, window_bounds = array<i64: 1, 64>}, {pipeline_mode = #tpu.pipeline_mode<synchronous>, transform_indices = @transform_5, window_bounds = array<i64: 64, 64>}, {pipeline_mode = #tpu.pipeline_mode<synchronous>, transform_indices = @transform_6, window_bounds = array<i64: 1, 64>}, {pipeline_mode = #tpu.pipeline_mode<synchronous>, transform_indices = @transform_7, window_bounds = array<i64: 9, 64>}, {pipeline_mode = #tpu.pipeline_mode<synchronous>, transform_indices = @transform_8, window_bounds = array<i64: 1, 64>}, {pipeline_mode = #tpu.pipeline_mode<synchronous>, transform_indices = @transform_9, window_bounds = array<i64: 64, 64>}, {pipeline_mode = #tpu.pipeline_mode<synchronous>, transform_indices = @transform_10, window_bounds = array<i64: 1, 64>}, {pipeline_mode = #tpu.pipeline_mode<synchronous>, transform_indices = @transform_11, window_bounds = array<i64: 9, 64>}, {pipeline_mode = #tpu.pipeline_mode<synchronous>, transform_indices = @transform_12, window_bounds = array<i64: 1, 64>}, {pipeline_mode = #tpu.pipeline_mode<synchronous>, transform_indices = @transform_13, window_bounds = array<i64: 64, 64>}, {pipeline_mode = #tpu.pipeline_mode<synchronous>, transform_indices = @transform_14, window_bounds = array<i64: 1, 64>}, {pipeline_mode = #tpu.pipeline_mode<synchronous>, transform_indices = @transform_15, window_bounds = array<i64: 9, 64>}, {pipeline_mode = #tpu.pipeline_mode<synchronous>, transform_indices = @transform_16, window_bounds = array<i64: 1, 64>}, {pipeline_mode = #tpu.pipeline_mode<synchronous>, transform_indices = @transform_17, window_bounds = array<i64: 64, 64>}, {pipeline_mode = #tpu.pipeline_mode<synchronous>, transform_indices = @transform_18, window_bounds = array<i64: 1, 64>}, {pipeline_mode = #tpu.pipeline_mode<synchronous>, transform_indices = @transform_19, window_bounds = array<i64: 64, 12>}, {transform_indices = @transform_20, window_bounds = array<i64: 1, 1, 12>}]} {
    %0 = tpu.iota {dimensions = array<i32: 0>} : vector<256x64xi32>
    %c7_i32 = arith.constant 7 : i32
    %1 = vector.broadcast %c7_i32 : i32 to vector<256x64xi32>
    %2 = arith.andi %0, %1 : vector<256x64xi32>
    %c5_i32 = arith.constant 5 : i32
    %3 = vector.broadcast %c5_i32 : i32 to vector<256x64xi32>
    %4 = arith.cmpi slt, %2, %3 : vector<256x64xi32>
    %c200_i32 = arith.constant 200 : i32
    %5 = vector.broadcast %c200_i32 : i32 to vector<256x64xi32>
    %6 = arith.cmpi slt, %0, %5 : vector<256x64xi32>
    %7 = arith.andi %4, %6 : vector<256x64xi1>
    %c0 = arith.constant 0 : index
    %c0_0 = arith.constant 0 : index
    %c0_1 = arith.constant 0 : index
    %8 = vector.load %arg1[%c0, %c0_0, %c0_1] : memref<1x256x40xf32, #tpu.memory_space<vmem>>, vector<1x256x40xf32>
    %9 = vector.shape_cast %8 : vector<1x256x40xf32> to vector<256x40xf32>
    %c0_2 = arith.constant 0 : index
    %c0_3 = arith.constant 0 : index
    %10 = vector.load %arg2[%c0_2, %c0_3] : memref<40x64xf32, #tpu.memory_space<vmem>>, vector<40x64xf32>
    %cst = arith.constant dense<0.000000e+00> : vector<256x64xf32>
    %11 = tpu.matmul %9, %10, %cst {dimension_numbers = #tpu.dot_dimension_numbers<[1], [0], [0], [1], [0, 0, 1, 1], [], []>} : vector<256x40xf32>, vector<40x64xf32>, vector<256x64xf32> -> vector<256x64xf32>
    %c0_4 = arith.constant 0 : index
    %c0_5 = arith.constant 0 : index
    %12 = vector.load %arg3[%c0_4, %c0_5] : memref<1x64xf32, #tpu.memory_space<vmem>>, vector<1x64xf32>
    %13 = vector.broadcast %12 : vector<1x64xf32> to vector<256x64xf32>
    %14 = arith.addf %11, %13 : vector<256x64xf32>
    %cst_6 = arith.constant 0.000000e+00 : f32
    %15 = vector.broadcast %cst_6 : f32 to vector<256x64xf32>
    %16 = arith.maximumf %14, %15 : vector<256x64xf32>
    %cst_7 = arith.constant 0.000000e+00 : f32
    %17 = vector.broadcast %cst_7 : f32 to vector<256x64xf32>
    %18 = arith.select %7, %16, %17 : vector<256x64xi1>, vector<256x64xf32>
    %c0_8 = arith.constant 0 : index
    %c0_9 = arith.constant 0 : index
    %19 = vector.load %arg4[%c0_8, %c0_9] : memref<9x64xf32, #tpu.memory_space<vmem>>, vector<9x64xf32>
    %20 = vector.extract_strided_slice %19 {offsets = [4, 0], sizes = [1, 64], strides = [1, 1]} : vector<9x64xf32> to vector<1x64xf32>
    %21 = vector.broadcast %20 : vector<1x64xf32> to vector<256x64xf32>
    %22 = arith.mulf %18, %21 : vector<256x64xf32>
    %c9_i32 = arith.constant 9 : i32
    %23 = tpu.dynamic_rotate %18 by %c9_i32 dim 0 : vector<256x64xf32>, i32 -> vector<256x64xf32>
    %24 = vector.extract_strided_slice %19 {offsets = [0, 0], sizes = [1, 64], strides = [1, 1]} : vector<9x64xf32> to vector<1x64xf32>
    %25 = vector.broadcast %24 : vector<1x64xf32> to vector<256x64xf32>
    %26 = arith.mulf %23, %25 : vector<256x64xf32>
    %27 = arith.addf %22, %26 : vector<256x64xf32>
    %c8_i32 = arith.constant 8 : i32
    %28 = tpu.dynamic_rotate %18 by %c8_i32 dim 0 : vector<256x64xf32>, i32 -> vector<256x64xf32>
    %29 = vector.extract_strided_slice %19 {offsets = [1, 0], sizes = [1, 64], strides = [1, 1]} : vector<9x64xf32> to vector<1x64xf32>
    %30 = vector.broadcast %29 : vector<1x64xf32> to vector<256x64xf32>
    %31 = arith.mulf %28, %30 : vector<256x64xf32>
    %32 = arith.addf %27, %31 : vector<256x64xf32>
    %c7_i32_10 = arith.constant 7 : i32
    %33 = tpu.dynamic_rotate %18 by %c7_i32_10 dim 0 : vector<256x64xf32>, i32 -> vector<256x64xf32>
    %34 = vector.extract_strided_slice %19 {offsets = [2, 0], sizes = [1, 64], strides = [1, 1]} : vector<9x64xf32> to vector<1x64xf32>
    %35 = vector.broadcast %34 : vector<1x64xf32> to vector<256x64xf32>
    %36 = arith.mulf %33, %35 : vector<256x64xf32>
    %37 = arith.addf %32, %36 : vector<256x64xf32>
    %c1_i32 = arith.constant 1 : i32
    %38 = tpu.dynamic_rotate %18 by %c1_i32 dim 0 : vector<256x64xf32>, i32 -> vector<256x64xf32>
    %39 = vector.extract_strided_slice %19 {offsets = [3, 0], sizes = [1, 64], strides = [1, 1]} : vector<9x64xf32> to vector<1x64xf32>
    %40 = vector.broadcast %39 : vector<1x64xf32> to vector<256x64xf32>
    %41 = arith.mulf %38, %40 : vector<256x64xf32>
    %42 = arith.addf %37, %41 : vector<256x64xf32>
    %c255_i32 = arith.constant 255 : i32
    %43 = tpu.dynamic_rotate %18 by %c255_i32 dim 0 : vector<256x64xf32>, i32 -> vector<256x64xf32>
    %44 = vector.extract_strided_slice %19 {offsets = [5, 0], sizes = [1, 64], strides = [1, 1]} : vector<9x64xf32> to vector<1x64xf32>
    %45 = vector.broadcast %44 : vector<1x64xf32> to vector<256x64xf32>
    %46 = arith.mulf %43, %45 : vector<256x64xf32>
    %47 = arith.addf %42, %46 : vector<256x64xf32>
    %c249_i32 = arith.constant 249 : i32
    %48 = tpu.dynamic_rotate %18 by %c249_i32 dim 0 : vector<256x64xf32>, i32 -> vector<256x64xf32>
    %49 = vector.extract_strided_slice %19 {offsets = [6, 0], sizes = [1, 64], strides = [1, 1]} : vector<9x64xf32> to vector<1x64xf32>
    %50 = vector.broadcast %49 : vector<1x64xf32> to vector<256x64xf32>
    %51 = arith.mulf %48, %50 : vector<256x64xf32>
    %52 = arith.addf %47, %51 : vector<256x64xf32>
    %c248_i32 = arith.constant 248 : i32
    %53 = tpu.dynamic_rotate %18 by %c248_i32 dim 0 : vector<256x64xf32>, i32 -> vector<256x64xf32>
    %54 = vector.extract_strided_slice %19 {offsets = [7, 0], sizes = [1, 64], strides = [1, 1]} : vector<9x64xf32> to vector<1x64xf32>
    %55 = vector.broadcast %54 : vector<1x64xf32> to vector<256x64xf32>
    %56 = arith.mulf %53, %55 : vector<256x64xf32>
    %57 = arith.addf %52, %56 : vector<256x64xf32>
    %c247_i32 = arith.constant 247 : i32
    %58 = tpu.dynamic_rotate %18 by %c247_i32 dim 0 : vector<256x64xf32>, i32 -> vector<256x64xf32>
    %59 = vector.extract_strided_slice %19 {offsets = [8, 0], sizes = [1, 64], strides = [1, 1]} : vector<9x64xf32> to vector<1x64xf32>
    %60 = vector.broadcast %59 : vector<1x64xf32> to vector<256x64xf32>
    %61 = arith.mulf %58, %60 : vector<256x64xf32>
    %62 = arith.addf %57, %61 : vector<256x64xf32>
    %c0_11 = arith.constant 0 : index
    %c0_12 = arith.constant 0 : index
    %63 = vector.load %arg5[%c0_11, %c0_12] : memref<1x64xf32, #tpu.memory_space<vmem>>, vector<1x64xf32>
    %64 = vector.broadcast %63 : vector<1x64xf32> to vector<256x64xf32>
    %65 = arith.addf %62, %64 : vector<256x64xf32>
    %cst_13 = arith.constant 0.000000e+00 : f32
    %66 = vector.broadcast %cst_13 : f32 to vector<256x64xf32>
    %67 = arith.maximumf %65, %66 : vector<256x64xf32>
    %cst_14 = arith.constant 0.000000e+00 : f32
    %68 = vector.broadcast %cst_14 : f32 to vector<256x64xf32>
    %69 = arith.select %7, %67, %68 : vector<256x64xi1>, vector<256x64xf32>
    %c0_15 = arith.constant 0 : index
    %c0_16 = arith.constant 0 : index
    %70 = vector.load %arg6[%c0_15, %c0_16] : memref<64x64xf32, #tpu.memory_space<vmem>>, vector<64x64xf32>
    %cst_17 = arith.constant dense<0.000000e+00> : vector<256x64xf32>
    %71 = tpu.matmul %69, %70, %cst_17 {dimension_numbers = #tpu.dot_dimension_numbers<[1], [0], [0], [1], [0, 0, 1, 1], [], []>} : vector<256x64xf32>, vector<64x64xf32>, vector<256x64xf32> -> vector<256x64xf32>
    %c0_18 = arith.constant 0 : index
    %c0_19 = arith.constant 0 : index
    %72 = vector.load %arg7[%c0_18, %c0_19] : memref<1x64xf32, #tpu.memory_space<vmem>>, vector<1x64xf32>
    %73 = vector.broadcast %72 : vector<1x64xf32> to vector<256x64xf32>
    %74 = arith.addf %71, %73 : vector<256x64xf32>
    %cst_20 = arith.constant 0.000000e+00 : f32
    %75 = vector.broadcast %cst_20 : f32 to vector<256x64xf32>
    %76 = arith.maximumf %74, %75 : vector<256x64xf32>
    %cst_21 = arith.constant 0.000000e+00 : f32
    %77 = vector.broadcast %cst_21 : f32 to vector<256x64xf32>
    %78 = arith.select %7, %76, %77 : vector<256x64xi1>, vector<256x64xf32>
    %c0_22 = arith.constant 0 : index
    %c0_23 = arith.constant 0 : index
    %79 = vector.load %arg8[%c0_22, %c0_23] : memref<9x64xf32, #tpu.memory_space<vmem>>, vector<9x64xf32>
    %80 = vector.extract_strided_slice %79 {offsets = [4, 0], sizes = [1, 64], strides = [1, 1]} : vector<9x64xf32> to vector<1x64xf32>
    %81 = vector.broadcast %80 : vector<1x64xf32> to vector<256x64xf32>
    %82 = arith.mulf %78, %81 : vector<256x64xf32>
    %c9_i32_24 = arith.constant 9 : i32
    %83 = tpu.dynamic_rotate %78 by %c9_i32_24 dim 0 : vector<256x64xf32>, i32 -> vector<256x64xf32>
    %84 = vector.extract_strided_slice %79 {offsets = [0, 0], sizes = [1, 64], strides = [1, 1]} : vector<9x64xf32> to vector<1x64xf32>
    %85 = vector.broadcast %84 : vector<1x64xf32> to vector<256x64xf32>
    %86 = arith.mulf %83, %85 : vector<256x64xf32>
    %87 = arith.addf %82, %86 : vector<256x64xf32>
    %c8_i32_25 = arith.constant 8 : i32
    %88 = tpu.dynamic_rotate %78 by %c8_i32_25 dim 0 : vector<256x64xf32>, i32 -> vector<256x64xf32>
    %89 = vector.extract_strided_slice %79 {offsets = [1, 0], sizes = [1, 64], strides = [1, 1]} : vector<9x64xf32> to vector<1x64xf32>
    %90 = vector.broadcast %89 : vector<1x64xf32> to vector<256x64xf32>
    %91 = arith.mulf %88, %90 : vector<256x64xf32>
    %92 = arith.addf %87, %91 : vector<256x64xf32>
    %c7_i32_26 = arith.constant 7 : i32
    %93 = tpu.dynamic_rotate %78 by %c7_i32_26 dim 0 : vector<256x64xf32>, i32 -> vector<256x64xf32>
    %94 = vector.extract_strided_slice %79 {offsets = [2, 0], sizes = [1, 64], strides = [1, 1]} : vector<9x64xf32> to vector<1x64xf32>
    %95 = vector.broadcast %94 : vector<1x64xf32> to vector<256x64xf32>
    %96 = arith.mulf %93, %95 : vector<256x64xf32>
    %97 = arith.addf %92, %96 : vector<256x64xf32>
    %c1_i32_27 = arith.constant 1 : i32
    %98 = tpu.dynamic_rotate %78 by %c1_i32_27 dim 0 : vector<256x64xf32>, i32 -> vector<256x64xf32>
    %99 = vector.extract_strided_slice %79 {offsets = [3, 0], sizes = [1, 64], strides = [1, 1]} : vector<9x64xf32> to vector<1x64xf32>
    %100 = vector.broadcast %99 : vector<1x64xf32> to vector<256x64xf32>
    %101 = arith.mulf %98, %100 : vector<256x64xf32>
    %102 = arith.addf %97, %101 : vector<256x64xf32>
    %c255_i32_28 = arith.constant 255 : i32
    %103 = tpu.dynamic_rotate %78 by %c255_i32_28 dim 0 : vector<256x64xf32>, i32 -> vector<256x64xf32>
    %104 = vector.extract_strided_slice %79 {offsets = [5, 0], sizes = [1, 64], strides = [1, 1]} : vector<9x64xf32> to vector<1x64xf32>
    %105 = vector.broadcast %104 : vector<1x64xf32> to vector<256x64xf32>
    %106 = arith.mulf %103, %105 : vector<256x64xf32>
    %107 = arith.addf %102, %106 : vector<256x64xf32>
    %c249_i32_29 = arith.constant 249 : i32
    %108 = tpu.dynamic_rotate %78 by %c249_i32_29 dim 0 : vector<256x64xf32>, i32 -> vector<256x64xf32>
    %109 = vector.extract_strided_slice %79 {offsets = [6, 0], sizes = [1, 64], strides = [1, 1]} : vector<9x64xf32> to vector<1x64xf32>
    %110 = vector.broadcast %109 : vector<1x64xf32> to vector<256x64xf32>
    %111 = arith.mulf %108, %110 : vector<256x64xf32>
    %112 = arith.addf %107, %111 : vector<256x64xf32>
    %c248_i32_30 = arith.constant 248 : i32
    %113 = tpu.dynamic_rotate %78 by %c248_i32_30 dim 0 : vector<256x64xf32>, i32 -> vector<256x64xf32>
    %114 = vector.extract_strided_slice %79 {offsets = [7, 0], sizes = [1, 64], strides = [1, 1]} : vector<9x64xf32> to vector<1x64xf32>
    %115 = vector.broadcast %114 : vector<1x64xf32> to vector<256x64xf32>
    %116 = arith.mulf %113, %115 : vector<256x64xf32>
    %117 = arith.addf %112, %116 : vector<256x64xf32>
    %c247_i32_31 = arith.constant 247 : i32
    %118 = tpu.dynamic_rotate %78 by %c247_i32_31 dim 0 : vector<256x64xf32>, i32 -> vector<256x64xf32>
    %119 = vector.extract_strided_slice %79 {offsets = [8, 0], sizes = [1, 64], strides = [1, 1]} : vector<9x64xf32> to vector<1x64xf32>
    %120 = vector.broadcast %119 : vector<1x64xf32> to vector<256x64xf32>
    %121 = arith.mulf %118, %120 : vector<256x64xf32>
    %122 = arith.addf %117, %121 : vector<256x64xf32>
    %c0_32 = arith.constant 0 : index
    %c0_33 = arith.constant 0 : index
    %123 = vector.load %arg9[%c0_32, %c0_33] : memref<1x64xf32, #tpu.memory_space<vmem>>, vector<1x64xf32>
    %124 = vector.broadcast %123 : vector<1x64xf32> to vector<256x64xf32>
    %125 = arith.addf %122, %124 : vector<256x64xf32>
    %cst_34 = arith.constant 0.000000e+00 : f32
    %126 = vector.broadcast %cst_34 : f32 to vector<256x64xf32>
    %127 = arith.maximumf %125, %126 : vector<256x64xf32>
    %cst_35 = arith.constant 0.000000e+00 : f32
    %128 = vector.broadcast %cst_35 : f32 to vector<256x64xf32>
    %129 = arith.select %7, %127, %128 : vector<256x64xi1>, vector<256x64xf32>
    %c0_36 = arith.constant 0 : index
    %c0_37 = arith.constant 0 : index
    %130 = vector.load %arg10[%c0_36, %c0_37] : memref<64x64xf32, #tpu.memory_space<vmem>>, vector<64x64xf32>
    %cst_38 = arith.constant dense<0.000000e+00> : vector<256x64xf32>
    %131 = tpu.matmul %129, %130, %cst_38 {dimension_numbers = #tpu.dot_dimension_numbers<[1], [0], [0], [1], [0, 0, 1, 1], [], []>} : vector<256x64xf32>, vector<64x64xf32>, vector<256x64xf32> -> vector<256x64xf32>
    %c0_39 = arith.constant 0 : index
    %c0_40 = arith.constant 0 : index
    %132 = vector.load %arg11[%c0_39, %c0_40] : memref<1x64xf32, #tpu.memory_space<vmem>>, vector<1x64xf32>
    %133 = vector.broadcast %132 : vector<1x64xf32> to vector<256x64xf32>
    %134 = arith.addf %131, %133 : vector<256x64xf32>
    %cst_41 = arith.constant 0.000000e+00 : f32
    %135 = vector.broadcast %cst_41 : f32 to vector<256x64xf32>
    %136 = arith.maximumf %134, %135 : vector<256x64xf32>
    %cst_42 = arith.constant 0.000000e+00 : f32
    %137 = vector.broadcast %cst_42 : f32 to vector<256x64xf32>
    %138 = arith.select %7, %136, %137 : vector<256x64xi1>, vector<256x64xf32>
    %c0_43 = arith.constant 0 : index
    %c0_44 = arith.constant 0 : index
    %139 = vector.load %arg12[%c0_43, %c0_44] : memref<9x64xf32, #tpu.memory_space<vmem>>, vector<9x64xf32>
    %140 = vector.extract_strided_slice %139 {offsets = [4, 0], sizes = [1, 64], strides = [1, 1]} : vector<9x64xf32> to vector<1x64xf32>
    %141 = vector.broadcast %140 : vector<1x64xf32> to vector<256x64xf32>
    %142 = arith.mulf %138, %141 : vector<256x64xf32>
    %c9_i32_45 = arith.constant 9 : i32
    %143 = tpu.dynamic_rotate %138 by %c9_i32_45 dim 0 : vector<256x64xf32>, i32 -> vector<256x64xf32>
    %144 = vector.extract_strided_slice %139 {offsets = [0, 0], sizes = [1, 64], strides = [1, 1]} : vector<9x64xf32> to vector<1x64xf32>
    %145 = vector.broadcast %144 : vector<1x64xf32> to vector<256x64xf32>
    %146 = arith.mulf %143, %145 : vector<256x64xf32>
    %147 = arith.addf %142, %146 : vector<256x64xf32>
    %c8_i32_46 = arith.constant 8 : i32
    %148 = tpu.dynamic_rotate %138 by %c8_i32_46 dim 0 : vector<256x64xf32>, i32 -> vector<256x64xf32>
    %149 = vector.extract_strided_slice %139 {offsets = [1, 0], sizes = [1, 64], strides = [1, 1]} : vector<9x64xf32> to vector<1x64xf32>
    %150 = vector.broadcast %149 : vector<1x64xf32> to vector<256x64xf32>
    %151 = arith.mulf %148, %150 : vector<256x64xf32>
    %152 = arith.addf %147, %151 : vector<256x64xf32>
    %c7_i32_47 = arith.constant 7 : i32
    %153 = tpu.dynamic_rotate %138 by %c7_i32_47 dim 0 : vector<256x64xf32>, i32 -> vector<256x64xf32>
    %154 = vector.extract_strided_slice %139 {offsets = [2, 0], sizes = [1, 64], strides = [1, 1]} : vector<9x64xf32> to vector<1x64xf32>
    %155 = vector.broadcast %154 : vector<1x64xf32> to vector<256x64xf32>
    %156 = arith.mulf %153, %155 : vector<256x64xf32>
    %157 = arith.addf %152, %156 : vector<256x64xf32>
    %c1_i32_48 = arith.constant 1 : i32
    %158 = tpu.dynamic_rotate %138 by %c1_i32_48 dim 0 : vector<256x64xf32>, i32 -> vector<256x64xf32>
    %159 = vector.extract_strided_slice %139 {offsets = [3, 0], sizes = [1, 64], strides = [1, 1]} : vector<9x64xf32> to vector<1x64xf32>
    %160 = vector.broadcast %159 : vector<1x64xf32> to vector<256x64xf32>
    %161 = arith.mulf %158, %160 : vector<256x64xf32>
    %162 = arith.addf %157, %161 : vector<256x64xf32>
    %c255_i32_49 = arith.constant 255 : i32
    %163 = tpu.dynamic_rotate %138 by %c255_i32_49 dim 0 : vector<256x64xf32>, i32 -> vector<256x64xf32>
    %164 = vector.extract_strided_slice %139 {offsets = [5, 0], sizes = [1, 64], strides = [1, 1]} : vector<9x64xf32> to vector<1x64xf32>
    %165 = vector.broadcast %164 : vector<1x64xf32> to vector<256x64xf32>
    %166 = arith.mulf %163, %165 : vector<256x64xf32>
    %167 = arith.addf %162, %166 : vector<256x64xf32>
    %c249_i32_50 = arith.constant 249 : i32
    %168 = tpu.dynamic_rotate %138 by %c249_i32_50 dim 0 : vector<256x64xf32>, i32 -> vector<256x64xf32>
    %169 = vector.extract_strided_slice %139 {offsets = [6, 0], sizes = [1, 64], strides = [1, 1]} : vector<9x64xf32> to vector<1x64xf32>
    %170 = vector.broadcast %169 : vector<1x64xf32> to vector<256x64xf32>
    %171 = arith.mulf %168, %170 : vector<256x64xf32>
    %172 = arith.addf %167, %171 : vector<256x64xf32>
    %c248_i32_51 = arith.constant 248 : i32
    %173 = tpu.dynamic_rotate %138 by %c248_i32_51 dim 0 : vector<256x64xf32>, i32 -> vector<256x64xf32>
    %174 = vector.extract_strided_slice %139 {offsets = [7, 0], sizes = [1, 64], strides = [1, 1]} : vector<9x64xf32> to vector<1x64xf32>
    %175 = vector.broadcast %174 : vector<1x64xf32> to vector<256x64xf32>
    %176 = arith.mulf %173, %175 : vector<256x64xf32>
    %177 = arith.addf %172, %176 : vector<256x64xf32>
    %c247_i32_52 = arith.constant 247 : i32
    %178 = tpu.dynamic_rotate %138 by %c247_i32_52 dim 0 : vector<256x64xf32>, i32 -> vector<256x64xf32>
    %179 = vector.extract_strided_slice %139 {offsets = [8, 0], sizes = [1, 64], strides = [1, 1]} : vector<9x64xf32> to vector<1x64xf32>
    %180 = vector.broadcast %179 : vector<1x64xf32> to vector<256x64xf32>
    %181 = arith.mulf %178, %180 : vector<256x64xf32>
    %182 = arith.addf %177, %181 : vector<256x64xf32>
    %c0_53 = arith.constant 0 : index
    %c0_54 = arith.constant 0 : index
    %183 = vector.load %arg13[%c0_53, %c0_54] : memref<1x64xf32, #tpu.memory_space<vmem>>, vector<1x64xf32>
    %184 = vector.broadcast %183 : vector<1x64xf32> to vector<256x64xf32>
    %185 = arith.addf %182, %184 : vector<256x64xf32>
    %cst_55 = arith.constant 0.000000e+00 : f32
    %186 = vector.broadcast %cst_55 : f32 to vector<256x64xf32>
    %187 = arith.maximumf %185, %186 : vector<256x64xf32>
    %cst_56 = arith.constant 0.000000e+00 : f32
    %188 = vector.broadcast %cst_56 : f32 to vector<256x64xf32>
    %189 = arith.select %7, %187, %188 : vector<256x64xi1>, vector<256x64xf32>
    %c0_57 = arith.constant 0 : index
    %c0_58 = arith.constant 0 : index
    %190 = vector.load %arg14[%c0_57, %c0_58] : memref<64x64xf32, #tpu.memory_space<vmem>>, vector<64x64xf32>
    %cst_59 = arith.constant dense<0.000000e+00> : vector<256x64xf32>
    %191 = tpu.matmul %189, %190, %cst_59 {dimension_numbers = #tpu.dot_dimension_numbers<[1], [0], [0], [1], [0, 0, 1, 1], [], []>} : vector<256x64xf32>, vector<64x64xf32>, vector<256x64xf32> -> vector<256x64xf32>
    %c0_60 = arith.constant 0 : index
    %c0_61 = arith.constant 0 : index
    %192 = vector.load %arg15[%c0_60, %c0_61] : memref<1x64xf32, #tpu.memory_space<vmem>>, vector<1x64xf32>
    %193 = vector.broadcast %192 : vector<1x64xf32> to vector<256x64xf32>
    %194 = arith.addf %191, %193 : vector<256x64xf32>
    %cst_62 = arith.constant 0.000000e+00 : f32
    %195 = vector.broadcast %cst_62 : f32 to vector<256x64xf32>
    %196 = arith.maximumf %194, %195 : vector<256x64xf32>
    %cst_63 = arith.constant 0.000000e+00 : f32
    %197 = vector.broadcast %cst_63 : f32 to vector<256x64xf32>
    %198 = arith.select %7, %196, %197 : vector<256x64xi1>, vector<256x64xf32>
    %c0_64 = arith.constant 0 : index
    %c0_65 = arith.constant 0 : index
    %199 = vector.load %arg16[%c0_64, %c0_65] : memref<9x64xf32, #tpu.memory_space<vmem>>, vector<9x64xf32>
    %200 = vector.extract_strided_slice %199 {offsets = [4, 0], sizes = [1, 64], strides = [1, 1]} : vector<9x64xf32> to vector<1x64xf32>
    %201 = vector.broadcast %200 : vector<1x64xf32> to vector<256x64xf32>
    %202 = arith.mulf %198, %201 : vector<256x64xf32>
    %c9_i32_66 = arith.constant 9 : i32
    %203 = tpu.dynamic_rotate %198 by %c9_i32_66 dim 0 : vector<256x64xf32>, i32 -> vector<256x64xf32>
    %204 = vector.extract_strided_slice %199 {offsets = [0, 0], sizes = [1, 64], strides = [1, 1]} : vector<9x64xf32> to vector<1x64xf32>
    %205 = vector.broadcast %204 : vector<1x64xf32> to vector<256x64xf32>
    %206 = arith.mulf %203, %205 : vector<256x64xf32>
    %207 = arith.addf %202, %206 : vector<256x64xf32>
    %c8_i32_67 = arith.constant 8 : i32
    %208 = tpu.dynamic_rotate %198 by %c8_i32_67 dim 0 : vector<256x64xf32>, i32 -> vector<256x64xf32>
    %209 = vector.extract_strided_slice %199 {offsets = [1, 0], sizes = [1, 64], strides = [1, 1]} : vector<9x64xf32> to vector<1x64xf32>
    %210 = vector.broadcast %209 : vector<1x64xf32> to vector<256x64xf32>
    %211 = arith.mulf %208, %210 : vector<256x64xf32>
    %212 = arith.addf %207, %211 : vector<256x64xf32>
    %c7_i32_68 = arith.constant 7 : i32
    %213 = tpu.dynamic_rotate %198 by %c7_i32_68 dim 0 : vector<256x64xf32>, i32 -> vector<256x64xf32>
    %214 = vector.extract_strided_slice %199 {offsets = [2, 0], sizes = [1, 64], strides = [1, 1]} : vector<9x64xf32> to vector<1x64xf32>
    %215 = vector.broadcast %214 : vector<1x64xf32> to vector<256x64xf32>
    %216 = arith.mulf %213, %215 : vector<256x64xf32>
    %217 = arith.addf %212, %216 : vector<256x64xf32>
    %c1_i32_69 = arith.constant 1 : i32
    %218 = tpu.dynamic_rotate %198 by %c1_i32_69 dim 0 : vector<256x64xf32>, i32 -> vector<256x64xf32>
    %219 = vector.extract_strided_slice %199 {offsets = [3, 0], sizes = [1, 64], strides = [1, 1]} : vector<9x64xf32> to vector<1x64xf32>
    %220 = vector.broadcast %219 : vector<1x64xf32> to vector<256x64xf32>
    %221 = arith.mulf %218, %220 : vector<256x64xf32>
    %222 = arith.addf %217, %221 : vector<256x64xf32>
    %c255_i32_70 = arith.constant 255 : i32
    %223 = tpu.dynamic_rotate %198 by %c255_i32_70 dim 0 : vector<256x64xf32>, i32 -> vector<256x64xf32>
    %224 = vector.extract_strided_slice %199 {offsets = [5, 0], sizes = [1, 64], strides = [1, 1]} : vector<9x64xf32> to vector<1x64xf32>
    %225 = vector.broadcast %224 : vector<1x64xf32> to vector<256x64xf32>
    %226 = arith.mulf %223, %225 : vector<256x64xf32>
    %227 = arith.addf %222, %226 : vector<256x64xf32>
    %c249_i32_71 = arith.constant 249 : i32
    %228 = tpu.dynamic_rotate %198 by %c249_i32_71 dim 0 : vector<256x64xf32>, i32 -> vector<256x64xf32>
    %229 = vector.extract_strided_slice %199 {offsets = [6, 0], sizes = [1, 64], strides = [1, 1]} : vector<9x64xf32> to vector<1x64xf32>
    %230 = vector.broadcast %229 : vector<1x64xf32> to vector<256x64xf32>
    %231 = arith.mulf %228, %230 : vector<256x64xf32>
    %232 = arith.addf %227, %231 : vector<256x64xf32>
    %c248_i32_72 = arith.constant 248 : i32
    %233 = tpu.dynamic_rotate %198 by %c248_i32_72 dim 0 : vector<256x64xf32>, i32 -> vector<256x64xf32>
    %234 = vector.extract_strided_slice %199 {offsets = [7, 0], sizes = [1, 64], strides = [1, 1]} : vector<9x64xf32> to vector<1x64xf32>
    %235 = vector.broadcast %234 : vector<1x64xf32> to vector<256x64xf32>
    %236 = arith.mulf %233, %235 : vector<256x64xf32>
    %237 = arith.addf %232, %236 : vector<256x64xf32>
    %c247_i32_73 = arith.constant 247 : i32
    %238 = tpu.dynamic_rotate %198 by %c247_i32_73 dim 0 : vector<256x64xf32>, i32 -> vector<256x64xf32>
    %239 = vector.extract_strided_slice %199 {offsets = [8, 0], sizes = [1, 64], strides = [1, 1]} : vector<9x64xf32> to vector<1x64xf32>
    %240 = vector.broadcast %239 : vector<1x64xf32> to vector<256x64xf32>
    %241 = arith.mulf %238, %240 : vector<256x64xf32>
    %242 = arith.addf %237, %241 : vector<256x64xf32>
    %c0_74 = arith.constant 0 : index
    %c0_75 = arith.constant 0 : index
    %243 = vector.load %arg17[%c0_74, %c0_75] : memref<1x64xf32, #tpu.memory_space<vmem>>, vector<1x64xf32>
    %244 = vector.broadcast %243 : vector<1x64xf32> to vector<256x64xf32>
    %245 = arith.addf %242, %244 : vector<256x64xf32>
    %cst_76 = arith.constant 0.000000e+00 : f32
    %246 = vector.broadcast %cst_76 : f32 to vector<256x64xf32>
    %247 = arith.maximumf %245, %246 : vector<256x64xf32>
    %cst_77 = arith.constant 0.000000e+00 : f32
    %248 = vector.broadcast %cst_77 : f32 to vector<256x64xf32>
    %249 = arith.select %7, %247, %248 : vector<256x64xi1>, vector<256x64xf32>
    %c0_78 = arith.constant 0 : index
    %c0_79 = arith.constant 0 : index
    %250 = vector.load %arg18[%c0_78, %c0_79] : memref<64x64xf32, #tpu.memory_space<vmem>>, vector<64x64xf32>
    %cst_80 = arith.constant dense<0.000000e+00> : vector<256x64xf32>
    %251 = tpu.matmul %249, %250, %cst_80 {dimension_numbers = #tpu.dot_dimension_numbers<[1], [0], [0], [1], [0, 0, 1, 1], [], []>} : vector<256x64xf32>, vector<64x64xf32>, vector<256x64xf32> -> vector<256x64xf32>
    %c0_81 = arith.constant 0 : index
    %c0_82 = arith.constant 0 : index
    %252 = vector.load %arg19[%c0_81, %c0_82] : memref<1x64xf32, #tpu.memory_space<vmem>>, vector<1x64xf32>
    %253 = vector.broadcast %252 : vector<1x64xf32> to vector<256x64xf32>
    %254 = arith.addf %251, %253 : vector<256x64xf32>
    %cst_83 = arith.constant 0.000000e+00 : f32
    %255 = vector.broadcast %cst_83 : f32 to vector<256x64xf32>
    %256 = arith.maximumf %254, %255 : vector<256x64xf32>
    %cst_84 = arith.constant 0.000000e+00 : f32
    %257 = vector.broadcast %cst_84 : f32 to vector<256x64xf32>
    %258 = arith.select %7, %256, %257 : vector<256x64xi1>, vector<256x64xf32>
    %cst_85 = arith.constant dense<0.000000e+00> : vector<64xf32>
    %259 = vector.multi_reduction <add>, %258, %cst_85 [0] : vector<256x64xf32> to vector<64xf32>
    %260 = vector.shape_cast %259 : vector<64xf32> to vector<1x64xf32>
    %cst_86 = arith.constant 8.000000e-03 : f32
    %261 = vector.broadcast %cst_86 : f32 to vector<1x64xf32>
    %262 = arith.mulf %260, %261 : vector<1x64xf32>
    %c0_87 = arith.constant 0 : index
    %c0_88 = arith.constant 0 : index
    %263 = vector.load %arg20[%c0_87, %c0_88] : memref<64x12xf32, #tpu.memory_space<vmem>>, vector<64x12xf32>
    %cst_89 = arith.constant dense<0.000000e+00> : vector<1x12xf32>
    %264 = tpu.matmul %262, %263, %cst_89 {dimension_numbers = #tpu.dot_dimension_numbers<[1], [0], [0], [1], [0, 0, 1, 1], [], []>} : vector<1x64xf32>, vector<64x12xf32>, vector<1x12xf32> -> vector<1x12xf32>
    %c0_90 = arith.constant 0 : index
    %c0_91 = arith.constant 0 : index
    %c0_92 = arith.constant 0 : index
    %265 = vector.load %arg21[%c0_90, %c0_91, %c0_92] : memref<1x1x12xf32, #tpu.memory_space<vmem>>, vector<1x1x12xf32>
    %266 = vector.shape_cast %265 : vector<1x1x12xf32> to vector<1x12xf32>
    %267 = vector.shape_cast %264 : vector<1x12xf32> to vector<1x1x12xf32>
    tpu.vector_store %arg21[%c0_90, %c0_91, %c0_92], %267 {strides = array<i32>} : memref<1x1x12xf32, #tpu.memory_space<vmem>>, vector<1x1x12xf32>,
    return
  }
  func.func @transform_0(%arg0: i32) -> (i32, i32, i32) {
    %c0_i32 = arith.constant 0 : i32
    %c0_i32_0 = arith.constant 0 : i32
    %c0_i32_1 = arith.constant 0 : i32
    return %arg0, %c0_i32, %c0_i32_0 : i32, i32, i32
  }
  func.func @transform_1(%arg0: i32) -> (i32, i32) {
    %c0_i32 = arith.constant 0 : i32
    %c0_i32_0 = arith.constant 0 : i32
    %c0_i32_1 = arith.constant 0 : i32
    return %c0_i32, %c0_i32_0 : i32, i32
  }
  func.func @transform_2(%arg0: i32) -> (i32, i32) {
    %c0_i32 = arith.constant 0 : i32
    %c0_i32_0 = arith.constant 0 : i32
    %c0_i32_1 = arith.constant 0 : i32
    return %c0_i32, %c0_i32_0 : i32, i32
  }
  func.func @transform_3(%arg0: i32) -> (i32, i32) {
    %c0_i32 = arith.constant 0 : i32
    %c0_i32_0 = arith.constant 0 : i32
    %c0_i32_1 = arith.constant 0 : i32
    return %c0_i32, %c0_i32_0 : i32, i32
  }
  func.func @transform_4(%arg0: i32) -> (i32, i32) {
    %c0_i32 = arith.constant 0 : i32
    %c0_i32_0 = arith.constant 0 : i32
    %c0_i32_1 = arith.constant 0 : i32
    return %c0_i32, %c0_i32_0 : i32, i32
  }
  func.func @transform_5(%arg0: i32) -> (i32, i32) {
    %c0_i32 = arith.constant 0 : i32
    %c0_i32_0 = arith.constant 0 : i32
    %c0_i32_1 = arith.constant 0 : i32
    return %c0_i32, %c0_i32_0 : i32, i32
  }
  func.func @transform_6(%arg0: i32) -> (i32, i32) {
    %c0_i32 = arith.constant 0 : i32
    %c0_i32_0 = arith.constant 0 : i32
    %c0_i32_1 = arith.constant 0 : i32
    return %c0_i32, %c0_i32_0 : i32, i32
  }
  func.func @transform_7(%arg0: i32) -> (i32, i32) {
    %c0_i32 = arith.constant 0 : i32
    %c0_i32_0 = arith.constant 0 : i32
    %c0_i32_1 = arith.constant 0 : i32
    return %c0_i32, %c0_i32_0 : i32, i32
  }
  func.func @transform_8(%arg0: i32) -> (i32, i32) {
    %c0_i32 = arith.constant 0 : i32
    %c0_i32_0 = arith.constant 0 : i32
    %c0_i32_1 = arith.constant 0 : i32
    return %c0_i32, %c0_i32_0 : i32, i32
  }
  func.func @transform_9(%arg0: i32) -> (i32, i32) {
    %c0_i32 = arith.constant 0 : i32
    %c0_i32_0 = arith.constant 0 : i32
    %c0_i32_1 = arith.constant 0 : i32
    return %c0_i32, %c0_i32_0 : i32, i32
  }
  func.func @transform_10(%arg0: i32) -> (i32, i32) {
    %c0_i32 = arith.constant 0 : i32
    %c0_i32_0 = arith.constant 0 : i32
    %c0_i32_1 = arith.constant 0 : i32
    return %c0_i32, %c0_i32_0 : i32, i32
  }
  func.func @transform_11(%arg0: i32) -> (i32, i32) {
    %c0_i32 = arith.constant 0 : i32
    %c0_i32_0 = arith.constant 0 : i32
    %c0_i32_1 = arith.constant 0 : i32
    return %c0_i32, %c0_i32_0 : i32, i32
  }
  func.func @transform_12(%arg0: i32) -> (i32, i32) {
    %c0_i32 = arith.constant 0 : i32
    %c0_i32_0 = arith.constant 0 : i32
    %c0_i32_1 = arith.constant 0 : i32
    return %c0_i32, %c0_i32_0 : i32, i32
  }
  func.func @transform_13(%arg0: i32) -> (i32, i32) {
    %c0_i32 = arith.constant 0 : i32
    %c0_i32_0 = arith.constant 0 : i32
    %c0_i32_1 = arith.constant 0 : i32
    return %c0_i32, %c0_i32_0 : i32, i32
  }
  func.func @transform_14(%arg0: i32) -> (i32, i32) {
    %c0_i32 = arith.constant 0 : i32
    %c0_i32_0 = arith.constant 0 : i32
    %c0_i32_1 = arith.constant 0 : i32
    return %c0_i32, %c0_i32_0 : i32, i32
  }
  func.func @transform_15(%arg0: i32) -> (i32, i32) {
    %c0_i32 = arith.constant 0 : i32
    %c0_i32_0 = arith.constant 0 : i32
    %c0_i32_1 = arith.constant 0 : i32
    return %c0_i32, %c0_i32_0 : i32, i32
  }
  func.func @transform_16(%arg0: i32) -> (i32, i32) {
    %c0_i32 = arith.constant 0 : i32
    %c0_i32_0 = arith.constant 0 : i32
    %c0_i32_1 = arith.constant 0 : i32
    return %c0_i32, %c0_i32_0 : i32, i32
  }
  func.func @transform_17(%arg0: i32) -> (i32, i32) {
    %c0_i32 = arith.constant 0 : i32
    %c0_i32_0 = arith.constant 0 : i32
    %c0_i32_1 = arith.constant 0 : i32
    return %c0_i32, %c0_i32_0 : i32, i32
  }
  func.func @transform_18(%arg0: i32) -> (i32, i32) {
    %c0_i32 = arith.constant 0 : i32
    %c0_i32_0 = arith.constant 0 : i32
    %c0_i32_1 = arith.constant 0 : i32
    return %c0_i32, %c0_i32_0 : i32, i32
  }
  func.func @transform_19(%arg0: i32) -> (i32, i32) {
    %c0_i32 = arith.constant 0 : i32
    %c0_i32_0 = arith.constant 0 : i32
    %c0_i32_1 = arith.constant 0 : i32
    return %c0_i32, %c0_i32_0 : i32, i32
  }
  func.func @transform_20(%arg0: i32) -> (i32, i32, i32) {
    %c0_i32 = arith.constant 0 : i32
    %c0_i32_0 = arith.constant 0 : i32
    %c0_i32_1 = arith.constant 0 : i32
    return %arg0, %c0_i32, %c0_i32_0 : i32, i32, i32
  }
}

</mosaic_0001>

<bundles_post_ra>
// kernel: dscnn_forward.1
= control target key start
LH: loop header
LB: loop body
LE: loop exit
PB: predicated region body
PF: predicated region fallthrough
CT: control target
= control target key end

     0   :  { %s12543_s0 = inlined_call_operand.vmem [shape: f32[2,256,40], index: 0, kind: input, shape index: {}]   ;;  %s12544_s1 = inlined_call_operand.vmem [shape: f32[40,64], index: 1, kind: input, shape index: {}]   ;;  %s12545_s2 = inlined_call_operand.vmem [shape: f32[1,64], index: 2, kind: input, shape index: {}]   ;;  %s12546_s3 = inlined_call_operand.vmem [shape: f32[9,64], index: 3, kind: input, shape index: {}]   ;;  %s12547_s4 = inlined_call_operand.vmem [shape: f32[1,64], index: 4, kind: input, shape index: {}]   ;;  %s12548_s5 = inlined_call_operand.vmem [shape: f32[64,64], index: 5, kind: input, shape index: {}]   ;;  %s12549_s6 = inlined_call_operand.vmem [shape: f32[1,64], index: 6, kind: input, shape index: {}]   ;;  %s12550_s7 = inlined_call_operand.vmem [shape: f32[9,64], index: 7, kind: input, shape index: {}]   ;;  %s12551_s8 = inlined_call_operand.vmem [shape: f32[1,64], index: 8, kind: input, shape index: {}]   ;;  %s12552_s9 = inlined_call_operand.vmem [shape: f32[64,64], index: 9, kind: input, shape index: {}]   ;;  %s12553_s10 = inlined_call_operand.vmem [shape: f32[1,64], index: 10, kind: input, shape index: {}]   ;;  %s12554_s11 = inlined_call_operand.vmem [shape: f32[9,64], index: 11, kind: input, shape index: {}]   ;;  %s12555_s12 = inlined_call_operand.vmem [shape: f32[1,64], index: 12, kind: input, shape index: {}]   ;;  %s12556_s13 = inlined_call_operand.vmem [shape: f32[64,64], index: 13, kind: input, shape index: {}]   ;;  %s12557_s14 = inlined_call_operand.vmem [shape: f32[1,64], index: 14, kind: input, shape index: {}]   ;;  %s12558_s15 = inlined_call_operand.vmem [shape: f32[9,64], index: 15, kind: input, shape index: {}]   ;;  %s12559_s16 = inlined_call_operand.vmem [shape: f32[1,64], index: 16, kind: input, shape index: {}]   ;;  %s12560_s17 = inlined_call_operand.vmem [shape: f32[64,64], index: 17, kind: input, shape index: {}]   ;;  %s12561_s18 = inlined_call_operand.vmem [shape: f32[1,64], index: 18, kind: input, shape index: {}]   ;;  %s12562_s19 = inlined_call_operand.vmem [shape: f32[64,12], index: 19, kind: input, shape index: {}]   ;;  %s12563_s20 = inlined_call_operand.hbm [shape: f32[2,1,12], index: 20, kind: output, shape index: {}]  }
   0x1   :  { %12924 = sst [smem:[#allocation122_spill]] %s12543_s0 }
   0x2   :  { %12925 = sst [smem:[#allocation123_spill]] %s12544_s1 }
   0x3   :  { %12926 = sst [smem:[#allocation124_spill]] %s12545_s2 }
   0x4   :  { %12927 = sst [smem:[#allocation125_spill]] %s12546_s3 }
   0x5   :  { %12928 = sst [smem:[#allocation126_spill]] %s12547_s4 }
   0x6   :  { %12929 = sst [smem:[#allocation127_spill]] %s12548_s5 }
   0x7   :  { %12930 = sst [smem:[#allocation128_spill]] %s12549_s6 }
   0x8   :  { %25 = vsyncpa [#allocation3], 0 }
   0x9   :  { %27 = vsyncpa [#allocation3 + $0x1], 0  ;;  %s7300_s1 = smov 0   ;;  %s7302_s22 = smov 0  }
   0xa   :  { %s7304_s23 = smov 0   ;;  %s7306_s24 = smov 0  }
   0xb LB: > { %12931 = sst [smem:[#allocation5_spill]] %s7185_s23  ;;  %s7321_s2 = sadd.s32 4294967295, %s7189_s24   ;;  %s7189_s24 = sphi %s7306_s24, %s14174_s24   ;;  %s7185_s23 = sphi %s7304_s23, %s14176_s23   ;;  %s7181_s22 = sphi %s7302_s22, %s14178_s22   ;;  %s7177_s1 = sphi %s7300_s1, %s14177_s1  }
   0xc   : > { %s6294_s25 = sadd.s32 4294967294, %s7189_s24   ;;  %s7325_s3 = sadd.s32 1, %s7189_s24  }
   0xd   : > { %12932 = sst [smem:[#allocation6_spill]] %s7325_s3  ;;  %s465_s26 = sadd.s32 1, %s7185_s23 }
   0xe   : > { %s462_s27 = ssub.s32 %s7189_s24, %s7325_s3  ;;  %p475_p0 = scmp.ne.s32.totalorder %s7185_s23, %s7181_s22 }
   0xf   : > { %p463_p1 = scmp.eq.s32.totalorder %s462_s27, 0  ;;  %p476_p2 = scmp.eq.s32.totalorder %s7321_s2, 1 }
  0x10   : > { %p481_p3 = scmp.ne.s32.totalorder %s7181_s22, %s7177_s1  ;;  %p482_p4 = scmp.eq.s32.totalorder %s6294_s25, 1 }
  0x11   : > { %s7336_s28 = scalar_select %p463_p1, %s7185_s23, %s465_s26  }
  0x12   : > { %p7338_p5 = por %p476_p2, %p475_p0  ;;  %p7342_p6 = por %p482_p4, %p481_p3 }
  0x13   : > { %12933 = sst [smem:[#allocation7_spill]] %s7336_s28  ;;  %p6297_p7 = scmp.ge.s32.totalorder %s7189_s24, 1 }
  0x14   : > { %s12935_s29 = scalar_select %p7342_p6, 1, 0 }
  0x15   : > { %p565_p8 = scmp.lt.s32.totalorder %s7189_s24, 3 }
  0x16   : > { %12936 = sst [smem:[#allocation8_spill]] %s12935_s29 }
  0x17   : > { %p566_p9 = pnand %p6297_p7, %p565_p8 }
  0x19   : > { %569 = sbr.rel (%p566_p9) target bundleno = 1868 (0x74c), region = 100 }
  0x20   : > { %s12937_s21 = sld [smem:[#allocation123_spill]]  ;;  %p622_p10 = scmp.lt.s32.totalorder %s7321_s2, 1  ;;  %vm832_vm0 = vcmask 326656   ;;  %v627_v51 = vlaneseq  ;;  %v12570_v59 = vmov 0.0  }
  0x21   : > { %s12938_s26 = sld [smem:[#allocation122_spill]]  ;;  %s12939_s5 = sld [smem:[#allocation127_spill]]  ;;  %v7477_v60 = vrot.slane %v12570_v59, 7 }
  0x22   : > { %s623_s29 = scalar_select %p622_p10, %s7321_s2, 1  ;;  %v7458_v52 = vshrl.u32 %v627_v51, 7 }
  0x23   : > { %12945 = vst [vmem:[#allocation13_spill] sm:$0xff] %v7477_v60  ;;  %s12960_s25 = sld [smem:[#allocation124_spill]]  ;;  %s13135_s27 = sld [smem:[#allocation126_spill]] }
  0x24   : > { %s6449_s30 = sshll.u32 %s623_s29, 8  ;;  %v7461_v53 = vsub.s32 0, %v7458_v52  ;;  %v629_v54 = vadd.s32 8, %v7458_v52  ;;  %v7468_v56 = vsub.s32 4, %v7458_v52  ;;  %v7471_v57 = vsub.s32 1, %v7458_v52  ;;  %s13372_s6 = sld [smem:[#allocation128_spill]] }
  0x25   : > { %v7474_v58 = vsub.s32 7, %v7458_v52  ;;  %v7483_v63 = vsub.s32 2, %v7458_v52  ;;  %vm12640_vm4 = vcmp.lt.s32.totalorder %v7458_v52, 1  ;;  %vm12630_vm5 = vcmp.lt.s32.totalorder %v7458_v52, 7  ;;  %s620_s29 = sand.u32 1, %s7181_s22  }
  0x26   : > { %v820_v0 = vld [vmem:[%s12937_s21] sm:$0xff]  ;;  %v821_v1 = vld [vmem:[%s12937_s21 + $0x8] sm:$0xff]  ;;  %v822_v2 = vld [vmem:[%s12937_s21 + $0x10] sm:$0xff]  ;;  %12940 = vst [vmem:[#allocation9_spill] sm:$0xff] %v7461_v53  ;;  %v661_v62 = vand.u32 7, %v629_v54  ;;  %v7614_v51 = vadd.s32 136, %v7458_v52 }
  0x27   : > { %v6989_v3 = vpack.c.bf16 %v821_v1, %v820_v0  ;;  %v823_v4 = vld [vmem:[%s12937_s21 + $0x18] sm:$0xff]  ;;  %s7365_s28 = scalar_lea.vmem %s12938_s26, %s6449_s30  ;;  %v824_v6 = vld [vmem:[%s12937_s21 + $0x20] sm:$0xff]  ;;  %v2034_v34 = vld [vmem:[%s12939_s5 + $0x8] sm:$0xff]  ;;  %s12941_s30 = sld [smem:[#allocation125_spill]]  ;;  %12942 = vst [vmem:[#allocation10_spill] sm:$0xff] %v7468_v56 }
  0x28   : > { %v6993_v5 = vpack.c.bf16 %v823_v4, %v822_v2  ;;  %v788_v7 = vld [vmem:[%s7365_s28] sm:$0xff]  ;;  %v789_v8 = vld [vmem:[%s7365_s28 + $0x8] sm:$0xff]  ;;  %v806_v9 = vld [vmem:[%s7365_s28 + $0x90] sm:$0xff]  ;;  %12943 = vst [vmem:[#allocation11_spill] sm:$0xff] %v7471_v57  ;;  %v660_v4 = vand.u32 7, %v7458_v52  ;;  %vm7549_vm1 = vcmp.lt.s32.totalorder %v661_v62, 5 }
  0x29   : > { %6990 = vmatprep.subr.bf16.mxu0 %v6989_v3  ;;  %7073 = vmatprep.subr.bf16.mxu1 %v6989_v3  ;;  %v807_v10 = vld [vmem:[%s7365_s28 + $0x98] sm:$0xff]  ;;  %v790_v11 = vld [vmem:[%s7365_s28 + $0x10] sm:$0xff]  ;;  %v808_v12 = vld [vmem:[%s7365_s28 + $0xa0] sm:$0xff]  ;;  %12944 = vst [vmem:[#allocation12_spill] sm:$0xff] %v7474_v58  ;;  %s6227_s3 = scalar_lea.sflag [#allocation3], %s620_s29 }
  0x2a   : > { %6992 = vmatpush3.bf16.msra.mxu0 %v6989_v3  ;;  %7076 = vmatpush3.bf16.msra.mxu1 %v6989_v3  ;;  %v791_v13 = vld [vmem:[%s7365_s28 + $0x18] sm:$0xff]  ;;  %v809_v14 = vld [vmem:[%s7365_s28 + $0xa8] sm:$0xff]  ;;  %v792_v15 = vld [vmem:[%s7365_s28 + $0x20] sm:$0xff]  ;;  %12946 = vst [vmem:[#allocation14_spill] sm:$0xff] %v7483_v63  ;;  %v7495_v3 = vsub.s32 3, %v7458_v52  ;;  %vm7568_vm2 = vcmp.lt.s32.totalorder %v660_v4, 5 }
  0x2b   : > { %6994 = vmatprep.subr.bf16.mxu0 %v6993_v5  ;;  %7074 = vmatprep.subr.bf16.mxu1 %v6993_v5  ;;  %v810_v16 = vld [vmem:[%s7365_s28 + $0xb0] sm:$0xff]  ;;  %v793_v17 = vld [vmem:[%s7365_s28 + $0x28] sm:$0xff]  ;;  %v811_v18 = vld [vmem:[%s7365_s28 + $0xb8] sm:$0xff]  ;;  %v7618_v4 = vadd.s32 176, %v7458_v52 }
  0x2c   : > { %6666 = vmatprep.mubr.msk.f32.mxu0 %vm832_vm0, %v788_v7  ;;  %6693 = vmatprep.mubr.msk.f32.mxu1 %vm832_vm0, %v806_v9  ;;  %v794_v19 = vld [vmem:[%s7365_s28 + $0x30] sm:$0xff]  ;;  %v812_v20 = vld [vmem:[%s7365_s28 + $0xc0] sm:$0xff]  ;;  %v795_v21 = vld [vmem:[%s7365_s28 + $0x38] sm:$0xff]  ;;  %12947 = vst [vmem:[#allocation15_spill] sm:$0xff] %v7495_v3  ;;  %v631_v7 = vadd.s32 24, %v7458_v52 }
  0x2d   : > { %v813_v22 = vld [vmem:[%s7365_s28 + $0xc8] sm:$0xff]  ;;  %v796_v23 = vld [vmem:[%s7365_s28 + $0x40] sm:$0xff]  ;;  %v798_v25 = vld [vmem:[%s7365_s28 + $0x50] sm:$0xff]  ;;  %12967 = vst [vmem:[#allocation26_spill] sm:$0xff] %v7618_v4 }
  0x2e   : > { %6996 = vmatpush3.bf16.msra.mxu0 %v6993_v5  ;;  %7077 = vmatpush3.bf16.msra.mxu1 %v6993_v5  ;;  %v797_v24 = vld [vmem:[%s7365_s28 + $0x48] sm:$0xff]  ;;  %v799_v26 = vld [vmem:[%s7365_s28 + $0x58] sm:$0xff]  ;;  %v800_v27 = vld [vmem:[%s7365_s28 + $0x60] sm:$0xff]  ;;  %v7499_v5 = vrot.slane %v12570_v59, 1  ;;  %v12970_v59 = vmov 0 }
  0x2f   : > { %6664 = vmatprep.subr.mxu0 %v824_v6  ;;  %7075 = vmatprep.subr.mxu1 %v824_v6  ;;  %v801_v28 = vld [vmem:[%s7365_s28 + $0x68] sm:$0xff]  ;;  %v802_v29 = vld [vmem:[%s7365_s28 + $0x70] sm:$0xff]  ;;  %v803_v30 = vld [vmem:[%s7365_s28 + $0x78] sm:$0xff] }
  0x30   : > { %v804_v31 = vld [vmem:[%s7365_s28 + $0x80] sm:$0xff]  ;;  %v805_v32 = vld [vmem:[%s7365_s28 + $0x88] sm:$0xff]  ;;  %v2035_v36 = vld [vmem:[%s12939_s5 + $0x10] sm:$0xff]  ;;  %12948 = vst [vmem:[#allocation16_spill] sm:$0xff] %v7499_v5 }
  0x31   : > { %v2033_v33 = vld [vmem:[%s12939_s5] sm:$0xff]  ;;  %v2036_v37 = vld [vmem:[%s12939_s5 + $0x18] sm:$0xff]  ;;  %v814_v39 = vld [vmem:[%s7365_s28 + $0xd0] sm:$0xff] }
  0x32   : > { %6665 = vmatpush3.msra.mxu0 %v824_v6  ;;  %7078 = vmatpush3.msra.mxu1 %v824_v6  ;;  %v6997_v35 = vpack.c.bf16 %v2034_v34, %v2033_v33  ;;  %v7001_v38 = vpack.c.bf16 %v2036_v37, %v2035_v36  ;;  %v815_v40 = vld [vmem:[%s7365_s28 + $0xd8] sm:$0xff]  ;;  %v2037_v41 = vld [vmem:[%s12939_s5 + $0x20] sm:$0xff]  ;;  %v2038_v42 = vld [vmem:[%s12939_s5 + $0x28] sm:$0xff]  ;;  %v7502_v6 = vsub.s32 5, %v7458_v52  ;;  %v12957_v33 = vmov 0 }
  0x33   : > { %6667 = vmatmul.mubr.msk.f32.vlgmr.msra.gmra.mrb[0].mxu0 %vm832_vm0, %v789_v8  ;;  %6694 = vmatmul.mubr.msk.f32.vlgmr.msra.gmra.mrb[0].mxu1 %vm832_vm0, %v807_v10  ;;  %v7005_v43 = vpack.c.bf16 %v2038_v42, %v2037_v41  ;;  %v816_v44 = vld [vmem:[%s7365_s28 + $0xe0] sm:$0xff]  ;;  %v817_v45 = vld [vmem:[%s7365_s28 + $0xe8] sm:$0xff]  ;;  %v2039_v46 = vld [vmem:[%s12939_s5 + $0x30] sm:$0xff]  ;;  %v7513_v10 = vsub.s32 6, %v7458_v52  ;;  %v12958_v33 = vsel %vm7568_vm2, 4294967295, %v12957_v33  ;;  %v7576_v37 = vadd.s32 144, %v7458_v52 }
  0x34   : > { %6669 = vmatprep.mubr.msk.f32.mxu0 %vm832_vm0, %v790_v11  ;;  %6696 = vmatprep.mubr.msk.f32.mxu1 %vm832_vm0, %v808_v12  ;;  %v2040_v47 = vld [vmem:[%s12939_s5 + $0x38] sm:$0xff]  ;;  %v818_v49 = vld [vmem:[%s7365_s28 + $0xf0] sm:$0xff]  ;;  %v1218_v55 = vld [vmem:[%s12941_s30] sm:$0xff]  ;;  %12949 = vst [vmem:[#allocation17_spill] sm:$0xff] %v7502_v6  ;;  %v7516_v11 = vadd.s32 16, %v7458_v52  ;;  %v7584_v41 = vadd.s32 120, %v7458_v52 }
  0x35   : > { %6998 = vmatprep.subr.bf16.mxu1 %v6997_v35  ;;  %v7009_v48 = vpack.c.bf16 %v2040_v47, %v2039_v46  ;;  %v819_v50 = vld [vmem:[%s7365_s28 + $0xf8] sm:$0xff]  ;;  %v7480_v61 = vrot.slane %v1218_v55, %v7461_v53  ;;  %v7486_v0 = vrot.slane %v1218_v55, %v7468_v56  ;;  %v7489_v1 = vrot.slane %v1218_v55, %v7471_v57  ;;  %v7589_v42 = vld [vmem:[%s12960_s25] ss:$0 sm:$0xff]  ;;  %s621_s28 = scalar_lea.vmem [#allocation2], %s620_s29 }
  0x36   : > { %7000 = vmatpush3.bf16.msra.mxu1 %v6997_v35  ;;  %v7492_v2 = vrot.slane %v1218_v55, %v7474_v58  ;;  %12950 = vst [vmem:[#allocation18_spill] sm:$0xff] %v7513_v10  ;;  %v7519_v12 = vrot.slane %v1218_v55, %v7483_v63  ;;  %12959 = vst [vmem:[#allocation23_spill] sm:$0xff] %v12958_v33  ;;  %v7598_v46 = vadd.s32 160, %v7458_v52  ;;  %v7601_v47 = vadd.s32 112, %v7458_v52  ;;  %s6239_s0 = sshll.u32 %s621_s28, 4  ;;  %s12503_s0 = int_to_ptr.vmem [resolvable:$true] %s6239_s0 }
  0x37   : > { %6670 = vmatmul.mubr.msk.f32.gmra.mrb[2].mxu0 %vm832_vm0, %v791_v13  ;;  %6697 = vmatmul.mubr.msk.f32.gmra.mrb[2].mxu1 %vm832_vm0, %v809_v14  ;;  %v7507_v8 = vmul.f32 %v7480_v61, %v7477_v60  ;;  %v7510_v9 = vmul.f32 0.0, %v7489_v1  ;;  %v7522_v13 = vadd.s32 40, %v7458_v52  ;;  %v7525_v14 = vadd.s32 32, %v7458_v52  ;;  %s7127_s5 = scalar_lea.vmem %s12503_s0, 16 }
  0x38   : > { %6672 = vmatprep.mubr.msk.f32.mxu0 %vm832_vm0, %v792_v15  ;;  %6699 = vmatprep.mubr.msk.f32.mxu1 %vm832_vm0, %v810_v16  ;;  %12951 = vst [vmem:[#allocation19_spill] sm:$0xff] %v7519_v12  ;;  %v647_v15 = vadd.s32 152, %v7458_v52  ;;  %v7529_v16 = vrot.slane %v1218_v55, %v7495_v3  ;;  %p7128_p11 = scmp.ne.s32.totalorder %s12503_s0, %s7127_s5 }
  0x39   : > { %7002 = vmatprep.subr.bf16.mxu1 %v7001_v38 }
  0x3a   : > { %7004 = vmatpush3.bf16.msra.mxu1 %v7001_v38  ;;  %p7129_p12 = pnand %p7128_p11, %p7338_p5 }
  0x3b   : > { %6673 = vmatmul.mubr.msk.f32.gmra.mrb[4].mxu0 %vm832_vm0, %v793_v17  ;;  %6700 = vmatmul.mubr.msk.f32.gmra.mrb[4].mxu1 %vm832_vm0, %v811_v18  ;;  %v7532_v17 = vadd.s32 56, %v7458_v52  ;;  %v7535_v18 = vadd.s32 48, %v7458_v52 }
  0x3c   : > { %6675 = vmatprep.mubr.msk.f32.mxu0 %vm832_vm0, %v794_v19  ;;  %6702 = vmatprep.mubr.msk.f32.mxu1 %vm832_vm0, %v812_v20  ;;  %v7538_v19 = vadd.s32 72, %v7458_v52  ;;  %v7541_v20 = vrot.slane %v1218_v55, %v7502_v6  ;;  %p7130_p13 = pneg %p7129_p12 }
  0x3d   : > { %7006 = vmatprep.subr.bf16.mxu1 %v7005_v43 }
  0x3e   : > { %7008 = vmatpush3.bf16.msra.mxu1 %v7005_v43  ;;  %12952 = vst [vmem:[#allocation20_spill] sm:$0xff] %v7541_v20  ;;  %v12961_v43 = vmov 0 }
  0x3f   : > { %6676 = vmatmul.mubr.msk.f32.gmra.mrb[6].mxu0 %vm832_vm0, %v795_v21  ;;  %6703 = vmatmul.mubr.msk.f32.gmra.mrb[6].mxu1 %vm832_vm0, %v813_v22  ;;  %v663_v21 = vand.u32 7, %v631_v7  ;;  %v7544_v22 = vadd.s32 64, %v7458_v52  ;;  %v7621_v7 = vadd.s32 128, %v7458_v52 }
  0x40   : > { %6678 = vmatprep.mubr.msk.f32.mxu0 %vm832_vm0, %v796_v23  ;;  %6705 = vmatprep.mubr.msk.f32.mxu1 %vm832_vm0, %v814_v39  ;;  %v7547_v23 = vadd.s32 88, %v7458_v52 }
  0x41   : > { %7010 = vmatprep.subr.bf16.mxu1 %v7009_v48  ;;  %vm7591_vm3 = vcmp.lt.s32.totalorder %v663_v21, 5  ;;  %12968 = vst [vmem:[#allocation27_spill] sm:$0xff] %v7621_v7 }
  0x42   : > { %7012 = vmatpush3.bf16.msra.mxu1 %v7009_v48  ;;  %v12962_v43 = vsel %vm7591_vm3, 4294967295, %v12961_v43  ;;  %v12964_v48 = vmov 0 }
  0x43   : > { %6679 = vmatmul.mubr.msk.f32.gmra.mrb[8].mxu0 %vm832_vm0, %v797_v24  ;;  %6706 = vmatmul.mubr.msk.f32.gmra.mrb[8].mxu1 %vm832_vm0, %v815_v40  ;;  %v12953_v24 = vmov 0  ;;  %v7581_v40 = vadd.s32 168, %v7458_v52  ;;  %12963 = vst [vmem:[#allocation24_spill] sm:$0xff] %v12962_v43 }
  0x44   : > { %6681 = vmatprep.mubr.msk.f32.mxu0 %vm832_vm0, %v798_v25  ;;  %6708 = vmatprep.mubr.msk.f32.mxu1 %vm832_vm0, %v816_v44  ;;  %v12954_v24 = vsel %vm7549_vm1, 4294967295, %v12953_v24  ;;  %v7554_v25 = vrot.slane %v1218_v55, %v7513_v10 }
  0x45   : > { %12955 = vst [vmem:[#allocation21_spill] sm:$0xff] %v12954_v24 }
  0x46   : > { %12956 = vst [vmem:[#allocation22_spill] sm:$0xff] %v7554_v25 }
  0x47   : > { %6682 = vmatmul.mubr.msk.f32.gmra.mrb[10].mxu0 %vm832_vm0, %v799_v26  ;;  %6709 = vmatmul.mubr.msk.f32.gmra.mrb[10].mxu1 %vm832_vm0, %v817_v45  ;;  %v662_v26 = vand.u32 7, %v7516_v11  ;;  %v7624_v11 = vadd.s32 192, %v7458_v52 }
  0x48   : > { %6684 = vmatprep.mubr.msk.f32.mxu0 %vm832_vm0, %v800_v27  ;;  %6711 = vmatprep.mubr.msk.f32.mxu1 %vm832_vm0, %v818_v49  ;;  %v7558_v27 = vadd.s32 80, %v7458_v52 }
  0x49   : > { %12969 = vst [vmem:[#allocation28_spill] sm:$0xff] %v7624_v11  ;;  %vm7638_vm7 = vcmp.lt.s32.totalorder %v662_v26, 5 }
  0x4a   : > { %v12971_v59 = vsel %vm7638_vm7, 4294967295, %v12970_v59 }
  0x4b   : > { %6685 = vmatmul.mubr.msk.f32.gmra.mrb[12].mxu0 %vm832_vm0, %v801_v28  ;;  %6712 = vmatmul.mubr.msk.f32.gmra.mrb[12].mxu1 %vm832_vm0, %v819_v50  ;;  %v7561_v28 = vadd.s32 104, %v7458_v52  ;;  %v7611_v50 = vadd.s32 184, %v7458_v52  ;;  %12972 = vst [vmem:[#allocation29_spill] sm:$0xff] %v12971_v59 }
  0x4c   : > { %6687 = vmatprep.mubr.msk.f32.mxu0 %vm832_vm0, %v802_v29  ;;  %v665_v29 = vand.u32 7, %v7522_v13 }
  0x4e   : > { %vm7661_vm8 = vcmp.lt.s32.totalorder %v665_v29, 5 }
  0x4f   : > { %6688 = vmatmul.mubr.msk.f32.gmra.mrb[14].mxu0 %vm832_vm0, %v803_v30 }
  0x50   : > { %6690 = vmatprep.mubr.msk.f32.mxu0 %vm832_vm0, %v804_v31  ;;  %v679_v31 = vand.u32 7, %v647_v15 }
  0x52   : > { %vm7605_vm6 = vcmp.lt.s32.totalorder %v679_v31, 5 }
  0x53   : > { %6691 = vmatmul.mubr.msk.f32.gmra.mrb[16].mxu0 %vm832_vm0, %v805_v32  ;;  %v7566_v32 = vadd.s32 96, %v7458_v52  ;;  %v12965_v48 = vsel %vm7605_vm6, 4294967295, %v12964_v48 }
  0x54   : > { %12966 = vst [vmem:[#allocation25_spill] sm:$0xff] %v12965_v48 }
 0x106   : > { %v6668_v54 = vpop.f32.mrb[0].mxu0  ;;  %v6695_v55 = vpop.f32.mrb[0].mxu1 }
 0x107   : > { %v1001_v13 = vadd.f32 %v6668_v54, %v7589_v42  ;;  %v995_v15 = vpop.f32.mrb[1].mxu0  ;;  %v1091_v21 = vadd.f32 %v6695_v55, %v7589_v42  ;;  %v1085_v31 = vpop.f32.mrb[1].mxu1 }
 0x108   : > { %v996_v62 = vadd.f32 %v7589_v42, %v995_v15  ;;  %v7632_v45 = vadd.f32 %v7589_v42, %v1085_v31 }
 0x109   : > { %v1155_v38 = vmax.f32 %v1001_v13, 0.0  ;;  %v1173_v36 = vmax.f32 %v1091_v21, 0.0 }
 0x10a   : > { %v1154_v35 = vmax.f32 %v996_v62, 0.0  ;;  %v6671_v34 = vpop.f32.mrb[2].mxu0  ;;  %v6698_v15 = vpop.f32.mrb[2].mxu1 }
 0x10b   : > { %v7647_v13 = vsel %vm7549_vm1, %v1155_v38, 0.0  ;;  %v1011_v21 = vadd.f32 %v6671_v34, %v7589_v42  ;;  %v1005_v55 = vpop.f32.mrb[3].mxu0  ;;  %v7652_v26 = vsel %vm7605_vm6, %v1173_v36, 0.0  ;;  %v7655_v54 = vpop.f32.mrb[3].mxu1  ;;  %v12974_v38 = vmov 0 }
 0x10c   : > { %12973 = vst [vmem:[#allocation30_spill] sm:$0xff] %v7652_v26  ;;  %v1225_v49 = vmul.f32 %v7486_v0, %v7647_v13  ;;  %v1257_v44 = vrot.slane %v7647_v13, 7  ;;  %v12975_v38 = vsel %vm7661_vm8, 4294967295, %v12974_v38  ;;  %v7666_v34 = vadd.f32 %v6698_v15, %v7589_v42 }
 0x10d   : > { %12976 = vst [vmem:[#allocation31_spill] sm:$0xff] %v12975_v38  ;;  %v7670_v36 = vmul.f32 %v7489_v1, %v7647_v13  ;;  %v1186_v39 = vsel %vm7568_vm2, %v1154_v35, 0.0  ;;  %v1157_v62 = vmax.f32 %v1011_v21, 0.0  ;;  %v1006_v30 = vadd.f32 %v7589_v42, %v1005_v55 }
 0x10e   : > { %v7677_v31 = vmul.f32 %v7492_v2, %v7647_v13  ;;  %v1224_v29 = vmul.f32 %v7486_v0, %v1186_v39  ;;  %v1256_v58 = vrot.slane %v1186_v39, 7  ;;  %v1457_v10 = vrot.slane %v1186_v39, 1  ;;  %v6674_v15 = vpop.f32.mrb[4].mxu0  ;;  %v7680_v6 = vpop.f32.mrb[4].mxu1 }
 0x10f   : > { %v1394_v3 = vmul.f32 %v7489_v1, %v1186_v39  ;;  %v7685_v63 = vsel %vm7591_vm3, %v1157_v62, 0.0  ;;  %v1156_v35 = vmax.f32 %v1006_v30, 0.0  ;;  %v1021_v55 = vadd.f32 %v6674_v15, %v7589_v42  ;;  %v7688_v21 = vpop.f32.mrb[5].mxu0  ;;  %v7690_v57 = vpop.f32.mrb[5].mxu1 }
 0x110   : > { %12977 = vst [vmem:[#allocation32_spill] sm:$0xff] %v7677_v31  ;;  %12978 = vst [vmem:[#allocation33_spill] sm:$0xff] %v7690_v57  ;;  %v1319_v56 = vsel %vm12640_vm4, %v1256_v58, %v1257_v44  ;;  %v1320_v53 = vsel %vm12640_vm4, %v7477_v60, %v1256_v58  ;;  %v1357_v39 = vadd.f32 %v7507_v8, %v1224_v29  ;;  %v12979_v48 = vrot.slane %v7647_v13, 1 }
 0x111   : > { %v1326_v62 = vmul.f32 %v7480_v61, %v1320_v53  ;;  %v1521_v15 = vsel %vm12630_vm5, %v7499_v5, %v1457_v10  ;;  %v7709_v11 = vmul.f32 %v7486_v0, %v7652_v26  ;;  %v1594_v29 = vmul.f32 %v7529_v16, %v1320_v53 }
 0x112   : > { %v1520_v30 = vsel %vm12630_vm5, %v1457_v10, %v12979_v48  ;;  %v1425_v58 = vadd.f32 %v7510_v9, %v1357_v39  ;;  %v1526_v8 = vmul.f32 %v7519_v12, %v1521_v15  ;;  %v1595_v48 = vmul.f32 %v7529_v16, %v1319_v56  ;;  %v6677_v60 = vpop.f32.mrb[6].mxu0  ;;  %v6704_v24 = vpop.f32.mrb[6].mxu1 }
 0x113   : > { %v1527_v43 = vmul.f32 %v7519_v12, %v1520_v30  ;;  %12980 = vst [vmem:[#allocation34_spill] sm:$0xff] %v7709_v11  ;;  %v1358_v33 = vadd.f32 %v1326_v62, %v1225_v49  ;;  %v7716_v7 = vmul.f32 %v7541_v20, %v1520_v30  ;;  %v7719_v10 = vmul.f32 %v7554_v25, %v1319_v56  ;;  %v1025_v11 = vpop.f32.mrb[7].mxu0  ;;  %v7723_v9 = vpop.f32.mrb[7].mxu1 }
 0x114   : > { %v1227_v5 = vmul.f32 %v7486_v0, %v7685_v63  ;;  %12981 = vst [vmem:[#allocation35_spill] sm:$0xff] %v7723_v9  ;;  %v1558_v39 = vadd.f32 %v1526_v8, %v1425_v58  ;;  %v7728_v15 = vmul.f32 %v7489_v1, %v7685_v63  ;;  %v1188_v30 = vsel %vm7638_vm7, %v1156_v35, 0.0 }
 0x115   : > { %v1426_v49 = vadd.f32 %v1394_v3, %v1358_v33  ;;  %v1327_v62 = vmul.f32 %v7480_v61, %v1319_v56  ;;  %v1159_v4 = vmax.f32 %v1021_v55, 0.0  ;;  %v7738_v58 = vmul.f32 %v7492_v2, %v7685_v63 }
 0x116   : > { %v7734_v31 = vadd.f32 %v1594_v29, %v1558_v39  ;;  %v1226_v8 = vmul.f32 %v7486_v0, %v1188_v30  ;;  %v1258_v53 = vrot.slane %v1188_v30, 7  ;;  %v12983_v9 = vand.u32 7, %v7525_v14  ;;  %v6680_v3 = vpop.f32.mrb[8].mxu0 }
 0x117   : > { %12982 = vst [vmem:[#allocation36_spill] sm:$0xff] %v7738_v58  ;;  %v12984_v24 = vmov 0  ;;  %v1559_v33 = vadd.f32 %v1527_v43, %v1426_v49  ;;  %v1396_v56 = vmul.f32 %v7489_v1, %v1188_v30  ;;  %v1459_v35 = vrot.slane %v1188_v30, 1  ;;  %v1035_v29 = vpop.f32.mrb[9].mxu0 }
 0x118   : > { %vm7743_vm9 = vcmp.lt.s32.totalorder %v12983_v9, 5  ;;  %v7750_v55 = vsel %vm7661_vm8, %v1159_v4, 0.0  ;;  %v12988_v39 = vrot.slane %v7685_v63, 7  ;;  %v1318_v14 = vsel %vm12640_vm4, %v1257_v44, %v1258_v53 }
 0x119   : > { %v12985_v24 = vsel %vm7743_vm9, 4294967295, %v12984_v24  ;;  %12987 = vst [vmem:[#allocation38_spill] sm:$0xff] %v7750_v55  ;;  %v1359_v9 = vadd.f32 %v1327_v62, %v1226_v8  ;;  %v1799_v43 = vmul.f32 %v7492_v2, %v1188_v30  ;;  %v12989_v49 = vand.u32 7, %v7532_v17 }
 0x11a   : > { %12986 = vst [vmem:[#allocation37_spill] sm:$0xff] %v12985_v24  ;;  %v7756_v59 = vsel %vm12640_vm4, %v1258_v53, %v12988_v39  ;;  %v12990_v58 = vmov 0  ;;  %v12993_v4 = vand.u32 7, %v7535_v18  ;;  %v12994_v38 = vmov 0 }
 0x11b   : > { %vm7763_vm10 = vcmp.lt.s32.totalorder %v12989_v49, 5  ;;  %v1627_v39 = vadd.f32 %v1595_v48, %v1559_v33  ;;  %v1328_v57 = vmul.f32 %v7480_v61, %v1318_v14  ;;  %v12997_v44 = vrot.slane %v7685_v63, 1  ;;  %v6683_v49 = vpop.f32.mrb[10].mxu0 }
 0x11c   : > { %v12991_v58 = vsel %vm7763_vm10, 4294967295, %v12990_v58  ;;  %vm7769_vm11 = vcmp.lt.s32.totalorder %v12993_v4, 5  ;;  %v12999_v17 = vrot.slane %v7647_v13, 1  ;;  %v13000_v18 = vand.u32 7, %v7538_v19 }
 0x11d   : > { %12992 = vst [vmem:[#allocation39_spill] sm:$0xff] %v12991_v58  ;;  %v12995_v38 = vsel %vm7769_vm11, 4294967295, %v12994_v38  ;;  %v7778_v53 = vsel %vm12630_vm5, %v1459_v35, %v12997_v44  ;;  %v13001_v62 = vmov 0  ;;  %v1427_v48 = vadd.f32 %v7670_v36, %v1359_v9  ;;  %v7806_v9 = vpop.f32.mrb[11].mxu0 }
 0x11e   : > { %12996 = vst [vmem:[#allocation40_spill] sm:$0xff] %v12995_v38  ;;  %12998 = vst [vmem:[#allocation41_spill] sm:$0xff] %v7778_v53  ;;  %v7784_v30 = vsel %vm12630_vm5, %v12999_v17, %v1459_v35  ;;  %vm7788_vm12 = vcmp.lt.s32.totalorder %v13000_v18, 5  ;;  %v1529_v33 = vmul.f32 %v7519_v12, %v7778_v53  ;;  %v1229_v13 = vmul.f32 %v7486_v0, %v7750_v55 }
 0x11f   : > { %v13002_v62 = vsel %vm7788_vm12, 4294967295, %v13001_v62  ;;  %v1528_v8 = vmul.f32 %v7519_v12, %v7784_v30  ;;  %v1360_v35 = vadd.f32 %v1328_v57, %v1227_v5  ;;  %v7800_v4 = vmul.f32 %v7529_v16, %v1318_v14 }
 0x120   : > { %13003 = vst [vmem:[#allocation42_spill] sm:$0xff] %v13002_v62  ;;  %v1597_v19 = vmul.f32 %v7529_v16, %v7756_v59  ;;  %v1663_v36 = vmul.f32 %v7541_v20, %v7784_v30  ;;  %v1731_v17 = vmul.f32 %v7554_v25, %v1318_v14  ;;  %v1261_v18 = vrot.slane %v7750_v55, 7  ;;  %v7826_v25 = vpop.f32.mrb[12].mxu0 }
 0x121   : > { %13004 = vst [vmem:[#allocation43_spill] sm:$0xff] %v7800_v4  ;;  %v7808_v44 = vadd.f32 %v1528_v8, %v1427_v48  ;;  %v7814_v57 = vmul.f32 %v7489_v1, %v7750_v55  ;;  %v1428_v5 = vadd.f32 %v1396_v56, %v1360_v35  ;;  %v1016_v53 = vadd.f32 %v7589_v42, %v7688_v21 }
 0x122   : > { %v1695_v4 = vadd.f32 %v1663_v36, %v1627_v39  ;;  %v7821_v20 = vmul.f32 %v7492_v2, %v7750_v55  ;;  %v1031_v48 = vadd.f32 %v6677_v60, %v7589_v42  ;;  %v1026_v14 = vadd.f32 %v7589_v42, %v1025_v11  ;;  %v7829_v36 = vpop.f32.mrb[13].mxu0 }
 0x123   : > { %13005 = vst [vmem:[#allocation44_spill] sm:$0xff] %v7808_v44  ;;  %v1041_v8 = vadd.f32 %v6680_v3, %v7589_v42  ;;  %v1561_v44 = vadd.f32 %v1529_v33, %v1428_v5  ;;  %v1158_v39 = vmax.f32 %v1016_v53, 0.0  ;;  %v1036_v35 = vadd.f32 %v7589_v42, %v1035_v29 }
 0x124   : > { %13006 = vst [vmem:[#allocation45_spill] sm:$0xff] %v7821_v20  ;;  %v1763_v56 = vadd.f32 %v1731_v17, %v1695_v4  ;;  %v1329_v21 = vmul.f32 %v7480_v61, %v7756_v59  ;;  %v1161_v12 = vmax.f32 %v1031_v48, 0.0  ;;  %v1160_v20 = vmax.f32 %v1026_v14, 0.0  ;;  %v7853_v17 = vpop.f32.mrb[14].mxu0 }
 0x125   : > { %v1163_v55 = vmax.f32 %v1041_v8, 0.0  ;;  %v7833_v60 = vadd.f32 %v1597_v19, %v1561_v44  ;;  %v7839_v3 = vsel %vm7743_vm9, %v1158_v39, 0.0  ;;  %v13007_v53 = vand.u32 7, %v7544_v22 }
 0x126   : > { %v7835_v11 = vadd.f32 %v1799_v43, %v1763_v56  ;;  %v13008_v29 = vmov 0  ;;  %v1051_v33 = vadd.f32 %v6683_v49, %v7589_v42  ;;  %v1228_v4 = vmul.f32 %v7486_v0, %v7839_v3  ;;  %v7874_v56 = vpop.f32.mrb[15].mxu0 }
 0x127   : > { %vm7843_vm13 = vcmp.lt.s32.totalorder %v13007_v53, 5  ;;  %v1260_v19 = vrot.slane %v7839_v3, 7  ;;  %v1398_v43 = vmul.f32 %v7489_v1, %v7839_v3  ;;  %v1162_v44 = vmax.f32 %v1036_v35, 0.0 }
 0x128   : > { %v13009_v29 = vsel %vm7843_vm13, 4294967295, %v13008_v29  ;;  %v7858_v22 = vmul.f32 %v7492_v2, %v7839_v3  ;;  %v7862_v49 = vsel %vm7763_vm10, %v1161_v12, 0.0  ;;  %v7866_v48 = vsel %vm7769_vm11, %v1160_v20, 0.0 }
 0x129   : > { %13010 = vst [vmem:[#allocation46_spill] sm:$0xff] %v13009_v29  ;;  %13012 = vst [vmem:[#allocation48_spill] sm:$0xff] %v7862_v49  ;;  %v13013_v14 = vand.u32 7, %v7547_v23  ;;  %v13014_v8 = vmov 0  ;;  %v7878_v39 = vsel %vm12640_vm4, %v1260_v19, %v1261_v18  ;;  %v13018_v35 = vrot.slane %v7685_v63, 7 }
 0x12a   : > { %13011 = vst [vmem:[#allocation47_spill] sm:$0xff] %v7858_v22  ;;  %13017 = vst [vmem:[#allocation50_spill] sm:$0xff] %v7878_v39  ;;  %v1361_v20 = vadd.f32 %v1329_v21, %v1228_v4  ;;  %v7888_v23 = vsel %vm7788_vm12, %v1163_v55, 0.0  ;;  %v1231_v5 = vmul.f32 %v7486_v0, %v7862_v49  ;;  %v1263_v58 = vrot.slane %v7862_v49, 7 }
 0x12b   : > { %vm7870_vm14 = vcmp.lt.s32.totalorder %v13013_v14, 5  ;;  %v7884_v12 = vsel %vm12640_vm4, %v13018_v35, %v1260_v19  ;;  %v7904_v21 = vmul.f32 %v7529_v16, %v7878_v39  ;;  %v1401_v55 = vmul.f32 %v7489_v1, %v7862_v49  ;;  %v7909_v35 = vpop.f32.mrb[16].mxu0 }
 0x12c   : > { %v13015_v8 = vsel %vm7870_vm14, 4294967295, %v13014_v8  ;;  %13019 = vst [vmem:[#allocation51_spill] sm:$0xff] %v7884_v12  ;;  %v1330_v53 = vmul.f32 %v7480_v61, %v7884_v12  ;;  %v7894_v14 = vmul.f32 %v7529_v16, %v7884_v12  ;;  %v7900_v19 = vadd.f32 %v7728_v15, %v1361_v20  ;;  %v7916_v20 = vpop.f32.mrb[17].mxu0 }
 0x12d   : > { %13016 = vst [vmem:[#allocation49_spill] sm:$0xff] %v13015_v8  ;;  %13021 = vst [vmem:[#allocation53_spill] sm:$0xff] %v7904_v21  ;;  %v1230_v38 = vmul.f32 %v7486_v0, %v7866_v48  ;;  %v1262_v24 = vrot.slane %v7866_v48, 7  ;;  %v1331_v15 = vmul.f32 %v7480_v61, %v7878_v39  ;;  %v7920_v21 = vmul.f32 %v7492_v2, %v7862_v49 }
 0x12e   : > { %13020 = vst [vmem:[#allocation52_spill] sm:$0xff] %v7894_v14  ;;  %v1362_v62 = vadd.f32 %v1330_v53, %v1229_v13  ;;  %v1400_v4 = vmul.f32 %v7489_v1, %v7866_v48  ;;  %v7927_v13 = vmul.f32 %v7492_v2, %v7866_v48  ;;  %v13025_v49 = vand.u32 7, %v7558_v27 }
 0x12f   : > { %13022 = vst [vmem:[#allocation54_spill] sm:$0xff] %v7920_v21  ;;  %v7933_v39 = vsel %vm12640_vm4, %v1262_v24, %v1263_v58  ;;  %v7937_v14 = vsel %vm12640_vm4, %v1261_v18, %v1262_v24  ;;  %v1363_v21 = vadd.f32 %v1331_v15, %v1230_v38  ;;  %v13026_v12 = vmov 0 }
 0x130   : > { %13023 = vst [vmem:[#allocation55_spill] sm:$0xff] %v7927_v13  ;;  %v7929_v53 = vadd.f32 %v1398_v43, %v1362_v62  ;;  %13024 = vst [vmem:[#allocation56_spill] sm:$0xff] %v7937_v14  ;;  %vm7941_vm15 = vcmp.lt.s32.totalorder %v13025_v49, 5  ;;  %v1332_v22 = vmul.f32 %v7480_v61, %v7937_v14  ;;  %v7949_v62 = vmul.f32 %v7529_v16, %v7937_v14 }
 0x131   : > { %v13027_v12 = vsel %vm7941_vm15, 4294967295, %v13026_v12  ;;  %v7953_v43 = vmul.f32 %v7529_v16, %v7933_v39  ;;  %v1233_v38 = vmul.f32 %v7486_v0, %v7888_v23  ;;  %v7958_v27 = vadd.f32 %v7814_v57, %v1363_v21 }
 0x132   : > { %13028 = vst [vmem:[#allocation57_spill] sm:$0xff] %v13027_v12  ;;  %13029 = vst [vmem:[#allocation58_spill] sm:$0xff] %v7949_v62  ;;  %v1265_v24 = vrot.slane %v7888_v23, 7  ;;  %v1403_v18 = vmul.f32 %v7489_v1, %v7888_v23  ;;  %v13032_v15 = vand.u32 7, %v7561_v28  ;;  %v13033_v62 = vmov 0 }
 0x133   : > { %13030 = vst [vmem:[#allocation59_spill] sm:$0xff] %v7953_v43  ;;  %13031 = vst [vmem:[#allocation60_spill] sm:$0xff] %v7958_v27  ;;  %v1364_v43 = vadd.f32 %v1332_v22, %v1231_v5  ;;  %v7972_v13 = vsel %vm7843_vm13, %v1162_v44, 0.0  ;;  %v1333_v57 = vmul.f32 %v7480_v61, %v7933_v39  ;;  %v1165_v21 = vmax.f32 %v1051_v33, 0.0 }
 0x134   : > { %vm7966_vm0 = vcmp.lt.s32.totalorder %v13032_v15, 5  ;;  %v13036_v14 = vand.u32 7, %v7576_v37  ;;  %v13037_v27 = vmov 0  ;;  %v7984_v28 = vmul.f32 %v7492_v2, %v7888_v23 }
 0x135   : > { %v13034_v62 = vsel %vm7966_vm0, 4294967295, %v13033_v62  ;;  %v1232_v5 = vmul.f32 %v7486_v0, %v7972_v13  ;;  %v1264_v44 = vrot.slane %v7972_v13, 7  ;;  %v1402_v22 = vmul.f32 %v7489_v1, %v7972_v13 }
 0x136   : > { %13035 = vst [vmem:[#allocation61_spill] sm:$0xff] %v13034_v62  ;;  %vm7978_vm5 = vcmp.lt.s32.totalorder %v13036_v14, 5  ;;  %13040 = vst [vmem:[#allocation63_spill] sm:$0xff] %v7984_v28  ;;  %v7991_v15 = vadd.f32 %v1400_v4, %v1364_v43  ;;  %v7996_v33 = vsel %vm7870_vm14, %v1165_v21, 0.0  ;;  %v1046_v14 = vadd.f32 %v7589_v42, %v7806_v9 }
 0x137   : > { %v13038_v27 = vsel %vm7978_vm5, 4294967295, %v13037_v27  ;;  %13041 = vst [vmem:[#allocation64_spill] sm:$0xff] %v7996_v33  ;;  %v8002_v49 = vsel %vm12640_vm4, %v1264_v44, %v1265_v24  ;;  %v8006_v29 = vsel %vm12640_vm4, %v1263_v58, %v1264_v44  ;;  %v1365_v28 = vadd.f32 %v1333_v57, %v1232_v5 }
 0x138   : > { %13039 = vst [vmem:[#allocation62_spill] sm:$0xff] %v13038_v27  ;;  %13042 = vst [vmem:[#allocation65_spill] sm:$0xff] %v8006_v29  ;;  %v8010_v4 = vmul.f32 %v7492_v2, %v7972_v13  ;;  %v13044_v43 = vand.u32 7, %v7566_v32  ;;  %v13045_v21 = vmov 0  ;;  %v1334_v9 = vmul.f32 %v7480_v61, %v8006_v29 }
 0x139   : > { %v8022_v37 = vmul.f32 %v7529_v16, %v8006_v29  ;;  %v8026_v58 = vmul.f32 %v7529_v16, %v8002_v49  ;;  %v1235_v57 = vmul.f32 %v7486_v0, %v7996_v33  ;;  %v8030_v5 = vadd.f32 %v1401_v55, %v1365_v28 }
 0x13a   : > { %13043 = vst [vmem:[#allocation66_spill] sm:$0xff] %v8010_v4  ;;  %vm8014_vm6 = vcmp.lt.s32.totalorder %v13044_v43, 5  ;;  %v1267_v32 = vrot.slane %v7996_v33, 7  ;;  %v1405_v44 = vmul.f32 %v7489_v1, %v7996_v33  ;;  %v1366_v8 = vadd.f32 %v1334_v9, %v1233_v38 }
 0x13b   : > { %v13046_v21 = vsel %vm8014_vm6, 4294967295, %v13045_v21  ;;  %13048 = vst [vmem:[#allocation68_spill] sm:$0xff] %v8022_v37  ;;  %13049 = vst [vmem:[#allocation69_spill] sm:$0xff] %v8026_v58  ;;  %v8038_v4 = vmul.f32 %v7492_v2, %v7996_v33  ;;  %v1164_v37 = vmax.f32 %v1046_v14, 0.0  ;;  %v1061_v58 = vadd.f32 %v7826_v25, %v7589_v42 }
 0x13c   : > { %13047 = vst [vmem:[#allocation67_spill] sm:$0xff] %v13046_v21  ;;  %v1335_v55 = vmul.f32 %v7480_v61, %v8002_v49  ;;  %v8047_v29 = vmul.f32 %v7489_v1, %v7652_v26  ;;  %v8050_v38 = vadd.f32 %v1402_v22, %v1366_v8  ;;  %v1056_v25 = vadd.f32 %v7589_v42, %v7829_v36 }
 0x13d   : > { %13050 = vst [vmem:[#allocation70_spill] sm:$0xff] %v8038_v4  ;;  %v8054_v9 = vsel %vm7941_vm15, %v1164_v37, 0.0  ;;  %v1167_v14 = vmax.f32 %v1061_v58, 0.0  ;;  %v8065_v8 = vmul.f32 %v7492_v2, %v7652_v26  ;;  %v13053_v43 = vand.u32 7, %v7581_v40 }
 0x13e   : > { %v1234_v4 = vmul.f32 %v7486_v0, %v8054_v9  ;;  %v1266_v28 = vrot.slane %v8054_v9, 7  ;;  %v1404_v33 = vmul.f32 %v7489_v1, %v8054_v9  ;;  %v8070_v37 = vmul.f32 %v7492_v2, %v8054_v9 }
 0x13f   : > { %13051 = vst [vmem:[#allocation71_spill] sm:$0xff] %v8065_v8  ;;  %v8074_v36 = vsel %vm7966_vm0, %v1167_v14, 0.0  ;;  %v1166_v58 = vmax.f32 %v1056_v25, 0.0  ;;  %vm8078_vm4 = vcmp.lt.s32.totalorder %v13053_v43, 5  ;;  %v13054_v12 = vmov 0 }
 0x140   : > { %13052 = vst [vmem:[#allocation72_spill] sm:$0xff] %v8070_v37  ;;  %v13055_v12 = vsel %vm8078_vm4, 4294967295, %v13054_v12  ;;  %vm13057_vm14 = vcmp.lt.s32.totalorder %v7458_v52, 1  ;;  %v1367_v37 = vadd.f32 %v1335_v55, %v1234_v4  ;;  %v13061_v62 = vmax.f32 %v7632_v45, 0.0 }
 0x141   : > { %13056 = vst [vmem:[#allocation73_spill] sm:$0xff] %v13055_v12  ;;  %v8084_v8 = vsel %vm13057_vm14, %v1266_v28, %v1267_v32  ;;  %vm13059_vm15 = vmmov %vm13057_vm14  ;;  %v8118_v27 = vmul.f32 %v7492_v2, %v8074_v36  ;;  %v13068_v45 = vmov 0  ;;  %v13071_v55 = vand.u32 7, %v7598_v46 }
 0x142   : > { %13058 = vst [vmem:[#allocation74_spill] sm:$0xff] %v8084_v8  ;;  %v8088_v22 = vsel %vm13059_vm15, %v1265_v24, %v1266_v28  ;;  %v8094_v14 = vsel %vm7978_vm5, %v13061_v62, 0.0  ;;  %v8104_v25 = vmul.f32 %v7529_v16, %v8084_v8  ;;  %v1237_v24 = vmul.f32 %v7486_v0, %v8074_v36 }
 0x143   : > { %13060 = vst [vmem:[#allocation75_spill] sm:$0xff] %v8088_v22  ;;  %13062 = vst [vmem:[#allocation76_spill] sm:$0xff] %v8094_v14  ;;  %v1336_v40 = vmul.f32 %v7480_v61, %v8088_v22  ;;  %v8100_v43 = vmul.f32 %v7529_v16, %v8088_v22  ;;  %v8108_v4 = vadd.f32 %v1403_v18, %v1367_v37  ;;  %v13067_v37 = vand.u32 7, %v7584_v41 }
 0x144   : > { %13064 = vst [vmem:[#allocation78_spill] sm:$0xff] %v8104_v25  ;;  %v8113_v62 = vmul.f32 %v7489_v1, %v8074_v36  ;;  %13065 = vst [vmem:[#allocation79_spill] sm:$0xff] %v8118_v27  ;;  %v8122_v25 = vsel %vm8014_vm6, %v1166_v58, 0.0  ;;  %v1337_v18 = vmul.f32 %v7480_v61, %v8084_v8  ;;  %vm8134_vm15 = vcmp.lt.s32.totalorder %v13071_v55, 5 }
 0x145   : > { %13063 = vst [vmem:[#allocation77_spill] sm:$0xff] %v8100_v43  ;;  %v1368_v28 = vadd.f32 %v1336_v40, %v1235_v57  ;;  %13066 = vst [vmem:[#allocation80_spill] sm:$0xff] %v8122_v25  ;;  %vm8128_vm14 = vcmp.lt.s32.totalorder %v13067_v37, 5  ;;  %v13072_v57 = vmov 0  ;;  %v1236_v40 = vmul.f32 %v7486_v0, %v8122_v25 }
 0x146   : > { %v13069_v45 = vsel %vm8128_vm14, 4294967295, %v13068_v45  ;;  %v13073_v57 = vsel %vm8134_vm15, 4294967295, %v13072_v57  ;;  %v1268_v58 = vrot.slane %v8122_v25, 7  ;;  %v1406_v21 = vmul.f32 %v7489_v1, %v8122_v25 }
 0x147   : > { %13070 = vst [vmem:[#allocation81_spill] sm:$0xff] %v13069_v45  ;;  %13074 = vst [vmem:[#allocation82_spill] sm:$0xff] %v13073_v57  ;;  %v8145_v41 = vmul.f32 %v7486_v0, %v8094_v14  ;;  %v8147_v37 = vadd.f32 %v1404_v33, %v1368_v28  ;;  %v8152_v55 = vmul.f32 %v7492_v2, %v8122_v25  ;;  %v13076_v8 = vrot.slane %v8074_v36, 7 }
 0x148   : > { %vm13077_vm5 = vcmp.lt.s32.totalorder %v7458_v52, 1  ;;  %v1369_v33 = vadd.f32 %v1337_v18, %v1236_v40  ;;  %v8167_v28 = vmul.f32 %v7489_v1, %v8094_v14  ;;  %v13082_v46 = vand.u32 7, %v7601_v47 }
 0x149   : > { %13075 = vst [vmem:[#allocation83_spill] sm:$0xff] %v8152_v55  ;;  %v8159_v43 = vsel %vm13077_vm5, %v1268_v58, %v13076_v8  ;;  %vm13079_vm0 = vmmov %vm13077_vm5  ;;  %v13083_v55 = vmov 0  ;;  %v13088_v18 = vrot.slane %v8094_v14, 7  ;;  %v8203_v25 = vmul.f32 %v7492_v2, %v8094_v14 }
 0x14a   : > { %13078 = vst [vmem:[#allocation84_spill] sm:$0xff] %v8159_v43  ;;  %v8163_v22 = vsel %vm13079_vm0, %v1267_v32, %v1268_v58  ;;  %13081 = vst [vmem:[#allocation86_spill] sm:$0xff] %v8167_v28  ;;  %vm8171_vm6 = vcmp.lt.s32.totalorder %v13082_v46, 5  ;;  %v13087_v32 = vrot.slane %v7652_v26, 7  ;;  %v8190_v58 = vadd.f32 %v1405_v44, %v1369_v33 }
 0x14b   : > { %13080 = vst [vmem:[#allocation85_spill] sm:$0xff] %v8163_v22  ;;  %v13084_v55 = vsel %vm8171_vm6, 4294967295, %v13083_v55  ;;  %v1338_v27 = vmul.f32 %v7480_v61, %v8163_v22  ;;  %v8179_v8 = vmul.f32 %v7529_v16, %v8163_v22  ;;  %vm13089_vm5 = vmmov %vm13079_vm0  ;;  %v8194_v46 = vmul.f32 %v7529_v16, %v8159_v43 }
 0x14c   : > { %13085 = vst [vmem:[#allocation87_spill] sm:$0xff] %v13084_v55  ;;  %v8187_v40 = vsel %vm13089_vm5, %v13088_v18, %v13087_v32  ;;  %13093 = vst [vmem:[#allocation92_spill] sm:$0xff] %v8203_v25  ;;  %v1071_v32 = vadd.f32 %v7853_v17, %v7589_v42  ;;  %v1096_v44 = vadd.f32 %v7589_v42, %v7655_v54 }
 0x14d   : > { %13086 = vst [vmem:[#allocation88_spill] sm:$0xff] %v8179_v8  ;;  %13090 = vst [vmem:[#allocation89_spill] sm:$0xff] %v8187_v40  ;;  %v8198_v28 = vmul.f32 %v7529_v16, %v8187_v40  ;;  %v1175_v8 = vmax.f32 %v7666_v34, 0.0  ;;  %v1370_v22 = vadd.f32 %v1338_v27, %v1237_v24  ;;  %v1345_v18 = vmul.f32 %v7480_v61, %v8187_v40  ;;  %v8220_v27 = vld [vmem:[%s12941_s30 + $0x8] ss:$0 sm:$0xff] }
 0x14e   : > { %13091 = vst [vmem:[#allocation90_spill] sm:$0xff] %v8194_v46  ;;  %v1066_v34 = vadd.f32 %v7589_v42, %v7874_v56  ;;  %v1694_v17 = vadd.f32 %v7716_v7, %v7734_v31  ;;  %v1339_v47 = vmul.f32 %v7480_v61, %v8159_v43  ;;  %v1174_v25 = vmax.f32 %v1096_v44, 0.0 }
 0x14f   : > { %13092 = vst [vmem:[#allocation91_spill] sm:$0xff] %v8198_v28  ;;  %v8211_v33 = vsel %vm8078_vm4, %v1175_v8, 0.0  ;;  %v8224_v24 = vadd.f32 %v1406_v21, %v1370_v22  ;;  %v1169_v28 = vmax.f32 %v1071_v32, 0.0  ;;  %v1866_v22 = vmul.f32 %v8220_v27, %v7784_v30 }
 0x150   : > { %13094 = vst [vmem:[#allocation93_spill] sm:$0xff] %v8211_v33  ;;  %v1245_v54 = vmul.f32 %v7486_v0, %v8211_v33  ;;  %v8233_v56 = vmul.f32 %v7489_v1, %v8211_v33  ;;  %v8238_v7 = vmul.f32 %v7492_v2, %v8211_v33  ;;  %v1168_v31 = vmax.f32 %v1066_v34, 0.0 }
 0x151   : > { %13095 = vst [vmem:[#allocation94_spill] sm:$0xff] %v8224_v24  ;;  %v1762_v21 = vadd.f32 %v7719_v10, %v1694_v17  ;;  %v8245_v8 = vsel %vm8128_vm14, %v1169_v28, 0.0  ;;  %v8249_v40 = vsel %vm8134_vm15, %v1174_v25, 0.0  ;;  %v13098_v32 = vand.u32 7, %v7611_v50 }
 0x152   : > { %13096 = vst [vmem:[#allocation95_spill] sm:$0xff] %v8238_v7  ;;  %13097 = vst [vmem:[#allocation96_spill] sm:$0xff] %v8249_v40  ;;  %v13099_v44 = vmov 0  ;;  %v1111_v10 = vadd.f32 %v7680_v6, %v7589_v42  ;;  %v13102_v34 = vand.u32 7, %v7614_v51  ;;  %v13103_v30 = vmov 0 }
 0x153   : > { %vm8253_vm0 = vcmp.lt.s32.totalorder %v13098_v32, 5  ;;  %v1081_v28 = vadd.f32 %v7909_v35, %v7589_v42  ;;  %v1239_v25 = vmul.f32 %v7486_v0, %v8245_v8  ;;  %v8272_v17 = vmul.f32 %v7489_v1, %v8245_v8  ;;  %v13106_v32 = vld [vmem:[#allocation33_spill] sm:$0xff] }
 0x154   : > { %v13100_v44 = vsel %vm8253_vm0, 4294967295, %v13099_v44  ;;  %vm8261_vm5 = vcmp.lt.s32.totalorder %v13102_v34, 5  ;;  %v1106_v6 = vadd.f32 %v7589_v42, %v13106_v32  ;;  %v8279_v34 = vmul.f32 %v7492_v2, %v8245_v8  ;;  %v13108_v32 = vld [vmem:[#allocation32_spill] sm:$0xff] }
 0x155   : > { %13101 = vst [vmem:[#allocation97_spill] sm:$0xff] %v13100_v44  ;;  %v13104_v30 = vsel %vm8261_vm5, 4294967295, %v13103_v30  ;;  %v1244_v35 = vmul.f32 %v7486_v0, %v8249_v40  ;;  %v1276_v12 = vrot.slane %v8249_v40, 7  ;;  %v1414_v50 = vmul.f32 %v7489_v1, %v8249_v40 }
 0x156   : > { %13105 = vst [vmem:[#allocation98_spill] sm:$0xff] %v13104_v30  ;;  %13107 = vst [vmem:[#allocation33_spill] sm:$0xff] %v8279_v34  ;;  %v8289_v7 = vsel %vm8171_vm6, %v1168_v31, 0.0  ;;  %v1830_v51 = vadd.f32 %v13108_v32, %v1762_v21  ;;  %v13109_v45 = vrot.slane %v8211_v33, 7  ;;  %vm13110_vm4 = vcmp.lt.s32.totalorder %v7458_v52, 1  ;;  %v13115_v31 = vld [vmem:[#allocation26_spill] sm:$0xff] }
 0x157   : > { %v13112_v46 = vrot.slane %v7652_v26, 7  ;;  %vm13113_vm15 = vmmov %vm13110_vm4  ;;  %v1377_v24 = vadd.f32 %v1345_v18, %v1244_v35  ;;  %v1238_v57 = vmul.f32 %v7486_v0, %v8289_v7  ;;  %v13116_v55 = vand.u32 7, %v13115_v31 }
 0x158   : > { %v8296_v34 = vsel %vm13110_vm4, %v1276_v12, %v13109_v45  ;;  %v13117_v21 = vmov 0  ;;  %v1408_v31 = vmul.f32 %v7489_v1, %v8289_v7  ;;  %v1176_v26 = vmax.f32 %v1106_v6, 0.0 }
 0x159   : > { %13111 = vst [vmem:[#allocation32_spill] sm:$0xff] %v8296_v34  ;;  %v8302_v43 = vsel %vm13113_vm15, %v13112_v46, %v1276_v12  ;;  %vm8308_vm14 = vcmp.lt.s32.totalorder %v13116_v55, 5  ;;  %v8320_v12 = vmul.f32 %v7492_v2, %v8249_v40  ;;  %v1270_v46 = vrot.slane %v8289_v7, 7  ;;  %vm13125_vm15 = vmmov %vm13110_vm4 }
 0x15a   : > { %13114 = vst [vmem:[#allocation99_spill] sm:$0xff] %v8302_v43  ;;  %v13118_v21 = vsel %vm8308_vm14, 4294967295, %v13117_v21  ;;  %v1346_v45 = vmul.f32 %v7480_v61, %v8302_v43  ;;  %v8316_v32 = vmul.f32 %v7529_v16, %v8302_v43  ;;  %v8324_v18 = vadd.f32 %v8047_v29, %v1377_v24 }
 0x15b   : > { %13119 = vst [vmem:[#allocation26_spill] sm:$0xff] %v13118_v21  ;;  %13121 = vst [vmem:[#allocation101_spill] sm:$0xff] %v8320_v12  ;;  %v8328_v55 = vmul.f32 %v7529_v16, %v8296_v34  ;;  %v1371_v35 = vadd.f32 %v1339_v47, %v1238_v57  ;;  %v13126_v40 = vrot.slane %v8074_v36, 7  ;;  %v13130_v47 = vmov 0 }
 0x15c   : > { %13120 = vst [vmem:[#allocation100_spill] sm:$0xff] %v8316_v32  ;;  %13122 = vst [vmem:[#allocation102_spill] sm:$0xff] %v8324_v18  ;;  %v1378_v43 = vadd.f32 %v1346_v45, %v1245_v54  ;;  %v13124_v32 = vrot.slane %v8245_v8, 7  ;;  %v1177_v24 = vmax.f32 %v1111_v10, 0.0  ;;  %v1171_v18 = vmax.f32 %v1081_v28, 0.0 }
 0x15d   : > { %13123 = vst [vmem:[#allocation103_spill] sm:$0xff] %v8328_v55  ;;  %v8342_v29 = vsel %vm13110_vm4, %v13126_v40, %v1270_v46  ;;  %v13128_v55 = vld [vmem:[#allocation27_spill] sm:$0xff]  ;;  %v8354_v45 = vadd.f32 %v8113_v62, %v1371_v35  ;;  %v8362_v40 = vmul.f32 %v7492_v2, %v8289_v7  ;;  %vm13142_vm4 = vcmask 523264  }
 0x15e   : > { %v8336_v12 = vsel %vm13125_vm15, %v1270_v46, %v13124_v32  ;;  %13127 = vst [vmem:[#allocation104_spill] sm:$0xff] %v8342_v29  ;;  %v13129_v57 = vand.u32 7, %v13128_v55  ;;  %v1340_v54 = vmul.f32 %v7480_v61, %v8342_v29  ;;  %v8358_v32 = vmul.f32 %v7529_v16, %v8342_v29  ;;  %v8367_v46 = vld [vmem:[%s13135_s27] ss:$0 sm:$0xff]  ;;  %s6446_s27 = sshll.u32 %s7321_s2, 4  ;;  %s7194_s2 = smov [#allocation2]  }
 0x15f   : > { %13134 = vst [vmem:[#allocation106_spill] sm:$0xff] %v8362_v40  ;;  %v8369_v55 = vadd.f32 %v1414_v50, %v1378_v43  ;;  %v8373_v35 = vmul.f32 %v7529_v16, %v8336_v12  ;;  %v8380_v29 = vsel %vm8253_vm0, %v1177_v24, 0.0  ;;  %v8384_v43 = vsel %vm8261_vm5, %v1171_v18, 0.0  ;;  %s12501_s23 = scalar_lea.hbm %s12563_s20, %s6446_s27 }
 0x160   : > { %vm8347_vm6 = vcmp.lt.s32.totalorder %v13129_v57, 5  ;;  %13133 = vst [vmem:[#allocation105_spill] sm:$0xff] %v8358_v32  ;;  %v1898_v57 = vadd.f32 %v1866_v22, %v1830_v51  ;;  %v1372_v62 = vadd.f32 %v1340_v54, %v1239_v25  ;;  %v1347_v32 = vmul.f32 %v7480_v61, %v8296_v34 }
 0x161   : > { %v13131_v47 = vsel %vm8347_vm6, 4294967295, %v13130_v47  ;;  %13136 = vst [vmem:[#allocation107_spill] sm:$0xff] %v8369_v55  ;;  %13137 = vst [vmem:[#allocation108_spill] sm:$0xff] %v8373_v35  ;;  %v1076_v22 = vadd.f32 %v7589_v42, %v7916_v20  ;;  %v1247_v28 = vmul.f32 %v7486_v0, %v8380_v29  ;;  %v1341_v50 = vmul.f32 %v7480_v61, %v8336_v12 }
 0x162   : > { %13132 = vst [vmem:[#allocation27_spill] sm:$0xff] %v13131_v47  ;;  %v1937_v40 = vadd.f32 %v8367_v46, %v1898_v57  ;;  %v8388_v10 = vadd.f32 %v1408_v31, %v1372_v62  ;;  %v8397_v51 = vmul.f32 %v7489_v1, %v8380_v29  ;;  %v8402_v20 = vmul.f32 %v7492_v2, %v8380_v29  ;;  %v13145_v57 = vld [vmem:[#allocation41_spill] sm:$0xff]  ;;  %v13171_v47 = vld [vmem:[#allocation44_spill] sm:$0xff] }
 0x163   : > { %v1241_v31 = vmul.f32 %v7486_v0, %v8384_v43  ;;  %v1273_v24 = vrot.slane %v8384_v43, 7  ;;  %v8409_v54 = vmul.f32 %v7489_v1, %v8384_v43  ;;  %v8416_v25 = vmul.f32 %v7492_v2, %v8384_v43 }
 0x164   : > { %v1969_v6 = vmax.f32 %v1937_v40, 0.0  ;;  %13138 = vst [vmem:[#allocation109_spill] sm:$0xff] %v8402_v20  ;;  %v8420_v18 = vsel %vm8308_vm14, %v1176_v26, 0.0  ;;  %v1170_v44 = vmax.f32 %v1076_v22, 0.0  ;;  %v13143_v20 = vrot.slane %v8094_v14, 7 }
 0x165   : > { %13139 = vst [vmem:[#allocation110_spill] sm:$0xff] %v8409_v54  ;;  %13141 = vst [vmem:[#allocation111_spill] sm:$0xff] %v8416_v25  ;;  %v12700_v40 = vrot.slane %v8420_v18, 7  ;;  %v1867_v34 = vmul.f32 %v8220_v27, %v13145_v57  ;;  %v13147_v21 = vrot.slane %v8211_v33, 7  ;;  %v13152_v35 = vrot.slane %v8380_v29, 1 }
 0x166   : > { %v2001_v62 = vsel %vm7568_vm2, %v1969_v6, 0.0  ;;  %v8427_v30 = vsel %vm13125_vm15, %v1273_v24, %v13143_v20  ;;  %v1246_v6 = vmul.f32 %v7486_v0, %v8420_v18  ;;  %v8453_v14 = vsel %vm8347_vm6, %v1170_v44, 0.0 }
 0x167   : > { %6730 = vmatprep.mubr.msk.f32.mxu1 %vm13142_vm4, %v2001_v62  ;;  %13144 = vst [vmem:[#allocation112_spill] sm:$0xff] %v8427_v30  ;;  %v1344_v26 = vmul.f32 %v7480_v61, %v8427_v30  ;;  %v8438_v22 = vmul.f32 %v7529_v16, %v8427_v30  ;;  %v1416_v62 = vmul.f32 %v7489_v1, %v8420_v18  ;;  %vm13148_vm4 = vmmov %vm13125_vm15  ;;  %v13150_v30 = vld [vmem:[#allocation34_spill] sm:$0xff]  ;;  %v13153_v33 = vrot.slane %v8420_v18, 1 }
 0x168   : > { %v8449_v55 = vsel %vm13148_vm4, %v13147_v21, %v12700_v40  ;;  %v1379_v25 = vadd.f32 %v1347_v32, %v1246_v6  ;;  %vm13154_vm15 = vcmp.lt.s32.totalorder %v7458_v52, 7  ;;  %v8471_v44 = vmul.f32 %v7492_v2, %v8420_v18 }
 0x169   : > { %13146 = vst [vmem:[#allocation41_spill] sm:$0xff] %v8438_v22  ;;  %13149 = vst [vmem:[#allocation113_spill] sm:$0xff] %v8449_v55  ;;  %v1899_v22 = vadd.f32 %v1867_v34, %v7835_v11  ;;  %v8457_v54 = vadd.f32 %v1344_v26, %v13150_v30  ;;  %v1348_v20 = vmul.f32 %v7480_v61, %v8449_v55  ;;  %v1272_v32 = vrot.slane %v8453_v14, 7 }
 0x16a   : > { %v8467_v21 = vsel %vm13154_vm15, %v13153_v33, %v13152_v35  ;;  %13156 = vst [vmem:[#allocation115_spill] sm:$0xff] %v8471_v44  ;;  %v8474_v11 = vadd.f32 %v8233_v56, %v1379_v25  ;;  %v8478_v30 = vmul.f32 %v7529_v16, %v8449_v55  ;;  %v1240_v34 = vmul.f32 %v7486_v0, %v8453_v14  ;;  %v13159_v33 = vld [vmem:[#allocation19_spill] sm:$0xff]  ;;  %vm13162_vm15 = vmmov %vm13148_vm4 }
 0x16b   : > { %13151 = vst [vmem:[#allocation34_spill] sm:$0xff] %v8457_v54  ;;  %13155 = vst [vmem:[#allocation114_spill] sm:$0xff] %v8467_v21  ;;  %v1380_v6 = vadd.f32 %v1348_v20, %v1247_v28  ;;  %v1549_v35 = vmul.f32 %v13159_v33, %v8467_v21  ;;  %v1410_v26 = vmul.f32 %v7489_v1, %v8453_v14  ;;  %v13161_v25 = vrot.slane %v8245_v8, 7  ;;  %v13172_v54 = vld [vmem:[#allocation43_spill] sm:$0xff] }
 0x16c   : > { %13157 = vst [vmem:[#allocation116_spill] sm:$0xff] %v8474_v11  ;;  %13158 = vst [vmem:[#allocation117_spill] sm:$0xff] %v8478_v30  ;;  %v8490_v56 = vsel %vm13148_vm4, %v1272_v32, %v1273_v24  ;;  %v1373_v30 = vadd.f32 %v1341_v50, %v1240_v34  ;;  %v1938_v28 = vadd.f32 %v8367_v46, %v1899_v22  ;;  %v13166_v22 = vrot.slane %v7839_v3, 1 }
 0x16d   : > { %13160 = vst [vmem:[#allocation19_spill] sm:$0xff] %v8490_v56  ;;  %v8496_v44 = vsel %vm13162_vm15, %v13161_v25, %v1272_v32  ;;  %v1448_v20 = vadd.f32 %v1416_v62, %v1380_v6  ;;  %v1343_v1 = vmul.f32 %v7480_v61, %v8490_v56  ;;  %v8505_v24 = vmul.f32 %v7492_v2, %v8453_v14 }
 0x16e   : > { %13163 = vst [vmem:[#allocation118_spill] sm:$0xff] %v8496_v44  ;;  %v1342_v21 = vmul.f32 %v7480_v61, %v8496_v44  ;;  %v8508_v40 = vadd.f32 %v8272_v17, %v1373_v30  ;;  %v8512_v32 = vmul.f32 %v7529_v16, %v8496_v44  ;;  %v1970_v50 = vmax.f32 %v1938_v28, 0.0  ;;  %v13174_v44 = vld [vmem:[#allocation28_spill] sm:$0xff]  ;;  %v13192_v30 = vld [vmem:[#allocation50_spill] sm:$0xff] }
 0x16f   : > { %13164 = vst [vmem:[#allocation119_spill] sm:$0xff] %v8505_v24  ;;  %v13167_v62 = vrot.slane %v7685_v63, 1  ;;  %vm13168_vm4 = vcmp.lt.s32.totalorder %v7458_v52, 7  ;;  %v1581_v6 = vadd.f32 %v1549_v35, %v1448_v20  ;;  %v8521_v55 = vadd.f32 %v1343_v1, %v8145_v41  ;;  %v13173_v24 = vld [vmem:[#allocation20_spill] sm:$0xff]  ;;  %v13183_v20 = vld [vmem:[#allocation38_spill] sm:$0xff] }
 0x170   : > { %13165 = vst [vmem:[#allocation120_spill] sm:$0xff] %v8512_v32  ;;  %v1374_v25 = vadd.f32 %v1342_v21, %v1241_v31  ;;  %v2002_v11 = vsel %vm7549_vm1, %v1970_v50, 0.0  ;;  %v1628_v28 = vadd.f32 %v13172_v54, %v13171_v47  ;;  %v1664_v32 = vmul.f32 %v13173_v24, %v13145_v57  ;;  %v13182_v54 = vld [vmem:[#allocation22_spill] sm:$0xff] }
 0x171   : > { %v1517_v34 = vsel %vm13168_vm4, %v13167_v62, %v13166_v22  ;;  %13169 = vst [vmem:[#allocation121_spill] sm:$0xff] %v8521_v55  ;;  %v13175_v22 = vand.u32 7, %v13174_v44  ;;  %v13176_v31 = vmov 0  ;;  %v8541_v21 = vmul.f32 %v7529_v16, %v8490_v56  ;;  %v13187_v62 = vld [vmem:[#allocation51_spill] sm:$0xff]  ;;  %v13193_v56 = vld [vmem:[#allocation36_spill] sm:$0xff] }
 0x172   : > { %v1530_v17 = vmul.f32 %v13159_v33, %v1517_v34  ;;  %v1665_v63 = vmul.f32 %v13173_v24, %v1517_v34  ;;  %v8537_v41 = vadd.f32 %v1410_v26, %v1374_v25  ;;  %vm13181_vm4 = vcmask 523264  }
 0x173   : > { %vm8533_vm15 = vcmp.lt.s32.totalorder %v13175_v22, 5  ;;  %13180 = vst [vmem:[#allocation20_spill] sm:$0xff] %v8541_v21  ;;  %6731 = vmatmul.mubr.msk.f32.vlgmr.msra.gmra.mrb[14].mxu1 %vm13181_vm4, %v2002_v11  ;;  %v1732_v57 = vmul.f32 %v13182_v54, %v7756_v59  ;;  %v1696_v35 = vadd.f32 %v1664_v32, %v1628_v28  ;;  %v13184_v44 = vrot.slane %v13183_v20, 1 }
 0x174   : > { %v13177_v31 = vsel %vm8533_vm15, 4294967295, %v13176_v31  ;;  %13179 = vst [vmem:[#allocation43_spill] sm:$0xff] %v8537_v41  ;;  %v1562_v47 = vadd.f32 %v1530_v17, %v7900_v19  ;;  %v13185_v1 = vrot.slane %v7839_v3, 1  ;;  %vm13186_vm2 = vcmp.lt.s32.totalorder %v7458_v52, 7  ;;  %v13194_v41 = vld [vmem:[#allocation47_spill] sm:$0xff] }
 0x175   : > { %13178 = vst [vmem:[#allocation44_spill] sm:$0xff] %v13177_v31  ;;  %v1697_v50 = vadd.f32 %v1665_v63, %v7833_v60  ;;  %v1733_v25 = vmul.f32 %v13182_v54, %v13187_v62  ;;  %v1868_v11 = vmul.f32 %v8220_v27, %v1517_v34  ;;  %v13188_v59 = vrot.slane %v7866_v48, 1  ;;  %vm13190_vm4 = vmmov %vm13186_vm2  ;;  %v13191_v63 = vld [vmem:[#allocation52_spill] sm:$0xff] }
 0x176   : > { %v1516_v26 = vsel %vm13186_vm2, %v13185_v1, %v13184_v44  ;;  %v13189_v32 = vmov %v13184_v44  ;;  %v1764_v28 = vadd.f32 %v1732_v57, %v1696_v35  ;;  %v1630_v44 = vadd.f32 %v13191_v63, %v1562_v47 }
 0x177   : > { %v1531_v19 = vmul.f32 %v13159_v33, %v1516_v26  ;;  %v1666_v17 = vmul.f32 %v13173_v24, %v1516_v26  ;;  %v1515_v3 = vsel %vm13190_vm4, %v13189_v32, %v13188_v59  ;;  %v1765_v22 = vadd.f32 %v1733_v25, %v1697_v50  ;;  %v13195_v59 = vld [vmem:[#allocation60_spill] sm:$0xff]  ;;  %v13196_v50 = vld [vmem:[#allocation35_spill] sm:$0xff]  ;;  %v13203_v32 = vld [vmem:[#allocation53_spill] sm:$0xff] }
 0x178   : > { %v1532_v60 = vmul.f32 %v13159_v33, %v1515_v3  ;;  %v1869_v34 = vmul.f32 %v8220_v27, %v1516_v26  ;;  %v1667_v62 = vmul.f32 %v13173_v24, %v1515_v3  ;;  %v1734_v21 = vmul.f32 %v13182_v54, %v13192_v30 }
 0x179   : > { %v1563_v1 = vadd.f32 %v1531_v19, %v7929_v53  ;;  %v1832_v20 = vadd.f32 %v13193_v56, %v1764_v28  ;;  %v1833_v55 = vadd.f32 %v13194_v41, %v1765_v22  ;;  %v1698_v35 = vadd.f32 %v1666_v17, %v1630_v44  ;;  %v13200_v19 = vld [vmem:[#allocation48_spill] sm:$0xff] }
 0x17a   : > { %v1564_v57 = vadd.f32 %v1532_v60, %v13195_v59  ;;  %v1116_v25 = vadd.f32 %v7589_v42, %v13196_v50  ;;  %v13197_v47 = vrot.slane %v8380_v29, 7  ;;  %v13198_v53 = vrot.slane %v8420_v18, 7 }
 0x17b   : > { %vm13199_vm2 = vcmp.lt.s32.totalorder %v7458_v52, 1  ;;  %v13201_v30 = vrot.slane %v13200_v19, 1  ;;  %v13202_v56 = vrot.slane %v7866_v48, 1  ;;  %v1631_v17 = vadd.f32 %v13203_v32, %v1563_v1 }
 0x17c   : > { %v8583_v26 = vsel %vm13199_vm2, %v13198_v53, %v13197_v47  ;;  %v1900_v28 = vadd.f32 %v1868_v11, %v1832_v20  ;;  %v1901_v22 = vadd.f32 %v1869_v34, %v1833_v55  ;;  %v1766_v42 = vadd.f32 %v1734_v21, %v1698_v35  ;;  %v13204_v53 = vld [vmem:[#allocation45_spill] sm:$0xff] }
 0x17d   : > { %v1514_v41 = vsel %vm13190_vm4, %v13202_v56, %v13201_v30  ;;  %v1870_v60 = vmul.f32 %v8220_v27, %v1515_v3  ;;  %v1178_v63 = vmax.f32 %v1116_v25, 0.0  ;;  %v1349_v44 = vmul.f32 %v7480_v61, %v8583_v26  ;;  %v13205_v61 = vld [vmem:[#allocation56_spill] sm:$0xff] }
 0x17e   : > { %v1617_v59 = vmul.f32 %v7529_v16, %v8583_v26  ;;  %v1533_v50 = vmul.f32 %v13159_v33, %v1514_v41  ;;  %v1939_v48 = vadd.f32 %v8367_v46, %v1900_v28  ;;  %v1940_v47 = vadd.f32 %v8367_v46, %v1901_v22  ;;  %v13206_v28 = vld [vmem:[#allocation29_spill] sm:$0xff] }
 0x17f   : > { %v1834_v1 = vadd.f32 %v13204_v53, %v1766_v42  ;;  %v1699_v11 = vadd.f32 %v1667_v62, %v1631_v17  ;;  %v8603_v55 = vsel %vm8533_vm15, %v1178_v63, 0.0  ;;  %v1735_v34 = vmul.f32 %v13182_v54, %v13205_v61 }
 0x180   : > { %v1649_v21 = vadd.f32 %v1617_v59, %v1581_v6  ;;  %v1565_v3 = vadd.f32 %v1533_v50, %v7991_v15  ;;  %v1971_v20 = vmax.f32 %v1939_v48, 0.0  ;;  %v1972_v35 = vmax.f32 %v1940_v47, 0.0 }
 0x181   : > { %v1902_v25 = vadd.f32 %v1870_v60, %v1834_v1  ;;  %v1248_v30 = vmul.f32 %v7486_v0, %v8603_v55  ;;  %v1280_v56 = vrot.slane %v8603_v55, 7  ;;  %v1481_v62 = vrot.slane %v8603_v55, 1  ;;  %v13209_v60 = vld [vmem:[#allocation13_spill] sm:$0xff] }
 0x182   : > { %v1668_v32 = vmul.f32 %v13173_v24, %v1514_v41  ;;  %v1767_v17 = vadd.f32 %v1735_v34, %v1699_v11  ;;  %v2003_v6 = vsel %vm7638_vm7, %v1971_v20, 0.0  ;;  %v2004_v22 = vsel %vm7591_vm3, %v1972_v35, 0.0 }
 0x183   : > { %v1941_v42 = vadd.f32 %v8367_v46, %v1902_v25  ;;  %v1381_v63 = vadd.f32 %v1349_v44, %v1248_v30  ;;  %vm13208_vm2 = vcmask 523264   ;;  %vm13210_vm4 = vcmp.lt.s32.totalorder %v7458_v52, 1  ;;  %v13215_v44 = vld [vmem:[#allocation55_spill] sm:$0xff] }
 0x184   : > { %6733 = vmatprep.mubr.msk.f32.mxu1 %vm13208_vm2, %v2003_v6  ;;  %v1295_v0 = vsel %vm13210_vm4, %v1280_v56, %v13209_v60  ;;  %v13211_v59 = vrot.slane %v8380_v29, 7  ;;  %vm13212_vm1 = vmmov %vm13210_vm4  ;;  %v13213_v48 = vrot.slane %v8380_v29, 1  ;;  %vm13214_vm7 = vcmp.lt.s32.totalorder %v7458_v52, 7 }
 0x185   : > { %v1835_v53 = vadd.f32 %v13215_v44, %v1767_v17  ;;  %6734 = vmatmul.mubr.msk.f32.gmra.mrb[16].mxu1 %vm13208_vm2, %v2004_v22  ;;  %v1973_v1 = vmax.f32 %v1941_v42, 0.0  ;;  %v1449_v11 = vadd.f32 %v8397_v51, %v1381_v63  ;;  %v1821_v35 = vmul.f32 %v7492_v2, %v8603_v55  ;;  %v13220_v22 = vld [vmem:[#allocation58_spill] sm:$0xff] }
 0x186   : > { %v1296_v50 = vsel %vm13212_vm1, %v13211_v59, %v1280_v56  ;;  %v8632_v47 = vsel %vm13214_vm7, %v13213_v48, %v1481_v62  ;;  %v1871_v25 = vmul.f32 %v8220_v27, %v1514_v41  ;;  %v13217_v51 = vrot.slane %v7972_v13, 1  ;;  %vm13219_vm1 = vmmov %vm13214_vm7 }
 0x187   : > { %v1550_v61 = vmul.f32 %v13159_v33, %v8632_v47  ;;  %v1618_v34 = vmul.f32 %v7529_v16, %v1296_v50  ;;  %v1685_v20 = vmul.f32 %v13173_v24, %v8632_v47  ;;  %v1753_v29 = vmul.f32 %v13182_v54, %v1296_v50  ;;  %vm13221_vm7 = vmmov %vm13208_vm2 }
 0x188   : > { %v2005_v56 = vsel %vm7743_vm9, %v1973_v1, 0.0  ;;  %v13218_v6 = vrot.slane %v13200_v19, 1  ;;  %v1632_v42 = vadd.f32 %v13220_v22, %v1564_v57  ;;  %v8657_v59 = vmul.f32 %v13182_v54, %v1295_v0  ;;  %vm13224_vm4 = vmmov %vm13219_vm1 }
 0x189   : > { %v1582_v17 = vadd.f32 %v1550_v61, %v1449_v11  ;;  %6736 = vmatprep.mubr.msk.f32.mxu1 %vm13221_vm7, %v2005_v56  ;;  %v1717_v63 = vadd.f32 %v1685_v20, %v1649_v21  ;;  %v1903_v41 = vadd.f32 %v1871_v25, %v1835_v53  ;;  %v1736_v19 = vmul.f32 %v13182_v54, %v7933_v39  ;;  %v13225_v25 = vld [vmem:[#allocation59_spill] sm:$0xff]  ;;  %vm13230_vm2 = vmmov %vm13219_vm1 }
 0x18a   : > { %v1513_v16 = vsel %vm13219_vm1, %v13218_v6, %v13217_v51  ;;  %v1700_v1 = vadd.f32 %v1668_v32, %v1632_v42  ;;  %v13222_v21 = vrot.slane %v7888_v23, 1  ;;  %v13223_v0 = vmov %v13217_v51  ;;  %v13227_v6 = vld [vmem:[#allocation54_spill] sm:$0xff]  ;;  %vm13233_vm1 = vmmov %vm13221_vm7 }
 0x18b   : > { %v1534_v50 = vmul.f32 %v13159_v33, %v1513_v16  ;;  %v8660_v48 = vadd.f32 %v1618_v34, %v1582_v17  ;;  %v1669_v44 = vmul.f32 %v13173_v24, %v1513_v16  ;;  %v1785_v11 = vadd.f32 %v1753_v29, %v1717_v63  ;;  %vm13237_vm7 = vmmov %vm13230_vm2 }
 0x18c   : > { %v1942_v57 = vadd.f32 %v8367_v46, %v1903_v41  ;;  %v1512_v53 = vsel %vm13224_vm4, %v13223_v0, %v13222_v21  ;;  %v1768_v34 = vadd.f32 %v1736_v19, %v1700_v1  ;;  %v1872_v20 = vmul.f32 %v8220_v27, %v1513_v16  ;;  %v13232_v19 = vld [vmem:[#allocation68_spill] sm:$0xff]  ;;  %vm13244_vm4 = vmmov %vm13230_vm2 }
 0x18d   : > { %v1566_v61 = vadd.f32 %v1534_v50, %v8030_v5  ;;  %v1535_v32 = vmul.f32 %v13159_v33, %v1512_v53  ;;  %v1633_v56 = vadd.f32 %v13225_v25, %v1565_v3  ;;  %v8676_v39 = vadd.f32 %v1821_v35, %v1785_v11  ;;  %v13226_v5 = vld [vmem:[#allocation65_spill] sm:$0xff] }
 0x18e   : > { %v1974_v29 = vmax.f32 %v1942_v57, 0.0  ;;  %v1670_v17 = vmul.f32 %v13173_v24, %v1512_v53  ;;  %v1737_v51 = vmul.f32 %v13182_v54, %v13226_v5  ;;  %v1836_v13 = vadd.f32 %v13227_v6, %v1768_v34  ;;  %v13234_v34 = vld [vmem:[#allocation64_spill] sm:$0xff] }
 0x18f   : > { %v1567_v22 = vadd.f32 %v1535_v32, %v8050_v38  ;;  %v1701_v42 = vadd.f32 %v1669_v44, %v1633_v56  ;;  %v13228_v63 = vrot.slane %v8054_v9, 1  ;;  %v13229_v16 = vmov %v13222_v21 }
 0x190   : > { %v2006_v41 = vsel %vm7661_vm8, %v1974_v29, 0.0  ;;  %v1873_v50 = vmul.f32 %v8220_v27, %v1512_v53  ;;  %v1634_v11 = vadd.f32 %v13232_v19, %v1566_v61  ;;  %v1904_v38 = vadd.f32 %v1872_v20, %v1836_v13  ;;  %v13238_v61 = vld [vmem:[#allocation69_spill] sm:$0xff]  ;;  %v13239_v29 = vld [vmem:[#allocation66_spill] sm:$0xff]  ;;  %v13240_v13 = vld [vmem:[#allocation75_spill] sm:$0xff] }
 0x191   : > { %v1511_v3 = vsel %vm13230_vm2, %v13229_v16, %v13228_v63  ;;  %6737 = vmatmul.mubr.msk.f32.gmra.mrb[18].mxu1 %vm13233_vm1, %v2006_v41  ;;  %v1769_v44 = vadd.f32 %v1737_v51, %v1701_v42  ;;  %v1738_v23 = vmul.f32 %v13182_v54, %v8002_v49  ;;  %v13235_v32 = vrot.slane %v13234_v34, 1  ;;  %v13245_v19 = vld [vmem:[#allocation63_spill] sm:$0xff]  ;;  %vm13249_vm2 = vmmov %vm13233_vm1 }
 0x192   : > { %v1536_v1 = vmul.f32 %v13159_v33, %v1511_v3  ;;  %v1671_v57 = vmul.f32 %v13173_v24, %v1511_v3  ;;  %v1702_v0 = vadd.f32 %v1670_v17, %v1634_v11  ;;  %v13236_v53 = vmov %v13228_v63  ;;  %vm13253_vm1 = vmmov %vm13244_vm4 }
 0x193   : > { %v1510_v25 = vsel %vm13237_vm7, %v13236_v53, %v13235_v32  ;;  %v1635_v56 = vadd.f32 %v13238_v61, %v1567_v22  ;;  %v1943_v20 = vadd.f32 %v8367_v46, %v1904_v38  ;;  %v1837_v5 = vadd.f32 %v13239_v29, %v1769_v44  ;;  %v13241_v22 = vld [vmem:[#allocation80_spill] sm:$0xff]  ;;  %v13248_v61 = vld [vmem:[#allocation74_spill] sm:$0xff]  ;;  %vm13257_vm7 = vmmov %vm13249_vm2 }
 0x194   : > { %v1568_v21 = vadd.f32 %v1536_v1, %v8108_v4  ;;  %v1874_v51 = vmul.f32 %v8220_v27, %v1511_v3  ;;  %v1537_v49 = vmul.f32 %v13159_v33, %v1510_v25  ;;  %v1770_v6 = vadd.f32 %v1738_v23, %v1702_v0  ;;  %v6707_v0 = vpop.f32.mrb[8].mxu1  ;;  %v13250_v29 = vld [vmem:[#allocation72_spill] sm:$0xff] }
 0x195   : > { %v1672_v4 = vmul.f32 %v13173_v24, %v1510_v25  ;;  %v1703_v17 = vadd.f32 %v1671_v57, %v1635_v56  ;;  %v1739_v9 = vmul.f32 %v13182_v54, %v13240_v13  ;;  %v1975_v42 = vmax.f32 %v1943_v20, 0.0  ;;  %v13246_v57 = vld [vmem:[#allocation77_spill] sm:$0xff]  ;;  %v1125_v56 = vpop.f32.mrb[9].mxu1 }
 0x196   : > { %v1905_v63 = vadd.f32 %v1873_v50, %v1837_v5  ;;  %v1569_v16 = vadd.f32 %v1537_v49, %v8147_v37  ;;  %v13242_v41 = vrot.slane %v13241_v22, 1  ;;  %v13243_v1 = vmov %v13235_v32 }
 0x197   : > { %v1838_v11 = vadd.f32 %v13245_v19, %v1770_v6  ;;  %v1771_v38 = vadd.f32 %v1739_v9, %v1703_v17  ;;  %v1636_v23 = vadd.f32 %v13246_v57, %v1568_v21  ;;  %v2007_v50 = vsel %vm7769_vm11, %v1975_v42, 0.0  ;;  %v13254_v42 = vld [vmem:[#allocation78_spill] sm:$0xff] }
 0x198   : > { %v1509_v3 = vsel %vm13244_vm4, %v13243_v1, %v13242_v41  ;;  %v1944_v37 = vadd.f32 %v8367_v46, %v1905_v63  ;;  %v1875_v53 = vmul.f32 %v8220_v27, %v1510_v25  ;;  %v1740_v34 = vmul.f32 %v13182_v54, %v13248_v61  ;;  %6739 = vmatprep.mubr.msk.f32.mxu1 %vm13249_vm2, %v2007_v50  ;;  %v13259_v50 = vld [vmem:[#allocation94_spill] sm:$0xff]  ;;  %vm13262_vm4 = vmmov %vm13253_vm1 }
 0x199   : > { %v1538_v44 = vmul.f32 %v13159_v33, %v1509_v3  ;;  %v1906_v20 = vadd.f32 %v1874_v51, %v1838_v11  ;;  %v1839_v5 = vadd.f32 %v13250_v29, %v1771_v38  ;;  %v1704_v21 = vadd.f32 %v1672_v4, %v1636_v23  ;;  %v13258_v23 = vld [vmem:[#allocation70_spill] sm:$0xff] }
 0x19a   : > { %v1976_v6 = vmax.f32 %v1944_v37, 0.0  ;;  %v1673_v17 = vmul.f32 %v13173_v24, %v1509_v3  ;;  %v13251_v13 = vrot.slane %v8074_v36, 1  ;;  %v13252_v9 = vmov %v13242_v41 }
 0x19b   : > { %v1570_v49 = vadd.f32 %v1538_v44, %v8190_v58  ;;  %v1637_v63 = vadd.f32 %v13254_v42, %v1569_v16  ;;  %v1945_v41 = vadd.f32 %v8367_v46, %v1906_v20  ;;  %v1907_v51 = vadd.f32 %v1875_v53, %v1839_v5  ;;  %v13256_v44 = vld [vmem:[#allocation85_spill] sm:$0xff]  ;;  %v13263_v20 = vld [vmem:[#allocation88_spill] sm:$0xff]  ;;  %v13265_v42 = vld [vmem:[#allocation83_spill] sm:$0xff] }
 0x19c   : > { %v1508_v25 = vsel %vm13253_vm1, %v13252_v9, %v13251_v13  ;;  %v1772_v1 = vadd.f32 %v1740_v34, %v1704_v21  ;;  %v2008_v4 = vsel %vm7763_vm10, %v1976_v6, 0.0  ;;  %v1876_v11 = vmul.f32 %v8220_v27, %v1509_v3  ;;  %v6710_v9 = vpop.f32.mrb[10].mxu1  ;;  %vm13268_vm1 = vmmov %vm13249_vm2 }
 0x19d   : > { %v1539_v19 = vmul.f32 %v13159_v33, %v1508_v25  ;;  %v1705_v38 = vadd.f32 %v1673_v17, %v1637_v63  ;;  %v1741_v22 = vmul.f32 %v13182_v54, %v13256_v44  ;;  %6740 = vmatmul.mubr.msk.f32.gmra.mrb[20].mxu1 %vm13257_vm7, %v2008_v4  ;;  %v1977_v57 = vmax.f32 %v1945_v41, 0.0  ;;  %vm13271_vm7 = vmmov %vm13262_vm4 }
 0x19e   : > { %v1946_v16 = vadd.f32 %v8367_v46, %v1907_v51  ;;  %v1840_v0 = vadd.f32 %v13258_v23, %v1772_v1  ;;  %v1674_v53 = vmul.f32 %v13173_v24, %v1508_v25  ;;  %v13260_v34 = vrot.slane %v8289_v7, 1  ;;  %v13266_v51 = vld [vmem:[#allocation84_spill] sm:$0xff] }
 0x19f   : > { %v1571_v37 = vadd.f32 %v1539_v19, %v13259_v50  ;;  %v1773_v61 = vadd.f32 %v1741_v22, %v1705_v38  ;;  %v13261_v3 = vmov %v13251_v13  ;;  %v1638_v29 = vadd.f32 %v13263_v20, %v1570_v49  ;;  %v1135_v19 = vpop.f32.mrb[11].mxu1  ;;  %v13273_v20 = vld [vmem:[#allocation79_spill] sm:$0xff] }
 0x1a0   : > { %v1507_v56 = vsel %vm13262_vm4, %v13261_v3, %v13260_v34  ;;  %v2009_v21 = vsel %vm7843_vm13, %v1977_v57, 0.0  ;;  %v1978_v6 = vmax.f32 %v1946_v16, 0.0  ;;  %v1908_v17 = vadd.f32 %v1876_v11, %v1840_v0  ;;  %v13272_v0 = vld [vmem:[#allocation90_spill] sm:$0xff] }
 0x1a1   : > { %v1540_v13 = vmul.f32 %v13159_v33, %v1507_v56  ;;  %6742 = vmatprep.mubr.msk.f32.mxu1 %vm13249_vm2, %v2009_v21  ;;  %v1841_v63 = vadd.f32 %v13265_v42, %v1773_v61  ;;  %v1877_v41 = vmul.f32 %v8220_v27, %v1508_v25  ;;  %v1706_v36 = vadd.f32 %v1674_v53, %v1638_v29  ;;  %vm13279_vm2 = vmmov %vm13271_vm7 }
 0x1a2   : > { %v1742_v1 = vmul.f32 %v13182_v54, %v13266_v51  ;;  %v2010_v4 = vsel %vm7788_vm12, %v1978_v6, 0.0  ;;  %v1947_v38 = vadd.f32 %v8367_v46, %v1908_v17  ;;  %v1675_v44 = vmul.f32 %v13173_v24, %v1507_v56  ;;  %v13274_v6 = vld [vmem:[#allocation104_spill] sm:$0xff]  ;;  %v13275_v17 = vld [vmem:[#allocation57_spill] sm:$0xff] }
 0x1a3   : > { %v1572_v11 = vadd.f32 %v1540_v13, %v8354_v45  ;;  %6743 = vmatmul.mubr.msk.f32.gmra.mrb[22].mxu1 %vm13268_vm1, %v2010_v4  ;;  %v1909_v22 = vadd.f32 %v1877_v41, %v1841_v63  ;;  %v13269_v25 = vrot.slane %v8245_v8, 1  ;;  %v13270_v16 = vmov %v13260_v34  ;;  %v13280_v63 = vld [vmem:[#allocation105_spill] sm:$0xff] }
 0x1a4   : > { %v1774_v57 = vadd.f32 %v1742_v1, %v1706_v36  ;;  %v1639_v50 = vadd.f32 %v13272_v0, %v1571_v37  ;;  %v1979_v53 = vmax.f32 %v1947_v38, 0.0  ;;  %v1878_v61 = vmul.f32 %v8220_v27, %v1507_v56 }
 0x1a5   : > { %v1506_v23 = vsel %vm13271_vm7, %v13270_v16, %v13269_v25  ;;  %v1948_v3 = vadd.f32 %v8367_v46, %v1909_v22  ;;  %v1743_v7 = vmul.f32 %v13182_v54, %v13274_v6  ;;  %vm13276_vm4 = vnez %v13275_v17 }
 0x1a6   : > { %v1541_v45 = vmul.f32 %v13159_v33, %v1506_v23  ;;  %v1676_v34 = vmul.f32 %v13173_v24, %v1506_v23  ;;  %v1842_v29 = vadd.f32 %v13273_v20, %v1774_v57  ;;  %v1707_v21 = vadd.f32 %v1675_v44, %v1639_v50  ;;  %v13281_v44 = vld [vmem:[#allocation49_spill] sm:$0xff]  ;;  %v13283_v57 = vld [vmem:[#allocation106_spill] sm:$0xff] }
 0x1a7   : > { %v2011_v13 = vsel %vm13276_vm4, %v1979_v53, 0.0  ;;  %v13277_v9 = vrot.slane %v8453_v14, 1  ;;  %v13278_v56 = vmov %v13269_v25  ;;  %v1640_v41 = vadd.f32 %v13280_v63, %v1572_v11 }
 0x1a8   : > { %v1573_v37 = vadd.f32 %v1541_v45, %v8388_v10  ;;  %6745 = vmatprep.mubr.msk.f32.mxu1 %vm13268_vm1, %v2011_v13  ;;  %v1980_v36 = vmax.f32 %v1948_v3, 0.0  ;;  %v1910_v51 = vadd.f32 %v1878_v61, %v1842_v29  ;;  %v1775_v1 = vadd.f32 %v1743_v7, %v1707_v21  ;;  %v13288_v61 = vld [vmem:[#allocation108_spill] sm:$0xff]  ;;  %v13289_v29 = vld [vmem:[#allocation118_spill] sm:$0xff]  ;;  %v13290_v21 = vld [vmem:[#allocation33_spill] sm:$0xff] }
 0x1a9   : > { %v1505_v42 = vsel %vm13279_vm2, %v13278_v56, %v13277_v9  ;;  %v1879_v4 = vmul.f32 %v8220_v27, %v1506_v23  ;;  %v1708_v38 = vadd.f32 %v1676_v34, %v1640_v41  ;;  %v1744_v8 = vmul.f32 %v13182_v54, %v8336_v12  ;;  %vm13284_vm2 = vmmov %vm13268_vm1  ;;  %v13292_v56 = vld [vmem:[#allocation110_spill] sm:$0xff]  ;;  %v13295_v41 = vld [vmem:[#allocation43_spill] sm:$0xff] }
 0x1aa   : > { %v1542_v19 = vmul.f32 %v13159_v33, %v1505_v42  ;;  %v1677_v10 = vmul.f32 %v13173_v24, %v1505_v42  ;;  %vm13282_vm7 = vnez %v13281_v44  ;;  %v1949_v11 = vadd.f32 %v8367_v46, %v1910_v51  ;;  %v13296_v51 = vld [vmem:[#allocation76_spill] sm:$0xff] }
 0x1ab   : > { %v2012_v22 = vsel %vm13282_vm7, %v1980_v36, 0.0  ;;  %v1843_v25 = vadd.f32 %v13283_v57, %v1775_v1  ;;  %v1776_v0 = vadd.f32 %v1744_v8, %v1708_v38  ;;  %v1880_v23 = vmul.f32 %v8220_v27, %v1505_v42  ;;  %v13293_v42 = vld [vmem:[#allocation67_spill] sm:$0xff]  ;;  %v6713_v57 = vpop.f32.mrb[12].mxu1 }
 0x1ac   : > { %v1574_v16 = vadd.f32 %v1542_v19, %v8508_v40  ;;  %6746 = vmatmul.mubr.msk.f32.gmra.mrb[24].mxu1 %vm13284_vm2, %v2012_v22  ;;  %v13285_v50 = vrot.slane %v8384_v43, 1  ;;  %v13286_v53 = vmov %v13277_v9  ;;  %vm13287_vm1 = vcmp.lt.s32.totalorder %v7458_v52, 7  ;;  %v13291_v9 = vld [vmem:[#allocation121_spill] sm:$0xff]  ;;  %v13300_v22 = vld [vmem:[#allocation120_spill] sm:$0xff]  ;;  %v13315_v57 = vld [vmem:[#allocation111_spill] sm:$0xff] }
 0x1ad   : > { %v1641_v45 = vadd.f32 %v13288_v61, %v1573_v37  ;;  %v1981_v34 = vmax.f32 %v1949_v11, 0.0  ;;  %v1911_v3 = vadd.f32 %v1879_v4, %v1843_v25  ;;  %v1745_v40 = vmul.f32 %v13182_v54, %v13289_v29  ;;  %v1145_v61 = vpop.f32.mrb[13].mxu1  ;;  %v13303_v29 = vld [vmem:[#allocation61_spill] sm:$0xff] }
 0x1ae   : > { %v1504_v12 = vsel %vm13287_vm1, %v13286_v53, %v13285_v50  ;;  %v1844_v6 = vadd.f32 %v13290_v21, %v1776_v0  ;;  %v1443_v14 = vadd.f32 %v13292_v56, %v13291_v9  ;;  %vm13294_vm2 = vnez %v13293_v42  ;;  %v13301_v53 = vld [vmem:[#allocation19_spill] sm:$0xff]  ;;  %v13306_v21 = vld [vmem:[#allocation86_spill] sm:$0xff] }
 0x1af   : > { %v1543_v20 = vmul.f32 %v13159_v33, %v1504_v12  ;;  %v1678_v7 = vmul.f32 %v13173_v24, %v1504_v12  ;;  %v1709_v13 = vadd.f32 %v1677_v10, %v1641_v45  ;;  %v2013_v63 = vsel %vm13294_vm2, %v1981_v34, 0.0  ;;  %v13302_v34 = vld [vmem:[#allocation119_spill] sm:$0xff] }
 0x1b0   : > { %v1950_v37 = vadd.f32 %v8367_v46, %v1911_v3  ;;  %v13297_v1 = vrot.slane %v13296_v51, 1  ;;  %v13298_v19 = vmov %v13285_v50  ;;  %vm13299_vm4 = vcmask 523264  }
 0x1b1   : > { %v1575_v36 = vadd.f32 %v1543_v20, %v13295_v41  ;;  %6748 = vmatprep.mubr.msk.f32.mxu1 %vm13299_vm4, %v2013_v63  ;;  %v1912_v10 = vadd.f32 %v1880_v23, %v1844_v6  ;;  %v1777_v38 = vadd.f32 %v1745_v40, %v1709_v13  ;;  %v1642_v11 = vadd.f32 %v13300_v22, %v1574_v16  ;;  %v13305_v16 = vld [vmem:[#allocation34_spill] sm:$0xff]  ;;  %v13310_v63 = vld [vmem:[#allocation20_spill] sm:$0xff]  ;;  %v13313_v22 = vld [vmem:[#allocation87_spill] sm:$0xff] }
 0x1b2   : > { %v1503_v4 = vsel %vm13287_vm1, %v13298_v19, %v13297_v1  ;;  %v1982_v25 = vmax.f32 %v1950_v37, 0.0  ;;  %v1881_v0 = vmul.f32 %v8220_v27, %v1504_v12  ;;  %v1746_v43 = vmul.f32 %v13182_v54, %v13301_v53  ;;  %v13307_v13 = vld [vmem:[#allocation30_spill] sm:$0xff] }
 0x1b3   : > { %v1544_v8 = vmul.f32 %v13159_v33, %v1503_v4  ;;  %v1679_v50 = vmul.f32 %v13173_v24, %v1503_v4  ;;  %v1951_v45 = vadd.f32 %v8367_v46, %v1912_v10  ;;  %v1845_v3 = vadd.f32 %v13302_v34, %v1777_v38  ;;  %v13319_v34 = vld [vmem:[#allocation41_spill] sm:$0xff] }
 0x1b4   : > { %v1710_v20 = vadd.f32 %v1678_v7, %v1642_v11  ;;  %vm13304_vm4 = vnez %v13303_v29  ;;  %v1444_v6 = vadd.f32 %v13306_v21, %v13305_v16  ;;  %v13308_v12 = vrot.slane %v13307_v13, 1  ;;  %v13320_v21 = vld [vmem:[#allocation89_spill] sm:$0xff] }
 0x1b5   : > { %v1576_v23 = vadd.f32 %v1544_v8, %v1443_v14  ;;  %v2014_v40 = vsel %vm13304_vm4, %v1982_v25, 0.0  ;;  %v13309_v9 = vmov %v13297_v1  ;;  %v1643_v37 = vadd.f32 %v13310_v63, %v1575_v36  ;;  %v13312_v8 = vld [vmem:[#allocation112_spill] sm:$0xff] }
 0x1b6   : > { %v1502_v56 = vsel %vm13287_vm1, %v13309_v9, %v13308_v12  ;;  %vm13311_vm2 = vcmask 523264   ;;  %v1983_v41 = vmax.f32 %v1951_v45, 0.0  ;;  %v1913_v14 = vadd.f32 %v1881_v0, %v1845_v3 }
 0x1b7   : > { %6749 = vmatmul.mubr.msk.f32.gmra.mrb[26].mxu1 %vm13311_vm2, %v2014_v40  ;;  %v1778_v7 = vadd.f32 %v1746_v43, %v1710_v20  ;;  %v1545_v1 = vmul.f32 %v13159_v33, %v1502_v56  ;;  %v1882_v19 = vmul.f32 %v8220_v27, %v1503_v4  ;;  %v1680_v10 = vmul.f32 %v13173_v24, %v1502_v56  ;;  %v13316_v4 = vld [vmem:[#allocation96_spill] sm:$0xff] }
 0x1b8   : > { %v1711_v38 = vadd.f32 %v1679_v50, %v1643_v37  ;;  %v1747_v51 = vmul.f32 %v13182_v54, %v13312_v8  ;;  %vm13314_vm4 = vnez %v13313_v22  ;;  %v1952_v36 = vadd.f32 %v8367_v46, %v1913_v14  ;;  %v13322_v37 = vld [vmem:[#allocation93_spill] sm:$0xff] }
 0x1b9   : > { %v2015_v11 = vsel %vm13314_vm4, %v1983_v41, 0.0  ;;  %v1846_v25 = vadd.f32 %v13315_v57, %v1778_v7  ;;  %v1577_v53 = vadd.f32 %v1545_v1, %v1444_v6  ;;  %v1883_v43 = vmul.f32 %v8220_v27, %v1502_v56 }
 0x1ba   : > { %6751 = vmatprep.mubr.msk.f32.mxu1 %vm13311_vm2, %v2015_v11  ;;  %v1779_v0 = vadd.f32 %v1747_v51, %v1711_v38  ;;  %v13317_v61 = vrot.slane %v13316_v4, 1  ;;  %v13318_v50 = vmov %v13308_v12  ;;  %v1644_v3 = vadd.f32 %v13319_v34, %v1576_v23  ;;  %v13321_v12 = vld [vmem:[#allocation92_spill] sm:$0xff]  ;;  %vm13325_vm2 = vmmov %vm13287_vm1  ;;  %v13326_v23 = vld [vmem:[#allocation81_spill] sm:$0xff] }
 0x1bb   : > { %v1984_v20 = vmax.f32 %v1952_v36, 0.0  ;;  %v1914_v40 = vadd.f32 %v1882_v19, %v1846_v25  ;;  %v1748_v6 = vmul.f32 %v13182_v54, %v13320_v21  ;;  %v13323_v41 = vrot.slane %v13322_v37, 1  ;;  %v13328_v19 = vld [vmem:[#allocation102_spill] sm:$0xff]  ;;  %v13330_v36 = vld [vmem:[#allocation91_spill] sm:$0xff] }
 0x1bc   : > { %v1501_v45 = vsel %vm13287_vm1, %v13318_v50, %v13317_v61  ;;  %v1847_v9 = vadd.f32 %v13321_v12, %v1779_v0  ;;  %v1712_v63 = vadd.f32 %v1680_v10, %v1644_v3  ;;  %v13324_v13 = vmov %v13317_v61  ;;  %v13331_v0 = vld [vmem:[#allocation107_spill] sm:$0xff] }
 0x1bd   : > { %v1546_v16 = vmul.f32 %v13159_v33, %v1501_v45  ;;  %v1681_v56 = vmul.f32 %v13173_v24, %v1501_v45  ;;  %v1500_v14 = vsel %vm13325_vm2, %v13324_v13, %v13323_v41  ;;  %vm13327_vm1 = vnez %v13326_v23  ;;  %v13332_v50 = vld [vmem:[#allocation99_spill] sm:$0xff] }
 0x1be   : > { %v2016_v7 = vsel %vm13327_vm1, %v1984_v20, 0.0  ;;  %v1953_v1 = vadd.f32 %v8367_v46, %v1914_v40  ;;  %v1547_v8 = vmul.f32 %v13159_v33, %v1500_v14  ;;  %vm13329_vm4 = vcmask 523264   ;;  %v13333_v20 = vld [vmem:[#allocation71_spill] sm:$0xff] }
 0x1bf   : > { %v1578_v38 = vadd.f32 %v1546_v16, %v13328_v19  ;;  %6752 = vmatmul.mubr.msk.f32.gmra.mrb[28].mxu1 %vm13329_vm4, %v2016_v7  ;;  %v1915_v51 = vadd.f32 %v1883_v43, %v1847_v9  ;;  %v1780_v10 = vadd.f32 %v1748_v6, %v1712_v63  ;;  %v1884_v11 = vmul.f32 %v8220_v27, %v1501_v45  ;;  %vm13336_vm4 = vmmov %vm13325_vm2  ;;  %v13337_v45 = vld [vmem:[#allocation27_spill] sm:$0xff]  ;;  %v13338_v9 = vld [vmem:[#allocation100_spill] sm:$0xff] }
 0x1c0   : > { %v1645_v57 = vadd.f32 %v13330_v36, %v1577_v53  ;;  %v1985_v25 = vmax.f32 %v1953_v1, 0.0  ;;  %v1579_v4 = vadd.f32 %v1547_v8, %v13331_v0  ;;  %v1682_v61 = vmul.f32 %v13173_v24, %v1500_v14  ;;  %v13341_v19 = vld [vmem:[#allocation116_spill] sm:$0xff] }
 0x1c1   : > { %v1749_v34 = vmul.f32 %v13182_v54, %v13332_v50  ;;  %v1954_v3 = vadd.f32 %v8367_v46, %v1915_v51  ;;  %v1848_v40 = vadd.f32 %v13333_v20, %v1780_v10  ;;  %v13334_v43 = vrot.slane %v8420_v18, 1  ;;  %v13340_v18 = vld [vmem:[#allocation32_spill] sm:$0xff]  ;;  %v13342_v10 = vld [vmem:[#allocation103_spill] sm:$0xff]  ;;  %v13345_v50 = vld [vmem:[#allocation113_spill] sm:$0xff] }
 0x1c2   : > { %v1713_v16 = vadd.f32 %v1681_v56, %v1645_v57  ;;  %v13335_v21 = vmov %v13323_v41  ;;  %v2017_v6 = vsel %vm8347_vm6, %v1985_v25, 0.0  ;;  %v1646_v63 = vadd.f32 %v13338_v9, %v1578_v38  ;;  %v13344_v25 = vld [vmem:[#allocation101_spill] sm:$0xff] }
 0x1c3   : > { %v1499_v53 = vsel %vm13336_vm4, %v13335_v21, %v13334_v43  ;;  %vm13339_vm2 = vcmask 523264   ;;  %v1986_v13 = vmax.f32 %v1954_v3, 0.0  ;;  %v1916_v56 = vadd.f32 %v1884_v11, %v1848_v40  ;;  %v13347_v20 = vld [vmem:[#allocation117_spill] sm:$0xff] }
 0x1c4   : > { %v1548_v12 = vmul.f32 %v13159_v33, %v1499_v53  ;;  %v1683_v41 = vmul.f32 %v13173_v24, %v1499_v53  ;;  %6754 = vmatprep.mubr.msk.f32.mxu1 %vm13339_vm2, %v2017_v6  ;;  %v1781_v7 = vadd.f32 %v1749_v34, %v1713_v16  ;;  %v1750_v37 = vmul.f32 %v13182_v54, %v13340_v18  ;;  %v13343_v33 = vld [vmem:[#allocation98_spill] sm:$0xff]  ;;  %vm13346_vm4 = vmmov %vm13339_vm2  ;;  %v13349_v6 = vld [vmem:[#allocation95_spill] sm:$0xff] }
 0x1c5   : > { %v1885_v1 = vmul.f32 %v8220_v27, %v1500_v14  ;;  %v1714_v51 = vadd.f32 %v1682_v61, %v1646_v63  ;;  %v1647_v36 = vadd.f32 %v13342_v10, %v1579_v4  ;;  %v2018_v38 = vsel %vm8261_vm5, %v1986_v13, 0.0  ;;  %v13348_v16 = vld [vmem:[#allocation114_spill] sm:$0xff]  ;;  %v13350_v13 = vld [vmem:[#allocation16_spill] sm:$0xff] }
 0x1c6   : > { %v1580_v8 = vadd.f32 %v1548_v12, %v13341_v19  ;;  %v1955_v57 = vadd.f32 %v8367_v46, %v1916_v56  ;;  %v1849_v0 = vadd.f32 %v13344_v25, %v1781_v7  ;;  %v1751_v11 = vmul.f32 %v13182_v54, %v13345_v50  ;;  %6755 = vmatmul.mubr.msk.f32.gmra.mrb[30].mxu1 %vm13346_vm4, %v2018_v38  ;;  %v13356_v50 = vld [vmem:[#allocation25_spill] sm:$0xff] }
 0x1c7   : > { %v1782_v34 = vadd.f32 %v1750_v37, %v1714_v51  ;;  %v1886_v14 = vmul.f32 %v8220_v27, %v1499_v53  ;;  %v1715_v3 = vadd.f32 %v1683_v41, %v1647_v36  ;;  %v1684_v43 = vmul.f32 %v13173_v24, %v13348_v16  ;;  %v13352_v41 = vld [vmem:[#allocation62_spill] sm:$0xff] }
 0x1c8   : > { %v1648_v61 = vadd.f32 %v13347_v20, %v1580_v8  ;;  %v1987_v40 = vmax.f32 %v1955_v57, 0.0  ;;  %v1917_v4 = vadd.f32 %v1885_v1, %v1849_v0  ;;  %v1752_v21 = vmul.f32 %v13182_v54, %v8583_v26  ;;  %v3247_v26 = vld [vmem:[%s12552_s9] sm:$0xff]  ;;  %v3248_v37 = vld [vmem:[%s12552_s9 + $0x8] sm:$0xff] }
 0x1c9   : > { %v1850_v12 = vadd.f32 %v13349_v6, %v1782_v34  ;;  %v1783_v9 = vadd.f32 %v1751_v11, %v1715_v3  ;;  %v1887_v63 = vmul.f32 %v8220_v27, %v13348_v16  ;;  %vm13351_vm2 = vcmp.lt.s32.totalorder %v7458_v52, 7  ;;  %v13358_v34 = vld [vmem:[#allocation109_spill] sm:$0xff] }
 0x1ca   : > { %v1496_v53 = vsel %vm13351_vm2, %v1481_v62, %v13350_v13  ;;  %vm13353_vm4 = vnez %v13352_v41  ;;  %v1956_v7 = vadd.f32 %v8367_v46, %v1917_v4  ;;  %v1716_v18 = vadd.f32 %v1684_v43, %v1648_v61  ;;  %v13355_v62 = vld [vmem:[#allocation115_spill] sm:$0xff]  ;;  %v13363_v43 = vld [vmem:[#allocation73_spill] sm:$0xff] }
 0x1cb   : > { %v2019_v56 = vsel %vm13353_vm4, %v1987_v40, 0.0  ;;  %v1686_v54 = vmul.f32 %v13173_v24, %v1496_v53  ;;  %vm13354_vm6 = vcmask 523264   ;;  %v1918_v55 = vadd.f32 %v1886_v14, %v1850_v12  ;;  %v13360_v40 = vld [vmem:[#allocation82_spill] sm:$0xff] }
 0x1cc   : > { %6757 = vmatprep.mubr.msk.f32.mxu1 %vm13354_vm6, %v2019_v56  ;;  %v1851_v1 = vadd.f32 %v13355_v62, %v1783_v9  ;;  %v1888_v19 = vmul.f32 %v8220_v27, %v8632_v47  ;;  %v1889_v8 = vmul.f32 %v8220_v27, %v1496_v53  ;;  %v1988_v51 = vmax.f32 %v1956_v7, 0.0  ;;  %v3251_v62 = vld [vmem:[%s12552_s9 + $0x20] sm:$0xff] }
 0x1cd   : > { %v1784_v24 = vadd.f32 %v1752_v21, %v1716_v18  ;;  %v1718_v10 = vadd.f32 %v1686_v54, %v8660_v48  ;;  %v1822_v36 = vmul.f32 0.0, %v7492_v2  ;;  %v1957_v38 = vadd.f32 %v8367_v46, %v1918_v55 }
 0x1ce   : > { %v1919_v57 = vadd.f32 %v1887_v63, %v1851_v1  ;;  %v1921_v25 = vadd.f32 %v1889_v8, %v8676_v39  ;;  %v7013_v0 = vpack.c.bf16 %v3248_v37, %v3247_v26  ;;  %vm13357_vm6 = vnez %v13356_v50  ;;  %v3250_v37 = vld [vmem:[%s12552_s9 + $0x18] sm:$0xff]  ;;  %v3252_v1 = vld [vmem:[%s12552_s9 + $0x28] sm:$0xff]  ;;  %v3253_v8 = vld [vmem:[%s12552_s9 + $0x30] sm:$0xff] }
 0x1cf   : > { %v2020_v11 = vsel %vm13357_vm6, %v1988_v51, 0.0  ;;  %v1852_v14 = vadd.f32 %v13358_v34, %v1784_v24  ;;  %v1786_v47 = vadd.f32 %v8657_v59, %v1718_v10  ;;  %v1890_v3 = vmul.f32 %v8220_v27, %v13350_v13  ;;  %v3254_v51 = vld [vmem:[%s12552_s9 + $0x38] sm:$0xff]  ;;  %v9009_v10 = vld [vmem:[%s13372_s6] ss:$0 sm:$0xff]  ;;  %s7131_s6 = sshll.u32 %s7194_s2, 4  ;;  %s7132_s6 = int_to_ptr.vmem [resolvable:$false] %s7131_s6 }
 0x1d0   : > { %vm13359_vm2 = vcmask 523264   ;;  %v1989_v48 = vmax.f32 %v1957_v38, 0.0  ;;  %v1958_v2 = vadd.f32 %v8367_v46, %v1919_v57  ;;  %v1960_v20 = vadd.f32 %v8367_v46, %v1921_v25  ;;  %7014 = vmatprep.subr.bf16.mxu0 %v7013_v0  ;;  %s7133_s25 = scalar_lea.vmem %s7132_s6, 32  ;;  %p7134_p0 = scmp.lt.s32.totalorder %s12503_s0, %s7132_s6 }
 0x1d1   : > { %6758 = vmatmul.mubr.msk.f32.gmra.mrb[32].mxu1 %vm13359_vm2, %v2020_v11  ;;  %v1920_v39 = vadd.f32 %v1888_v19, %v1852_v14  ;;  %v1854_v61 = vadd.f32 %v1822_v36, %v1786_v47  ;;  %7016 = vmatpush3.bf16.msra.mxu0 %v7013_v0  ;;  %vm13361_vm4 = vnez %v13360_v40  ;;  %vm13362_vm6 = vmmov %vm13359_vm2  ;;  %vm13364_vm2 = vnez %v13363_v43  ;;  %v2434_v36 = vld [vmem:[%s12550_s7] sm:$0xff]  ;;  %v13374_v47 = vld [vmem:[#allocation10_spill] sm:$0xff]  ;;  %p7135_p1 = scmp.lt.s32.totalorder %s7133_s25, %s7127_s5 }
 0x1d2   : > { %v2021_v4 = vsel %vm13361_vm4, %v1989_v48, 0.0  ;;  %v1990_v16 = vmax.f32 %v1958_v2, 0.0  ;;  %v1992_v6 = vmax.f32 %v1960_v20, 0.0  ;;  %vm13365_vm5 = vmmov %vm13362_vm6  ;;  %v13371_v26 = vmov 0.0   ;;  %v13373_v11 = vld [vmem:[#allocation9_spill] sm:$0xff] }
 0x1d3   : > { %6760 = vmatprep.mubr.msk.f32.mxu1 %vm13362_vm6, %v2021_v4  ;;  %v1959_v59 = vadd.f32 %v8367_v46, %v1920_v39  ;;  %v1922_v27 = vadd.f32 %v1890_v3, %v1854_v61  ;;  %vm13367_vm4 = vmmov %vm13365_vm5  ;;  %v7021_v19 = vpack.c.bf16 %v3252_v1, %v3251_v62  ;;  %v7025_v24 = vpack.c.bf16 %v3254_v51, %v3253_v8  ;;  %v13375_v2 = vld [vmem:[#allocation21_spill] sm:$0xff]  ;;  %v13377_v39 = vld [vmem:[#allocation11_spill] sm:$0xff]  ;;  %p7136_p2 = por %p7135_p1, %p7134_p0 }
 0x1d4   : > { %v2022_v21 = vsel %vm13364_vm2, %v1990_v16, 0.0  ;;  %v2024_v18 = vsel %vm8253_vm0, %v1992_v6, 0.0  ;;  %vm13369_vm6 = vmmov %vm13367_vm4  ;;  %v9017_v34 = vrot.slane %v2434_v36, %v13373_v11  ;;  %v9020_v3 = vrot.slane %v2434_v36, %v13374_v47 }
 0x1d5   : > { %6761 = vmatmul.mubr.msk.f32.gmra.mrb[34].mxu1 %vm13365_vm5, %v2022_v21  ;;  %v1991_v12 = vmax.f32 %v1959_v59, 0.0  ;;  %v1961_v9 = vadd.f32 %v8367_v46, %v1922_v27  ;;  %vm13370_vm2 = vmmov %vm13367_vm4  ;;  %v3249_v46 = vld [vmem:[%s12552_s9 + $0x10] sm:$0xff]  ;;  %vm13376_vm5 = vnez %v13375_v2  ;;  %v9027_v61 = vrot.slane %v2434_v36, %v13377_v39  ;;  %p7137_p3 = pnand %p7136_p2, %p7130_p13 }
 0x1d6   : > { %v7017_v55 = vpack.c.bf16 %v3250_v37, %v3249_v46  ;;  %v2540_v59 = vmul.f32 %v9017_v34, %v13209_v60  ;;  %v13378_v27 = vld [vmem:[#allocation23_spill] sm:$0xff] }
 0x1d7   : > { %v2023_v53 = vsel %vm8308_vm14, %v1991_v12, 0.0  ;;  %v1993_v56 = vmax.f32 %v1961_v9, 0.0  ;;  %v2608_v6 = vmul.f32 0.0, %v9027_v61 }
 0x1d8   : > { %6763 = vmatprep.mubr.msk.f32.mxu1 %vm13367_vm4, %v2023_v53  ;;  %7018 = vmatprep.subr.bf16.mxu0 %v7017_v55  ;;  %vm13379_vm4 = vnez %v13378_v27 }
 0x1d9   : > { %6764 = vmatmul.mubr.msk.f32.gmra.mrb[36].mxu1 %vm13369_vm6, %v2024_v18  ;;  %v2025_v54 = vsel %vm8533_vm15, %v1993_v56, 0.0  ;;  %7020 = vmatpush3.bf16.msra.mxu0 %v7017_v55  ;;  %v13380_v56 = vld [vmem:[#allocation14_spill] sm:$0xff]  ;;  %vm13384_vm15 = vcmp.lt.s32.totalorder %v7458_v52, 7 }
 0x1da   : > { %6766 = vmatprep.mubr.msk.f32.mxu1 %vm13370_vm2, %v2025_v54  ;;  %7022 = vmatprep.subr.bf16.mxu0 %v7021_v19  ;;  %v9038_v18 = vrot.slane %v2434_v36, %v13380_v56  ;;  %v13381_v54 = vld [vmem:[#allocation15_spill] sm:$0xff]  ;;  %vm13382_vm2 = vcmp.lt.s32.totalorder %v7458_v52, 1  ;;  %vm13385_vm14 = vmmov %vm13384_vm15 }
 0x1db   : > { %v9041_v46 = vrot.slane %v2434_v36, %v13381_v54  ;;  %vm13383_vm6 = vmmov %vm13382_vm2 }
 0x1dd   : > { %6767 = vmatmul.mubr.f32.gmra.mrb[38].mxu1 %v13371_v26  ;;  %7024 = vmatpush3.bf16.msra.mxu0 %v7021_v19 }
 0x1de   : > { %6769 = vmatprep.mubr.f32.mxu1 %v13371_v26  ;;  %7026 = vmatprep.subr.bf16.mxu0 %v7025_v24 }
 0x1e1   : > { %6770 = vmatmul.mubr.f32.gmra.mrb[40].mxu1 %v13371_v26  ;;  %7028 = vmatpush3.bf16.msra.mxu0 %v7025_v24 }
 0x1e2   : > { %6772 = vmatprep.mubr.f32.mxu1 %v13371_v26 }
 0x1e5   : > { %6773 = vmatmul.mubr.f32.gmra.mrb[42].mxu1 %v13371_v26 }
 0x1e6   : > { %6775 = vmatprep.mubr.f32.mxu1 %v13371_v26 }
 0x1e9   : > { %6776 = vmatmul.mubr.f32.gmra.mrb[44].mxu1 %v13371_v26 }
 0x246   : > { %v6732_v38 = vpop.f32.mrb[14].mxu1 }
 0x247   : > { %v2217_v57 = vadd.f32 %v6732_v38, %v9009_v10  ;;  %v2211_v25 = vpop.f32.mrb[15].mxu1 }
 0x248   : > { %v2212_v0 = vadd.f32 %v9009_v10, %v2211_v25 }
 0x249   : > { %v2371_v14 = vmax.f32 %v2217_v57, 0.0  ;;  %v13386_v57 = vld [vmem:[#allocation17_spill] sm:$0xff] }
 0x24a   : > { %v2370_v48 = vmax.f32 %v2212_v0, 0.0  ;;  %v9060_v25 = vrot.slane %v2434_v36, %v13386_v57 }
 0x24b   : > { %v9024_v20 = vsel %vm13376_vm5, %v2371_v14, 0.0 }
 0x24c   : > { %v2473_v4 = vrot.slane %v9024_v20, 7  ;;  %v12722_v16 = vrot.slane %v9024_v20, 1  ;;  %v2402_v21 = vsel %vm13379_vm4, %v2370_v48, 0.0  ;;  %v2441_v19 = vmul.f32 %v9020_v3, %v9024_v20 }
 0x24d   : > { %v2440_v12 = vmul.f32 %v9020_v3, %v2402_v21  ;;  %v2472_v9 = vrot.slane %v2402_v21, 7  ;;  %v2672_v53 = vrot.slane %v2402_v21, 1  ;;  %v2609_v14 = vmul.f32 %v9027_v61, %v2402_v21 }
 0x24e   : > { %v13392_v47 = vrot.slane %v9024_v20, 1 }
 0x24f   : > { %v2534_v37 = vsel %vm13382_vm2, %v2472_v9, %v2473_v4  ;;  %v2535_v55 = vsel %vm13383_vm6, %v13209_v60, %v2472_v9  ;;  %v2572_v62 = vadd.f32 %v2540_v59, %v2440_v12  ;;  %v2734_v1 = vsel %vm13384_vm15, %v2672_v53, %v12722_v16  ;;  %v13387_v12 = vld [vmem:[#allocation18_spill] sm:$0xff]  ;;  %vm13390_vm15 = vmmov %vm13382_vm2 }
 0x250   : > { %v2541_v8 = vmul.f32 %v9017_v34, %v2535_v55  ;;  %v2735_v51 = vsel %vm13385_vm14, %v13350_v13, %v2672_v53  ;;  %v2808_v59 = vmul.f32 %v9041_v46, %v2535_v55  ;;  %v9065_v9 = vrot.slane %v2434_v36, %v13387_v12  ;;  %v13388_v53 = vld [vmem:[#allocation12_spill] sm:$0xff] }
 0x251   : > { %v2640_v24 = vadd.f32 %v2608_v6, %v2572_v62  ;;  %v2740_v38 = vmul.f32 %v9038_v18, %v2735_v51  ;;  %v2741_v54 = vmul.f32 %v9038_v18, %v2734_v1  ;;  %v9069_v6 = vrot.slane %v2434_v36, %v13388_v53 }
 0x252   : > { %v2573_v0 = vadd.f32 %v2541_v8, %v2441_v19  ;;  %v2876_v51 = vmul.f32 %v9060_v25, %v2734_v1  ;;  %vm13389_vm14 = vnez %v13206_v28  ;;  %vm13391_vm6 = vcmp.lt.s32.totalorder %v7458_v52, 7 }
 0x253   : > { %v2772_v48 = vadd.f32 %v2740_v38, %v2640_v24  ;;  %v2809_v24 = vmul.f32 %v9041_v46, %v2534_v37  ;;  %v2944_v38 = vmul.f32 %v9065_v9, %v2534_v37  ;;  %v3012_v36 = vmul.f32 %v9069_v6, %v9024_v20  ;;  %vm13393_vm0 = vmmov %vm13391_vm6 }
 0x254   : > { %v2641_v16 = vadd.f32 %v2609_v14, %v2573_v0 }
 0x255   : > { %v2840_v62 = vadd.f32 %v2808_v59, %v2772_v48  ;;  %v2542_v48 = vmul.f32 %v9017_v34, %v2534_v37  ;;  %v2610_v59 = vmul.f32 %v9027_v61, %v9024_v20 }
 0x256   : > { %v2773_v21 = vadd.f32 %v2741_v54, %v2641_v16 }
 0x257   : > { %v2908_v14 = vadd.f32 %v2876_v51, %v2840_v62 }
 0x258   : > { %v6735_v56 = vpop.f32.mrb[16].mxu1  ;;  %v2841_v12 = vadd.f32 %v2809_v24, %v2773_v21 }
 0x259   : > { %v2227_v19 = vadd.f32 %v6735_v56, %v9009_v10  ;;  %v2221_v8 = vpop.f32.mrb[17].mxu1  ;;  %v2976_v56 = vadd.f32 %v2944_v38, %v2908_v14 }
 0x25a   : > { %v2222_v55 = vadd.f32 %v9009_v10, %v2221_v8 }
 0x25b   : > { %v2373_v0 = vmax.f32 %v2227_v19, 0.0  ;;  %v3044_v51 = vadd.f32 %v3012_v36, %v2976_v56 }
 0x25c   : > { %v2372_v57 = vmax.f32 %v2222_v55, 0.0 }
 0x25d   : > { %v9080_v1 = vsel %vm7591_vm3, %v2373_v0, 0.0 }
 0x25e   : > { %v12725_v16 = vrot.slane %v9080_v1, 7  ;;  %v12727_v54 = vrot.slane %v9080_v1, 1  ;;  %v2404_v62 = vsel %vm13389_vm14, %v2372_v57, 0.0  ;;  %v2443_v19 = vmul.f32 %v9020_v3, %v9080_v1 }
 0x25f   : > { %v2442_v8 = vmul.f32 %v9020_v3, %v2404_v62  ;;  %v2474_v21 = vrot.slane %v2404_v62, 7  ;;  %v2674_v24 = vrot.slane %v2404_v62, 1  ;;  %v9094_v55 = vmul.f32 %v9027_v61, %v9080_v1 }
 0x260   : > { %v9098_v37 = vmul.f32 %v9069_v6, %v9080_v1  ;;  %v2611_v38 = vmul.f32 %v9027_v61, %v2404_v62  ;;  %v3013_v57 = vmul.f32 %v9069_v6, %v2404_v62 }
 0x261   : > { %v2532_v0 = vsel %vm13390_vm15, %v2474_v21, %v12725_v16  ;;  %v2533_v14 = vsel %vm13382_vm2, %v2473_v4, %v2474_v21  ;;  %v2574_v36 = vadd.f32 %v2542_v48, %v2442_v8  ;;  %v2732_v56 = vsel %vm13391_vm6, %v2674_v24, %v12727_v54  ;;  %v9122_v4 = vld [vmem:[%s12550_s7 + $0x8] ss:$0 sm:$0xff] }
 0x262   : > { %v2543_v39 = vmul.f32 %v9017_v34, %v2533_v14  ;;  %v2733_v62 = vsel %vm13393_vm0, %v13392_v47, %v2674_v24  ;;  %v2743_v11 = vmul.f32 %v9038_v18, %v2732_v56  ;;  %v2810_v16 = vmul.f32 %v9041_v46, %v2533_v14  ;;  %vm13395_vm0 = vmmov %vm13382_vm2 }
 0x263   : > { %v2642_v48 = vadd.f32 %v2610_v59, %v2574_v36  ;;  %v2742_v8 = vmul.f32 %v9038_v18, %v2733_v62  ;;  %v2811_v21 = vmul.f32 %v9041_v46, %v2532_v0  ;;  %v2877_v20 = vmul.f32 %v9060_v25, %v2733_v62  ;;  %vm13397_vm15 = vmmov %vm13395_vm0 }
 0x264   : > { %v6738_v53 = vpop.f32.mrb[18].mxu1  ;;  %v2575_v54 = vadd.f32 %v2543_v39, %v2443_v19  ;;  %v2945_v47 = vmul.f32 %v9065_v9, %v2533_v14  ;;  %v2544_v63 = vmul.f32 %v9017_v34, %v2532_v0  ;;  %v3080_v7 = vmul.f32 %v9122_v4, %v2733_v62  ;;  %vm13399_vm2 = vmmov %vm13391_vm6 }
 0x265   : > { %v2231_v26 = vpop.f32.mrb[19].mxu1  ;;  %v2237_v24 = vadd.f32 %v6738_v53, %v9009_v10  ;;  %v2774_v60 = vadd.f32 %v2742_v8, %v2642_v48  ;;  %v2909_v31 = vadd.f32 %v2877_v20, %v2841_v12  ;;  %v3081_v43 = vmul.f32 %v9122_v4, %v2732_v56 }
 0x266   : > { %v2232_v13 = vadd.f32 %v9009_v10, %v2231_v26  ;;  %v2643_v59 = vadd.f32 %v2611_v38, %v2575_v54  ;;  %v3112_v41 = vadd.f32 %v3080_v7, %v3044_v51  ;;  %v2878_v19 = vmul.f32 %v9060_v25, %v2732_v56  ;;  %v9153_v7 = vld [vmem:[%s12551_s8] ss:$0 sm:$0xff] }
 0x267   : > { %v2375_v36 = vmax.f32 %v2237_v24, 0.0  ;;  %v2977_v15 = vadd.f32 %v2945_v47, %v2909_v31  ;;  %v2842_v39 = vadd.f32 %v2810_v16, %v2774_v60  ;;  %v2946_v53 = vmul.f32 %v9065_v9, %v2532_v0 }
 0x268   : > { %v2374_v40 = vmax.f32 %v2232_v13, 0.0  ;;  %v2775_v14 = vadd.f32 %v2743_v11, %v2643_v59  ;;  %v3151_v48 = vadd.f32 %v9153_v7, %v3112_v41  ;;  %v13396_v47 = vrot.slane %v9080_v1, 7 }
 0x269   : > { %v9136_v26 = vsel %vm7661_vm8, %v2375_v36, 0.0  ;;  %v3045_v54 = vadd.f32 %v3013_v57, %v2977_v15  ;;  %vm13400_vm6 = vcmask 523264  }
 0x26a   : > { %v9140_v12 = vsel %vm7743_vm9, %v2374_v40, 0.0  ;;  %v2445_v13 = vmul.f32 %v9020_v3, %v9136_v26  ;;  %v2477_v31 = vrot.slane %v9136_v26, 7  ;;  %v9148_v60 = vmul.f32 %v9027_v61, %v9136_v26 }
 0x26b   : > { %v9155_v11 = vadd.f32 %v2811_v21, %v2775_v14  ;;  %v9160_v15 = vmul.f32 %v9069_v6, %v9136_v26  ;;  %v2444_v16 = vmul.f32 %v9020_v3, %v9140_v12  ;;  %v2476_v51 = vrot.slane %v9140_v12, 7 }
 0x26c   : > { %v2613_v38 = vmul.f32 %v9027_v61, %v9140_v12  ;;  %v12733_v57 = vrot.slane %v9140_v12, 1  ;;  %v9170_v0 = vmul.f32 %v9069_v6, %v9140_v12  ;;  %v3113_v8 = vadd.f32 %v3081_v43, %v3045_v54 }
 0x26d   : > { %13394 = vst [vmem:[#allocation28_spill] sm:$0xff] %v9160_v15  ;;  %v2576_v56 = vadd.f32 %v2544_v63, %v2444_v16  ;;  %v2910_v21 = vadd.f32 %v2878_v19, %v2842_v39  ;;  %v9175_v20 = vsel %vm13395_vm0, %v2476_v51, %v2477_v31  ;;  %v9181_v24 = vsel %vm13397_vm15, %v13396_v47, %v2476_v51  ;;  %vm13403_vm15 = vmmov %vm13395_vm0 }
 0x26e   : > { %v13398_v63 = vrot.slane %v9080_v1, 1  ;;  %v2545_v43 = vmul.f32 %v9017_v34, %v9181_v24  ;;  %v9195_v19 = vmul.f32 %v9041_v46, %v9181_v24  ;;  %v9199_v14 = vmul.f32 %v9041_v46, %v9175_v20 }
 0x26f   : > { %v2644_v39 = vadd.f32 %v9094_v55, %v2576_v56  ;;  %v2546_v1 = vmul.f32 %v9017_v34, %v9175_v20  ;;  %v3183_v51 = vmax.f32 %v3151_v48, 0.0  ;;  %v3152_v47 = vadd.f32 %v9153_v7, %v3113_v8 }
 0x270   : > { %v6741_v62 = vpop.f32.mrb[20].mxu1  ;;  %v2731_v41 = vsel %vm13399_vm2, %v13398_v63, %v12733_v57  ;;  %v2978_v40 = vadd.f32 %v2946_v53, %v2910_v21  ;;  %vm13408_vm2 = vmmov %vm13400_vm6  ;;  %v13412_v2 = vrot.slane %v9136_v26, 1 }
 0x271   : > { %v2247_v59 = vadd.f32 %v6741_v62, %v9009_v10  ;;  %v2241_v36 = vpop.f32.mrb[21].mxu1  ;;  %v2577_v62 = vadd.f32 %v2545_v43, %v2445_v13  ;;  %v2744_v55 = vmul.f32 %v9038_v18, %v2731_v41  ;;  %v9207_v56 = vmul.f32 %v9060_v25, %v2731_v41 }
 0x272   : > { %v2242_v16 = vadd.f32 %v9009_v10, %v2241_v36  ;;  %v3215_v36 = vsel %vm13379_vm4, %v3183_v51, 0.0  ;;  %v3184_v58 = vmax.f32 %v3152_v47, 0.0  ;;  %vm13433_vm4 = vmmov %vm13395_vm0 }
 0x273   : > { %v2377_v54 = vmax.f32 %v2247_v59, 0.0  ;;  %v9215_v35 = vadd.f32 %v2613_v38, %v2577_v62  ;;  %6794 = vmatprep.mubr.msk.f32.mxu0 %vm13400_vm6, %v3215_v36  ;;  %v9252_v30 = vadd.f32 %v2744_v55, %v2644_v39  ;;  %vm13410_vm6 = vmmov %vm13395_vm0 }
 0x274   : > { %v2376_v57 = vmax.f32 %v2242_v16, 0.0 }
 0x275   : > { %v9211_v63 = vsel %vm7763_vm10, %v2377_v54, 0.0 }
 0x276   : > { %v6744_v59 = vpop.f32.mrb[22].mxu1  ;;  %v2447_v13 = vmul.f32 %v9020_v3, %v9211_v63  ;;  %v2479_v48 = vrot.slane %v9211_v63, 7  ;;  %v2616_v8 = vmul.f32 %v9027_v61, %v9211_v63  ;;  %v9226_v16 = vmul.f32 %v9069_v6, %v9211_v63 }
 0x277   : > { %v2251_v43 = vpop.f32.mrb[23].mxu1  ;;  %v9230_v53 = vsel %vm7769_vm11, %v2376_v57, 0.0  ;;  %v2257_v38 = vadd.f32 %v6744_v59, %v9009_v10 }
 0x278   : > { %13401 = vst [vmem:[#allocation22_spill] sm:$0xff] %v9226_v16  ;;  %v2446_v21 = vmul.f32 %v9020_v3, %v9230_v53  ;;  %v2478_v51 = vrot.slane %v9230_v53, 7  ;;  %v2615_v62 = vmul.f32 %v9027_v61, %v9230_v53  ;;  %v9241_v54 = vmul.f32 %v9069_v6, %v9230_v53 }
 0x279   : > { %v2379_v27 = vmax.f32 %v2257_v38, 0.0  ;;  %v2252_v57 = vadd.f32 %v9009_v10, %v2251_v43 }
 0x27a   : > { %13402 = vst [vmem:[#allocation38_spill] sm:$0xff] %v9241_v54  ;;  %v9246_v59 = vsel %vm13395_vm0, %v2478_v51, %v2479_v48  ;;  %v9250_v32 = vsel %vm13403_vm15, %v2477_v31, %v2478_v51  ;;  %v2578_v16 = vadd.f32 %v2546_v1, %v2446_v21  ;;  %vm13414_vm15 = vcmp.lt.s32.totalorder %v7458_v52, 7 }
 0x27b   : > { %13404 = vst [vmem:[#allocation51_spill] sm:$0xff] %v9250_v32  ;;  %v2547_v36 = vmul.f32 %v9017_v34, %v9250_v32  ;;  %v9258_v38 = vmul.f32 %v9041_v46, %v9250_v32  ;;  %v9262_v47 = vmul.f32 %v9041_v46, %v9246_v59  ;;  %v9266_v43 = vsel %vm7788_vm12, %v2379_v27, 0.0 }
 0x27c   : > { %v9269_v31 = vadd.f32 %v9148_v60, %v2578_v16  ;;  %v2449_v39 = vmul.f32 %v9020_v3, %v9266_v43  ;;  %v2481_v1 = vrot.slane %v9266_v43, 7  ;;  %v2618_v55 = vmul.f32 %v9027_v61, %v9266_v43 }
 0x27d   : > { %13405 = vst [vmem:[#allocation52_spill] sm:$0xff] %v9258_v38  ;;  %13406 = vst [vmem:[#allocation50_spill] sm:$0xff] %v9262_v47  ;;  %v2579_v51 = vadd.f32 %v2547_v36, %v2447_v13  ;;  %v9279_v49 = vmul.f32 %v9069_v6, %v9266_v43  ;;  %v2378_v27 = vmax.f32 %v2252_v57, 0.0  ;;  %v2548_v60 = vmul.f32 %v9017_v34, %v9246_v59 }
 0x27e   : > { %v3216_v32 = vsel %vm13376_vm5, %v3184_v58, 0.0  ;;  %v3046_v36 = vadd.f32 %v9098_v37, %v2978_v40  ;;  %v3082_v57 = vmul.f32 %v9122_v4, %v2731_v41  ;;  %vm13452_vm5 = vcmp.lt.s32.totalorder %v7458_v52, 1 }
 0x27f   : > { %v6747_v21 = vpop.f32.mrb[24].mxu1  ;;  %13407 = vst [vmem:[#allocation36_spill] sm:$0xff] %v9279_v49  ;;  %v9287_v15 = vadd.f32 %v2615_v62, %v2579_v51  ;;  %v9291_v13 = vsel %vm7843_vm13, %v2378_v27, 0.0  ;;  %6795 = vmatmul.mubr.msk.f32.vlgmr.msra.gmra.mrb[18].mxu0 %vm13408_vm2, %v3216_v32  ;;  %v13413_v62 = vrot.slane %v9140_v12, 1  ;;  %vm13419_vm2 = vnez %v13275_v17 }
 0x280   : > { %v2261_v47 = vpop.f32.mrb[25].mxu1  ;;  %v2267_v16 = vadd.f32 %v6747_v21, %v9009_v10  ;;  %v2448_v21 = vmul.f32 %v9020_v3, %v9291_v13  ;;  %v2617_v58 = vmul.f32 %v9027_v61, %v9291_v13  ;;  %v9304_v51 = vmul.f32 %v9069_v6, %v9291_v13 }
 0x281   : > { %v2262_v54 = vadd.f32 %v9009_v10, %v2261_v47  ;;  %v2480_v47 = vrot.slane %v9291_v13, 7  ;;  %v3114_v38 = vadd.f32 %v3082_v57, %v3046_v36  ;;  %v9320_v5 = vsel %vm13414_vm15, %v13413_v62, %v13412_v2 }
 0x282   : > { %13409 = vst [vmem:[#allocation47_spill] sm:$0xff] %v9304_v51  ;;  %v2381_v27 = vmax.f32 %v2267_v16, 0.0  ;;  %v2580_v41 = vadd.f32 %v2548_v60, %v2448_v21  ;;  %vm13427_vm15 = vnez %v13303_v29  ;;  %v3083_v28 = vmul.f32 %v9122_v4, %v9320_v5 }
 0x283   : > { %v2380_v32 = vmax.f32 %v2262_v54, 0.0  ;;  %v9308_v37 = vsel %vm13410_vm6, %v2480_v47, %v2481_v1  ;;  %v9312_v40 = vsel %vm13395_vm0, %v2479_v48, %v2480_v47  ;;  %vm13421_vm6 = vmmov %vm13395_vm0 }
 0x284   : > { %13411 = vst [vmem:[#allocation60_spill] sm:$0xff] %v9308_v37  ;;  %v2549_v54 = vmul.f32 %v9017_v34, %v9312_v40  ;;  %v9326_v16 = vmul.f32 %v9041_v46, %v9312_v40  ;;  %v9330_v48 = vmul.f32 %v9041_v46, %v9308_v37  ;;  %v9334_v60 = vsel %vm13282_vm7, %v2381_v27, 0.0 }
 0x285   : > { %13417 = vst [vmem:[#allocation53_spill] sm:$0xff] %v9334_v60  ;;  %v9336_v12 = vadd.f32 %v2616_v8, %v2580_v41  ;;  %v2451_v2 = vmul.f32 %v9020_v3, %v9334_v60  ;;  %v2483_v36 = vrot.slane %v9334_v60, 7  ;;  %v2620_v57 = vmul.f32 %v9027_v61, %v9334_v60 }
 0x286   : > { %13415 = vst [vmem:[#allocation35_spill] sm:$0xff] %v9326_v16  ;;  %13416 = vst [vmem:[#allocation48_spill] sm:$0xff] %v9330_v48  ;;  %v2581_v47 = vadd.f32 %v2549_v54, %v2449_v39  ;;  %v9346_v49 = vmul.f32 %v9069_v6, %v9334_v60  ;;  %v9350_v8 = vsel %vm13419_vm2, %v2380_v32, 0.0  ;;  %v2550_v48 = vmul.f32 %v9017_v34, %v9308_v37 }
 0x287   : > { %v2450_v41 = vmul.f32 %v9020_v3, %v9350_v8  ;;  %v2482_v44 = vrot.slane %v9350_v8, 7  ;;  %v2619_v39 = vmul.f32 %v9027_v61, %v9350_v8  ;;  %v9364_v32 = vmul.f32 %v9069_v6, %v9350_v8 }
 0x288   : > { %13418 = vst [vmem:[#allocation45_spill] sm:$0xff] %v9346_v49  ;;  %v9359_v54 = vadd.f32 %v2617_v58, %v2581_v47 }
 0x289   : > { %13420 = vst [vmem:[#allocation56_spill] sm:$0xff] %v9364_v32  ;;  %v9369_v49 = vsel %vm13421_vm6, %v2482_v44, %v2483_v36  ;;  %v9373_v60 = vsel %vm13395_vm0, %v2481_v1, %v2482_v44  ;;  %v2582_v37 = vadd.f32 %v2550_v48, %v2450_v41  ;;  %v3153_v1 = vadd.f32 %v9153_v7, %v3114_v38 }
 0x28a   : > { %v6750_v21 = vpop.f32.mrb[26].mxu1  ;;  %13422 = vst [vmem:[#allocation55_spill] sm:$0xff] %v9369_v49  ;;  %13423 = vst [vmem:[#allocation58_spill] sm:$0xff] %v9373_v60  ;;  %v2551_v47 = vmul.f32 %v9017_v34, %v9373_v60  ;;  %v9380_v62 = vmul.f32 %v9041_v46, %v9373_v60  ;;  %v2552_v44 = vmul.f32 %v9017_v34, %v9369_v49  ;;  %vm13431_vm6 = vnez %v13293_v42 }
 0x28b   : > { %v2271_v27 = vpop.f32.mrb[27].mxu1  ;;  %v2277_v17 = vadd.f32 %v6750_v21, %v9009_v10  ;;  %v9384_v21 = vmul.f32 %v9041_v46, %v9369_v49  ;;  %v9386_v16 = vadd.f32 %v2618_v55, %v2582_v37  ;;  %v3185_v42 = vmax.f32 %v3153_v1, 0.0 }
 0x28c   : > { %v2272_v58 = vadd.f32 %v9009_v10, %v2271_v27  ;;  %13424 = vst [vmem:[#allocation59_spill] sm:$0xff] %v9380_v62  ;;  %v2583_v48 = vadd.f32 %v2551_v47, %v2451_v2  ;;  %v2745_v62 = vmul.f32 %v9038_v18, %v9320_v5 }
 0x28d   : > { %13425 = vst [vmem:[#allocation65_spill] sm:$0xff] %v9384_v21  ;;  %v2383_v32 = vmax.f32 %v2277_v17, 0.0  ;;  %13426 = vst [vmem:[#allocation54_spill] sm:$0xff] %v9386_v16  ;;  %v9399_v17 = vmul.f32 %v9060_v25, %v9320_v5 }
 0x28e   : > { %v2382_v51 = vmax.f32 %v2272_v58, 0.0  ;;  %v9407_v58 = vadd.f32 %v2619_v39, %v2583_v48  ;;  %v9438_v16 = vadd.f32 %v2745_v62, %v9215_v35 }
 0x28f   : > { %v9393_v27 = vsel %vm13427_vm15, %v2383_v32, 0.0 }
 0x290   : > { %13428 = vst [vmem:[#allocation68_spill] sm:$0xff] %v9393_v27  ;;  %v2453_v55 = vmul.f32 %v9020_v3, %v9393_v27  ;;  %v2485_v37 = vrot.slane %v9393_v27, 7  ;;  %v2622_v38 = vmul.f32 %v9027_v61, %v9393_v27  ;;  %13429 = vst [vmem:[#allocation64_spill] sm:$0xff] %v9407_v58  ;;  %v9411_v47 = vmul.f32 %v9069_v6, %v9393_v27 }
 0x291   : > { %v9415_v29 = vsel %vm13431_vm6, %v2382_v51, 0.0 }
 0x292   : > { %v6753_v41 = vpop.f32.mrb[28].mxu1  ;;  %13430 = vst [vmem:[#allocation69_spill] sm:$0xff] %v9411_v47  ;;  %v2452_v49 = vmul.f32 %v9020_v3, %v9415_v29  ;;  %v2484_v60 = vrot.slane %v9415_v29, 7  ;;  %v2621_v2 = vmul.f32 %v9027_v61, %v9415_v29  ;;  %v9426_v48 = vmul.f32 %v9069_v6, %v9415_v29 }
 0x293   : > { %v2281_v32 = vpop.f32.mrb[29].mxu1  ;;  %v2287_v21 = vadd.f32 %v6753_v41, %v9009_v10 }
 0x294   : > { %13432 = vst [vmem:[#allocation66_spill] sm:$0xff] %v9426_v48  ;;  %v2282_v51 = vadd.f32 %v9009_v10, %v2281_v32  ;;  %v9431_v41 = vsel %vm13395_vm0, %v2484_v60, %v2485_v37  ;;  %v9435_v27 = vsel %vm13433_vm4, %v2483_v36, %v2484_v60  ;;  %v2584_v58 = vadd.f32 %v2552_v44, %v2452_v49 }
 0x295   : > { %v2385_v47 = vmax.f32 %v2287_v21, 0.0  ;;  %13434 = vst [vmem:[#allocation75_spill] sm:$0xff] %v9435_v27  ;;  %v2553_v39 = vmul.f32 %v9017_v34, %v9435_v27  ;;  %v9444_v21 = vmul.f32 %v9041_v46, %v9435_v27  ;;  %v9448_v1 = vmul.f32 %v9041_v46, %v9431_v41 }
 0x296   : > { %v9454_v60 = vadd.f32 %v2620_v57, %v2584_v58  ;;  %v2554_v57 = vmul.f32 %v9017_v34, %v9431_v41  ;;  %v3217_v27 = vsel %vm13389_vm14, %v3185_v42, 0.0  ;;  %vm13439_vm4 = vnez %v13313_v22 }
 0x297   : > { %13435 = vst [vmem:[#allocation80_spill] sm:$0xff] %v9444_v21  ;;  %13436 = vst [vmem:[#allocation63_spill] sm:$0xff] %v9448_v1  ;;  %v9452_v32 = vsel %vm13327_vm1, %v2385_v47, 0.0  ;;  %v2585_v44 = vadd.f32 %v2553_v39, %v2453_v55  ;;  %v2384_v47 = vmax.f32 %v2282_v51, 0.0  ;;  %vm13440_vm0 = vcmask 523264  }
 0x298   : > { %13437 = vst [vmem:[#allocation77_spill] sm:$0xff] %v9454_v60  ;;  %v2455_v35 = vmul.f32 %v9020_v3, %v9452_v32  ;;  %v2487_v49 = vrot.slane %v9452_v32, 7  ;;  %v2624_v36 = vmul.f32 %v9027_v61, %v9452_v32  ;;  %v9464_v1 = vmul.f32 %v9069_v6, %v9452_v32  ;;  %6797 = vmatprep.mubr.msk.f32.mxu0 %vm13440_vm0, %v3217_v27 }
 0x299   : > { %v6756_v62 = vpop.f32.mrb[30].mxu1  ;;  %v9472_v60 = vadd.f32 %v2621_v2, %v2585_v44  ;;  %v9476_v55 = vsel %vm13439_vm4, %v2384_v47, 0.0  ;;  %v2911_v39 = vadd.f32 %v9207_v56, %v9155_v11  ;;  %v2947_v51 = vmul.f32 %v9065_v9, %v9181_v24 }
 0x29a   : > { %13438 = vst [vmem:[#allocation74_spill] sm:$0xff] %v9464_v1  ;;  %v2291_v23 = vpop.f32.mrb[31].mxu1  ;;  %v2297_v58 = vadd.f32 %v6756_v62, %v9009_v10  ;;  %v2486_v62 = vrot.slane %v9476_v55, 7  ;;  %v2623_v42 = vmul.f32 %v9027_v61, %v9476_v55  ;;  %v9491_v44 = vmul.f32 %v9069_v6, %v9476_v55 }
 0x29b   : > { %v2292_v21 = vadd.f32 %v9009_v10, %v2291_v23  ;;  %v2454_v23 = vmul.f32 %v9020_v3, %v9476_v55  ;;  %v2979_v11 = vadd.f32 %v2947_v51, %v2911_v39  ;;  %vm13442_vm0 = vcmp.lt.s32.totalorder %v7458_v52, 1 }
 0x29c   : > { %13441 = vst [vmem:[#allocation72_spill] sm:$0xff] %v9491_v44  ;;  %v2387_v27 = vmax.f32 %v2297_v58, 0.0  ;;  %v9495_v24 = vsel %vm13442_vm0, %v2486_v62, %v2487_v49  ;;  %vm13444_vm14 = vmmov %vm13442_vm0  ;;  %vm13447_vm0 = vnez %v13343_v33 }
 0x29d   : > { %v2386_v47 = vmax.f32 %v2292_v21, 0.0  ;;  %13443 = vst [vmem:[#allocation78_spill] sm:$0xff] %v9495_v24  ;;  %v9499_v56 = vsel %vm13444_vm14, %v2485_v37, %v2486_v62  ;;  %v2586_v48 = vadd.f32 %v2554_v57, %v2454_v23  ;;  %v9511_v21 = vmul.f32 %v9041_v46, %v9495_v24 }
 0x29e   : > { %v2555_v2 = vmul.f32 %v9017_v34, %v9499_v56  ;;  %v9507_v58 = vmul.f32 %v9041_v46, %v9499_v56  ;;  %v9515_v39 = vsel %vm13447_vm0, %v2387_v27, 0.0  ;;  %vm13450_vm14 = vnez %v13337_v45  ;;  %vm13454_vm0 = vmmov %vm13452_vm5 }
 0x29f   : > { %13446 = vst [vmem:[#allocation70_spill] sm:$0xff] %v9511_v21  ;;  %13448 = vst [vmem:[#allocation94_spill] sm:$0xff] %v9515_v39  ;;  %v9517_v37 = vadd.f32 %v2622_v38, %v2586_v48  ;;  %v2457_v5 = vmul.f32 %v9020_v3, %v9515_v39  ;;  %v2489_v57 = vrot.slane %v9515_v39, 7  ;;  %v2626_v51 = vmul.f32 %v9027_v61, %v9515_v39 }
 0x2a0   : > { %13445 = vst [vmem:[#allocation85_spill] sm:$0xff] %v9507_v58  ;;  %v2587_v62 = vadd.f32 %v2555_v2, %v2455_v35  ;;  %v9527_v1 = vmul.f32 %v9069_v6, %v9515_v39  ;;  %v9531_v38 = vsel %vm13450_vm14, %v2386_v47, 0.0  ;;  %v2556_v21 = vmul.f32 %v9017_v34, %v9495_v24 }
 0x2a1   : > { %v2456_v27 = vmul.f32 %v9020_v3, %v9531_v38  ;;  %v2488_v33 = vrot.slane %v9531_v38, 7  ;;  %v2625_v35 = vmul.f32 %v9027_v61, %v9531_v38  ;;  %v9545_v47 = vmul.f32 %v9069_v6, %v9531_v38 }
 0x2a2   : > { %13449 = vst [vmem:[#allocation88_spill] sm:$0xff] %v9527_v1  ;;  %v9540_v2 = vadd.f32 %v2623_v42, %v2587_v62 }
 0x2a3   : > { %13451 = vst [vmem:[#allocation83_spill] sm:$0xff] %v9545_v47  ;;  %v9550_v1 = vsel %vm13452_vm5, %v2488_v33, %v2489_v57  ;;  %v9554_v39 = vsel %vm13454_vm0, %v2487_v49, %v2488_v33  ;;  %v2588_v44 = vadd.f32 %v2556_v21, %v2456_v27  ;;  %v3047_v21 = vadd.f32 %v9170_v0, %v2979_v11 }
 0x2a4   : > { %v6759_v23 = vpop.f32.mrb[32].mxu1  ;;  %13453 = vst [vmem:[#allocation84_spill] sm:$0xff] %v9550_v1  ;;  %13455 = vst [vmem:[#allocation90_spill] sm:$0xff] %v9554_v39  ;;  %v2557_v62 = vmul.f32 %v9017_v34, %v9554_v39  ;;  %v9561_v22 = vmul.f32 %v9041_v46, %v9554_v39  ;;  %v2558_v49 = vmul.f32 %v9017_v34, %v9550_v1  ;;  %vm13459_vm5 = vnez %v13356_v50 }
 0x2a5   : > { %v2301_v48 = vpop.f32.mrb[33].mxu1  ;;  %v2307_v45 = vadd.f32 %v6759_v23, %v9009_v10  ;;  %v9565_v23 = vmul.f32 %v9041_v46, %v9550_v1  ;;  %v9567_v58 = vadd.f32 %v2624_v36, %v2588_v44  ;;  %vm13462_vm0 = vcmp.lt.s32.totalorder %v7458_v52, 7 }
 0x2a6   : > { %v2302_v42 = vadd.f32 %v9009_v10, %v2301_v48  ;;  %13456 = vst [vmem:[#allocation79_spill] sm:$0xff] %v9561_v22  ;;  %v2589_v27 = vadd.f32 %v2557_v62, %v2457_v5  ;;  %v13460_v22 = vrot.slane %v9230_v53, 1  ;;  %v2844_v36 = vadd.f32 %v9195_v19, %v9252_v30 }
 0x2a7   : > { %13457 = vst [vmem:[#allocation104_spill] sm:$0xff] %v9565_v23  ;;  %v2389_v47 = vmax.f32 %v2307_v45, 0.0  ;;  %13458 = vst [vmem:[#allocation105_spill] sm:$0xff] %v9567_v58  ;;  %v13461_v23 = vrot.slane %v9136_v26, 1  ;;  %v3115_v19 = vadd.f32 %v3083_v28, %v3047_v21 }
 0x2a8   : > { %v6762_v24 = vpop.f32.mrb[34].mxu1  ;;  %v2388_v33 = vmax.f32 %v2302_v42, 0.0  ;;  %v2912_v1 = vadd.f32 %v9399_v17, %v2844_v36  ;;  %v2948_v17 = vmul.f32 %v9065_v9, %v9175_v20  ;;  %v13477_v20 = vrot.slane %v9211_v63, 1 }
 0x2a9   : > { %v2311_v48 = vpop.f32.mrb[35].mxu1  ;;  %v9574_v39 = vsel %vm13459_vm5, %v2389_v47, 0.0  ;;  %v2729_v45 = vsel %vm13462_vm0, %v13461_v23, %v13460_v22  ;;  %v9592_v47 = vadd.f32 %v2625_v35, %v2589_v27  ;;  %v13465_v22 = vld [vmem:[#allocation62_spill] sm:$0xff]  ;;  %v3154_v28 = vadd.f32 %v9153_v7, %v3115_v19 }
 0x2aa   : > { %v2459_v44 = vmul.f32 %v9020_v3, %v9574_v39  ;;  %v9589_v11 = vmul.f32 %v9027_v61, %v9574_v39  ;;  %v9596_v26 = vmul.f32 %v9069_v6, %v9574_v39  ;;  %vm13466_vm0 = vnez %v13465_v22 }
 0x2ab   : > { %13463 = vst [vmem:[#allocation106_spill] sm:$0xff] %v9592_v47  ;;  %v9600_v30 = vsel %vm13466_vm0, %v2388_v33, 0.0  ;;  %v2746_v33 = vmul.f32 %v9038_v18, %v2729_v45  ;;  %v2881_v21 = vmul.f32 %v9060_v25, %v2729_v45  ;;  %v13469_v50 = vrot.slane %v9574_v39, 7 }
 0x2ac   : > { %13464 = vst [vmem:[#allocation108_spill] sm:$0xff] %v9596_v26  ;;  %13467 = vst [vmem:[#allocation118_spill] sm:$0xff] %v9600_v30  ;;  %v9602_v42 = vpop.f32.mrb[36].mxu1  ;;  %v2458_v62 = vmul.f32 %v9020_v3, %v9600_v30  ;;  %v2490_v23 = vrot.slane %v9600_v30, 7  ;;  %v2627_v35 = vmul.f32 %v9027_v61, %v9600_v30  ;;  %v9614_v0 = vmul.f32 %v9069_v6, %v9600_v30 }
 0x2ad   : > { %v9610_v5 = vpop.f32.mrb[37].mxu1  ;;  %vm13470_vm5 = vcmp.lt.s32.totalorder %v7458_v52, 1 }
 0x2ae   : > { %13468 = vst [vmem:[#allocation33_spill] sm:$0xff] %v9614_v0  ;;  %v9623_v22 = vsel %vm13470_vm5, %v2490_v23, %v13469_v50  ;;  %vm13471_vm0 = vmmov %vm13470_vm5  ;;  %v2590_v26 = vadd.f32 %v2558_v49, %v2458_v62  ;;  %v3186_v50 = vmax.f32 %v3154_v28, 0.0  ;;  %v3084_v49 = vmul.f32 %v9122_v4, %v2729_v45 }
 0x2af   : > { %v9627_v27 = vsel %vm13471_vm0, %v2489_v57, %v2490_v23  ;;  %v9638_v30 = vmul.f32 %v9041_v46, %v9623_v22  ;;  %v2778_v57 = vadd.f32 %v2746_v33, %v9269_v31  ;;  %v2312_v28 = vadd.f32 %v9009_v10, %v2311_v48  ;;  %v13480_v33 = vld [vmem:[#allocation28_spill] sm:$0xff]  ;;  %v13481_v23 = vld [vmem:[#allocation51_spill] sm:$0xff] }
 0x2b0   : > { %13472 = vst [vmem:[#allocation121_spill] sm:$0xff] %v9627_v27  ;;  %v2559_v19 = vmul.f32 %v9017_v34, %v9627_v27  ;;  %v9634_v0 = vmul.f32 %v9041_v46, %v9627_v27  ;;  %v6768_v47 = vpop.f32.mrb[38].mxu1  ;;  %v9640_v58 = vadd.f32 %v2626_v51, %v2590_v26  ;;  %v2317_v27 = vadd.f32 %v6762_v24, %v9009_v10 }
 0x2b1   : > { %13474 = vst [vmem:[#allocation43_spill] sm:$0xff] %v9638_v30  ;;  %v9646_v36 = vpop.f32.mrb[39].mxu1  ;;  %vm13476_vm5 = vcmask 523264   ;;  %v2980_v51 = vadd.f32 %v2948_v17, %v2912_v1  ;;  %v2560_v31 = vmul.f32 %v9017_v34, %v9623_v22  ;;  %v13478_v45 = vrot.slane %v9230_v53, 1 }
 0x2b2   : > { %13473 = vst [vmem:[#allocation110_spill] sm:$0xff] %v9634_v0  ;;  %v2591_v62 = vadd.f32 %v2559_v19, %v2459_v44  ;;  %v3218_v0 = vsel %vm7591_vm3, %v3186_v50, 0.0  ;;  %vm13479_vm0 = vcmp.lt.s32.totalorder %v7458_v52, 7  ;;  %v2845_v47 = vadd.f32 %v9199_v14, %v9438_v16  ;;  %v13484_v14 = vld [vmem:[#allocation82_spill] sm:$0xff] }
 0x2b3   : > { %6798 = vmatmul.mubr.msk.f32.gmra.mrb[20].mxu0 %vm13476_vm5, %v3218_v0  ;;  %v2728_v44 = vsel %vm13479_vm0, %v13478_v45, %v13477_v20  ;;  %v2391_v24 = vmax.f32 %v2317_v27, 0.0  ;;  %v2390_v48 = vmax.f32 %v2312_v28, 0.0  ;;  %v3048_v19 = vadd.f32 %v13480_v33, %v2980_v51  ;;  %v13482_v20 = vld [vmem:[#allocation73_spill] sm:$0xff] }
 0x2b4   : > { %v9663_v26 = vadd.f32 %v2627_v35, %v2591_v62  ;;  %v2747_v0 = vmul.f32 %v9038_v18, %v2728_v44  ;;  %v6771_v1 = vpop.f32.mrb[40].mxu1  ;;  %v2882_v50 = vmul.f32 %v9060_v25, %v2728_v44  ;;  %v2913_v17 = vadd.f32 %v2881_v21, %v2845_v47 }
 0x2b5   : > { %v2949_v53 = vmul.f32 %v9065_v9, %v13481_v23  ;;  %v2341_v30 = vpop.f32.mrb[41].mxu1  ;;  %vm13483_vm5 = vnez %v13482_v20  ;;  %vm13485_vm0 = vnez %v13484_v14  ;;  %v3085_v27 = vmul.f32 %v9122_v4, %v2728_v44 }
 0x2b6   : > { %v9672_v45 = vsel %vm13483_vm5, %v2391_v24, 0.0  ;;  %v9676_v16 = vsel %vm13485_vm0, %v2390_v48, 0.0  ;;  %v2779_v35 = vadd.f32 %v2747_v0, %v9287_v15  ;;  %v3116_v62 = vadd.f32 %v3084_v49, %v3048_v19 }
 0x2b7   : > { %v2461_v21 = vmul.f32 %v9020_v3, %v9672_v45  ;;  %v12774_v28 = vrot.slane %v9672_v45, 7  ;;  %v9685_v30 = vmul.f32 %v9027_v61, %v9672_v45  ;;  %v9690_v51 = vmul.f32 %v9069_v6, %v9672_v45 }
 0x2b8   : > { %v2460_v15 = vmul.f32 %v9020_v3, %v9676_v16  ;;  %v2492_v49 = vrot.slane %v9676_v16, 7  ;;  %v6774_v44 = vpop.f32.mrb[42].mxu1  ;;  %v3155_v47 = vadd.f32 %v9153_v7, %v3116_v62  ;;  %v2629_v24 = vmul.f32 %v9027_v61, %v9676_v16 }
 0x2b9   : > { %13486 = vst [vmem:[#allocation76_spill] sm:$0xff] %v9690_v51  ;;  %v9701_v0 = vmul.f32 %v9069_v6, %v9676_v16  ;;  %v2351_v1 = vpop.f32.mrb[43].mxu1  ;;  %vm13488_vm3 = vcmp.lt.s32.totalorder %v7458_v52, 1  ;;  %v13489_v19 = vrot.slane %v9574_v39, 7  ;;  %v2981_v23 = vadd.f32 %v2949_v53, %v2913_v17  ;;  %v13494_v51 = vld [vmem:[#allocation38_spill] sm:$0xff] }
 0x2ba   : > { %v9707_v33 = vsel %vm13488_vm3, %v2492_v49, %v12774_v28  ;;  %vm13490_vm5 = vmmov %vm13488_vm3  ;;  %v2592_v44 = vadd.f32 %v2560_v31, %v2460_v15  ;;  %v3187_v48 = vmax.f32 %v3155_v47, 0.0  ;;  %v13495_v31 = vrot.slane %v9291_v13, 1  ;;  %v13498_v15 = vld [vmem:[#allocation52_spill] sm:$0xff] }
 0x2bb   : > { %13487 = vst [vmem:[#allocation120_spill] sm:$0xff] %v9701_v0  ;;  %v9713_v62 = vsel %vm13490_vm5, %v13489_v19, %v2492_v49  ;;  %v9723_v28 = vmul.f32 %v9041_v46, %v9707_v33  ;;  %v3049_v49 = vadd.f32 %v13494_v51, %v2981_v23  ;;  %v13496_v17 = vrot.slane %v9211_v63, 1 }
 0x2bc   : > { %13491 = vst [vmem:[#allocation19_spill] sm:$0xff] %v9713_v62  ;;  %v2561_v20 = vmul.f32 %v9017_v34, %v9713_v62  ;;  %v9719_v1 = vmul.f32 %v9041_v46, %v9713_v62  ;;  %v9726_v14 = vadd.f32 %v9589_v11, %v2592_v44  ;;  %vm13497_vm3 = vcmp.lt.s32.totalorder %v7458_v52, 7  ;;  %v6777_v19 = vpop.f32.mrb[44].mxu1 }
 0x2bd   : > { %13493 = vst [vmem:[#allocation34_spill] sm:$0xff] %v9723_v28  ;;  %v2727_v53 = vsel %vm13497_vm3, %v13496_v17, %v13495_v31  ;;  %v2846_v47 = vadd.f32 %v13498_v15, %v2778_v57  ;;  %v2361_v44 = vpop.f32.mrb[45].mxu1  ;;  %vm13500_vm5 = vcmask 523264   ;;  %v3117_v23 = vadd.f32 %v3085_v27, %v3049_v49 }
 0x2be   : > { %13492 = vst [vmem:[#allocation119_spill] sm:$0xff] %v9719_v1  ;;  %v3219_v1 = vsel %vm7743_vm9, %v3187_v48, 0.0  ;;  %v2593_v62 = vadd.f32 %v2561_v20, %v2461_v21  ;;  %v2748_v28 = vmul.f32 %v9038_v18, %v2727_v53  ;;  %v2883_v11 = vmul.f32 %v9060_v25, %v2727_v53  ;;  %v13505_v44 = vld [vmem:[#allocation97_spill] sm:$0xff] }
 0x2bf   : > { %6800 = vmatprep.mubr.msk.f32.mxu0 %vm13500_vm5, %v3219_v1  ;;  %v2914_v51 = vadd.f32 %v2882_v50, %v2846_v47  ;;  %v2950_v63 = vmul.f32 %v9065_v9, %v9246_v59  ;;  %v3086_v31 = vmul.f32 %v9122_v4, %v2727_v53  ;;  %v2327_v20 = vadd.f32 %v9602_v42, %v9009_v10  ;;  %v13504_v53 = vld [vmem:[#allocation22_spill] sm:$0xff] }
 0x2c0   : > { %v9744_v57 = vadd.f32 %v2629_v24, %v2593_v62  ;;  %v2780_v17 = vadd.f32 %v2748_v28, %v9336_v12  ;;  %v2322_v21 = vadd.f32 %v9009_v10, %v9610_v5  ;;  %v3156_v48 = vadd.f32 %v9153_v7, %v3117_v23  ;;  %v13503_v62 = vld [vmem:[#allocation50_spill] sm:$0xff] }
 0x2c1   : > { %v2982_v1 = vadd.f32 %v2950_v63, %v2914_v51  ;;  %v2562_v50 = vmul.f32 %v9017_v34, %v9707_v33  ;;  %v13501_v59 = vrot.slane %v9266_v43, 1  ;;  %v13502_v27 = vrot.slane %v9291_v13, 1  ;;  %v13507_v23 = vld [vmem:[#allocation26_spill] sm:$0xff] }
 0x2c2   : > { %v2393_v12 = vmax.f32 %v2327_v20, 0.0  ;;  %v2392_v28 = vmax.f32 %v2322_v21, 0.0  ;;  %v2847_v49 = vadd.f32 %v13503_v62, %v2779_v35  ;;  %v3188_v5 = vmax.f32 %v3156_v48, 0.0 }
 0x2c3   : > { %v2726_v24 = vsel %vm13497_vm3, %v13502_v27, %v13501_v59  ;;  %v3050_v15 = vadd.f32 %v13504_v53, %v2982_v1  ;;  %v2951_v19 = vmul.f32 %v9065_v9, %v9312_v40  ;;  %vm13506_vm5 = vnez %v13505_v44 }
 0x2c4   : > { %v2749_v42 = vmul.f32 %v9038_v18, %v2726_v24  ;;  %v2884_v47 = vmul.f32 %v9060_v25, %v2726_v24  ;;  %v9768_v13 = vsel %vm13506_vm5, %v2393_v12, 0.0  ;;  %vm13508_vm3 = vnez %v13507_v23  ;;  %v13524_v23 = vld [vmem:[#allocation60_spill] sm:$0xff] }
 0x2c5   : > { %v9772_v51 = vsel %vm13508_vm3, %v2392_v28, 0.0  ;;  %v2915_v20 = vadd.f32 %v2883_v11, %v2847_v49  ;;  %v3220_v21 = vsel %vm7661_vm8, %v3188_v5, 0.0  ;;  %v3118_v48 = vadd.f32 %v3086_v31, %v3050_v15 }
 0x2c6   : > { %v2781_v63 = vadd.f32 %v2749_v42, %v9359_v54  ;;  %v2463_v1 = vmul.f32 %v9020_v3, %v9768_v13  ;;  %v2495_v40 = vrot.slane %v9768_v13, 7  ;;  %vm13510_vm9 = vcmask 523264  }
 0x2c7   : > { %6801 = vmatmul.mubr.msk.f32.gmra.mrb[22].mxu0 %vm13510_vm9, %v3220_v21  ;;  %v9783_v59 = vmul.f32 %v9027_v61, %v9768_v13  ;;  %v2695_v27 = vrot.slane %v9768_v13, 1  ;;  %v9788_v54 = vmul.f32 %v9069_v6, %v9768_v13  ;;  %v2462_v11 = vmul.f32 %v9020_v3, %v9772_v51 }
 0x2c8   : > { %v3157_v31 = vadd.f32 %v9153_v7, %v3118_v48  ;;  %v2494_v12 = vrot.slane %v9772_v51, 7  ;;  %v2631_v28 = vmul.f32 %v9027_v61, %v9772_v51  ;;  %v12780_v42 = vrot.slane %v9772_v51, 1 }
 0x2c9   : > { %13511 = vst [vmem:[#allocation86_spill] sm:$0xff] %v9788_v54  ;;  %v2594_v62 = vadd.f32 %v2562_v50, %v2462_v11  ;;  %v9799_v49 = vmul.f32 %v9069_v6, %v9772_v51  ;;  %v2983_v5 = vadd.f32 %v2951_v19, %v2915_v20  ;;  %v3087_v53 = vmul.f32 %v9122_v4, %v2726_v24 }
 0x2ca   : > { %v3189_v15 = vmax.f32 %v3157_v31, 0.0  ;;  %v13513_v13 = vrot.slane %v9672_v45, 7  ;;  %vm13514_vm9 = vcmp.lt.s32.totalorder %v7458_v52, 1  ;;  %vm13515_vm8 = vcmp.lt.s32.totalorder %v7458_v52, 7 }
 0x2cb   : > { %13512 = vst [vmem:[#allocation30_spill] sm:$0xff] %v9799_v49  ;;  %v9812_v61 = vsel %vm13515_vm8, %v12780_v42, %v2695_v27  ;;  %v13516_v50 = vrot.slane %v9350_v8, 1  ;;  %v13517_v48 = vrot.slane %v9266_v43, 1  ;;  %vm13518_vm3 = vmmov %vm13515_vm8  ;;  %v9823_v20 = vadd.f32 %v9685_v30, %v2594_v62  ;;  %v13521_v43 = vld [vmem:[#allocation47_spill] sm:$0xff] }
 0x2cc   : > { %v9806_v21 = vsel %vm13514_vm9, %v13513_v13, %v2494_v12  ;;  %v2763_v11 = vmul.f32 %v9038_v18, %v9812_v61  ;;  %v3221_v42 = vsel %vm7769_vm11, %v3189_v15, 0.0  ;;  %v3051_v0 = vadd.f32 %v13521_v43, %v2983_v5 }
 0x2cd   : > { %v2725_v24 = vsel %vm13518_vm3, %v13517_v48, %v13516_v50  ;;  %v2563_v19 = vmul.f32 %v9017_v34, %v9806_v21  ;;  %v9829_v31 = vmul.f32 %v9041_v46, %v9806_v21  ;;  %v13522_v48 = vld [vmem:[#allocation35_spill] sm:$0xff]  ;;  %vm13523_vm8 = vcmask 523264   ;;  %vm13526_vm3 = vmmov %vm13514_vm9 }
 0x2ce   : > { %v2750_v50 = vmul.f32 %v9038_v18, %v2725_v24  ;;  %v2848_v35 = vadd.f32 %v13522_v48, %v2780_v17  ;;  %6803 = vmatprep.mubr.msk.f32.mxu0 %vm13523_vm8, %v3221_v42  ;;  %v2885_v62 = vmul.f32 %v9060_v25, %v2725_v24  ;;  %v2952_v44 = vmul.f32 %v9065_v9, %v13524_v23 }
 0x2cf   : > { %13519 = vst [vmem:[#allocation20_spill] sm:$0xff] %v9829_v31  ;;  %v2595_v30 = vadd.f32 %v2563_v19, %v2463_v1  ;;  %v3088_v54 = vmul.f32 %v9122_v4, %v2725_v24  ;;  %v3119_v49 = vadd.f32 %v3087_v53, %v3051_v0  ;;  %v13525_v31 = vld [vmem:[#allocation54_spill] sm:$0xff]  ;;  %v2332_v5 = vadd.f32 %v9009_v10, %v9646_v36  ;;  %v13527_v1 = vld [vmem:[#allocation53_spill] sm:$0xff]  ;;  %v13531_v24 = vld [vmem:[#allocation48_spill] sm:$0xff] }
 0x2d0   : > { %v2782_v13 = vadd.f32 %v2750_v50, %v13525_v31  ;;  %v2916_v15 = vadd.f32 %v2884_v47, %v2848_v35  ;;  %v9846_v17 = vsel %vm13526_vm3, %v2494_v12, %v2495_v40  ;;  %v13528_v42 = vrot.slane %v13527_v1, 1  ;;  %v13532_v50 = vld [vmem:[#allocation36_spill] sm:$0xff] }
 0x2d1   : > { %v2663_v43 = vadd.f32 %v2631_v28, %v2595_v30  ;;  %v13529_v19 = vrot.slane %v9350_v8, 1  ;;  %vm13530_vm9 = vcmp.lt.s32.totalorder %v7458_v52, 7  ;;  %v2849_v0 = vadd.f32 %v13531_v24, %v2781_v63  ;;  %v13533_v30 = vld [vmem:[#allocation44_spill] sm:$0xff] }
 0x2d2   : > { %v3158_v53 = vadd.f32 %v9153_v7, %v3119_v49  ;;  %v2984_v47 = vadd.f32 %v2952_v44, %v2916_v15  ;;  %v2394_v35 = vmax.f32 %v2332_v5, 0.0  ;;  %v2564_v10 = vmul.f32 %v9017_v34, %v9846_v17  ;;  %v13535_v5 = vld [vmem:[#allocation39_spill] sm:$0xff]  ;;  %v13536_v24 = vld [vmem:[#allocation64_spill] sm:$0xff] }
 0x2d3   : > { %v2724_v23 = vsel %vm13530_vm9, %v13529_v19, %v13528_v42  ;;  %v2795_v36 = vadd.f32 %v2763_v11, %v2663_v43  ;;  %v2831_v12 = vmul.f32 %v9041_v46, %v9846_v17  ;;  %vm13534_vm8 = vnez %v13533_v30 }
 0x2d4   : > { %v2751_v28 = vmul.f32 %v9038_v18, %v2724_v23  ;;  %v2886_v8 = vmul.f32 %v9060_v25, %v2724_v23  ;;  %v3190_v31 = vmax.f32 %v3158_v53, 0.0  ;;  %v3052_v48 = vadd.f32 %v13532_v50, %v2984_v47  ;;  %v13542_v50 = vld [vmem:[#allocation58_spill] sm:$0xff] }
 0x2d5   : > { %v9865_v63 = vsel %vm13534_vm8, %v2394_v35, 0.0  ;;  %v2917_v44 = vadd.f32 %v2885_v62, %v2849_v0  ;;  %v2863_v15 = vadd.f32 %v2831_v12, %v2795_v36  ;;  %vm13537_vm3 = vcmask 523264   ;;  %v13538_v62 = vld [vmem:[#allocation13_spill] sm:$0xff] }
 0x2d6   : > { %v2464_v49 = vmul.f32 %v9020_v3, %v9865_v63  ;;  %v2496_v34 = vrot.slane %v9865_v63, 7  ;;  %v12785_v11 = vrot.slane %v9865_v63, 1  ;;  %v3222_v43 = vsel %vm7763_vm10, %v3190_v31, 0.0 }
 0x2d7   : > { %v3120_v42 = vadd.f32 %v3088_v54, %v3052_v48  ;;  %v3035_v19 = vmul.f32 %v9069_v6, %v9865_v63  ;;  %v2783_v53 = vadd.f32 %v2751_v28, %v13536_v24  ;;  %6804 = vmatmul.mubr.msk.f32.gmra.mrb[24].mxu0 %vm13537_vm3, %v3222_v43  ;;  %vm13539_vm9 = vcmp.lt.s32.totalorder %v7458_v52, 1 }
 0x2d8   : > { %v2510_v3 = vsel %vm13539_vm9, %v2496_v34, %v13538_v62  ;;  %vm13540_vm11 = vmmov %vm13539_vm9  ;;  %v2596_v47 = vadd.f32 %v2564_v10, %v2464_v49  ;;  %vm13541_vm10 = vcmp.lt.s32.totalorder %v7458_v52, 7  ;;  %v13543_v43 = vrot.slane %v9415_v29, 1 }
 0x2d9   : > { %v2511_v0 = vsel %vm13540_vm11, %v2495_v40, %v2496_v34  ;;  %v9886_v54 = vsel %vm13541_vm10, %v2695_v27, %v12785_v11  ;;  %v3159_v35 = vadd.f32 %v9153_v7, %v3120_v42  ;;  %v9897_v10 = vmul.f32 %v9065_v9, %v2510_v3  ;;  %v13545_v3 = vld [vmem:[#allocation59_spill] sm:$0xff]  ;;  %vm13548_vm11 = vmmov %vm13537_vm3 }
 0x2da   : > { %v2764_v36 = vmul.f32 %v9038_v18, %v9886_v54  ;;  %v2832_v12 = vmul.f32 %v9041_v46, %v2511_v0  ;;  %v2899_v28 = vmul.f32 %v9060_v25, %v9886_v54  ;;  %v2664_v31 = vadd.f32 %v9783_v59, %v2596_v47  ;;  %vm13554_vm3 = vmmov %vm13541_vm10 }
 0x2db   : > { %v2967_v40 = vmul.f32 %v9065_v9, %v2511_v0  ;;  %v2953_v27 = vmul.f32 %v9065_v9, %v13542_v50  ;;  %v3191_v48 = vmax.f32 %v3159_v35, 0.0  ;;  %v3089_v34 = vmul.f32 %v9122_v4, %v2724_v23  ;;  %v13547_v23 = vld [vmem:[#allocation55_spill] sm:$0xff]  ;;  %vm13559_vm9 = vmmov %vm13554_vm3 }
 0x2dc   : > { %v2931_v49 = vadd.f32 %v2899_v28, %v2863_v15  ;;  %v13544_v46 = vrot.slane %v13527_v1, 1  ;;  %v2796_v59 = vadd.f32 %v2764_v36, %v2664_v31  ;;  %v2850_v47 = vadd.f32 %v13545_v3, %v2782_v13 }
 0x2dd   : > { %v2985_v24 = vadd.f32 %v2953_v27, %v2917_v44  ;;  %v3223_v50 = vsel %vm7843_vm13, %v3191_v48, 0.0  ;;  %v2954_v28 = vmul.f32 %v9065_v9, %v13547_v23  ;;  %v13550_v44 = vld [vmem:[#allocation77_spill] sm:$0xff]  ;;  %v13551_v48 = vld [vmem:[#allocation68_spill] sm:$0xff] }
 0x2de   : > { %v2723_v42 = vsel %vm13541_vm10, %v13544_v46, %v13543_v43  ;;  %v2999_v35 = vadd.f32 %v2967_v40, %v2931_v49  ;;  %6806 = vmatprep.mubr.msk.f32.mxu0 %vm13548_vm11, %v3223_v50  ;;  %v9916_v1 = vadd.f32 %v2832_v12, %v2796_v59  ;;  %v13549_v43 = vld [vmem:[#allocation56_spill] sm:$0xff]  ;;  %v2918_v27 = vadd.f32 %v2886_v8, %v2850_v47  ;;  %v13555_v23 = vld [vmem:[#allocation65_spill] sm:$0xff]  ;;  %vm13565_vm10 = vmmov %vm13554_vm3 }
 0x2df   : > { %v2752_v0 = vmul.f32 %v9038_v18, %v2723_v42  ;;  %v2887_v15 = vmul.f32 %v9060_v25, %v2723_v42  ;;  %v3053_v36 = vadd.f32 %v13549_v43, %v2985_v24  ;;  %v3090_v13 = vmul.f32 %v9122_v4, %v2723_v42 }
 0x2e0   : > { %v9920_v46 = vadd.f32 %v3035_v19, %v2999_v35  ;;  %v13552_v40 = vrot.slane %v13551_v48, 1  ;;  %v13553_v49 = vrot.slane %v9415_v29, 1  ;;  %v2851_v50 = vadd.f32 %v13555_v23, %v2783_v53  ;;  %v13556_v19 = vld [vmem:[#allocation75_spill] sm:$0xff] }
 0x2e1   : > { %v2784_v31 = vadd.f32 %v2752_v0, %v13550_v44  ;;  %v3121_v12 = vadd.f32 %v3089_v34, %v3053_v36  ;;  %v2986_v59 = vadd.f32 %v2954_v28, %v2918_v27  ;;  %v2955_v47 = vmul.f32 %v9065_v9, %v13556_v19  ;;  %v13560_v34 = vld [vmem:[#allocation45_spill] sm:$0xff]  ;;  %v13561_v27 = vld [vmem:[#allocation80_spill] sm:$0xff]  ;;  %v13562_v19 = vld [vmem:[#allocation66_spill] sm:$0xff] }
 0x2e2   : > { %v2722_v3 = vsel %vm13554_vm3, %v13553_v49, %v13552_v40  ;;  %v2919_v8 = vadd.f32 %v2887_v15, %v2851_v50  ;;  %v13557_v35 = vrot.slane %v9476_v55, 1  ;;  %v13558_v29 = vmov %v13552_v40 }
 0x2e3   : > { %v2753_v24 = vmul.f32 %v9038_v18, %v2722_v3  ;;  %v2888_v0 = vmul.f32 %v9060_v25, %v2722_v3  ;;  %v3091_v42 = vmul.f32 %v9122_v4, %v2722_v3  ;;  %v3160_v53 = vadd.f32 %v9153_v7, %v3121_v12 }
 0x2e4   : > { %v2721_v43 = vsel %vm13559_vm9, %v13558_v29, %v13557_v35  ;;  %v3054_v28 = vadd.f32 %v13560_v34, %v2986_v59  ;;  %v2987_v44 = vadd.f32 %v2955_v47, %v2919_v8  ;;  %v2852_v40 = vadd.f32 %v13561_v27, %v2784_v31  ;;  %v13566_v8 = vld [vmem:[#allocation63_spill] sm:$0xff]  ;;  %vm13574_vm9 = vmmov %vm13548_vm11 }
 0x2e5   : > { %v2785_v36 = vadd.f32 %v2753_v24, %v9472_v60  ;;  %v2754_v15 = vmul.f32 %v9038_v18, %v2721_v43  ;;  %v2889_v49 = vmul.f32 %v9060_v25, %v2721_v43  ;;  %v2956_v3 = vmul.f32 %v9065_v9, %v9431_v41 }
 0x2e6   : > { %v3192_v48 = vmax.f32 %v3160_v53, 0.0  ;;  %v3122_v23 = vadd.f32 %v3090_v13, %v3054_v28  ;;  %v3092_v12 = vmul.f32 %v9122_v4, %v2721_v43  ;;  %v3055_v59 = vadd.f32 %v13562_v19, %v2987_v44 }
 0x2e7   : > { %v2786_v50 = vadd.f32 %v2754_v15, %v9517_v37  ;;  %v2920_v35 = vadd.f32 %v2888_v0, %v2852_v40  ;;  %v13563_v60 = vrot.slane %v9452_v32, 1  ;;  %v13564_v24 = vrot.slane %v9476_v55, 1 }
 0x2e8   : > { %v2853_v47 = vadd.f32 %v13566_v8, %v2785_v36  ;;  %v3224_v41 = vsel %vm7788_vm12, %v3192_v48, 0.0  ;;  %v3161_v13 = vadd.f32 %v9153_v7, %v3122_v23  ;;  %v3123_v0 = vadd.f32 %v3091_v42, %v3055_v59  ;;  %v13570_v42 = vld [vmem:[#allocation69_spill] sm:$0xff] }
 0x2e9   : > { %v2720_v31 = vsel %vm13565_vm10, %v13564_v24, %v13563_v60  ;;  %6807 = vmatmul.mubr.msk.f32.gmra.mrb[26].mxu0 %vm13548_vm11, %v3224_v41  ;;  %v2988_v53 = vadd.f32 %v2956_v3, %v2920_v35  ;;  %v2957_v55 = vmul.f32 %v9065_v9, %v9499_v56  ;;  %v13568_v44 = vrot.slane %v9531_v38, 1  ;;  %v13573_v35 = vld [vmem:[#allocation78_spill] sm:$0xff]  ;;  %vm13580_vm10 = vmmov %vm13554_vm3 }
 0x2ea   : > { %v2755_v37 = vmul.f32 %v9038_v18, %v2720_v31  ;;  %v2890_v43 = vmul.f32 %v9060_v25, %v2720_v31  ;;  %v2921_v34 = vadd.f32 %v2889_v49, %v2853_v47  ;;  %v3193_v28 = vmax.f32 %v3161_v13, 0.0  ;;  %v13576_v47 = vld [vmem:[#allocation105_spill] sm:$0xff]  ;;  %vm13583_vm11 = vmmov %vm13574_vm9  ;;  %v13584_v38 = vld [vmem:[#allocation90_spill] sm:$0xff] }
 0x2eb   : > { %v3093_v15 = vmul.f32 %v9122_v4, %v2720_v31  ;;  %v13569_v27 = vmov %v13563_v60  ;;  %v3162_v48 = vadd.f32 %v9153_v7, %v3123_v0  ;;  %v3056_v3 = vadd.f32 %v13570_v42, %v2988_v53  ;;  %v13575_v31 = vld [vmem:[#allocation72_spill] sm:$0xff]  ;;  %v13577_v0 = vld [vmem:[#allocation94_spill] sm:$0xff] }
 0x2ec   : > { %v2787_v36 = vadd.f32 %v2755_v37, %v9540_v2  ;;  %v2719_v40 = vsel %vm13554_vm3, %v13569_v27, %v13568_v44  ;;  %v2989_v49 = vadd.f32 %v2957_v55, %v2921_v34  ;;  %v3225_v19 = vsel %vm13419_vm2, %v3193_v28, 0.0  ;;  %v13572_v2 = vld [vmem:[#allocation85_spill] sm:$0xff] }
 0x2ed   : > { %v2756_v23 = vmul.f32 %v9038_v18, %v2719_v40  ;;  %v2854_v59 = vadd.f32 %v13572_v2, %v2786_v50  ;;  %v2891_v4 = vmul.f32 %v9060_v25, %v2719_v40  ;;  %v2958_v32 = vmul.f32 %v9065_v9, %v13573_v35  ;;  %6809 = vmatprep.mubr.msk.f32.mxu0 %vm13574_vm9, %v3225_v19  ;;  %v9990_v37 = vld [vmem:[%s12550_s7 + $0x8] ss:$0 sm:$0xff]  ;;  %v13585_v2 = vld [vmem:[#allocation106_spill] sm:$0xff] }
 0x2ee   : > { %v3194_v60 = vmax.f32 %v3162_v48, 0.0  ;;  %v3124_v24 = vadd.f32 %v3092_v12, %v3056_v3  ;;  %v3057_v8 = vadd.f32 %v13575_v31, %v2989_v49  ;;  %v3094_v50 = vmul.f32 %v9990_v37, %v2719_v40  ;;  %v13581_v12 = vld [vmem:[#allocation70_spill] sm:$0xff] }
 0x2ef   : > { %v2788_v41 = vadd.f32 %v2756_v23, %v13576_v47  ;;  %v2922_v13 = vadd.f32 %v2890_v43, %v2854_v59  ;;  %v13578_v53 = vrot.slane %v13577_v0, 1  ;;  %v13579_v34 = vmov %v13568_v44  ;;  %v13587_v31 = vld [vmem:[#allocation118_spill] sm:$0xff]  ;;  %v13590_v47 = vld [vmem:[#allocation79_spill] sm:$0xff]  ;;  %v13593_v0 = vld [vmem:[#allocation84_spill] sm:$0xff] }
 0x2f0   : > { %v2855_v28 = vadd.f32 %v13581_v12, %v2787_v36  ;;  %v3226_v27 = vsel %vm13282_vm7, %v3194_v60, 0.0  ;;  %v3163_v43 = vadd.f32 %v9153_v7, %v3124_v24  ;;  %v3125_v48 = vadd.f32 %v3093_v15, %v3057_v8  ;;  %v13586_v60 = vld [vmem:[#allocation74_spill] sm:$0xff] }
 0x2f1   : > { %v2718_v55 = vsel %vm13580_vm10, %v13579_v34, %v13578_v53  ;;  %6810 = vmatmul.mubr.msk.f32.gmra.mrb[28].mxu0 %vm13583_vm11, %v3226_v27  ;;  %v2990_v40 = vadd.f32 %v2958_v32, %v2922_v13  ;;  %v2959_v23 = vmul.f32 %v9065_v9, %v13584_v38  ;;  %v13588_v8 = vrot.slane %v13587_v31, 1  ;;  %v13592_v27 = vld [vmem:[#allocation83_spill] sm:$0xff]  ;;  %vm13597_vm10 = vmmov %vm13554_vm3 }
 0x2f2   : > { %v2757_v42 = vmul.f32 %v9038_v18, %v2718_v55  ;;  %v2892_v3 = vmul.f32 %v9060_v25, %v2718_v55  ;;  %v2923_v49 = vadd.f32 %v2891_v4, %v2855_v28  ;;  %v3195_v19 = vmax.f32 %v3163_v43, 0.0  ;;  %vm13598_vm11 = vmmov %vm13574_vm9 }
 0x2f3   : > { %v3164_v36 = vadd.f32 %v9153_v7, %v3125_v48  ;;  %v3095_v35 = vmul.f32 %v9990_v37, %v2718_v55  ;;  %v3058_v15 = vadd.f32 %v13586_v60, %v2990_v40  ;;  %v13589_v32 = vmov %v13578_v53 }
 0x2f4   : > { %v2789_v59 = vadd.f32 %v2757_v42, %v13585_v2  ;;  %v2991_v24 = vadd.f32 %v2959_v23, %v2923_v49  ;;  %v2717_v4 = vsel %vm13554_vm3, %v13589_v32, %v13588_v8  ;;  %v2856_v13 = vadd.f32 %v13590_v47, %v2788_v41 }
 0x2f5   : > { %v3227_v34 = vsel %vm13431_vm6, %v3195_v19, 0.0  ;;  %v3196_v7 = vmax.f32 %v3164_v36, 0.0  ;;  %v2758_v12 = vmul.f32 %v9038_v18, %v2717_v4  ;;  %v2893_v55 = vmul.f32 %v9060_v25, %v2717_v4 }
 0x2f6   : > { %6812 = vmatprep.mubr.msk.f32.mxu0 %vm13574_vm9, %v3227_v34  ;;  %v3126_v28 = vadd.f32 %v3094_v50, %v3058_v15  ;;  %v3059_v43 = vadd.f32 %v13592_v27, %v2991_v24  ;;  %v2924_v48 = vadd.f32 %v2892_v3, %v2856_v13  ;;  %v2960_v42 = vmul.f32 %v9065_v9, %v13593_v0  ;;  %v10041_v3 = vld [vmem:[%s12551_s8] ss:$0 sm:$0xff] }
 0x2f7   : > { %v3228_v41 = vsel %vm13427_vm15, %v3196_v7, 0.0  ;;  %v2790_v49 = vadd.f32 %v2758_v12, %v9640_v58  ;;  %v3096_v38 = vmul.f32 %v9990_v37, %v2717_v4  ;;  %v13595_v23 = vrot.slane %v9574_v39, 1  ;;  %v13599_v15 = vld [vmem:[#allocation104_spill] sm:$0xff] }
 0x2f8   : > { %v13596_v19 = vmov %v13588_v8  ;;  %6813 = vmatmul.mubr.msk.f32.gmra.mrb[30].mxu0 %vm13598_vm11, %v3228_v41  ;;  %v3165_v36 = vadd.f32 %v10041_v3, %v3126_v28  ;;  %v3127_v2 = vadd.f32 %v3095_v35, %v3059_v43  ;;  %v2992_v58 = vadd.f32 %v2960_v42, %v2924_v48  ;;  %v13600_v8 = vld [vmem:[#allocation121_spill] sm:$0xff]  ;;  %v13601_v34 = vld [vmem:[#allocation88_spill] sm:$0xff]  ;;  %v13604_v43 = vld [vmem:[#allocation110_spill] sm:$0xff] }
 0x2f9   : > { %v2716_v50 = vsel %vm13597_vm10, %v13596_v19, %v13595_v23  ;;  %v2857_v24 = vadd.f32 %v13599_v15, %v2789_v59  ;;  %v2961_v32 = vmul.f32 %v9065_v9, %v13600_v8  ;;  %v13602_v28 = vrot.slane %v9676_v16, 1  ;;  %v13605_v42 = vld [vmem:[#allocation87_spill] sm:$0xff]  ;;  %vm13609_vm10 = vmmov %vm13554_vm3 }
 0x2fa   : > { %v2759_v60 = vmul.f32 %v9038_v18, %v2716_v50  ;;  %v2894_v31 = vmul.f32 %v9060_v25, %v2716_v50  ;;  %v3097_v4 = vmul.f32 %v9990_v37, %v2716_v50  ;;  %v3197_v47 = vmax.f32 %v3165_v36, 0.0  ;;  %vm13610_vm11 = vmmov %vm13574_vm9 }
 0x2fb   : > { %v3166_v13 = vadd.f32 %v10041_v3, %v3127_v2  ;;  %v3060_v7 = vadd.f32 %v13601_v34, %v2992_v58  ;;  %v2925_v35 = vadd.f32 %v2893_v55, %v2857_v24  ;;  %v13603_v27 = vmov %v13595_v23  ;;  %v13611_v24 = vld [vmem:[#allocation33_spill] sm:$0xff] }
 0x2fc   : > { %v2791_v12 = vadd.f32 %v2759_v60, %v9663_v26  ;;  %v2715_v59 = vsel %vm13554_vm3, %v13603_v27, %v13602_v28  ;;  %v2858_v48 = vadd.f32 %v13604_v43, %v2790_v49  ;;  %v2962_v0 = vmul.f32 %v9065_v9, %v9623_v22  ;;  %v13614_v27 = vld [vmem:[#allocation108_spill] sm:$0xff] }
 0x2fd   : > { %v3229_v41 = vsel %vm13439_vm4, %v3197_v47, 0.0  ;;  %v3198_v23 = vmax.f32 %v3166_v13, 0.0  ;;  %v3128_v19 = vadd.f32 %v3096_v38, %v3060_v7  ;;  %v2760_v26 = vmul.f32 %v9038_v18, %v2715_v59  ;;  %v13612_v47 = vld [vmem:[#allocation43_spill] sm:$0xff] }
 0x2fe   : > { %6815 = vmatprep.mubr.msk.f32.mxu0 %vm13574_vm9, %v3229_v41  ;;  %v2993_v55 = vadd.f32 %v2961_v32, %v2925_v35  ;;  %v2895_v39 = vmul.f32 %v9060_v25, %v2715_v59  ;;  %v2926_v50 = vadd.f32 %v2894_v31, %v2858_v48  ;;  %v3098_v36 = vmul.f32 %v9990_v37, %v2715_v59  ;;  %v13615_v41 = vld [vmem:[#allocation27_spill] sm:$0xff] }
 0x2ff   : > { %v3230_v49 = vsel %vm13327_vm1, %v3198_v23, 0.0  ;;  %v3167_v22 = vadd.f32 %v10041_v3, %v3128_v19  ;;  %v2792_v58 = vadd.f32 %v2760_v26, %v9726_v14  ;;  %v13607_v60 = vrot.slane %v9672_v45, 1  ;;  %v13613_v14 = vld [vmem:[#allocation19_spill] sm:$0xff] }
 0x300   : > { %v13608_v38 = vmov %v13602_v28  ;;  %6816 = vmatmul.mubr.msk.f32.gmra.mrb[32].mxu0 %vm13610_vm11, %v3230_v49  ;;  %v3061_v31 = vadd.f32 %v13611_v24, %v2993_v55  ;;  %v2994_v8 = vadd.f32 %v2962_v0, %v2926_v50  ;;  %v2859_v13 = vadd.f32 %v13612_v47, %v2791_v12  ;;  %v13618_v26 = vld [vmem:[#allocation119_spill] sm:$0xff]  ;;  %v13620_v24 = vld [vmem:[#allocation120_spill] sm:$0xff]  ;;  %v13621_v47 = vld [vmem:[#allocation98_spill] sm:$0xff] }
 0x301   : > { %v2714_v15 = vsel %vm13609_vm10, %v13608_v38, %v13607_v60  ;;  %v3199_v34 = vmax.f32 %v3167_v22, 0.0  ;;  %v2963_v35 = vmul.f32 %v9065_v9, %v13613_v14  ;;  %v13616_v23 = vrot.slane %v9772_v51, 1  ;;  %v13623_v14 = vld [vmem:[#allocation20_spill] sm:$0xff]  ;;  %vm13624_vm11 = vmmov %vm13574_vm9 }
 0x302   : > { %v2761_v32 = vmul.f32 %v9038_v18, %v2714_v15  ;;  %v2896_v7 = vmul.f32 %v9060_v25, %v2714_v15  ;;  %v3099_v16 = vmul.f32 %v9990_v37, %v2714_v15  ;;  %v3129_v28 = vadd.f32 %v3097_v4, %v3061_v31 }
 0x303   : > { %v3062_v59 = vadd.f32 %v13614_v27, %v2994_v8  ;;  %v2927_v48 = vadd.f32 %v2895_v39, %v2859_v13  ;;  %v3231_v0 = vsel %vm13450_vm14, %v3199_v34, 0.0  ;;  %v13617_v12 = vmov %v13607_v60  ;;  %v13619_v60 = vld [vmem:[#allocation34_spill] sm:$0xff] }
 0x304   : > { %v2793_v43 = vadd.f32 %v2761_v32, %v9744_v57  ;;  %v2713_v19 = vsel %vm13554_vm3, %v13617_v12, %v13616_v23  ;;  %v2860_v55 = vadd.f32 %v13618_v26, %v2792_v58  ;;  %v2964_v4 = vmul.f32 %v9065_v9, %v9707_v33  ;;  %6818 = vmatprep.mubr.msk.f32.mxu0 %vm13574_vm9, %v3231_v0  ;;  %v13628_v23 = vld [vmem:[#allocation16_spill] sm:$0xff] }
 0x305   : > { %v3168_v57 = vadd.f32 %v10041_v3, %v3129_v28  ;;  %v3130_v39 = vadd.f32 %v3098_v36, %v3062_v59  ;;  %v2995_v50 = vadd.f32 %v2963_v35, %v2927_v48  ;;  %v2762_v49 = vmul.f32 %v9038_v18, %v2713_v19  ;;  %v13625_v28 = vld [vmem:[#allocation76_spill] sm:$0xff] }
 0x306   : > { %v2897_v51 = vmul.f32 %v9060_v25, %v2713_v19  ;;  %v2928_v22 = vadd.f32 %v2896_v7, %v2860_v55  ;;  %v3100_v45 = vmul.f32 %v9990_v37, %v2713_v19  ;;  %v2861_v38 = vadd.f32 %v13619_v60, %v2793_v43  ;;  %v13626_v43 = vld [vmem:[#allocation62_spill] sm:$0xff] }
 0x307   : > { %v3200_v15 = vmax.f32 %v3168_v57, 0.0  ;;  %v3169_v58 = vadd.f32 %v10041_v3, %v3130_v39  ;;  %v3063_v33 = vadd.f32 %v13620_v24, %v2995_v50  ;;  %v2794_v31 = vadd.f32 %v2762_v49, %v9823_v20  ;;  %v4463_v57 = vld [vmem:[%s12556_s13 + $0x18] sm:$0xff] }
 0x308   : > { %v2996_v8 = vadd.f32 %v2964_v4, %v2928_v22  ;;  %v2929_v32 = vadd.f32 %v2897_v51, %v2861_v38  ;;  %v2965_v36 = vmul.f32 %v9065_v9, %v9806_v21  ;;  %v3101_v18 = vmul.f32 %v9990_v37, %v9812_v61  ;;  %v13632_v38 = vld [vmem:[#allocation25_spill] sm:$0xff] }
 0x309   : > { %vm13622_vm10 = vnez %v13621_v47  ;;  %v3201_v34 = vmax.f32 %v3169_v58, 0.0  ;;  %v3131_v7 = vadd.f32 %v3099_v16, %v3063_v33  ;;  %v2862_v35 = vadd.f32 %v13623_v14, %v2794_v31 }
 0x30a   : > { %v3232_v13 = vsel %vm13622_vm10, %v3200_v15, 0.0  ;;  %v3064_v27 = vadd.f32 %v13625_v28, %v2996_v8  ;;  %v2997_v20 = vadd.f32 %v2965_v36, %v2929_v32  ;;  %v2898_v59 = vmul.f32 %v9060_v25, %v9812_v61  ;;  %v4460_v61 = vld [vmem:[%s12556_s13] sm:$0xff]  ;;  %v13634_v8 = vld [vmem:[#allocation86_spill] sm:$0xff] }
 0x30b   : > { %6819 = vmatmul.mubr.msk.f32.gmra.mrb[34].mxu0 %vm13624_vm11, %v3232_v13  ;;  %v2966_v21 = vmul.f32 %v9065_v9, %v9846_v17  ;;  %vm13627_vm3 = vnez %v13626_v43  ;;  %v3170_v0 = vadd.f32 %v10041_v3, %v3131_v7  ;;  %v3102_v16 = vmul.f32 %v9990_v37, %v9886_v54  ;;  %v13631_v17 = vld [vmem:[#allocation30_spill] sm:$0xff]  ;;  %v13636_v28 = vld [vmem:[#allocation73_spill] sm:$0xff] }
 0x30c   : > { %v3233_v48 = vsel %vm13627_vm3, %v3201_v34, 0.0  ;;  %v13629_v12 = vrot.slane %v9865_v63, 1  ;;  %vm13630_vm9 = vcmp.lt.s32.totalorder %v7458_v52, 7  ;;  %v3132_v9 = vadd.f32 %v3100_v45, %v3064_v27  ;;  %v4461_v54 = vld [vmem:[%s12556_s13 + $0x8] sm:$0xff]  ;;  %v4462_v63 = vld [vmem:[%s12556_s13 + $0x10] sm:$0xff] }
 0x30d   : > { %6821 = vmatprep.mubr.msk.f32.mxu0 %vm13624_vm11, %v3233_v48  ;;  %v3065_v26 = vadd.f32 %v13631_v17, %v2997_v20  ;;  %v2930_v55 = vadd.f32 %v2898_v59, %v2862_v35  ;;  %v3202_v39 = vmax.f32 %v3170_v0, 0.0  ;;  %v3036_v49 = vmul.f32 0.0, %v9069_v6  ;;  %v4465_v36 = vld [vmem:[%s12556_s13 + $0x28] sm:$0xff]  ;;  %v4466_v17 = vld [vmem:[%s12556_s13 + $0x30] sm:$0xff] }
 0x30e   : > { %v2710_v19 = vsel %vm13630_vm9, %v13629_v12, %v13628_v23  ;;  %v3171_v51 = vadd.f32 %v10041_v3, %v3132_v9  ;;  %vm13633_vm9 = vnez %v13632_v38  ;;  %v7029_v24 = vpack.c.bf16 %v4461_v54, %v4460_v61  ;;  %v13639_v0 = vld [vmem:[#allocation97_spill] sm:$0xff]  ;;  %v13640_v12 = vld [vmem:[#allocation26_spill] sm:$0xff] }
 0x30f   : > { %v2900_v4 = vmul.f32 %v9060_v25, %v2710_v19  ;;  %v3103_v50 = vmul.f32 %v9990_v37, %v2710_v19  ;;  %v3104_v25 = vmul.f32 %v9990_v37, %v13628_v23  ;;  %v3133_v22 = vadd.f32 %v3101_v18, %v3065_v26  ;;  %v13635_v18 = vld [vmem:[#allocation82_spill] sm:$0xff]  ;;  %v4467_v26 = vld [vmem:[%s12556_s13 + $0x38] sm:$0xff]  ;;  %v3647_v54 = vld [vmem:[%s12554_s11] sm:$0xff] }
 0x310   : > { %v2998_v45 = vadd.f32 %v2966_v21, %v2930_v55  ;;  %v3234_v15 = vsel %vm13633_vm9, %v3202_v39, 0.0  ;;  %v7033_v33 = vpack.c.bf16 %v4463_v57, %v4462_v63  ;;  %v3203_v31 = vmax.f32 %v3171_v51, 0.0  ;;  %7030 = vmatprep.subr.bf16.mxu1 %v7029_v24  ;;  %vm13638_vm9 = vmmov %vm13624_vm11 }
 0x311   : > { %v2932_v60 = vadd.f32 %v2900_v4, %v9916_v1  ;;  %v3135_v58 = vadd.f32 %v3103_v50, %v9920_v46  ;;  %6822 = vmatmul.mubr.msk.f32.gmra.mrb[36].mxu0 %vm13624_vm11, %v3234_v15  ;;  %v3172_v6 = vadd.f32 %v10041_v3, %v3133_v22  ;;  %v4464_v1 = vld [vmem:[%s12556_s13 + $0x20] sm:$0xff]  ;;  %7032 = vmatpush3.bf16.msra.mxu1 %v7029_v24  ;;  %v13647_v22 = vld [vmem:[#allocation10_spill] sm:$0xff]  ;;  %v13650_v24 = vld [vmem:[#allocation11_spill] sm:$0xff]  ;;  %vm13667_vm14 = vcmp.lt.s32.totalorder %v7458_v52, 7 }
 0x312   : > { %v3066_v37 = vadd.f32 %v13634_v8, %v2998_v45  ;;  %v3235_v13 = vsel %vm13485_vm0, %v3203_v31, 0.0  ;;  %7034 = vmatprep.subr.bf16.mxu1 %v7033_v33  ;;  %v7037_v35 = vpack.c.bf16 %v4465_v36, %v4464_v1  ;;  %vm13637_vm3 = vnez %v13636_v28  ;;  %vm13642_vm0 = vmmov %vm13638_vm9  ;;  %v10199_v4 = vld [vmem:[%s12553_s10] ss:$0 sm:$0xff]  ;;  %v13648_v15 = vld [vmem:[#allocation21_spill] sm:$0xff] }
 0x313   : > { %v3000_v32 = vadd.f32 %v9897_v10, %v2932_v60  ;;  %v3174_v46 = vadd.f32 %v10041_v3, %v3135_v58  ;;  %v3204_v34 = vmax.f32 %v3172_v6, 0.0  ;;  %6824 = vmatprep.mubr.msk.f32.mxu0 %vm13624_vm11, %v3235_v13  ;;  %vm13641_vm11 = vnez %v13640_v12 }
 0x314   : > { %v3134_v7 = vadd.f32 %v3102_v16, %v3066_v37  ;;  %v7041_v55 = vpack.c.bf16 %v4467_v26, %v4466_v17  ;;  %v10210_v45 = vrot.slane %v3647_v54, %v13647_v22  ;;  %v13651_v37 = vld [vmem:[#allocation23_spill] sm:$0xff]  ;;  %vm13677_vm10 = vcmask 523264  }
 0x315   : > { %v3068_v14 = vadd.f32 %v3036_v49, %v3000_v32  ;;  %v3206_v10 = vmax.f32 %v3174_v46, 0.0  ;;  %v3236_v27 = vsel %vm13637_vm3, %v3204_v34, 0.0  ;;  %7036 = vmatpush3.bf16.msra.mxu1 %v7033_v33  ;;  %vm13643_vm3 = vmmov %vm13642_vm0  ;;  %v13646_v49 = vld [vmem:[#allocation9_spill] sm:$0xff]  ;;  %v10217_v33 = vrot.slane %v3647_v54, %v13650_v24  ;;  %v13653_v34 = vld [vmem:[#allocation14_spill] sm:$0xff] }
 0x316   : > { %v3173_v20 = vadd.f32 %v10041_v3, %v3134_v7  ;;  %6825 = vmatmul.mubr.msk.f32.gmra.mrb[38].mxu0 %vm13638_vm9, %v3236_v27  ;;  %7038 = vmatprep.subr.bf16.mxu1 %v7037_v35  ;;  %vm13644_vm9 = vmmov %vm13642_vm0  ;;  %v10228_v7 = vrot.slane %v3647_v54, %v13653_v34  ;;  %vm13679_vm4 = vcmp.lt.s32.totalorder %v7458_v52, 7 }
 0x317   : > { %v3136_v59 = vadd.f32 %v3104_v25, %v3068_v14  ;;  %v3238_v16 = vsel %vm13506_vm5, %v3206_v10, 0.0  ;;  %v10207_v25 = vrot.slane %v3647_v54, %v13646_v49  ;;  %v3821_v1 = vmul.f32 0.0, %v10217_v33  ;;  %v13654_v14 = vld [vmem:[#allocation15_spill] sm:$0xff] }
 0x318   : > { %v3205_v21 = vmax.f32 %v3173_v20, 0.0  ;;  %v10231_v10 = vrot.slane %v3647_v54, %v13654_v14 }
 0x319   : > { %v3175_v48 = vadd.f32 %v10041_v3, %v3136_v59  ;;  %7040 = vmatpush3.bf16.msra.mxu1 %v7037_v35  ;;  %v13645_v3 = vmov 0.0   ;;  %v3753_v8 = vmul.f32 %v10207_v25, %v13538_v62 }
 0x31a   : > { %v3237_v19 = vsel %vm13641_vm11, %v3205_v21, 0.0  ;;  %7042 = vmatprep.subr.bf16.mxu1 %v7041_v55  ;;  %vm13657_vm11 = vcmp.lt.s32.totalorder %v7458_v52, 7 }
 0x31b   : > { %v3207_v61 = vmax.f32 %v3175_v48, 0.0  ;;  %6827 = vmatprep.mubr.msk.f32.mxu0 %vm13642_vm0, %v3237_v19  ;;  %vm13649_vm0 = vnez %v13648_v15  ;;  %vm13658_vm5 = vmmov %vm13657_vm11 }
 0x31c   : > { %6828 = vmatmul.mubr.msk.f32.gmra.mrb[40].mxu0 %vm13643_vm3, %v3238_v16  ;;  %vm13652_vm3 = vnez %v13651_v37 }
 0x31d   : > { %v3239_v9 = vsel %vm13534_vm8, %v3207_v61, 0.0  ;;  %7044 = vmatpush3.bf16.msra.mxu1 %v7041_v55 }
 0x31e   : > { %6830 = vmatprep.mubr.msk.f32.mxu0 %vm13644_vm9, %v3239_v9  ;;  %vm13655_vm9 = vcmp.lt.s32.totalorder %v7458_v52, 1  ;;  %v13659_v9 = vld [vmem:[#allocation17_spill] sm:$0xff] }
 0x31f   : > { %vm13656_vm8 = vmmov %vm13655_vm9  ;;  %v10248_v17 = vrot.slane %v3647_v54, %v13659_v9 }
 0x320   : > { %6831 = vmatmul.mubr.f32.gmra.mrb[42].mxu0 %v13645_v3 }
 0x321   : > { %6833 = vmatprep.mubr.f32.mxu0 %v13645_v3 }
 0x324   : > { %6834 = vmatmul.mubr.f32.gmra.mrb[44].mxu0 %v13645_v3 }
 0x325   : > { %6836 = vmatprep.mubr.f32.mxu0 %v13645_v3 }
 0x328   : > { %6837 = vmatmul.mubr.f32.gmra.mrb[46].mxu0 %v13645_v3 }
 0x329   : > { %6839 = vmatprep.mubr.f32.mxu0 %v13645_v3 }
 0x32c   : > { %6840 = vmatmul.mubr.f32.gmra.mrb[48].mxu0 %v13645_v3 }
 0x352   : > { %v6796_v63 = vpop.f32.mrb[18].mxu0 }
 0x353   : > { %v3430_v57 = vadd.f32 %v6796_v63, %v10199_v4  ;;  %v3424_v39 = vpop.f32.mrb[19].mxu0 }
 0x354   : > { %v3425_v50 = vadd.f32 %v10199_v4, %v3424_v39  ;;  %v13660_v39 = vld [vmem:[#allocation18_spill] sm:$0xff] }
 0x355   : > { %v3584_v51 = vmax.f32 %v3430_v57, 0.0 }
 0x356   : > { %v3583_v60 = vmax.f32 %v3425_v50, 0.0  ;;  %v10253_v50 = vrot.slane %v3647_v54, %v13660_v39 }
 0x357   : > { %v10214_v58 = vsel %vm13649_vm0, %v3584_v51, 0.0 }
 0x358   : > { %v3686_v31 = vrot.slane %v10214_v58, 7  ;;  %v3886_v6 = vrot.slane %v10214_v58, 1  ;;  %v3615_v32 = vsel %vm13652_vm3, %v3583_v60, 0.0  ;;  %v3654_v21 = vmul.f32 %v10210_v45, %v10214_v58 }
 0x359   : > { %v3653_v36 = vmul.f32 %v10210_v45, %v3615_v32  ;;  %v3685_v46 = vrot.slane %v3615_v32, 7  ;;  %v3885_v13 = vrot.slane %v3615_v32, 1  ;;  %v3822_v55 = vmul.f32 %v10217_v33, %v3615_v32 }
 0x35b   : > { %v3747_v35 = vsel %vm13655_vm9, %v3685_v46, %v3686_v31  ;;  %v3748_v27 = vsel %vm13656_vm8, %v13538_v62, %v3685_v46  ;;  %v3785_v20 = vadd.f32 %v3753_v8, %v3653_v36  ;;  %v3947_v59 = vsel %vm13657_vm11, %v3885_v13, %v3886_v6  ;;  %v13661_v8 = vld [vmem:[#allocation12_spill] sm:$0xff]  ;;  %vm13666_vm11 = vmmov %vm13655_vm9 }
 0x35c   : > { %v3754_v48 = vmul.f32 %v10207_v25, %v3748_v27  ;;  %v3948_v16 = vsel %vm13658_vm5, %v13628_v23, %v3885_v13  ;;  %v4021_v57 = vmul.f32 %v10231_v10, %v3748_v27  ;;  %v3954_v60 = vmul.f32 %v10228_v7, %v3947_v59 }
 0x35d   : > { %v3853_v19 = vadd.f32 %v3821_v1, %v3785_v20  ;;  %v3953_v61 = vmul.f32 %v10228_v7, %v3948_v16  ;;  %v10257_v36 = vrot.slane %v3647_v54, %v13661_v8  ;;  %v4089_v46 = vmul.f32 %v10248_v17, %v3947_v59 }
 0x35e   : > { %v3786_v26 = vadd.f32 %v3754_v48, %v3654_v21  ;;  %v4022_v20 = vmul.f32 %v10231_v10, %v3747_v35  ;;  %v4157_v32 = vmul.f32 %v10253_v50, %v3747_v35 }
 0x35f   : > { %v3985_v63 = vadd.f32 %v3953_v61, %v3853_v19  ;;  %v4225_v27 = vmul.f32 %v10257_v36, %v10214_v58 }
 0x360   : > { %v3854_v51 = vadd.f32 %v3822_v55, %v3786_v26 }
 0x361   : > { %v4053_v1 = vadd.f32 %v4021_v57, %v3985_v63  ;;  %v13662_v57 = vld [vmem:[#allocation24_spill] sm:$0xff] }
 0x362   : > { %v3986_v13 = vadd.f32 %v3954_v60, %v3854_v51  ;;  %vm13663_vm5 = vnez %v13662_v57 }
 0x363   : > { %v4121_v21 = vadd.f32 %v4089_v46, %v4053_v1  ;;  %v3755_v46 = vmul.f32 %v10207_v25, %v3747_v35 }
 0x364   : > { %v4054_v48 = vadd.f32 %v4022_v20, %v3986_v13  ;;  %v13664_v13 = vld [vmem:[#allocation29_spill] sm:$0xff] }
 0x365   : > { %v4189_v16 = vadd.f32 %v4157_v32, %v4121_v21  ;;  %vm13665_vm8 = vnez %v13664_v13 }
 0x367   : > { %v4257_v19 = vadd.f32 %v4225_v27, %v4189_v16  ;;  %v3823_v16 = vmul.f32 %v10217_v33, %v10214_v58 }
 0x386   : > { %v6799_v61 = vpop.f32.mrb[20].mxu0 }
 0x387   : > { %v3440_v26 = vadd.f32 %v6799_v61, %v10199_v4  ;;  %v3434_v54 = vpop.f32.mrb[21].mxu0 }
 0x388   : > { %v3435_v55 = vadd.f32 %v10199_v4, %v3434_v54 }
 0x389   : > { %v3586_v63 = vmax.f32 %v3440_v26, 0.0 }
 0x38a   : > { %v3585_v59 = vmax.f32 %v3435_v55, 0.0  ;;  %v10291_v55 = vld [vmem:[%s12554_s11 + $0x8] ss:$0 sm:$0xff] }
 0x38b   : > { %v10268_v51 = vsel %vm13663_vm5, %v3586_v63, 0.0 }
 0x38c   : > { %v12791_v60 = vrot.slane %v10268_v51, 7  ;;  %v12790_v1 = vrot.slane %v10268_v51, 1  ;;  %v3617_v20 = vsel %vm13665_vm8, %v3585_v59, 0.0  ;;  %v3656_v58 = vmul.f32 %v10210_v45, %v10268_v51 }
 0x38d   : > { %v3655_v32 = vmul.f32 %v10210_v45, %v3617_v20  ;;  %v3687_v21 = vrot.slane %v3617_v20, 7  ;;  %v3887_v27 = vrot.slane %v3617_v20, 1 }
 0x38f   : > { %v3745_v61 = vsel %vm13666_vm11, %v3687_v21, %v12791_v60  ;;  %v3746_v26 = vsel %vm13655_vm9, %v3686_v31, %v3687_v21  ;;  %v3787_v54 = vadd.f32 %v3755_v46, %v3655_v32  ;;  %v3945_v35 = vsel %vm13667_vm14, %v3887_v27, %v12790_v1  ;;  %vm13668_vm11 = vmmov %vm13667_vm14 }
 0x390   : > { %v3756_v63 = vmul.f32 %v10207_v25, %v3746_v26  ;;  %v3946_v59 = vsel %vm13668_vm11, %v3886_v6, %v3887_v27  ;;  %v3824_v1 = vmul.f32 %v10217_v33, %v3617_v20  ;;  %v4023_v39 = vmul.f32 %v10231_v10, %v3746_v26  ;;  %v10307_v6 = vld [vmem:[%s12555_s12] ss:$0 sm:$0xff] }
 0x391   : > { %v3855_v31 = vadd.f32 %v3823_v16, %v3787_v54  ;;  %v3955_v46 = vmul.f32 %v10228_v7, %v3946_v59  ;;  %v4090_v32 = vmul.f32 %v10248_v17, %v3946_v59  ;;  %v4293_v60 = vmul.f32 %v10291_v55, %v3946_v59 }
 0x392   : > { %v3788_v21 = vadd.f32 %v3756_v63, %v3656_v58  ;;  %v4158_v14 = vmul.f32 %v10253_v50, %v3746_v26  ;;  %v3956_v16 = vmul.f32 %v10228_v7, %v3945_v35  ;;  %v4226_v63 = vmul.f32 %v10257_v36, %v3617_v20 }
 0x393   : > { %v3987_v8 = vadd.f32 %v3955_v46, %v3855_v31  ;;  %v4122_v9 = vadd.f32 %v4090_v32, %v4054_v48  ;;  %v4325_v54 = vadd.f32 %v4293_v60, %v4257_v19  ;;  %v4091_v59 = vmul.f32 %v10248_v17, %v3945_v35 }
 0x394   : > { %v3856_v27 = vadd.f32 %v3824_v1, %v3788_v21  ;;  %v4024_v48 = vmul.f32 %v10231_v10, %v3745_v61  ;;  %v4294_v24 = vmul.f32 %v10291_v55, %v3945_v35  ;;  %v4159_v1 = vmul.f32 %v10253_v50, %v3745_v61 }
 0x395   : > { %v4190_v58 = vadd.f32 %v4158_v14, %v4122_v9  ;;  %v4055_v34 = vadd.f32 %v4023_v39, %v3987_v8  ;;  %v4364_v26 = vadd.f32 %v10307_v6, %v4325_v54  ;;  %v4227_v39 = vmul.f32 %v10257_v36, %v10268_v51 }
 0x396   : > { %v3988_v31 = vadd.f32 %v3956_v16, %v3856_v27  ;;  %vm13669_vm14 = vcmask 523264  }
 0x397   : > { %v4258_v46 = vadd.f32 %v4226_v63, %v4190_v58  ;;  %v4123_v22 = vadd.f32 %v4091_v59, %v4055_v34  ;;  %v4396_v19 = vmax.f32 %v4364_v26, 0.0  ;;  %v13670_v58 = vld [vmem:[#allocation31_spill] sm:$0xff] }
 0x398   : > { %v4056_v21 = vadd.f32 %v4024_v48, %v3988_v31  ;;  %vm13671_vm9 = vnez %v13670_v58  ;;  %v3757_v31 = vmul.f32 %v10207_v25, %v3745_v61 }
 0x399   : > { %v4326_v60 = vadd.f32 %v4294_v24, %v4258_v46  ;;  %v4191_v20 = vadd.f32 %v4159_v1, %v4123_v22  ;;  %v4428_v16 = vsel %vm13652_vm3, %v4396_v19, 0.0  ;;  %v13672_v24 = vld [vmem:[#allocation37_spill] sm:$0xff]  ;;  %v3825_v1 = vmul.f32 %v10217_v33, %v10268_v51 }
 0x39a   : > { %v6802_v32 = vpop.f32.mrb[22].mxu0  ;;  %6858 = vmatprep.mubr.msk.f32.mxu1 %vm13669_vm14, %v4428_v16  ;;  %vm13673_vm11 = vnez %v13672_v24  ;;  %vm13674_vm14 = vcmp.lt.s32.totalorder %v7458_v52, 1  ;;  %v13675_v19 = vrot.slane %v10268_v51, 7 }
 0x39b   : > { %v3450_v14 = vadd.f32 %v6802_v32, %v10199_v4  ;;  %v3444_v9 = vpop.f32.mrb[23].mxu0  ;;  %v4365_v34 = vadd.f32 %v10307_v6, %v4326_v60  ;;  %v4259_v54 = vadd.f32 %v4227_v39, %v4191_v20  ;;  %vm13676_vm3 = vmmov %vm13674_vm14  ;;  %v13678_v60 = vrot.slane %v10268_v51, 1 }
 0x39c   : > { %v3445_v8 = vadd.f32 %v10199_v4, %v3444_v9 }
 0x39d   : > { %v3588_v27 = vmax.f32 %v3450_v14, 0.0  ;;  %v4397_v48 = vmax.f32 %v4365_v34, 0.0 }
 0x39e   : > { %v3587_v35 = vmax.f32 %v3445_v8, 0.0 }
 0x39f   : > { %v10326_v63 = vsel %vm13671_vm9, %v3588_v27, 0.0  ;;  %v4429_v9 = vsel %vm13649_vm0, %v4397_v48, 0.0  ;;  %vm13748_vm0 = vnez %v13636_v28 }
 0x3a0   : > { %v12794_v59 = vrot.slane %v10326_v63, 7  ;;  %v3619_v22 = vsel %vm13673_vm11, %v3587_v35, 0.0  ;;  %v3890_v14 = vrot.slane %v10326_v63, 1  ;;  %6859 = vmatmul.mubr.msk.f32.vlgmr.msra.gmra.mrb[46].mxu1 %vm13677_vm10, %v4429_v9  ;;  %v3658_v27 = vmul.f32 %v10210_v45, %v10326_v63  ;;  %vm13680_vm10 = vmmov %vm13679_vm4 }
 0x3a1   : > { %v3657_v26 = vmul.f32 %v10210_v45, %v3619_v22  ;;  %v3689_v46 = vrot.slane %v3619_v22, 7  ;;  %v3889_v32 = vrot.slane %v3619_v22, 1  ;;  %v3826_v35 = vmul.f32 %v10217_v33, %v3619_v22 }
 0x3a3   : > { %v3743_v61 = vsel %vm13674_vm14, %v3689_v46, %v12794_v59  ;;  %v3744_v39 = vsel %vm13676_vm3, %v13675_v19, %v3689_v46  ;;  %v3789_v8 = vadd.f32 %v3757_v31, %v3657_v26  ;;  %v3944_v20 = vsel %vm13679_vm4, %v13678_v60, %v3889_v32 }
 0x3a4   : > { %v3758_v16 = vmul.f32 %v10207_v25, %v3744_v39  ;;  %v3957_v48 = vmul.f32 %v10228_v7, %v3944_v20  ;;  %v4295_v46 = vmul.f32 %v10291_v55, %v3944_v20  ;;  %v4228_v26 = vmul.f32 %v10257_v36, %v3619_v22 }
 0x3a5   : > { %v3857_v34 = vadd.f32 %v3825_v1, %v3789_v8  ;;  %v4092_v51 = vmul.f32 %v10248_v17, %v3944_v20  ;;  %v3943_v9 = vsel %vm13680_vm10, %v3889_v32, %v3890_v14  ;;  %v4025_v19 = vmul.f32 %v10231_v10, %v3744_v39 }
 0x3a6   : > { %v3790_v31 = vadd.f32 %v3758_v16, %v3658_v27  ;;  %v4327_v37 = vadd.f32 %v4295_v46, %v4259_v54  ;;  %v4160_v15 = vmul.f32 %v10253_v50, %v3744_v39  ;;  %v3958_v27 = vmul.f32 %v10228_v7, %v3943_v9 }
 0x3a7   : > { %v3989_v59 = vadd.f32 %v3957_v48, %v3857_v34  ;;  %v4124_v16 = vadd.f32 %v4092_v51, %v4056_v21  ;;  %v4093_v32 = vmul.f32 %v10248_v17, %v3943_v9  ;;  %v4026_v23 = vmul.f32 %v10231_v10, %v3743_v61 }
 0x3a8   : > { %v3858_v1 = vadd.f32 %v3826_v35, %v3790_v31  ;;  %v4366_v20 = vadd.f32 %v10307_v6, %v4327_v37  ;;  %vm13681_vm4 = vnez %v13535_v5  ;;  %vm13684_vm14 = vcmask 523264  }
 0x3a9   : > { %v4057_v3 = vadd.f32 %v4025_v19, %v3989_v59  ;;  %v4192_v48 = vadd.f32 %v4160_v15, %v4124_v16  ;;  %v3759_v59 = vmul.f32 %v10207_v25, %v3743_v61  ;;  %v13682_v19 = vld [vmem:[#allocation40_spill] sm:$0xff]  ;;  %vm13685_vm10 = vcmp.lt.s32.totalorder %v7458_v52, 1 }
 0x3aa   : > { %v6805_v60 = vpop.f32.mrb[24].mxu0  ;;  %v3990_v54 = vadd.f32 %v3958_v27, %v3858_v1  ;;  %v4398_v35 = vmax.f32 %v4366_v20, 0.0  ;;  %vm13683_vm3 = vnez %v13682_v19  ;;  %v4229_v27 = vmul.f32 %v10257_v36, %v10326_v63 }
 0x3ab   : > { %v3460_v8 = vadd.f32 %v6805_v60, %v10199_v4  ;;  %v3454_v49 = vpop.f32.mrb[25].mxu0  ;;  %v4125_v46 = vadd.f32 %v4093_v32, %v4057_v3  ;;  %v4260_v21 = vadd.f32 %v4228_v26, %v4192_v48  ;;  %v4161_v3 = vmul.f32 %v10253_v50, %v3743_v61 }
 0x3ac   : > { %v3455_v22 = vadd.f32 %v10199_v4, %v3454_v49  ;;  %v4296_v49 = vmul.f32 %v10291_v55, %v3943_v9  ;;  %v4058_v51 = vadd.f32 %v4026_v23, %v3990_v54  ;;  %v4430_v15 = vsel %vm13665_vm8, %v4398_v35, 0.0  ;;  %vm13687_vm8 = vmmov %vm13685_vm10 }
 0x3ad   : > { %v3590_v34 = vmax.f32 %v3460_v8, 0.0  ;;  %v3827_v8 = vmul.f32 %v10217_v33, %v10326_v63  ;;  %6861 = vmatprep.mubr.msk.f32.mxu1 %vm13684_vm14, %v4430_v15  ;;  %v4193_v20 = vadd.f32 %v4161_v3, %v4125_v46  ;;  %v13686_v32 = vrot.slane %v10326_v63, 7 }
 0x3ae   : > { %v3589_v39 = vmax.f32 %v3455_v22, 0.0  ;;  %v4328_v1 = vadd.f32 %v4296_v49, %v4260_v21  ;;  %vm13688_vm14 = vcmp.lt.s32.totalorder %v7458_v52, 7 }
 0x3af   : > { %v10371_v31 = vsel %vm13681_vm4, %v3590_v34, 0.0 }
 0x3b0   : > { %v12801_v37 = vrot.slane %v10371_v31, 7  ;;  %v3621_v60 = vsel %vm13683_vm3, %v3589_v39, 0.0  ;;  %v12800_v16 = vrot.slane %v10371_v31, 1  ;;  %v4367_v22 = vadd.f32 %v10307_v6, %v4328_v1 }
 0x3b1   : > { %v3659_v26 = vmul.f32 %v10210_v45, %v3621_v60  ;;  %v3691_v9 = vrot.slane %v3621_v60, 7  ;;  %v3891_v23 = vrot.slane %v3621_v60, 1  ;;  %v3660_v39 = vmul.f32 %v10210_v45, %v10371_v31 }
 0x3b2   : > { %v3828_v46 = vmul.f32 %v10217_v33, %v3621_v60  ;;  %v4230_v21 = vmul.f32 %v10257_v36, %v3621_v60  ;;  %v4399_v15 = vmax.f32 %v4367_v22, 0.0 }
 0x3b3   : > { %v3741_v61 = vsel %vm13685_vm10, %v3691_v9, %v12801_v37  ;;  %v3742_v34 = vsel %vm13687_vm8, %v13686_v32, %v3691_v9  ;;  %v3791_v54 = vadd.f32 %v3759_v59, %v3659_v26  ;;  %v3942_v48 = vsel %vm13688_vm14, %v3890_v14, %v3891_v23  ;;  %vm13689_vm8 = vmmov %vm13688_vm14 }
 0x3b4   : > { %v3760_v35 = vmul.f32 %v10207_v25, %v3742_v34  ;;  %v3959_v63 = vmul.f32 %v10228_v7, %v3942_v48  ;;  %v4094_v1 = vmul.f32 %v10248_v17, %v3942_v48  ;;  %v4261_v59 = vadd.f32 %v4229_v27, %v4193_v20 }
 0x3b5   : > { %v3859_v49 = vadd.f32 %v3827_v8, %v3791_v54  ;;  %v4297_v26 = vmul.f32 %v10291_v55, %v3942_v48  ;;  %v3941_v14 = vsel %vm13689_vm8, %v3891_v23, %v12800_v16  ;;  %v4027_v9 = vmul.f32 %v10231_v10, %v3742_v34 }
 0x3b6   : > { %v3792_v3 = vadd.f32 %v3760_v35, %v3660_v39  ;;  %v4431_v60 = vsel %vm13663_vm5, %v4399_v15, 0.0  ;;  %v3960_v22 = vmul.f32 %v10228_v7, %v3941_v14  ;;  %vm13690_vm10 = vcmask 523264  }
 0x3b7   : > { %v3991_v8 = vadd.f32 %v3959_v63, %v3859_v49  ;;  %6862 = vmatmul.mubr.msk.f32.gmra.mrb[48].mxu1 %vm13690_vm10, %v4431_v60  ;;  %v4329_v27 = vadd.f32 %v4297_v26, %v4261_v59  ;;  %v4126_v20 = vadd.f32 %v4094_v1, %v4058_v51  ;;  %v4162_v48 = vmul.f32 %v10253_v50, %v3742_v34  ;;  %vm13691_vm14 = vmmov %vm13690_vm10 }
 0x3b8   : > { %v3860_v32 = vadd.f32 %v3828_v46, %v3792_v3  ;;  %v4028_v39 = vmul.f32 %v10231_v10, %v3741_v61  ;;  %v4095_v16 = vmul.f32 %v10248_v17, %v3941_v14  ;;  %v3829_v3 = vmul.f32 %v10217_v33, %v10371_v31 }
 0x3b9   : > { %v4059_v37 = vadd.f32 %v4027_v9, %v3991_v8  ;;  %v4368_v15 = vadd.f32 %v10307_v6, %v4329_v27  ;;  %v4194_v63 = vadd.f32 %v4162_v48, %v4126_v20  ;;  %v4163_v34 = vmul.f32 %v10253_v50, %v3741_v61 }
 0x3ba   : > { %v3992_v46 = vadd.f32 %v3960_v22, %v3860_v32  ;;  %v10429_v9 = vmul.f32 %v10257_v36, %v10371_v31  ;;  %v4298_v22 = vmul.f32 %v10291_v55, %v3941_v14  ;;  %v3761_v27 = vmul.f32 %v10207_v25, %v3741_v61 }
 0x3bb   : > { %v4127_v1 = vadd.f32 %v4095_v16, %v4059_v37  ;;  %v4400_v26 = vmax.f32 %v4368_v15, 0.0  ;;  %v4262_v60 = vadd.f32 %v4230_v21, %v4194_v63  ;;  %vm13692_vm8 = vcmp.lt.s32.totalorder %v7458_v52, 1 }
 0x3bc   : > { %v6808_v54 = vpop.f32.mrb[26].mxu0  ;;  %vm13694_vm10 = vmmov %vm13692_vm8  ;;  %vm13741_vm5 = vcmask 523264  }
 0x3bd   : > { %v3470_v23 = vadd.f32 %v6808_v54, %v10199_v4  ;;  %v3464_v35 = vpop.f32.mrb[27].mxu0  ;;  %v10425_v54 = vadd.f32 %v4028_v39, %v3992_v46  ;;  %v10436_v32 = vadd.f32 %v4163_v34, %v4127_v1  ;;  %v4432_v14 = vsel %vm13673_vm11, %v4400_v26, 0.0 }
 0x3be   : > { %v3465_v49 = vadd.f32 %v10199_v4, %v3464_v35  ;;  %6864 = vmatprep.mubr.msk.f32.mxu1 %vm13691_vm14, %v4432_v14  ;;  %v13693_v26 = vrot.slane %v10371_v31, 7  ;;  %v13695_v14 = vrot.slane %v10371_v31, 1  ;;  %vm13696_vm14 = vcmp.lt.s32.totalorder %v7458_v52, 7 }
 0x3bf   : > { %v3592_v51 = vmax.f32 %v3470_v23, 0.0  ;;  %v4330_v23 = vadd.f32 %v4298_v22, %v4262_v60  ;;  %vm13729_vm11 = vcmp.lt.s32.totalorder %v7458_v52, 1 }
 0x3c0   : > { %v3591_v59 = vmax.f32 %v3465_v49, 0.0 }
 0x3c1   : > { %v10433_v8 = vsel %vm7788_vm12, %v3592_v51, 0.0  ;;  %v4369_v34 = vadd.f32 %v10307_v6, %v4330_v23 }
 0x3c2   : > { %v3662_v37 = vmul.f32 %v10210_v45, %v10433_v8  ;;  %v3694_v16 = vrot.slane %v10433_v8, 7  ;;  %v3831_v21 = vmul.f32 %v10217_v33, %v10433_v8  ;;  %v10447_v48 = vsel %vm7843_vm13, %v3591_v59, 0.0 }
 0x3c3   : > { %v10453_v35 = vmul.f32 %v10257_v36, %v10433_v8  ;;  %v3661_v49 = vmul.f32 %v10210_v45, %v10447_v48  ;;  %v3693_v61 = vrot.slane %v10447_v48, 7  ;;  %v12802_v15 = vrot.slane %v10447_v48, 1 }
 0x3c4   : > { %v6811_v39 = vpop.f32.mrb[28].mxu0  ;;  %v3830_v63 = vmul.f32 %v10217_v33, %v10447_v48  ;;  %v10489_v20 = vmul.f32 %v10257_v36, %v10447_v48  ;;  %v4401_v13 = vmax.f32 %v4369_v34, 0.0  ;;  %v13705_v58 = vrot.slane %v10447_v48, 1 }
 0x3c5   : > { %v3474_v46 = vpop.f32.mrb[29].mxu0  ;;  %v3480_v51 = vadd.f32 %v6811_v39, %v10199_v4  ;;  %v10467_v59 = vsel %vm13692_vm8, %v3693_v61, %v3694_v16  ;;  %v10473_v60 = vsel %vm13694_vm10, %v13693_v26, %v3693_v61  ;;  %v3793_v22 = vadd.f32 %v3761_v27, %v3661_v49  ;;  %vm13698_vm10 = vmmov %vm13692_vm8 }
 0x3c6   : > { %v3475_v1 = vadd.f32 %v10199_v4, %v3474_v46  ;;  %v3940_v39 = vsel %vm13696_vm14, %v13695_v14, %v12802_v15  ;;  %v3762_v23 = vmul.f32 %v10207_v25, %v10473_v60  ;;  %v10485_v46 = vmul.f32 %v10231_v10, %v10473_v60 }
 0x3c7   : > { %v3594_v61 = vmax.f32 %v3480_v51, 0.0  ;;  %v3861_v27 = vadd.f32 %v3829_v3, %v3793_v22  ;;  %v10493_v49 = vmul.f32 %v10231_v10, %v10467_v59  ;;  %v3763_v26 = vmul.f32 %v10207_v25, %v10467_v59 }
 0x3c8   : > { %v3593_v31 = vmax.f32 %v3475_v1, 0.0  ;;  %v3794_v14 = vadd.f32 %v3762_v23, %v3662_v37  ;;  %v3961_v57 = vmul.f32 %v10228_v7, %v3940_v39  ;;  %v10508_v29 = vmul.f32 %v10248_v17, %v3940_v39 }
 0x3c9   : > { %v10499_v15 = vsel %vm13282_vm7, %v3594_v61, 0.0  ;;  %vm13699_vm14 = vcmask 523264  }
 0x3ca   : > { %v3664_v3 = vmul.f32 %v10210_v45, %v10499_v15  ;;  %v3696_v51 = vrot.slane %v10499_v15, 7  ;;  %v3833_v1 = vmul.f32 %v10217_v33, %v10499_v15  ;;  %v10510_v37 = vadd.f32 %v3830_v63, %v3794_v14 }
 0x3cb   : > { %v6814_v24 = vpop.f32.mrb[30].mxu0  ;;  %v10515_v34 = vsel %vm13419_vm2, %v3593_v31, 0.0  ;;  %v10520_v44 = vmul.f32 %v10257_v36, %v10499_v15  ;;  %v10540_v30 = vadd.f32 %v3961_v57, %v3861_v27 }
 0x3cc   : > { %v3484_v22 = vpop.f32.mrb[31].mxu0  ;;  %v3490_v61 = vadd.f32 %v6814_v24, %v10199_v4  ;;  %v3663_v11 = vmul.f32 %v10210_v45, %v10515_v34  ;;  %v3695_v62 = vrot.slane %v10515_v34, 7  ;;  %v3832_v63 = vmul.f32 %v10217_v33, %v10515_v34 }
 0x3cd   : > { %13697 = vst [vmem:[#allocation112_spill] sm:$0xff] %v10520_v44  ;;  %v3485_v31 = vadd.f32 %v10199_v4, %v3484_v22  ;;  %v4433_v24 = vsel %vm13671_vm9, %v4401_v13, 0.0  ;;  %v10550_v13 = vmul.f32 %v10257_v36, %v10515_v34  ;;  %vm13731_vm9 = vmmov %vm13729_vm11 }
 0x3ce   : > { %v3596_v23 = vmax.f32 %v3490_v61, 0.0  ;;  %v10533_v56 = vsel %vm13692_vm8, %v3695_v62, %v3696_v51  ;;  %v10537_v44 = vsel %vm13698_vm10, %v3694_v16, %v3695_v62  ;;  %v3795_v5 = vadd.f32 %v3763_v26, %v3663_v11  ;;  %6865 = vmatmul.mubr.msk.f32.gmra.mrb[50].mxu1 %vm13699_vm14, %v4433_v24  ;;  %vm13709_vm14 = vmmov %vm13698_vm10 }
 0x3cf   : > { %v3764_v61 = vmul.f32 %v10207_v25, %v10537_v44  ;;  %v10546_v22 = vmul.f32 %v10231_v10, %v10537_v44  ;;  %13701 = vst [vmem:[#allocation96_spill] sm:$0xff] %v10550_v13  ;;  %v10560_v57 = vmul.f32 %v10231_v10, %v10533_v56  ;;  %v4263_v13 = vadd.f32 %v10429_v9, %v10436_v32 }
 0x3d0   : > { %v10554_v62 = vsel %vm13427_vm15, %v3596_v23, 0.0  ;;  %v10556_v11 = vadd.f32 %v3831_v21, %v3795_v5  ;;  %v3595_v23 = vmax.f32 %v3485_v31, 0.0  ;;  %v3765_v5 = vmul.f32 %v10207_v25, %v10533_v56 }
 0x3d1   : > { %13700 = vst [vmem:[#allocation111_spill] sm:$0xff] %v10546_v22  ;;  %13702 = vst [vmem:[#allocation41_spill] sm:$0xff] %v10554_v62  ;;  %v3666_v16 = vmul.f32 %v10210_v45, %v10554_v62  ;;  %v3698_v27 = vrot.slane %v10554_v62, 7  ;;  %v3796_v24 = vadd.f32 %v3764_v61, %v3664_v3  ;;  %v3835_v14 = vmul.f32 %v10217_v33, %v10554_v62 }
 0x3d2   : > { %13703 = vst [vmem:[#allocation89_spill] sm:$0xff] %v10560_v57  ;;  %v10578_v3 = vsel %vm13431_vm6, %v3595_v23, 0.0  ;;  %v4299_v61 = vmul.f32 %v10291_v55, %v3940_v39  ;;  %v13704_v31 = vrot.slane %v10433_v8, 1  ;;  %vm13706_vm8 = vcmp.lt.s32.totalorder %v7458_v52, 7 }
 0x3d3   : > { %v6817_v26 = vpop.f32.mrb[32].mxu0  ;;  %v10574_v22 = vadd.f32 %v3832_v63, %v3796_v24  ;;  %v3665_v9 = vmul.f32 %v10210_v45, %v10578_v3  ;;  %v3697_v32 = vrot.slane %v10578_v3, 7  ;;  %v3834_v39 = vmul.f32 %v10217_v33, %v10578_v3 }
 0x3d4   : > { %v3494_v40 = vpop.f32.mrb[33].mxu0  ;;  %v3500_v21 = vadd.f32 %v6817_v26, %v10199_v4  ;;  %v10587_v26 = vsel %vm13706_vm8, %v13705_v58, %v13704_v31  ;;  %v4331_v23 = vadd.f32 %v4299_v61, %v4263_v13  ;;  %vm13715_vm8 = vnez %v13605_v42 }
 0x3d5   : > { %v3495_v57 = vadd.f32 %v10199_v4, %v3494_v40  ;;  %v10591_v40 = vmul.f32 %v10257_v36, %v10554_v62  ;;  %v10601_v58 = vsel %vm13698_vm10, %v3697_v32, %v3698_v27  ;;  %v10605_v31 = vsel %vm13709_vm14, %v3696_v51, %v3697_v32  ;;  %vm13719_vm14 = vmmov %vm13698_vm10 }
 0x3d6   : > { %v3598_v24 = vmax.f32 %v3500_v21, 0.0  ;;  %13708 = vst [vmem:[#allocation93_spill] sm:$0xff] %v10601_v58  ;;  %13710 = vst [vmem:[#allocation102_spill] sm:$0xff] %v10605_v31  ;;  %v3797_v53 = vadd.f32 %v3765_v5, %v3665_v9  ;;  %v3766_v62 = vmul.f32 %v10207_v25, %v10605_v31  ;;  %v3962_v51 = vmul.f32 %v10228_v7, %v10587_v26 }
 0x3d7   : > { %13707 = vst [vmem:[#allocation92_spill] sm:$0xff] %v10591_v40  ;;  %v3597_v48 = vmax.f32 %v3495_v57, 0.0  ;;  %v10609_v40 = vmul.f32 %v10257_v36, %v10578_v3  ;;  %v10615_v57 = vmul.f32 %v10231_v10, %v10605_v31  ;;  %v10627_v5 = vmul.f32 %v10231_v10, %v10601_v58 }
 0x3d8   : > { %v10619_v13 = vsel %vm13327_vm1, %v3598_v24, 0.0  ;;  %v10623_v21 = vadd.f32 %v3833_v1, %v3797_v53  ;;  %v3798_v32 = vadd.f32 %v3766_v62, %v3666_v16  ;;  %v3767_v62 = vmul.f32 %v10207_v25, %v10601_v58 }
 0x3d9   : > { %13711 = vst [vmem:[#allocation91_spill] sm:$0xff] %v10609_v40  ;;  %13712 = vst [vmem:[#allocation107_spill] sm:$0xff] %v10615_v57  ;;  %v3668_v61 = vmul.f32 %v10210_v45, %v10619_v13  ;;  %v3700_v9 = vrot.slane %v10619_v13, 7  ;;  %v3837_v63 = vmul.f32 %v10217_v33, %v10619_v13  ;;  %v10637_v2 = vsel %vm13715_vm8, %v3597_v48, 0.0 }
 0x3da   : > { %13713 = vst [vmem:[#allocation99_spill] sm:$0xff] %v10619_v13  ;;  %13714 = vst [vmem:[#allocation71_spill] sm:$0xff] %v10627_v5  ;;  %v10641_v1 = vmul.f32 %v10257_v36, %v10619_v13  ;;  %v3667_v5 = vmul.f32 %v10210_v45, %v10637_v2  ;;  %v3699_v40 = vrot.slane %v10637_v2, 7  ;;  %v10648_v57 = vadd.f32 %v3834_v39, %v3798_v32 }
 0x3db   : > { %v3836_v48 = vmul.f32 %v10217_v33, %v10637_v2 }
 0x3dc   : > { %13716 = vst [vmem:[#allocation100_spill] sm:$0xff] %v10641_v1  ;;  %13717 = vst [vmem:[#allocation32_spill] sm:$0xff] %v10648_v57  ;;  %v10656_v1 = vsel %vm13698_vm10, %v3699_v40, %v3700_v9  ;;  %v10660_v13 = vsel %vm13719_vm14, %v3698_v27, %v3699_v40  ;;  %v3799_v31 = vadd.f32 %v3767_v62, %v3667_v5  ;;  %vm13724_vm10 = vnez %v13621_v47 }
 0x3dd   : > { %13718 = vst [vmem:[#allocation116_spill] sm:$0xff] %v10656_v1  ;;  %13720 = vst [vmem:[#allocation103_spill] sm:$0xff] %v10660_v13  ;;  %v3768_v39 = vmul.f32 %v10207_v25, %v10660_v13  ;;  %v10667_v32 = vmul.f32 %v10231_v10, %v10660_v13  ;;  %v10677_v27 = vmul.f32 %v10231_v10, %v10656_v1  ;;  %vm13727_vm14 = vnez %v13615_v41 }
 0x3de   : > { %v6820_v53 = vpop.f32.mrb[34].mxu0  ;;  %v10673_v57 = vadd.f32 %v3835_v14, %v3799_v31  ;;  %v3769_v5 = vmul.f32 %v10207_v25, %v10656_v1  ;;  %v4370_v13 = vadd.f32 %v10307_v6, %v4331_v23 }
 0x3df   : > { %v3504_v16 = vpop.f32.mrb[35].mxu0  ;;  %v3510_v42 = vadd.f32 %v6820_v53, %v10199_v4  ;;  %13721 = vst [vmem:[#allocation101_spill] sm:$0xff] %v10667_v32  ;;  %v10671_v53 = vmul.f32 %v10257_v36, %v10637_v2  ;;  %13723 = vst [vmem:[#allocation117_spill] sm:$0xff] %v10677_v27  ;;  %v3800_v62 = vadd.f32 %v3768_v39, %v3668_v61 }
 0x3e0   : > { %v3505_v58 = vadd.f32 %v10199_v4, %v3504_v16  ;;  %v10696_v61 = vmul.f32 %v10248_v17, %v10587_v26  ;;  %v4402_v41 = vmax.f32 %v4370_v13, 0.0 }
 0x3e1   : > { %13722 = vst [vmem:[#allocation113_spill] sm:$0xff] %v10671_v53  ;;  %v3600_v24 = vmax.f32 %v3510_v42, 0.0  ;;  %v10687_v42 = vadd.f32 %v3962_v51, %v10510_v37 }
 0x3e2   : > { %v3599_v40 = vmax.f32 %v3505_v58, 0.0 }
 0x3e3   : > { %v10683_v16 = vsel %vm13724_vm10, %v3600_v24, 0.0  ;;  %v10698_v24 = vadd.f32 %v3836_v48, %v3800_v62 }
 0x3e4   : > { %13725 = vst [vmem:[#allocation114_spill] sm:$0xff] %v10683_v16  ;;  %v6823_v32 = vpop.f32.mrb[36].mxu0  ;;  %v3670_v14 = vmul.f32 %v10210_v45, %v10683_v16  ;;  %v3702_v31 = vrot.slane %v10683_v16, 7  ;;  %v3839_v58 = vmul.f32 %v10217_v33, %v10683_v16  ;;  %v10703_v37 = vsel %vm13727_vm14, %v3599_v40, 0.0 }
 0x3e5   : > { %v3514_v27 = vpop.f32.mrb[37].mxu0  ;;  %13726 = vst [vmem:[#allocation95_spill] sm:$0xff] %v10698_v24  ;;  %v3520_v51 = vadd.f32 %v6823_v32, %v10199_v4  ;;  %v10708_v39 = vmul.f32 %v10257_v36, %v10683_v16  ;;  %v3669_v47 = vmul.f32 %v10210_v45, %v10703_v37  ;;  %v3701_v53 = vrot.slane %v10703_v37, 7 }
 0x3e6   : > { %v3838_v48 = vmul.f32 %v10217_v33, %v10703_v37  ;;  %v3515_v40 = vadd.f32 %v10199_v4, %v3514_v27  ;;  %v10727_v24 = vadd.f32 %v10508_v29, %v10425_v54  ;;  %v10737_v27 = vmul.f32 %v10257_v36, %v10703_v37 }
 0x3e7   : > { %13728 = vst [vmem:[#allocation115_spill] sm:$0xff] %v10708_v39  ;;  %v3602_v23 = vmax.f32 %v3520_v51, 0.0  ;;  %v10719_v32 = vsel %vm13729_vm11, %v3701_v53, %v3702_v31  ;;  %v10723_v39 = vsel %vm13731_vm9, %v3700_v9, %v3701_v53  ;;  %v3801_v16 = vadd.f32 %v3769_v5, %v3669_v47 }
 0x3e8   : > { %13730 = vst [vmem:[#allocation109_spill] sm:$0xff] %v10719_v32  ;;  %13732 = vst [vmem:[#allocation28_spill] sm:$0xff] %v10723_v39  ;;  %v3770_v51 = vmul.f32 %v10207_v25, %v10723_v39  ;;  %v10733_v13 = vmul.f32 %v10231_v10, %v10723_v39  ;;  %vm13735_vm9 = vnez %v13632_v38  ;;  %v10747_v29 = vmul.f32 %v10231_v10, %v10719_v32 }
 0x3e9   : > { %v6826_v1 = vpop.f32.mrb[38].mxu0  ;;  %13734 = vst [vmem:[#allocation38_spill] sm:$0xff] %v10737_v27  ;;  %v10741_v9 = vsel %vm13735_vm9, %v3602_v23, 0.0  ;;  %v10743_v53 = vadd.f32 %v3837_v63, %v3801_v16  ;;  %v3601_v23 = vmax.f32 %v3515_v40, 0.0  ;;  %v3771_v63 = vmul.f32 %v10207_v25, %v10719_v32 }
 0x3ea   : > { %13733 = vst [vmem:[#allocation51_spill] sm:$0xff] %v10733_v13  ;;  %13736 = vst [vmem:[#allocation52_spill] sm:$0xff] %v10741_v9  ;;  %v3524_v47 = vpop.f32.mrb[39].mxu0  ;;  %v3672_v54 = vmul.f32 %v10210_v45, %v10741_v9  ;;  %v3704_v5 = vrot.slane %v10741_v9, 7  ;;  %v3802_v62 = vadd.f32 %v3770_v51, %v3670_v14  ;;  %v3841_v27 = vmul.f32 %v10217_v33, %v10741_v9 }
 0x3eb   : > { %13737 = vst [vmem:[#allocation50_spill] sm:$0xff] %v10747_v29  ;;  %v3530_v16 = vadd.f32 %v6826_v1, %v10199_v4  ;;  %v3525_v13 = vadd.f32 %v10199_v4, %v3524_v47  ;;  %v4434_v29 = vsel %vm13683_vm3, %v4402_v41, 0.0  ;;  %v10765_v14 = vmul.f32 %v10257_v36, %v10741_v9 }
 0x3ec   : > { %v10761_v39 = vadd.f32 %v3838_v48, %v3802_v62  ;;  %vm13739_vm11 = vnez %v13626_v43  ;;  %6867 = vmatprep.mubr.msk.f32.mxu1 %vm13741_vm5, %v4434_v29  ;;  %v10774_v1 = vmul.f32 %v10253_v50, %v10473_v60  ;;  %vm13743_vm5 = vcmp.lt.s32.totalorder %v7458_v52, 1 }
 0x3ed   : > { %13738 = vst [vmem:[#allocation22_spill] sm:$0xff] %v10765_v14  ;;  %v10769_v51 = vsel %vm13739_vm11, %v3601_v23, 0.0  ;;  %v10783_v23 = vmul.f32 %v10291_v55, %v10587_v26  ;;  %v3604_v60 = vmax.f32 %v3530_v16, 0.0  ;;  %v3603_v19 = vmax.f32 %v3525_v13, 0.0  ;;  %vm13745_vm3 = vmmov %vm13743_vm5 }
 0x3ee   : > { %13740 = vst [vmem:[#allocation47_spill] sm:$0xff] %v10769_v51  ;;  %v3671_v41 = vmul.f32 %v10210_v45, %v10769_v51  ;;  %v3703_v48 = vrot.slane %v10769_v51, 7  ;;  %v3840_v62 = vmul.f32 %v10217_v33, %v10769_v51  ;;  %v10788_v38 = vmul.f32 %v10257_v36, %v10769_v51 }
 0x3ef   : > { %v6829_v40 = vpop.f32.mrb[40].mxu0  ;;  %v10807_v13 = vsel %vm13748_vm0, %v3604_v60, 0.0  ;;  %vm13754_vm0 = vmmov %vm13743_vm5 }
 0x3f0   : > { %v3534_v47 = vpop.f32.mrb[41].mxu0  ;;  %13742 = vst [vmem:[#allocation35_spill] sm:$0xff] %v10788_v38  ;;  %v10792_v43 = vsel %vm13743_vm5, %v3703_v48, %v3704_v5  ;;  %v10796_v14 = vsel %vm13745_vm3, %v3702_v31, %v3703_v48  ;;  %v3803_v9 = vadd.f32 %v3771_v63, %v3671_v41  ;;  %v3540_v26 = vadd.f32 %v6829_v40, %v10199_v4 }
 0x3f1   : > { %13744 = vst [vmem:[#allocation60_spill] sm:$0xff] %v10792_v43  ;;  %13746 = vst [vmem:[#allocation54_spill] sm:$0xff] %v10796_v14  ;;  %v3772_v29 = vmul.f32 %v10207_v25, %v10796_v14  ;;  %v10803_v32 = vmul.f32 %v10231_v10, %v10796_v14  ;;  %v3535_v16 = vadd.f32 %v10199_v4, %v3534_v47  ;;  %v3706_v40 = vrot.slane %v10807_v13, 7 }
 0x3f2   : > { %13749 = vst [vmem:[#allocation48_spill] sm:$0xff] %v10807_v13  ;;  %v10810_v51 = vadd.f32 %v3839_v58, %v3803_v9  ;;  %v10814_v31 = vmul.f32 %v10231_v10, %v10792_v43  ;;  %v3674_v63 = vmul.f32 %v10210_v45, %v10807_v13  ;;  %v3843_v60 = vmul.f32 %v10217_v33, %v10807_v13 }
 0x3f3   : > { %13747 = vst [vmem:[#allocation53_spill] sm:$0xff] %v10803_v32  ;;  %v6832_v38 = vpop.f32.mrb[42].mxu0  ;;  %v3804_v48 = vadd.f32 %v3772_v29, %v3672_v54  ;;  %vm13751_vm3 = vnez %v13635_v18  ;;  %v10828_v58 = vmul.f32 %v10257_v36, %v10807_v13  ;;  %v3773_v54 = vmul.f32 %v10207_v25, %v10792_v43 }
 0x3f4   : > { %13750 = vst [vmem:[#allocation36_spill] sm:$0xff] %v10814_v31  ;;  %v3544_v41 = vpop.f32.mrb[43].mxu0  ;;  %v10824_v38 = vsel %vm13751_vm3, %v3603_v19, 0.0  ;;  %v3606_v18 = vmax.f32 %v3540_v26, 0.0  ;;  %v3605_v14 = vmax.f32 %v3535_v16, 0.0  ;;  %v4196_v19 = vadd.f32 %v10774_v1, %v10727_v24 }
 0x3f5   : > { %13752 = vst [vmem:[#allocation64_spill] sm:$0xff] %v10828_v58  ;;  %v3673_v9 = vmul.f32 %v10210_v45, %v10824_v38  ;;  %v3705_v47 = vrot.slane %v10824_v38, 7  ;;  %v10835_v29 = vadd.f32 %v3840_v62, %v3804_v48  ;;  %v3842_v28 = vmul.f32 %v10217_v33, %v10824_v38 }
 0x3f6   : > { %v10856_v26 = vmul.f32 %v10257_v36, %v10824_v38  ;;  %v4264_v1 = vadd.f32 %v10489_v20, %v4196_v19  ;;  %v4165_v20 = vmul.f32 %v10253_v50, %v10467_v59 }
 0x3f7   : > { %v6835_v31 = vpop.f32.mrb[44].mxu0  ;;  %v10842_v58 = vsel %vm13743_vm5, %v3705_v47, %v3706_v40  ;;  %v10846_v13 = vsel %vm13754_vm0, %v3704_v5, %v3705_v47  ;;  %v3805_v32 = vadd.f32 %v3773_v54, %v3673_v9  ;;  %vm13756_vm5 = vnez %v13639_v0 }
 0x3f8   : > { %13753 = vst [vmem:[#allocation58_spill] sm:$0xff] %v10842_v58  ;;  %v3554_v43 = vpop.f32.mrb[45].mxu0  ;;  %v3774_v62 = vmul.f32 %v10207_v25, %v10846_v13  ;;  %v10852_v48 = vmul.f32 %v10231_v10, %v10846_v13  ;;  %13755 = vst [vmem:[#allocation59_spill] sm:$0xff] %v10856_v26  ;;  %v10860_v31 = vsel %vm13756_vm5, %v3606_v18, 0.0  ;;  %vm13758_vm0 = vnez %v13640_v12 }
 0x3f9   : > { %v10862_v5 = vadd.f32 %v3841_v27, %v3805_v32  ;;  %v10866_v43 = vmul.f32 %v10231_v10, %v10842_v58  ;;  %v3676_v16 = vmul.f32 %v10210_v45, %v10860_v31  ;;  %v10873_v54 = vmul.f32 %v10217_v33, %v10860_v31 }
 0x3fa   : > { %v3806_v47 = vadd.f32 %v3774_v62, %v3674_v63  ;;  %v10878_v18 = vsel %vm13758_vm0, %v3605_v14, 0.0  ;;  %v10882_v27 = vmul.f32 %v10257_v36, %v10860_v31  ;;  %v3775_v62 = vmul.f32 %v10207_v25, %v10842_v58 }
 0x3fb   : > { %13757 = vst [vmem:[#allocation55_spill] sm:$0xff] %v10866_v43  ;;  %v6838_v32 = vpop.f32.mrb[46].mxu0  ;;  %v3675_v0 = vmul.f32 %v10210_v45, %v10878_v18  ;;  %v3707_v63 = vrot.slane %v10878_v18, 7  ;;  %v3844_v14 = vmul.f32 %v10217_v33, %v10878_v18  ;;  %vm13760_vm5 = vcmp.lt.s32.totalorder %v7458_v52, 1 }
 0x3fc   : > { %13759 = vst [vmem:[#allocation56_spill] sm:$0xff] %v10882_v27  ;;  %v3564_v9 = vpop.f32.mrb[47].mxu0  ;;  %v10889_v43 = vadd.f32 %v3842_v28, %v3806_v47  ;;  %v12853_v32 = vrot.slane %v10878_v18, 1  ;;  %v13761_v26 = vrot.slane %v10515_v34, 1  ;;  %v13762_v58 = vrot.slane %v10433_v8, 1 }
 0x3fd   : > { %v10898_v12 = vsel %vm13760_vm5, %v3706_v40, %v3707_v63  ;;  %v3807_v27 = vadd.f32 %v3775_v62, %v3675_v0  ;;  %vm13763_vm0 = vcmp.lt.s32.totalorder %v7458_v52, 7  ;;  %v4061_v33 = vadd.f32 %v10485_v46, %v10540_v30 }
 0x3fe   : > { %v3938_v28 = vsel %vm13763_vm0, %v13762_v58, %v13761_v26  ;;  %v3776_v9 = vmul.f32 %v10207_v25, %v10898_v12  ;;  %v13764_v24 = vrot.slane %v10860_v31, 1  ;;  %vm13765_vm5 = vmmov %vm13763_vm0  ;;  %v10920_v8 = vmul.f32 %v10257_v36, %v10878_v18 }
 0x3ff   : > { %v6841_v40 = vpop.f32.mrb[48].mxu0  ;;  %v10923_v58 = vadd.f32 %v3843_v60, %v3807_v27  ;;  %v10929_v46 = vmul.f32 %v10231_v10, %v10898_v12  ;;  %v3963_v26 = vmul.f32 %v10228_v7, %v3938_v28  ;;  %v4098_v19 = vmul.f32 %v10248_v17, %v3938_v28 }
 0x400   : > { %v10916_v0 = vsel %vm13765_vm5, %v12853_v32, %v13764_v24  ;;  %13766 = vst [vmem:[#allocation77_spill] sm:$0xff] %v10920_v8  ;;  %v3574_v47 = vpop.f32.mrb[49].mxu0  ;;  %v3808_v62 = vadd.f32 %v3776_v9, %v3676_v16  ;;  %v4332_v24 = vadd.f32 %v10783_v23, %v4264_v1  ;;  %v4129_v32 = vadd.f32 %v10696_v61, %v4061_v33 }
 0x401   : > { %v3976_v30 = vmul.f32 %v10228_v7, %v10916_v0  ;;  %v3995_v60 = vadd.f32 %v3963_v26, %v10556_v11  ;;  %v3545_v27 = vadd.f32 %v10199_v4, %v3544_v41  ;;  %v13767_v40 = vrot.slane %v10860_v31, 7  ;;  %v13771_v26 = vld [vmem:[#allocation44_spill] sm:$0xff] }
 0x402   : > { %vm13768_vm0 = vcmp.lt.s32.totalorder %v7458_v52, 1  ;;  %v3876_v16 = vadd.f32 %v3844_v14, %v3808_v62  ;;  %v4371_v23 = vadd.f32 %v10307_v6, %v4332_v24  ;;  %v4197_v9 = vadd.f32 %v4165_v20, %v4129_v32  ;;  %v13773_v24 = vld [vmem:[#allocation39_spill] sm:$0xff] }
 0x403   : > { %v10943_v8 = vsel %vm13768_vm0, %v3707_v63, %v13767_v40  ;;  %v4301_v61 = vmul.f32 %v10291_v55, %v3938_v28  ;;  %v3607_v33 = vmax.f32 %v3545_v27, 0.0  ;;  %v13769_v11 = vrot.slane %v10499_v15, 1 }
 0x404   : > { %v3777_v59 = vmul.f32 %v10207_v25, %v10943_v8  ;;  %v13770_v4 = vrot.slane %v10515_v34, 1  ;;  %v4062_v63 = vadd.f32 %v10493_v49, %v10687_v42  ;;  %v4008_v14 = vadd.f32 %v3976_v30, %v3876_v16 }
 0x405   : > { %v4403_v1 = vmax.f32 %v4371_v23, 0.0  ;;  %v4265_v32 = vadd.f32 %v10453_v35, %v4197_v9  ;;  %v4044_v28 = vmul.f32 %v10231_v10, %v10943_v8  ;;  %vm13772_vm0 = vnez %v13771_v26  ;;  %v13775_v23 = vld [vmem:[#allocation13_spill] sm:$0xff] }
 0x406   : > { %v3937_v41 = vsel %vm13765_vm5, %v13770_v4, %v13769_v11  ;;  %v10962_v25 = vsel %vm13772_vm0, %v3607_v33, 0.0  ;;  %v4130_v62 = vadd.f32 %v4098_v19, %v4062_v63  ;;  %vm13774_vm5 = vcmask 523264  }
 0x407   : > { %v3964_v47 = vmul.f32 %v10228_v7, %v3937_v41  ;;  %v4099_v34 = vmul.f32 %v10248_v17, %v3937_v41  ;;  %v4435_v20 = vsel %vm13681_vm4, %v4403_v1, 0.0  ;;  %v4333_v49 = vadd.f32 %v4301_v61, %v4265_v32 }
 0x408   : > { %v3677_v42 = vmul.f32 %v10210_v45, %v10962_v25  ;;  %v3709_v35 = vrot.slane %v10962_v25, 7  ;;  %6868 = vmatmul.mubr.msk.f32.gmra.mrb[52].mxu1 %vm13774_vm5, %v4435_v20  ;;  %v3909_v30 = vrot.slane %v10962_v25, 1  ;;  %v4076_v27 = vadd.f32 %v4044_v28, %v4008_v14 }
 0x409   : > { %v3996_v40 = vadd.f32 %v3964_v47, %v10574_v22  ;;  %v4166_v16 = vmul.f32 %v10253_v50, %v10537_v44  ;;  %v4372_v19 = vadd.f32 %v10307_v6, %v4333_v49  ;;  %vm13776_vm4 = vcmp.lt.s32.totalorder %v7458_v52, 1  ;;  %v13784_v49 = vld [vmem:[#allocation111_spill] sm:$0xff] }
 0x40a   : > { %v3723_v9 = vsel %vm13776_vm4, %v3709_v35, %v13775_v23  ;;  %v13777_v45 = vrot.slane %v10860_v31, 7  ;;  %vm13778_vm0 = vmmov %vm13776_vm4  ;;  %v3809_v33 = vadd.f32 %v3777_v59, %v3677_v42  ;;  %v13779_v11 = vrot.slane %v10860_v31, 1 }
 0x40b   : > { %vm13780_vm5 = vcmp.lt.s32.totalorder %v7458_v52, 7  ;;  %v4248_v63 = vmul.f32 %v10257_v36, %v10962_v25  ;;  %v4404_v14 = vmax.f32 %v4372_v19, 0.0  ;;  %v11002_v32 = vmul.f32 %v10253_v50, %v3723_v9  ;;  %v13787_v9 = vld [vmem:[#allocation96_spill] sm:$0xff]  ;;  %v13875_v25 = vld [vmem:[#allocation77_spill] sm:$0xff] }
 0x40c   : > { %v3724_v61 = vsel %vm13778_vm0, %v13777_v45, %v3709_v35  ;;  %v10990_v22 = vsel %vm13780_vm5, %v13779_v11, %v3909_v30  ;;  %v3877_v1 = vadd.f32 %v10873_v54, %v3809_v33  ;;  %v4198_v28 = vadd.f32 %v4166_v16, %v4130_v62  ;;  %vm13783_vm4 = vmmov %vm13780_vm5 }
 0x40d   : > { %v4045_v44 = vmul.f32 %v10231_v10, %v3724_v61  ;;  %v4180_v4 = vmul.f32 %v10253_v50, %v3724_v61  ;;  %v3977_v59 = vmul.f32 %v10228_v7, %v10990_v22  ;;  %v4112_v31 = vmul.f32 %v10248_v17, %v10990_v22  ;;  %vm13791_vm5 = vmmov %vm13783_vm4 }
 0x40e   : > { %v13781_v10 = vrot.slane %v10578_v3, 1  ;;  %v13782_v47 = vrot.slane %v10499_v15, 1  ;;  %v4063_v42 = vadd.f32 %v13784_v49, %v3995_v60  ;;  %v4436_v35 = vsel %vm7843_vm13, %v4404_v14, 0.0 }
 0x40f   : > { %v4009_v19 = vadd.f32 %v3977_v59, %v3877_v1  ;;  %v4144_v45 = vadd.f32 %v4112_v31, %v4076_v27  ;;  %vm13786_vm0 = vcmask 523264   ;;  %v4266_v62 = vadd.f32 %v13787_v9, %v4198_v28  ;;  %v13788_v59 = vld [vmem:[#allocation41_spill] sm:$0xff] }
 0x410   : > { %v3936_v20 = vsel %vm13783_vm4, %v13782_v47, %v13781_v10  ;;  %6870 = vmatprep.mubr.msk.f32.mxu1 %vm13786_vm0, %v4436_v35  ;;  %v4302_v16 = vmul.f32 %v10291_v55, %v3937_v41  ;;  %v4131_v33 = vadd.f32 %v4099_v34, %v4063_v42  ;;  %v4167_v15 = vmul.f32 %v10253_v50, %v10533_v56  ;;  %v13792_v34 = vld [vmem:[#allocation89_spill] sm:$0xff]  ;;  %v13793_v42 = vld [vmem:[#allocation112_spill] sm:$0xff]  ;;  %vm13803_vm0 = vmmov %vm13783_vm4 }
 0x411   : > { %v3965_v61 = vmul.f32 %v10228_v7, %v3936_v20  ;;  %v11019_v11 = vadd.f32 %v4045_v44, %v4009_v19  ;;  %v4212_v60 = vadd.f32 %v4180_v4, %v4144_v45  ;;  %v4100_v14 = vmul.f32 %v10248_v17, %v3936_v20  ;;  %v13794_v45 = vld [vmem:[#allocation102_spill] sm:$0xff] }
 0x412   : > { %v4334_v27 = vadd.f32 %v4302_v16, %v4266_v62  ;;  %v4199_v1 = vadd.f32 %v4167_v15, %v4131_v33  ;;  %v13789_v31 = vrot.slane %v13788_v59, 1  ;;  %v13790_v47 = vrot.slane %v10578_v3, 1  ;;  %v13798_v16 = vld [vmem:[#allocation107_spill] sm:$0xff] }
 0x413   : > { %v3997_v10 = vadd.f32 %v3965_v61, %v10623_v21  ;;  %v4064_v28 = vadd.f32 %v13792_v34, %v3996_v40  ;;  %v11030_v49 = vadd.f32 %v4248_v63, %v4212_v60  ;;  %v4303_v56 = vmul.f32 %v10291_v55, %v3936_v20  ;;  %v13795_v61 = vld [vmem:[#allocation32_spill] sm:$0xff]  ;;  %v13800_v34 = vld [vmem:[#allocation99_spill] sm:$0xff] }
 0x414   : > { %v3935_v41 = vsel %vm13791_vm5, %v13790_v47, %v13789_v31  ;;  %v4373_v4 = vadd.f32 %v10307_v6, %v4334_v27  ;;  %v4267_v35 = vadd.f32 %v13793_v42, %v4199_v1  ;;  %v4168_v3 = vmul.f32 %v10253_v50, %v13794_v45  ;;  %v13799_v47 = vld [vmem:[#allocation93_spill] sm:$0xff] }
 0x415   : > { %v3966_v44 = vmul.f32 %v10228_v7, %v3935_v41  ;;  %v4101_v21 = vmul.f32 %v10248_v17, %v3935_v41  ;;  %v4132_v19 = vadd.f32 %v4100_v14, %v4064_v28  ;;  %v4304_v40 = vmul.f32 %v10291_v55, %v3935_v41 }
 0x416   : > { %v13796_v63 = vrot.slane %v10637_v2, 1  ;;  %v13797_v20 = vmov %v13789_v31  ;;  %v4065_v33 = vadd.f32 %v13798_v16, %v3997_v10  ;;  %v4405_v15 = vmax.f32 %v4373_v4, 0.0  ;;  %v13805_v4 = vld [vmem:[#allocation91_spill] sm:$0xff] }
 0x417   : > { %v3998_v9 = vadd.f32 %v3966_v44, %v13795_v61  ;;  %v4335_v60 = vadd.f32 %v4303_v56, %v4267_v35  ;;  %v4200_v27 = vadd.f32 %v4168_v3, %v4132_v19  ;;  %v4169_v41 = vmul.f32 %v10253_v50, %v13799_v47  ;;  %v13807_v2 = vld [vmem:[#allocation71_spill] sm:$0xff] }
 0x418   : > { %v3934_v62 = vsel %vm13783_vm4, %v13797_v20, %v13796_v63  ;;  %v4133_v31 = vadd.f32 %v4101_v21, %v4065_v33  ;;  %v13801_v28 = vrot.slane %v13800_v34, 1  ;;  %v13802_v59 = vmov %v13796_v63  ;;  %v13808_v33 = vld [vmem:[#allocation103_spill] sm:$0xff]  ;;  %vm13813_vm4 = vmmov %vm13803_vm0  ;;  %v11087_v34 = vld [vmem:[%s12554_s11 + $0x8] ss:$0 sm:$0xff] }
 0x419   : > { %v3967_v14 = vmul.f32 %v10228_v7, %v3934_v62  ;;  %v4102_v1 = vmul.f32 %v10248_v17, %v3934_v62  ;;  %v4437_v10 = vsel %vm7788_vm12, %v4405_v15, 0.0  ;;  %v4374_v56 = vadd.f32 %v10307_v6, %v4335_v60  ;;  %v13809_v60 = vld [vmem:[#allocation92_spill] sm:$0xff]  ;;  %v13810_v47 = vld [vmem:[#allocation95_spill] sm:$0xff] }
 0x41a   : > { %v3933_v44 = vsel %vm13803_vm0, %v13802_v59, %v13801_v28  ;;  %v4268_v35 = vadd.f32 %v13805_v4, %v4200_v27  ;;  %vm13806_vm5 = vcmask 523264   ;;  %v4201_v21 = vadd.f32 %v4169_v41, %v4133_v31  ;;  %v13815_v59 = vld [vmem:[#allocation101_spill] sm:$0xff] }
 0x41b   : > { %v3999_v19 = vadd.f32 %v3967_v14, %v10673_v57  ;;  %6871 = vmatmul.mubr.msk.f32.gmra.mrb[54].mxu1 %vm13806_vm5, %v4437_v10  ;;  %v4305_v45 = vmul.f32 %v10291_v55, %v3934_v62  ;;  %v3968_v3 = vmul.f32 %v10228_v7, %v3933_v44  ;;  %v4066_v61 = vadd.f32 %v13807_v2, %v3998_v9  ;;  %vm13816_vm0 = vmmov %vm13806_vm5  ;;  %v13817_v2 = vld [vmem:[#allocation116_spill] sm:$0xff] }
 0x41c   : > { %v4406_v63 = vmax.f32 %v4374_v56, 0.0  ;;  %v4336_v20 = vadd.f32 %v4304_v40, %v4268_v35  ;;  %v4103_v16 = vmul.f32 %v10248_v17, %v3933_v44  ;;  %v4170_v15 = vmul.f32 %v10253_v50, %v13808_v33  ;;  %v13819_v33 = vld [vmem:[#allocation114_spill] sm:$0xff]  ;;  %vm13822_vm5 = vmmov %vm13813_vm4 }
 0x41d   : > { %v4269_v27 = vadd.f32 %v13809_v60, %v4201_v21  ;;  %v4000_v57 = vadd.f32 %v3968_v3, %v13810_v47  ;;  %v4134_v14 = vadd.f32 %v4102_v1, %v4066_v61  ;;  %v13811_v31 = vrot.slane %v10703_v37, 1 }
 0x41e   : > { %v13812_v55 = vmov %v13801_v28  ;;  %v4438_v40 = vsel %vm13419_vm2, %v4406_v63, 0.0  ;;  %v4375_v41 = vadd.f32 %v10307_v6, %v4336_v20  ;;  %v4067_v10 = vadd.f32 %v13815_v59, %v3999_v19  ;;  %v13818_v63 = vld [vmem:[#allocation113_spill] sm:$0xff]  ;;  %v13826_v59 = vld [vmem:[#allocation28_spill] sm:$0xff] }
 0x41f   : > { %v3932_v62 = vsel %vm13813_vm4, %v13812_v55, %v13811_v31  ;;  %6873 = vmatprep.mubr.msk.f32.mxu1 %vm13816_vm0, %v4438_v40  ;;  %v4337_v56 = vadd.f32 %v4305_v45, %v4269_v27  ;;  %v4202_v1 = vadd.f32 %v4170_v15, %v4134_v14  ;;  %v4306_v4 = vmul.f32 %v11087_v34, %v3933_v44  ;;  %v11097_v45 = vld [vmem:[%s12555_s12] ss:$0 sm:$0xff]  ;;  %vm13825_vm4 = vmmov %vm13816_vm0 }
 0x420   : > { %v3969_v28 = vmul.f32 %v10228_v7, %v3932_v62  ;;  %v4104_v35 = vmul.f32 %v10248_v17, %v3932_v62  ;;  %v4407_v21 = vmax.f32 %v4375_v41, 0.0  ;;  %v4135_v3 = vadd.f32 %v4103_v16, %v4067_v10  ;;  %v13823_v16 = vld [vmem:[#allocation117_spill] sm:$0xff]  ;;  %v13827_v10 = vld [vmem:[#allocation100_spill] sm:$0xff]  ;;  %vm13831_vm0 = vmmov %vm13822_vm5 }
 0x421   : > { %v4171_v19 = vmul.f32 %v10253_v50, %v13817_v2  ;;  %v4376_v61 = vadd.f32 %v11097_v45, %v4337_v56  ;;  %v4270_v20 = vadd.f32 %v13818_v63, %v4202_v1  ;;  %v13820_v44 = vrot.slane %v13819_v33, 1 }
 0x422   : > { %v4001_v6 = vadd.f32 %v3969_v28, %v10743_v53  ;;  %v13821_v15 = vmov %v13811_v31  ;;  %v4068_v60 = vadd.f32 %v13823_v16, %v4000_v57  ;;  %v4439_v47 = vsel %vm13282_vm7, %v4407_v21, 0.0  ;;  %v13828_v21 = vld [vmem:[#allocation47_spill] sm:$0xff] }
 0x423   : > { %v3931_v53 = vsel %vm13822_vm5, %v13821_v15, %v13820_v44  ;;  %v4203_v14 = vadd.f32 %v4171_v19, %v4135_v3  ;;  %v4307_v31 = vmul.f32 %v11087_v34, %v3932_v62  ;;  %6874 = vmatmul.mubr.msk.f32.gmra.mrb[56].mxu1 %vm13825_vm4, %v4439_v47  ;;  %v4408_v40 = vmax.f32 %v4376_v61, 0.0  ;;  %vm13833_vm5 = vmmov %vm13825_vm4 }
 0x424   : > { %v3970_v55 = vmul.f32 %v10228_v7, %v3931_v53  ;;  %v4338_v41 = vadd.f32 %v4306_v4, %v4270_v20  ;;  %v4136_v28 = vadd.f32 %v4104_v35, %v4068_v60  ;;  %v4172_v37 = vmul.f32 %v10253_v50, %v13826_v59  ;;  %v13835_v60 = vld [vmem:[#allocation38_spill] sm:$0xff]  ;;  %v13837_v59 = vld [vmem:[#allocation52_spill] sm:$0xff]  ;;  %vm13840_vm4 = vmmov %vm13831_vm0 }
 0x425   : > { %v4271_v56 = vadd.f32 %v13827_v10, %v4203_v14  ;;  %v4105_v1 = vmul.f32 %v10248_v17, %v3931_v53  ;;  %v13829_v3 = vrot.slane %v13828_v21, 1  ;;  %v13830_v62 = vmov %v13820_v44  ;;  %v13834_v44 = vld [vmem:[#allocation51_spill] sm:$0xff] }
 0x426   : > { %v4002_v57 = vadd.f32 %v3970_v55, %v10761_v39  ;;  %v4440_v4 = vsel %vm13431_vm6, %v4408_v40, 0.0  ;;  %v4377_v35 = vadd.f32 %v11097_v45, %v4338_v41  ;;  %v4204_v61 = vadd.f32 %v4172_v37, %v4136_v28  ;;  %v13836_v55 = vld [vmem:[#allocation109_spill] sm:$0xff] }
 0x427   : > { %v3930_v2 = vsel %vm13831_vm0, %v13830_v62, %v13829_v3  ;;  %6876 = vmatprep.mubr.msk.f32.mxu1 %vm13833_vm5, %v4440_v4  ;;  %v4339_v39 = vadd.f32 %v4307_v31, %v4271_v56  ;;  %v4308_v20 = vmul.f32 %v11087_v34, %v3931_v53  ;;  %v4069_v15 = vadd.f32 %v13834_v44, %v4001_v6  ;;  %v13841_v53 = vld [vmem:[#allocation50_spill] sm:$0xff]  ;;  %vm13843_vm0 = vmmov %vm13833_vm5 }
 0x428   : > { %v3971_v63 = vmul.f32 %v10228_v7, %v3930_v2  ;;  %v4106_v33 = vmul.f32 %v10248_v17, %v3930_v2  ;;  %v4409_v16 = vmax.f32 %v4377_v35, 0.0  ;;  %v4272_v47 = vadd.f32 %v13835_v60, %v4204_v61  ;;  %vm13847_vm5 = vmmov %vm13840_vm4 }
 0x429   : > { %v4173_v40 = vmul.f32 %v10253_v50, %v13836_v55  ;;  %v4378_v41 = vadd.f32 %v11097_v45, %v4339_v39  ;;  %v4137_v28 = vadd.f32 %v4105_v1, %v4069_v15  ;;  %v13838_v37 = vrot.slane %v13837_v59, 1 }
 0x42a   : > { %v4003_v14 = vadd.f32 %v3971_v63, %v10810_v51  ;;  %v13839_v31 = vmov %v13829_v3  ;;  %v4070_v10 = vadd.f32 %v13841_v53, %v4002_v57  ;;  %v4441_v3 = vsel %vm13427_vm15, %v4409_v16, 0.0  ;;  %v13844_v63 = vld [vmem:[#allocation54_spill] sm:$0xff]  ;;  %v13848_v16 = vld [vmem:[#allocation87_spill] sm:$0xff] }
 0x42b   : > { %v3929_v6 = vsel %vm13840_vm4, %v13839_v31, %v13838_v37  ;;  %v4340_v62 = vadd.f32 %v4308_v20, %v4272_v47  ;;  %v4309_v51 = vmul.f32 %v11087_v34, %v3930_v2  ;;  %6877 = vmatmul.mubr.msk.f32.gmra.mrb[58].mxu1 %vm13843_vm0, %v4441_v3  ;;  %v4410_v1 = vmax.f32 %v4378_v41, 0.0  ;;  %vm13850_vm4 = vmmov %vm13843_vm0  ;;  %v13852_v53 = vld [vmem:[#allocation35_spill] sm:$0xff] }
 0x42c   : > { %v3972_v4 = vmul.f32 %v10228_v7, %v3929_v6  ;;  %v4205_v35 = vadd.f32 %v4173_v40, %v4137_v28  ;;  %v4138_v61 = vadd.f32 %v4106_v33, %v4070_v10  ;;  %v4174_v21 = vmul.f32 %v10253_v50, %v13844_v63  ;;  %v13849_v33 = vld [vmem:[#allocation115_spill] sm:$0xff]  ;;  %v13851_v28 = vld [vmem:[#allocation53_spill] sm:$0xff]  ;;  %v13855_v63 = vld [vmem:[#allocation48_spill] sm:$0xff] }
 0x42d   : > { %v4379_v39 = vadd.f32 %v11097_v45, %v4340_v62  ;;  %v4107_v44 = vmul.f32 %v10248_v17, %v3929_v6  ;;  %v13845_v20 = vrot.slane %v10824_v38, 1  ;;  %v13846_v2 = vmov %v13838_v37  ;;  %v13853_v62 = vld [vmem:[#allocation60_spill] sm:$0xff]  ;;  %vm13858_vm0 = vmmov %vm13847_vm5 }
 0x42e   : > { %v4004_v57 = vadd.f32 %v3972_v4, %v10835_v29  ;;  %v4442_v60 = vsel %vm13715_vm8, %v4410_v1, 0.0  ;;  %v4273_v47 = vadd.f32 %v13849_v33, %v4205_v35  ;;  %v4206_v55 = vadd.f32 %v4174_v21, %v4138_v61 }
 0x42f   : > { %v3928_v15 = vsel %vm13847_vm5, %v13846_v2, %v13845_v20  ;;  %6879 = vmatprep.mubr.msk.f32.mxu1 %vm13850_vm4, %v4442_v60  ;;  %v4411_v29 = vmax.f32 %v4379_v39, 0.0  ;;  %v4310_v41 = vmul.f32 %v11087_v34, %v3929_v6  ;;  %v4071_v37 = vadd.f32 %v13851_v28, %v4003_v14  ;;  %v13859_v39 = vld [vmem:[#allocation36_spill] sm:$0xff]  ;;  %vm13860_vm5 = vmmov %vm13850_vm4  ;;  %v13864_v28 = vld [vmem:[#allocation22_spill] sm:$0xff] }
 0x430   : > { %v3973_v40 = vmul.f32 %v10228_v7, %v3928_v15  ;;  %v4108_v59 = vmul.f32 %v10248_v17, %v3928_v15  ;;  %v4341_v31 = vadd.f32 %v4309_v51, %v4273_v47  ;;  %v4274_v10 = vadd.f32 %v13852_v53, %v4206_v55  ;;  %vm13863_vm4 = vmmov %vm13858_vm0 }
 0x431   : > { %v4175_v4 = vmul.f32 %v10253_v50, %v13853_v62  ;;  %v4443_v35 = vsel %vm13327_vm1, %v4411_v29, 0.0  ;;  %v4139_v61 = vadd.f32 %v4107_v44, %v4071_v37  ;;  %v13856_v21 = vrot.slane %v13855_v63, 1 }
 0x432   : > { %v4005_v3 = vadd.f32 %v3973_v40, %v10862_v5  ;;  %v13857_v6 = vmov %v13845_v20  ;;  %v4072_v51 = vadd.f32 %v13859_v39, %v4004_v57  ;;  %6880 = vmatmul.mubr.msk.f32.gmra.mrb[60].mxu1 %vm13860_vm5, %v4443_v35  ;;  %v4380_v5 = vadd.f32 %v11097_v45, %v4341_v31 }
 0x433   : > { %v3927_v14 = vsel %vm13858_vm0, %v13857_v6, %v13856_v21  ;;  %v4342_v20 = vadd.f32 %v4310_v41, %v4274_v10  ;;  %v4311_v2 = vmul.f32 %v11087_v34, %v3928_v15  ;;  %v4207_v33 = vadd.f32 %v4175_v4, %v4139_v61  ;;  %v13866_v4 = vld [vmem:[#allocation58_spill] sm:$0xff]  ;;  %vm13867_vm0 = vmmov %vm13860_vm5  ;;  %v13868_v61 = vld [vmem:[#allocation59_spill] sm:$0xff] }
 0x434   : > { %v3974_v60 = vmul.f32 %v10228_v7, %v3927_v14  ;;  %v4109_v44 = vmul.f32 %v10248_v17, %v3927_v14  ;;  %v4140_v47 = vadd.f32 %v4108_v59, %v4072_v51  ;;  %v4176_v38 = vmul.f32 %v10253_v50, %v10846_v13  ;;  %v13865_v13 = vld [vmem:[#allocation27_spill] sm:$0xff]  ;;  %vm13871_vm5 = vmmov %vm13867_vm0 }
 0x435   : > { %v4412_v55 = vmax.f32 %v4380_v5, 0.0  ;;  %v4381_v40 = vadd.f32 %v11097_v45, %v4342_v20  ;;  %v13861_v29 = vrot.slane %v10878_v18, 1  ;;  %v13862_v41 = vmov %v13856_v21  ;;  %v13870_v51 = vld [vmem:[#allocation55_spill] sm:$0xff] }
 0x436   : > { %v4006_v57 = vadd.f32 %v3974_v60, %v10889_v43  ;;  %v4275_v37 = vadd.f32 %v13864_v28, %v4207_v33  ;;  %v4208_v31 = vadd.f32 %v4176_v38, %v4140_v47  ;;  %v4073_v53 = vadd.f32 %v10852_v48, %v4005_v3  ;;  %v5674_v33 = vld [vmem:[%s12560_s17 + $0x8] sm:$0xff] }
 0x437   : > { %v3926_v15 = vsel %vm13863_vm4, %v13862_v41, %v13861_v29  ;;  %v4444_v10 = vsel %vm13727_vm14, %v4412_v55, 0.0  ;;  %v4413_v62 = vmax.f32 %v4381_v40, 0.0  ;;  %v4312_v43 = vmul.f32 %v11087_v34, %v3927_v14 }
 0x438   : > { %v3975_v59 = vmul.f32 %v10228_v7, %v3926_v15  ;;  %v4177_v18 = vmul.f32 %v10253_v50, %v13866_v4  ;;  %6882 = vmatprep.mubr.msk.f32.mxu1 %vm13867_vm0, %v4444_v10  ;;  %v4343_v35 = vadd.f32 %v4311_v2, %v4275_v37  ;;  %v4276_v63 = vadd.f32 %v13868_v61, %v4208_v31  ;;  %v13869_v7 = vld [vmem:[#allocation98_spill] sm:$0xff]  ;;  %v13873_v37 = vld [vmem:[#allocation16_spill] sm:$0xff] }
 0x439   : > { %v4141_v6 = vadd.f32 %v4109_v44, %v4073_v53  ;;  %v4445_v48 = vsel %vm13724_vm10, %v4413_v62, 0.0  ;;  %v4110_v3 = vmul.f32 %v10248_v17, %v3926_v15  ;;  %v4313_v39 = vmul.f32 %v11087_v34, %v3926_v15  ;;  %v13874_v53 = vld [vmem:[#allocation62_spill] sm:$0xff] }
 0x43a   : > { %v4007_v21 = vadd.f32 %v3975_v59, %v10923_v58  ;;  %v4074_v14 = vadd.f32 %v13870_v51, %v4006_v57  ;;  %6883 = vmatmul.mubr.msk.f32.gmra.mrb[62].mxu1 %vm13871_vm5, %v4445_v48  ;;  %v4382_v5 = vadd.f32 %v11097_v45, %v4343_v35  ;;  %v4344_v20 = vadd.f32 %v4312_v43, %v4276_v63  ;;  %v5673_v58 = vld [vmem:[%s12560_s17] sm:$0xff]  ;;  %v5676_v59 = vld [vmem:[%s12560_s17 + $0x18] sm:$0xff]  ;;  %v5678_v48 = vld [vmem:[%s12560_s17 + $0x28] sm:$0xff] }
 0x43b   : > { %v4209_v2 = vadd.f32 %v4177_v18, %v4141_v6  ;;  %v4178_v60 = vmul.f32 %v10253_v50, %v10898_v12  ;;  %v4314_v47 = vmul.f32 %v11087_v34, %v10916_v0  ;;  %v4111_v55 = vmul.f32 %v10248_v17, %v10916_v0  ;;  %v13872_v57 = vld [vmem:[#allocation64_spill] sm:$0xff]  ;;  %v5675_v0 = vld [vmem:[%s12560_s17 + $0x10] sm:$0xff]  ;;  %v13876_v35 = vld [vmem:[#allocation25_spill] sm:$0xff] }
 0x43c   : > { %v4142_v44 = vadd.f32 %v4110_v3, %v4074_v14  ;;  %v4075_v38 = vadd.f32 %v10929_v46, %v4007_v21  ;;  %v4414_v40 = vmax.f32 %v4382_v5, 0.0  ;;  %v4383_v12 = vadd.f32 %v11097_v45, %v4344_v20  ;;  %vm13877_vm5 = vmmov %vm13867_vm0  ;;  %v13878_v3 = vld [vmem:[#allocation56_spill] sm:$0xff] }
 0x43d   : > { %v4277_v29 = vadd.f32 %v13872_v57, %v4209_v2  ;;  %v4179_v41 = vmul.f32 %v10253_v50, %v10943_v8  ;;  %v3923_v31 = vsel %vm13863_vm4, %v3909_v30, %v13873_v37  ;;  %v7045_v46 = vpack.c.bf16 %v5674_v33, %v5673_v58  ;;  %vm13880_vm4 = vmmov %vm13867_vm0 }
 0x43e   : > { %v4210_v15 = vadd.f32 %v4178_v60, %v4142_v44  ;;  %v4143_v28 = vadd.f32 %v4111_v55, %v4075_v38  ;;  %v4446_v50 = vsel %vm13739_vm11, %v4414_v40, 0.0  ;;  %v4415_v8 = vmax.f32 %v4383_v12, 0.0  ;;  %v13879_v44 = vld [vmem:[#allocation82_spill] sm:$0xff]  ;;  %v13881_v55 = vld [vmem:[#allocation73_spill] sm:$0xff] }
 0x43f   : > { %v4345_v10 = vadd.f32 %v4313_v39, %v4277_v29  ;;  %v4113_v62 = vmul.f32 %v10248_v17, %v3923_v31  ;;  %6885 = vmatprep.mubr.msk.f32.mxu1 %vm13867_vm0, %v4446_v50  ;;  %v4316_v4 = vmul.f32 %v11087_v34, %v3923_v31  ;;  %v4249_v18 = vmul.f32 0.0, %v10257_v36  ;;  %7046 = vmatprep.subr.bf16.mxu0 %v7045_v46  ;;  %v5677_v17 = vld [vmem:[%s12560_s17 + $0x20] sm:$0xff]  ;;  %v13884_v29 = vld [vmem:[#allocation26_spill] sm:$0xff] }
 0x440   : > { %v4278_v30 = vadd.f32 %v13875_v25, %v4210_v15  ;;  %v4211_v43 = vadd.f32 %v4179_v41, %v4143_v28  ;;  %v4447_v61 = vsel %vm13735_vm9, %v4415_v8, 0.0  ;;  %7048 = vmatpush3.bf16.msra.mxu0 %v7045_v46  ;;  %v7049_v6 = vpack.c.bf16 %v5676_v59, %v5675_v0  ;;  %v13886_v15 = vld [vmem:[#allocation97_spill] sm:$0xff]  ;;  %v5680_v59 = vld [vmem:[%s12560_s17 + $0x38] sm:$0xff]  ;;  %v11302_v8 = vld [vmem:[%s12557_s14] ss:$0 sm:$0xff] }
 0x441   : > { %v4384_v63 = vadd.f32 %v11097_v45, %v4345_v10  ;;  %v4145_v21 = vadd.f32 %v4113_v62, %v11019_v11  ;;  %6886 = vmatmul.mubr.msk.f32.gmra.mrb[64].mxu1 %vm13877_vm5, %v4447_v61  ;;  %v4315_v51 = vmul.f32 %v11087_v34, %v10990_v22  ;;  %v4348_v11 = vadd.f32 %v4316_v4, %v11030_v49  ;;  %vm13883_vm5 = vmmov %vm13880_vm4  ;;  %v4860_v10 = vld [vmem:[%s12558_s15] sm:$0xff] }
 0x442   : > { %v4346_v36 = vadd.f32 %v4314_v47, %v4278_v30  ;;  %v4279_v39 = vadd.f32 %v13878_v3, %v4211_v43  ;;  %v4317_v20 = vmul.f32 %v11087_v34, %v13873_v37  ;;  %7050 = vmatprep.subr.bf16.mxu0 %v7049_v6  ;;  %v7053_v33 = vpack.c.bf16 %v5678_v48, %v5677_v17  ;;  %vm13888_vm11 = vmmov %vm13883_vm5  ;;  %v13893_v4 = vld [vmem:[#allocation9_spill] sm:$0xff] }
 0x443   : > { %v4416_v14 = vmax.f32 %v4384_v63, 0.0  ;;  %v4213_v5 = vadd.f32 %v11002_v32, %v4145_v21  ;;  %v4387_v58 = vadd.f32 %v11097_v45, %v4348_v11  ;;  %vm13882_vm0 = vnez %v13881_v55  ;;  %vm13889_vm9 = vmmov %vm13883_vm5  ;;  %v13894_v63 = vld [vmem:[#allocation10_spill] sm:$0xff]  ;;  %v13895_v17 = vld [vmem:[#allocation21_spill] sm:$0xff] }
 0x444   : > { %v4385_v2 = vadd.f32 %v11097_v45, %v4346_v36  ;;  %v4347_v60 = vadd.f32 %v4315_v51, %v4279_v39  ;;  %7052 = vmatpush3.bf16.msra.mxu0 %v7049_v6  ;;  %vm13890_vm14 = vnez %v13771_v26  ;;  %v13892_v0 = vmov 0.0   ;;  %v13897_v36 = vld [vmem:[#allocation11_spill] sm:$0xff] }
 0x445   : > { %v4448_v47 = vsel %vm13751_vm3, %v4416_v14, 0.0  ;;  %v4281_v38 = vadd.f32 %v4249_v18, %v4213_v5  ;;  %v4419_v49 = vmax.f32 %v4387_v58, 0.0  ;;  %7054 = vmatprep.subr.bf16.mxu0 %v7053_v33  ;;  %vm13885_vm3 = vnez %v13884_v29  ;;  %v13898_v14 = vld [vmem:[#allocation23_spill] sm:$0xff] }
 0x446   : > { %6888 = vmatprep.mubr.msk.f32.mxu1 %vm13880_vm4, %v4448_v47  ;;  %v4417_v22 = vmax.f32 %v4385_v2, 0.0  ;;  %v4386_v32 = vadd.f32 %v11097_v45, %v4347_v60  ;;  %vm13887_vm4 = vnez %v13886_v15  ;;  %v11310_v18 = vrot.slane %v4860_v10, %v13893_v4 }
 0x447   : > { %v4349_v34 = vadd.f32 %v4317_v20, %v4281_v38  ;;  %v4451_v28 = vsel %vm13887_vm4, %v4419_v49, 0.0  ;;  %v11313_v21 = vrot.slane %v4860_v10, %v13894_v63  ;;  %v11320_v3 = vrot.slane %v4860_v10, %v13897_v36  ;;  %v13901_v38 = vld [vmem:[#allocation15_spill] sm:$0xff]  ;;  %v13908_v63 = vld [vmem:[#allocation12_spill] sm:$0xff] }
 0x448   : > { %v4449_v40 = vsel %vm13882_vm0, %v4417_v22, 0.0  ;;  %v4418_v12 = vmax.f32 %v4386_v32, 0.0  ;;  %7056 = vmatpush3.bf16.msra.mxu0 %v7053_v33  ;;  %vm13891_vm0 = vmmov %vm13883_vm5  ;;  %v4966_v11 = vmul.f32 %v11310_v18, %v13775_v23  ;;  %v13900_v33 = vld [vmem:[#allocation14_spill] sm:$0xff]  ;;  %v11334_v22 = vrot.slane %v4860_v10, %v13901_v38 }
 0x449   : > { %6889 = vmatmul.mubr.msk.f32.gmra.mrb[66].mxu1 %vm13883_vm5, %v4449_v40  ;;  %v4388_v57 = vadd.f32 %v11097_v45, %v4349_v34  ;;  %v5679_v45 = vld [vmem:[%s12560_s17 + $0x30] sm:$0xff]  ;;  %v5034_v20 = vmul.f32 0.0, %v11320_v3  ;;  %v11331_v47 = vrot.slane %v4860_v10, %v13900_v33  ;;  %vm13914_vm4 = vcmp.lt.s32.totalorder %v7458_v52, 7 }
 0x44a   : > { %v4450_v41 = vsel %vm13885_vm3, %v4418_v12, 0.0  ;;  %v7057_v50 = vpack.c.bf16 %v5680_v59, %v5679_v45  ;;  %vm13923_vm10 = vcmask 523264   ;;  %vm13925_vm8 = vcmp.lt.s32.totalorder %v7458_v52, 7 }
 0x44b   : > { %6891 = vmatprep.mubr.msk.f32.mxu1 %vm13888_vm11, %v4450_v41  ;;  %v4420_v31 = vmax.f32 %v4388_v57, 0.0  ;;  %vm13899_vm11 = vnez %v13898_v14 }
 0x44c   : > { %7058 = vmatprep.subr.bf16.mxu0 %v7057_v50 }
 0x44d   : > { %6892 = vmatmul.mubr.msk.f32.gmra.mrb[68].mxu1 %vm13889_vm9, %v4451_v28  ;;  %v4452_v46 = vsel %vm13890_vm14, %v4420_v31, 0.0  ;;  %7060 = vmatpush3.bf16.msra.mxu0 %v7057_v50  ;;  %vm13896_vm9 = vnez %v13895_v17  ;;  %vm13904_vm14 = vcmp.lt.s32.totalorder %v7458_v52, 7 }
 0x44e   : > { %6894 = vmatprep.mubr.msk.f32.mxu1 %vm13891_vm0, %v4452_v46  ;;  %vm13902_vm0 = vcmp.lt.s32.totalorder %v7458_v52, 1  ;;  %vm13905_vm3 = vmmov %vm13904_vm14  ;;  %v13906_v46 = vld [vmem:[#allocation17_spill] sm:$0xff] }
 0x44f   : > { %vm13903_vm5 = vmmov %vm13902_vm0  ;;  %v11351_v45 = vrot.slane %v4860_v10, %v13906_v46 }
 0x451   : > { %6895 = vmatmul.mubr.f32.gmra.mrb[70].mxu1 %v13892_v0 }
 0x452   : > { %6897 = vmatprep.mubr.f32.mxu1 %v13892_v0 }
 0x455   : > { %6898 = vmatmul.mubr.f32.gmra.mrb[72].mxu1 %v13892_v0 }
 0x456   : > { %6900 = vmatprep.mubr.f32.mxu1 %v13892_v0 }
 0x459   : > { %6901 = vmatmul.mubr.f32.gmra.mrb[74].mxu1 %v13892_v0 }
 0x45a   : > { %6903 = vmatprep.mubr.f32.mxu1 %v13892_v0 }
 0x45d   : > { %6904 = vmatmul.mubr.f32.gmra.mrb[76].mxu1 %v13892_v0 }
 0x473   : > { %v6860_v62 = vpop.f32.mrb[46].mxu1 }
 0x474   : > { %v4643_v25 = vadd.f32 %v6860_v62, %v11302_v8  ;;  %v4637_v30 = vpop.f32.mrb[47].mxu1 }
 0x475   : > { %v4638_v43 = vadd.f32 %v11302_v8, %v4637_v30  ;;  %v13907_v30 = vld [vmem:[#allocation18_spill] sm:$0xff] }
 0x476   : > { %v4797_v61 = vmax.f32 %v4643_v25, 0.0 }
 0x477   : > { %v4796_v6 = vmax.f32 %v4638_v43, 0.0  ;;  %v11356_v43 = vrot.slane %v4860_v10, %v13907_v30 }
 0x478   : > { %v11317_v48 = vsel %vm13896_vm9, %v4797_v61, 0.0 }
 0x479   : > { %v4899_v39 = vrot.slane %v11317_v48, 7  ;;  %v5099_v51 = vrot.slane %v11317_v48, 1  ;;  %v4828_v5 = vsel %vm13899_vm11, %v4796_v6, 0.0  ;;  %v4867_v12 = vmul.f32 %v11313_v21, %v11317_v48 }
 0x47a   : > { %v4866_v2 = vmul.f32 %v11313_v21, %v4828_v5  ;;  %v4898_v60 = vrot.slane %v4828_v5, 7  ;;  %v5098_v58 = vrot.slane %v4828_v5, 1  ;;  %v5035_v50 = vmul.f32 %v11320_v3, %v4828_v5 }
 0x47b   : > { %v11360_v6 = vrot.slane %v4860_v10, %v13908_v63  ;;  %v5036_v63 = vmul.f32 %v11320_v3, %v11317_v48 }
 0x47c   : > { %v4960_v32 = vsel %vm13902_vm0, %v4898_v60, %v4899_v39  ;;  %v4961_v49 = vsel %vm13903_vm5, %v13775_v23, %v4898_v60  ;;  %v4998_v34 = vadd.f32 %v4966_v11, %v4866_v2  ;;  %v5160_v40 = vsel %vm13904_vm14, %v5098_v58, %v5099_v51  ;;  %vm13913_vm5 = vmmov %vm13902_vm0 }
 0x47d   : > { %v4967_v57 = vmul.f32 %v11310_v18, %v4961_v49  ;;  %v5161_v41 = vsel %vm13905_vm3, %v13873_v37, %v5098_v58  ;;  %v5234_v25 = vmul.f32 %v11334_v22, %v4961_v49  ;;  %v5167_v61 = vmul.f32 %v11331_v47, %v5160_v40 }
 0x47e   : > { %v5066_v28 = vadd.f32 %v5034_v20, %v4998_v34  ;;  %v5166_v31 = vmul.f32 %v11331_v47, %v5161_v41  ;;  %v5302_v11 = vmul.f32 %v11351_v45, %v5160_v40  ;;  %v5235_v2 = vmul.f32 %v11334_v22, %v4960_v32 }
 0x47f   : > { %v4999_v59 = vadd.f32 %v4967_v57, %v4867_v12  ;;  %v5370_v5 = vmul.f32 %v11356_v43, %v4960_v32  ;;  %v5438_v38 = vmul.f32 %v11360_v6, %v11317_v48 }
 0x480   : > { %v5198_v62 = vadd.f32 %v5166_v31, %v5066_v28  ;;  %v13909_v28 = vld [vmem:[#allocation24_spill] sm:$0xff] }
 0x481   : > { %v5067_v4 = vadd.f32 %v5035_v50, %v4999_v59  ;;  %vm13910_vm14 = vnez %v13909_v28  ;;  %v4968_v50 = vmul.f32 %v11310_v18, %v4960_v32 }
 0x482   : > { %v5266_v36 = vadd.f32 %v5234_v25, %v5198_v62  ;;  %v13911_v62 = vld [vmem:[#allocation29_spill] sm:$0xff] }
 0x483   : > { %v5199_v20 = vadd.f32 %v5167_v61, %v5067_v4  ;;  %vm13912_vm3 = vnez %v13911_v62 }
 0x484   : > { %v5334_v60 = vadd.f32 %v5302_v11, %v5266_v36 }
 0x485   : > { %v5267_v58 = vadd.f32 %v5235_v2, %v5199_v20  ;;  %v11394_v2 = vld [vmem:[%s12558_s15 + $0x8] ss:$0 sm:$0xff] }
 0x486   : > { %v5402_v12 = vadd.f32 %v5370_v5, %v5334_v60 }
 0x488   : > { %v5470_v41 = vadd.f32 %v5438_v38, %v5402_v12 }
 0x48a   : > { %v6863_v33 = vpop.f32.mrb[48].mxu1 }
 0x48b   : > { %v4653_v49 = vadd.f32 %v6863_v33, %v11302_v8  ;;  %v4647_v34 = vpop.f32.mrb[49].mxu1 }
 0x48c   : > { %v4648_v10 = vadd.f32 %v11302_v8, %v4647_v34 }
 0x48d   : > { %v4799_v57 = vmax.f32 %v4653_v49, 0.0 }
 0x48e   : > { %v4798_v40 = vmax.f32 %v4648_v10, 0.0 }
 0x48f   : > { %v11371_v31 = vsel %vm13910_vm14, %v4799_v57, 0.0 }
 0x490   : > { %v4901_v46 = vrot.slane %v11371_v31, 7  ;;  %v12859_v59 = vrot.slane %v11371_v31, 1  ;;  %v4830_v25 = vsel %vm13912_vm3, %v4798_v40, 0.0  ;;  %v4869_v48 = vmul.f32 %v11313_v21, %v11371_v31 }
 0x491   : > { %v4868_v30 = vmul.f32 %v11313_v21, %v4830_v25  ;;  %v4900_v4 = vrot.slane %v4830_v25, 7  ;;  %v5100_v61 = vrot.slane %v4830_v25, 1  ;;  %v5037_v34 = vmul.f32 %v11320_v3, %v4830_v25 }
 0x493   : > { %v4958_v36 = vsel %vm13902_vm0, %v4900_v4, %v4901_v46  ;;  %v4959_v11 = vsel %vm13913_vm5, %v4899_v39, %v4900_v4  ;;  %v5000_v20 = vadd.f32 %v4968_v50, %v4868_v30  ;;  %v5158_v32 = vsel %vm13914_vm4, %v5100_v61, %v12859_v59  ;;  %vm13915_vm0 = vmmov %vm13914_vm4 }
 0x494   : > { %v4969_v5 = vmul.f32 %v11310_v18, %v4959_v11  ;;  %v5159_v60 = vsel %vm13915_vm0, %v5099_v51, %v5100_v61  ;;  %v5236_v57 = vmul.f32 %v11334_v22, %v4959_v11  ;;  %v5371_v50 = vmul.f32 %v11356_v43, %v4959_v11  ;;  %v11410_v51 = vld [vmem:[%s12559_s16] ss:$0 sm:$0xff] }
 0x495   : > { %v5068_v39 = vadd.f32 %v5036_v63, %v5000_v20  ;;  %v5168_v33 = vmul.f32 %v11331_v47, %v5159_v60  ;;  %v5303_v38 = vmul.f32 %v11351_v45, %v5159_v60  ;;  %v5506_v12 = vmul.f32 %v11394_v2, %v5159_v60 }
 0x496   : > { %v5001_v49 = vadd.f32 %v4969_v5, %v4869_v48  ;;  %v5169_v4 = vmul.f32 %v11331_v47, %v5158_v32  ;;  %v5439_v20 = vmul.f32 %v11360_v6, %v4830_v25  ;;  %v5304_v5 = vmul.f32 %v11351_v45, %v5158_v32 }
 0x497   : > { %v5200_v10 = vadd.f32 %v5168_v33, %v5068_v39  ;;  %v5335_v40 = vadd.f32 %v5303_v38, %v5267_v58  ;;  %v5538_v61 = vadd.f32 %v5506_v12, %v5470_v41  ;;  %v5237_v58 = vmul.f32 %v11334_v22, %v4958_v36 }
 0x498   : > { %v5069_v30 = vadd.f32 %v5037_v34, %v5001_v49  ;;  %v5507_v38 = vmul.f32 %v11394_v2, %v5158_v32  ;;  %v5372_v49 = vmul.f32 %v11356_v43, %v4958_v36  ;;  %vm13916_vm4 = vcmask 523264  }
 0x499   : > { %v5403_v63 = vadd.f32 %v5371_v50, %v5335_v40  ;;  %v5268_v48 = vadd.f32 %v5236_v57, %v5200_v10  ;;  %v5577_v11 = vadd.f32 %v11410_v51, %v5538_v61  ;;  %v5440_v10 = vmul.f32 %v11360_v6, %v11371_v31 }
 0x49a   : > { %v5201_v60 = vadd.f32 %v5169_v4, %v5069_v30 }
 0x49b   : > { %v5471_v39 = vadd.f32 %v5439_v20, %v5403_v63  ;;  %v5336_v59 = vadd.f32 %v5304_v5, %v5268_v48  ;;  %v5609_v25 = vmax.f32 %v5577_v11, 0.0  ;;  %v13917_v20 = vld [vmem:[#allocation31_spill] sm:$0xff] }
 0x49c   : > { %v5269_v34 = vadd.f32 %v5237_v58, %v5201_v60  ;;  %vm13918_vm5 = vnez %v13917_v20  ;;  %v4970_v60 = vmul.f32 %v11310_v18, %v4958_v36  ;;  %v13919_v58 = vld [vmem:[#allocation37_spill] sm:$0xff] }
 0x49d   : > { %v5539_v40 = vadd.f32 %v5507_v38, %v5471_v39  ;;  %v5404_v50 = vadd.f32 %v5372_v49, %v5336_v59  ;;  %v5641_v4 = vsel %vm13899_vm11, %v5609_v25, 0.0  ;;  %vm13920_vm0 = vnez %v13919_v58 }
 0x49e   : > { %6922 = vmatprep.mubr.msk.f32.mxu0 %vm13916_vm4, %v5641_v4  ;;  %v5038_v49 = vmul.f32 %v11320_v3, %v11371_v31  ;;  %vm13921_vm4 = vcmp.lt.s32.totalorder %v7458_v52, 1 }
 0x49f   : > { %v5578_v61 = vadd.f32 %v11410_v51, %v5539_v40  ;;  %v5472_v63 = vadd.f32 %v5440_v10, %v5404_v50  ;;  %vm13922_vm11 = vmmov %vm13921_vm4 }
 0x4a1   : > { %v6866_v33 = vpop.f32.mrb[50].mxu1  ;;  %v5610_v11 = vmax.f32 %v5578_v61, 0.0 }
 0x4a2   : > { %v4663_v41 = vadd.f32 %v6866_v33, %v11302_v8  ;;  %v4657_v12 = vpop.f32.mrb[51].mxu1 }
 0x4a3   : > { %v4658_v57 = vadd.f32 %v11302_v8, %v4657_v12  ;;  %v5642_v12 = vsel %vm13896_vm9, %v5610_v11, 0.0 }
 0x4a4   : > { %v4801_v30 = vmax.f32 %v4663_v41, 0.0  ;;  %6923 = vmatmul.mubr.msk.f32.vlgmr.msra.gmra.mrb[50].mxu0 %vm13923_vm10, %v5642_v12  ;;  %vm13926_vm10 = vmmov %vm13925_vm8 }
 0x4a5   : > { %v4800_v32 = vmax.f32 %v4658_v57, 0.0  ;;  %v13924_v57 = vrot.slane %v11371_v31, 1 }
 0x4a6   : > { %v11429_v48 = vsel %vm13918_vm5, %v4801_v30, 0.0 }
 0x4a7   : > { %v12863_v5 = vrot.slane %v11429_v48, 7  ;;  %v4832_v59 = vsel %vm13920_vm0, %v4800_v32, 0.0  ;;  %v12866_v41 = vrot.slane %v11429_v48, 1  ;;  %v4871_v50 = vmul.f32 %v11313_v21, %v11429_v48 }
 0x4a8   : > { %v4870_v39 = vmul.f32 %v11313_v21, %v4832_v59  ;;  %v4902_v33 = vrot.slane %v4832_v59, 7  ;;  %v5102_v38 = vrot.slane %v4832_v59, 1  ;;  %v5441_v17 = vmul.f32 %v11360_v6, %v4832_v59 }
 0x4aa   : > { %v4956_v36 = vsel %vm13921_vm4, %v4902_v33, %v12863_v5  ;;  %v4957_v25 = vsel %vm13922_vm11, %v4901_v46, %v4902_v33  ;;  %v5002_v10 = vadd.f32 %v4970_v60, %v4870_v39  ;;  %v5157_v40 = vsel %vm13925_vm8, %v13924_v57, %v5102_v38 }
 0x4ab   : > { %v4971_v30 = vmul.f32 %v11310_v18, %v4957_v25  ;;  %v5170_v32 = vmul.f32 %v11331_v47, %v5157_v40  ;;  %v5508_v61 = vmul.f32 %v11394_v2, %v5157_v40  ;;  %v5039_v46 = vmul.f32 %v11320_v3, %v4832_v59 }
 0x4ac   : > { %v5070_v4 = vadd.f32 %v5038_v49, %v5002_v10  ;;  %v5305_v60 = vmul.f32 %v11351_v45, %v5157_v40  ;;  %v5156_v31 = vsel %vm13926_vm10, %v5102_v38, %v12866_v41  ;;  %v5238_v39 = vmul.f32 %v11334_v22, %v4957_v25 }
 0x4ad   : > { %v5003_v11 = vadd.f32 %v4971_v30, %v4871_v50  ;;  %v5540_v12 = vadd.f32 %v5508_v61, %v5472_v63  ;;  %v5171_v49 = vmul.f32 %v11331_v47, %v5156_v31  ;;  %v5373_v5 = vmul.f32 %v11356_v43, %v4957_v25 }
 0x4ae   : > { %v5202_v33 = vadd.f32 %v5170_v32, %v5070_v4  ;;  %v5337_v10 = vadd.f32 %v5305_v60, %v5269_v34  ;;  %v5306_v30 = vmul.f32 %v11351_v45, %v5156_v31  ;;  %v5239_v14 = vmul.f32 %v11334_v22, %v4956_v36 }
 0x4af   : > { %v5071_v57 = vadd.f32 %v5039_v46, %v5003_v11  ;;  %v5579_v50 = vadd.f32 %v11410_v51, %v5540_v12  ;;  %v5374_v63 = vmul.f32 %v11356_v43, %v4956_v36  ;;  %v5509_v34 = vmul.f32 %v11394_v2, %v5156_v31 }
 0x4b0   : > { %v5270_v40 = vadd.f32 %v5238_v39, %v5202_v33  ;;  %v5405_v41 = vadd.f32 %v5373_v5, %v5337_v10  ;;  %v5442_v25 = vmul.f32 %v11360_v6, %v11429_v48  ;;  %vm13927_vm8 = vcmask 523264  }
 0x4b1   : > { %v5203_v38 = vadd.f32 %v5171_v49, %v5071_v57  ;;  %v5611_v0 = vmax.f32 %v5579_v50, 0.0  ;;  %vm13928_vm11 = vmmov %vm13927_vm8  ;;  %vm13929_vm4 = vnez %v13773_v24  ;;  %v4972_v10 = vmul.f32 %v11310_v18, %v4956_v36  ;;  %v13930_v50 = vld [vmem:[#allocation40_spill] sm:$0xff] }
 0x4b2   : > { %v5338_v4 = vadd.f32 %v5306_v30, %v5270_v40  ;;  %v5473_v32 = vadd.f32 %v5441_v17, %v5405_v41  ;;  %vm13931_vm10 = vnez %v13930_v50 }
 0x4b3   : > { %v5271_v61 = vadd.f32 %v5239_v14, %v5203_v38  ;;  %v5643_v11 = vsel %vm13912_vm3, %v5611_v0, 0.0  ;;  %vm13936_vm3 = vcmp.lt.s32.totalorder %v7458_v52, 7 }
 0x4b4   : > { %v5406_v46 = vadd.f32 %v5374_v63, %v5338_v4  ;;  %6925 = vmatprep.mubr.msk.f32.mxu0 %vm13927_vm8, %v5643_v11  ;;  %v5541_v59 = vadd.f32 %v5509_v34, %v5473_v32  ;;  %v5040_v63 = vmul.f32 %v11320_v3, %v11429_v48  ;;  %vm13932_vm8 = vcmp.lt.s32.totalorder %v7458_v52, 1 }
 0x4b6   : > { %v5474_v60 = vadd.f32 %v5442_v25, %v5406_v46  ;;  %v5580_v5 = vadd.f32 %v11410_v51, %v5541_v59  ;;  %v13933_v25 = vrot.slane %v11429_v48, 7  ;;  %v13935_v46 = vrot.slane %v11429_v48, 1 }
 0x4b8   : > { %v5612_v39 = vmax.f32 %v5580_v5, 0.0 }
 0x4ba   : > { %v5644_v17 = vsel %vm13910_vm14, %v5612_v39, 0.0  ;;  %vm13991_vm14 = vcmp.lt.s32.totalorder %v7458_v52, 1 }
 0x4bb   : > { %6926 = vmatmul.mubr.msk.f32.gmra.mrb[52].mxu0 %vm13928_vm11, %v5644_v17  ;;  %vm13934_vm11 = vmmov %vm13932_vm8 }
 0x4bc   : > { %vm13993_vm9 = vmmov %vm13991_vm14 }
 0x4db   : > { %v6869_v14 = vpop.f32.mrb[52].mxu1 }
 0x4dc   : > { %v4673_v41 = vadd.f32 %v6869_v14, %v11302_v8  ;;  %v4667_v31 = vpop.f32.mrb[53].mxu1 }
 0x4dd   : > { %v4668_v33 = vadd.f32 %v11302_v8, %v4667_v31 }
 0x4de   : > { %v4803_v0 = vmax.f32 %v4673_v41, 0.0 }
 0x4df   : > { %v4802_v12 = vmax.f32 %v4668_v33, 0.0 }
 0x4e0   : > { %v11487_v57 = vsel %vm13929_vm4, %v4803_v0, 0.0 }
 0x4e1   : > { %v12869_v49 = vrot.slane %v11487_v57, 7  ;;  %v4834_v30 = vsel %vm13931_vm10, %v4802_v12, 0.0  ;;  %v12871_v32 = vrot.slane %v11487_v57, 1  ;;  %v4873_v5 = vmul.f32 %v11313_v21, %v11487_v57 }
 0x4e2   : > { %v4872_v40 = vmul.f32 %v11313_v21, %v4834_v30  ;;  %v4904_v38 = vrot.slane %v4834_v30, 7  ;;  %v5104_v4 = vrot.slane %v4834_v30, 1  ;;  %v11514_v17 = vmul.f32 %v11320_v3, %v11487_v57 }
 0x4e3   : > { %v5041_v48 = vmul.f32 %v11320_v3, %v4834_v30  ;;  %v13941_v58 = vrot.slane %v11487_v57, 1 }
 0x4e4   : > { %v4954_v34 = vsel %vm13932_vm8, %v4904_v38, %v12869_v49  ;;  %v4955_v36 = vsel %vm13934_vm11, %v13933_v25, %v4904_v38  ;;  %v5004_v11 = vadd.f32 %v4972_v10, %v4872_v40  ;;  %v5155_v59 = vsel %vm13936_vm3, %v13935_v46, %v5104_v4 }
 0x4e5   : > { %v4973_v39 = vmul.f32 %v11310_v18, %v4955_v36  ;;  %v5172_v41 = vmul.f32 %v11331_v47, %v5155_v59  ;;  %v5510_v31 = vmul.f32 %v11394_v2, %v5155_v59  ;;  %v5307_v0 = vmul.f32 %v11351_v45, %v5155_v59 }
 0x4e6   : > { %v5072_v14 = vadd.f32 %v5040_v63, %v5004_v11  ;;  %v5154_v12 = vsel %vm13936_vm3, %v5104_v4, %v12871_v32  ;;  %v5240_v10 = vmul.f32 %v11334_v22, %v4955_v36  ;;  %v5443_v40 = vmul.f32 %v11360_v6, %v4834_v30  ;;  %vm13940_vm3 = vmmov %vm13934_vm11 }
 0x4e7   : > { %v5005_v33 = vadd.f32 %v4973_v39, %v4873_v5  ;;  %v5542_v63 = vadd.f32 %v5510_v31, %v5474_v60  ;;  %v5173_v46 = vmul.f32 %v11331_v47, %v5154_v12  ;;  %v5339_v5 = vadd.f32 %v5307_v0, %v5271_v61 }
 0x4e8   : > { %v5204_v38 = vadd.f32 %v5172_v41, %v5072_v14  ;;  %v5375_v39 = vmul.f32 %v11356_v43, %v4955_v36  ;;  %v5308_v4 = vmul.f32 %v11351_v45, %v5154_v12  ;;  %v5241_v28 = vmul.f32 %v11334_v22, %v4954_v34 }
 0x4e9   : > { %v5073_v25 = vadd.f32 %v5041_v48, %v5005_v33  ;;  %v5581_v62 = vadd.f32 %v11410_v51, %v5542_v63  ;;  %v5376_v61 = vmul.f32 %v11356_v43, %v4954_v34  ;;  %v5444_v36 = vmul.f32 %v11360_v6, %v11487_v57 }
 0x4ea   : > { %v5272_v32 = vadd.f32 %v5240_v10, %v5204_v38  ;;  %v5407_v14 = vadd.f32 %v5375_v39, %v5339_v5  ;;  %v5511_v38 = vmul.f32 %v11394_v2, %v5154_v12  ;;  %vm13937_vm8 = vcmask 523264  }
 0x4eb   : > { %v5205_v60 = vadd.f32 %v5173_v46, %v5073_v25  ;;  %v5613_v31 = vmax.f32 %v5581_v62, 0.0 }
 0x4ec   : > { %v5340_v33 = vadd.f32 %v5308_v4, %v5272_v32  ;;  %v5475_v0 = vadd.f32 %v5443_v40, %v5407_v14 }
 0x4ed   : > { %v11536_v63 = vadd.f32 %v5241_v28, %v5205_v60  ;;  %v11551_v28 = vmul.f32 0.0, %v11360_v6 }
 0x4ee   : > { %v6872_v11 = vpop.f32.mrb[54].mxu1  ;;  %v5408_v62 = vadd.f32 %v5376_v61, %v5340_v33  ;;  %v5543_v12 = vadd.f32 %v5511_v38, %v5475_v0 }
 0x4ef   : > { %v4683_v59 = vadd.f32 %v6872_v11, %v11302_v8  ;;  %v4677_v49 = vpop.f32.mrb[55].mxu1  ;;  %v4974_v11 = vmul.f32 %v11310_v18, %v4954_v34  ;;  %13938 = vst [vmem:[#allocation68_spill] sm:$0xff] %v11551_v28 }
 0x4f0   : > { %v4678_v30 = vadd.f32 %v11302_v8, %v4677_v49  ;;  %v5645_v49 = vsel %vm13920_vm0, %v5613_v31, 0.0  ;;  %v11557_v5 = vadd.f32 %v5444_v36, %v5408_v62  ;;  %v5582_v33 = vadd.f32 %v11410_v51, %v5543_v12 }
 0x4f1   : > { %v4805_v41 = vmax.f32 %v4683_v59, 0.0  ;;  %6928 = vmatprep.mubr.msk.f32.mxu0 %vm13937_vm8, %v5645_v49  ;;  %v13939_v36 = vrot.slane %v11487_v57, 7  ;;  %vm13942_vm8 = vcmp.lt.s32.totalorder %v7458_v52, 7  ;;  %vm13971_vm0 = vnez %v13869_v7 }
 0x4f2   : > { %v4804_v48 = vmax.f32 %v4678_v30, 0.0 }
 0x4f3   : > { %v11540_v10 = vsel %vm7788_vm12, %v4805_v41, 0.0 }
 0x4f4   : > { %v4875_v32 = vmul.f32 %v11313_v21, %v11540_v10  ;;  %v4907_v25 = vrot.slane %v11540_v10, 7  ;;  %v5044_v40 = vmul.f32 %v11320_v3, %v11540_v10  ;;  %v4836_v46 = vsel %vm7843_vm13, %v4804_v48, 0.0 }
 0x4f5   : > { %v11562_v59 = vmul.f32 %v11360_v6, %v11540_v10  ;;  %v4874_v34 = vmul.f32 %v11313_v21, %v4836_v46  ;;  %v4906_v4 = vrot.slane %v4836_v46, 7  ;;  %v5043_v60 = vmul.f32 %v11320_v3, %v4836_v46 }
 0x4f6   : > { %v6875_v30 = vpop.f32.mrb[56].mxu1  ;;  %v5106_v14 = vrot.slane %v4836_v46, 1  ;;  %v11586_v12 = vmul.f32 %v11360_v6, %v4836_v46 }
 0x4f7   : > { %v4693_v41 = vadd.f32 %v6875_v30, %v11302_v8  ;;  %v4687_v31 = vpop.f32.mrb[57].mxu1  ;;  %v11570_v61 = vsel %vm13934_vm11, %v4906_v4, %v4907_v25  ;;  %v11576_v48 = vsel %vm13940_vm3, %v13939_v36, %v4906_v4  ;;  %v5006_v0 = vadd.f32 %v4974_v11, %v4874_v34  ;;  %vm13944_vm11 = vmmov %vm13942_vm8 }
 0x4f8   : > { %v4688_v49 = vadd.f32 %v11302_v8, %v4687_v31  ;;  %v4975_v38 = vmul.f32 %v11310_v18, %v11576_v48  ;;  %v11583_v62 = vmul.f32 %v11334_v22, %v11576_v48  ;;  %v11591_v4 = vmul.f32 %v11334_v22, %v11570_v61 }
 0x4f9   : > { %v4807_v30 = vmax.f32 %v4693_v41, 0.0  ;;  %v5074_v39 = vadd.f32 %v11514_v17, %v5006_v0  ;;  %v5614_v34 = vmax.f32 %v5582_v33, 0.0  ;;  %v5153_v46 = vsel %vm13942_vm8, %v13941_v58, %v5106_v14 }
 0x4fa   : > { %v4806_v11 = vmax.f32 %v4688_v49, 0.0  ;;  %v5007_v31 = vadd.f32 %v4975_v38, %v4875_v32  ;;  %v13943_v41 = vrot.slane %v11540_v10, 1  ;;  %v4976_v57 = vmul.f32 %v11310_v18, %v11570_v61 }
 0x4fb   : > { %v11595_v36 = vsel %vm13282_vm7, %v4807_v30, 0.0  ;;  %v5646_v30 = vsel %vm13918_vm5, %v5614_v34, 0.0  ;;  %vm13946_vm3 = vcmask 523264   ;;  %v5174_v20 = vmul.f32 %v11331_v47, %v5153_v46 }
 0x4fc   : > { %v11605_v17 = vsel %vm13944_vm11, %v5106_v14, %v13943_v41  ;;  %v4877_v0 = vmul.f32 %v11313_v21, %v11595_v36  ;;  %v4909_v32 = vrot.slane %v11595_v36, 7  ;;  %v5046_v33 = vmul.f32 %v11320_v3, %v11595_v36  ;;  %6929 = vmatmul.mubr.msk.f32.gmra.mrb[54].mxu0 %vm13946_vm3, %v5646_v30 }
 0x4fd   : > { %v5075_v49 = vadd.f32 %v5043_v60, %v5007_v31  ;;  %v11617_v38 = vsel %vm13419_vm2, %v4806_v11, 0.0  ;;  %v11623_v41 = vmul.f32 %v11360_v6, %v11595_v36  ;;  %vm13947_vm8 = vcmp.lt.s32.totalorder %v7458_v52, 1 }
 0x4fe   : > { %v6878_v14 = vpop.f32.mrb[58].mxu1  ;;  %v4876_v28 = vmul.f32 %v11313_v21, %v11617_v38  ;;  %v4908_v37 = vrot.slane %v11617_v38, 7  ;;  %v5045_v60 = vmul.f32 %v11320_v3, %v11617_v38  ;;  %vm13949_vm11 = vmmov %vm13947_vm8  ;;  %v11645_v30 = vmul.f32 %v11360_v6, %v11617_v38 }
 0x4ff   : > { %13945 = vst [vmem:[#allocation65_spill] sm:$0xff] %v11623_v41  ;;  %v4697_v31 = vpop.f32.mrb[59].mxu1  ;;  %v4703_v58 = vadd.f32 %v6878_v14, %v11302_v8  ;;  %v5309_v41 = vmul.f32 %v11351_v45, %v5153_v46  ;;  %vm13957_vm3 = vmmov %vm13947_vm8 }
 0x500   : > { %v4698_v34 = vadd.f32 %v11302_v8, %v4697_v31  ;;  %v11637_v27 = vsel %vm13947_vm8, %v4908_v37, %v4909_v32  ;;  %v11641_v9 = vsel %vm13949_vm11, %v4907_v25, %v4908_v37  ;;  %v5008_v42 = vadd.f32 %v4976_v57, %v4876_v28  ;;  %13951 = vst [vmem:[#allocation80_spill] sm:$0xff] %v11645_v30  ;;  %vm13959_vm8 = vmmov %vm13957_vm3 }
 0x501   : > { %13948 = vst [vmem:[#allocation75_spill] sm:$0xff] %v11637_v27  ;;  %13950 = vst [vmem:[#allocation45_spill] sm:$0xff] %v11641_v9  ;;  %v4977_v14 = vmul.f32 %v11310_v18, %v11641_v9  ;;  %v11651_v31 = vmul.f32 %v11334_v22, %v11641_v9  ;;  %v4809_v11 = vmax.f32 %v4703_v58, 0.0  ;;  %v11658_v37 = vmul.f32 %v11334_v22, %v11637_v27 }
 0x502   : > { %v11654_v54 = vadd.f32 %v5044_v40, %v5008_v42  ;;  %v4808_v25 = vmax.f32 %v4698_v34, 0.0  ;;  %v11660_v28 = vadd.f32 %v5174_v20, %v5074_v39  ;;  %v5512_v9 = vmul.f32 %v11394_v2, %v5153_v46 }
 0x503   : > { %13952 = vst [vmem:[#allocation66_spill] sm:$0xff] %v11651_v31  ;;  %13953 = vst [vmem:[#allocation63_spill] sm:$0xff] %v11658_v37  ;;  %v5009_v57 = vadd.f32 %v4977_v14, %v4877_v0  ;;  %v11664_v30 = vsel %vm13427_vm15, %v4809_v11, 0.0  ;;  %v4978_v31 = vmul.f32 %v11310_v18, %v11637_v27  ;;  %v5175_v0 = vmul.f32 %v11331_v47, %v11605_v17 }
 0x504   : > { %13954 = vst [vmem:[#allocation69_spill] sm:$0xff] %v11664_v30  ;;  %v4879_v42 = vmul.f32 %v11313_v21, %v11664_v30  ;;  %v4911_v40 = vrot.slane %v11664_v30, 7  ;;  %v5048_v20 = vmul.f32 %v11320_v3, %v11664_v30  ;;  %v11681_v14 = vsel %vm13431_vm6, %v4808_v25, 0.0 }
 0x505   : > { %v6881_v58 = vpop.f32.mrb[60].mxu1  ;;  %v11676_v11 = vadd.f32 %v5045_v60, %v5009_v57  ;;  %v11686_v56 = vmul.f32 %v11360_v6, %v11664_v30  ;;  %v4878_v37 = vmul.f32 %v11313_v21, %v11681_v14  ;;  %v4910_v27 = vrot.slane %v11681_v14, 7 }
 0x506   : > { %v4707_v39 = vpop.f32.mrb[61].mxu1  ;;  %v4713_v46 = vadd.f32 %v6881_v58, %v11302_v8  ;;  %v5047_v60 = vmul.f32 %v11320_v3, %v11681_v14  ;;  %v5544_v19 = vadd.f32 %v5512_v9, %v11557_v5  ;;  %v11704_v23 = vadd.f32 %v5175_v0, %v5075_v49 }
 0x507   : > { %13955 = vst [vmem:[#allocation85_spill] sm:$0xff] %v11676_v11  ;;  %13956 = vst [vmem:[#allocation78_spill] sm:$0xff] %v11686_v56  ;;  %v4708_v25 = vadd.f32 %v11302_v8, %v4707_v39  ;;  %v11698_v58 = vsel %vm13957_vm3, %v4910_v27, %v4911_v40  ;;  %v11702_v56 = vsel %vm13959_vm8, %v4909_v32, %v4910_v27  ;;  %vm13966_vm11 = vnez %v13848_v16 }
 0x508   : > { %v4811_v34 = vmax.f32 %v4713_v46, 0.0  ;;  %13958 = vst [vmem:[#allocation72_spill] sm:$0xff] %v11698_v58  ;;  %v5010_v30 = vadd.f32 %v4978_v31, %v4878_v37  ;;  %v4979_v11 = vmul.f32 %v11310_v18, %v11702_v56  ;;  %v11710_v46 = vmul.f32 %v11334_v22, %v11702_v56  ;;  %vm13969_vm8 = vmmov %vm13957_vm3 }
 0x509   : > { %v11714_v9 = vmul.f32 %v11360_v6, %v11681_v14  ;;  %v11724_v32 = vmul.f32 %v11334_v22, %v11698_v58  ;;  %vm13978_vm5 = vmmov %vm13969_vm8 }
 0x50a   : > { %13960 = vst [vmem:[#allocation105_spill] sm:$0xff] %v11710_v46  ;;  %v11718_v5 = vsel %vm13327_vm1, %v4811_v34, 0.0  ;;  %v11720_v27 = vadd.f32 %v5046_v33, %v5010_v30  ;;  %v5011_v39 = vadd.f32 %v4979_v11, %v4879_v42  ;;  %v4810_v34 = vmax.f32 %v4708_v25, 0.0 }
 0x50b   : > { %13961 = vst [vmem:[#allocation94_spill] sm:$0xff] %v11714_v9  ;;  %13962 = vst [vmem:[#allocation70_spill] sm:$0xff] %v11718_v5  ;;  %v4881_v49 = vmul.f32 %v11313_v21, %v11718_v5  ;;  %v4913_v31 = vrot.slane %v11718_v5, 7  ;;  %v5050_v0 = vmul.f32 %v11320_v3, %v11718_v5  ;;  %v4980_v33 = vmul.f32 %v11310_v18, %v11698_v58 }
 0x50c   : > { %13963 = vst [vmem:[#allocation90_spill] sm:$0xff] %v11724_v32  ;;  %v5583_v9 = vadd.f32 %v11410_v51, %v5544_v19  ;;  %v11737_v46 = vadd.f32 %v5047_v60, %v5011_v39  ;;  %v11741_v42 = vmul.f32 %v11360_v6, %v11718_v5  ;;  %v11745_v11 = vsel %vm13966_vm11, %v4810_v34, 0.0 }
 0x50d   : > { %v6884_v37 = vpop.f32.mrb[62].mxu1  ;;  %v5341_v25 = vadd.f32 %v5309_v41, %v11536_v63  ;;  %v4880_v57 = vmul.f32 %v11313_v21, %v11745_v11  ;;  %v5049_v19 = vmul.f32 %v11320_v3, %v11745_v11  ;;  %v11760_v39 = vmul.f32 %v11360_v6, %v11745_v11 }
 0x50e   : > { %v4717_v1 = vpop.f32.mrb[63].mxu1  ;;  %v4723_v30 = vadd.f32 %v6884_v37, %v11302_v8  ;;  %13964 = vst [vmem:[#allocation106_spill] sm:$0xff] %v11737_v46  ;;  %13965 = vst [vmem:[#allocation74_spill] sm:$0xff] %v11741_v42  ;;  %v4912_v37 = vrot.slane %v11745_v11, 7  ;;  %v5615_v5 = vmax.f32 %v5583_v9, 0.0 }
 0x50f   : > { %v4718_v32 = vadd.f32 %v11302_v8, %v4717_v1  ;;  %v11755_v1 = vmul.f32 %v11351_v45, %v11605_v17  ;;  %13967 = vst [vmem:[#allocation118_spill] sm:$0xff] %v11760_v39  ;;  %v5012_v42 = vadd.f32 %v4980_v33, %v4880_v57  ;;  %v5377_v39 = vmul.f32 %v11356_v43, %v11576_v48 }
 0x510   : > { %v4813_v34 = vmax.f32 %v4723_v30, 0.0  ;;  %v11764_v41 = vsel %vm13957_vm3, %v4912_v37, %v4913_v31  ;;  %v11768_v16 = vsel %vm13969_vm8, %v4911_v40, %v4912_v37  ;;  %vm13974_vm3 = vnez %v13865_v13 }
 0x511   : > { %v4812_v63 = vmax.f32 %v4718_v32, 0.0  ;;  %13968 = vst [vmem:[#allocation79_spill] sm:$0xff] %v11764_v41  ;;  %v4981_v58 = vmul.f32 %v11310_v18, %v11768_v16  ;;  %v11774_v60 = vmul.f32 %v11334_v22, %v11768_v16  ;;  %v11782_v46 = vadd.f32 %v5048_v20, %v5012_v42 }
 0x512   : > { %v11778_v32 = vsel %vm13971_vm0, %v4813_v34, 0.0  ;;  %v11786_v40 = vmul.f32 %v11334_v22, %v11764_v41 }
 0x513   : > { %13970 = vst [vmem:[#allocation83_spill] sm:$0xff] %v11774_v60  ;;  %13972 = vst [vmem:[#allocation84_spill] sm:$0xff] %v11778_v32  ;;  %v4883_v57 = vmul.f32 %v11313_v21, %v11778_v32  ;;  %v4915_v9 = vrot.slane %v11778_v32, 7  ;;  %v5013_v37 = vadd.f32 %v4981_v58, %v4881_v49  ;;  %v5052_v34 = vmul.f32 %v11320_v3, %v11778_v32 }
 0x514   : > { %v6887_v30 = vpop.f32.mrb[64].mxu1  ;;  %13973 = vst [vmem:[#allocation104_spill] sm:$0xff] %v11786_v40  ;;  %v11796_v48 = vsel %vm13974_vm3, %v4812_v63, 0.0  ;;  %v11800_v20 = vmul.f32 %v11360_v6, %v11778_v32  ;;  %v4982_v58 = vmul.f32 %v11310_v18, %v11764_v41 }
 0x515   : > { %v4727_v33 = vpop.f32.mrb[65].mxu1  ;;  %v4882_v42 = vmul.f32 %v11313_v21, %v11796_v48  ;;  %v4914_v40 = vrot.slane %v11796_v48, 7  ;;  %v11807_v49 = vadd.f32 %v5049_v19, %v5013_v37  ;;  %v5051_v7 = vmul.f32 %v11320_v3, %v11796_v48 }
 0x516   : > { %13975 = vst [vmem:[#allocation121_spill] sm:$0xff] %v11800_v20  ;;  %v4733_v13 = vadd.f32 %v6887_v30, %v11302_v8  ;;  %v4728_v41 = vadd.f32 %v11302_v8, %v4727_v33  ;;  %v11830_v30 = vmul.f32 %v11360_v6, %v11796_v48 }
 0x517   : > { %13976 = vst [vmem:[#allocation88_spill] sm:$0xff] %v11807_v49  ;;  %v11815_v20 = vsel %vm13969_vm8, %v4914_v40, %v4915_v9  ;;  %v11819_v32 = vsel %vm13978_vm5, %v4913_v31, %v4914_v40  ;;  %v5014_v60 = vadd.f32 %v4982_v58, %v4882_v42  ;;  %v5647_v42 = vsel %vm13931_vm10, %v5615_v5, 0.0 }
 0x518   : > { %13977 = vst [vmem:[#allocation110_spill] sm:$0xff] %v11815_v20  ;;  %13979 = vst [vmem:[#allocation33_spill] sm:$0xff] %v11819_v32  ;;  %v4983_v19 = vmul.f32 %v11310_v18, %v11819_v32  ;;  %v11826_v37 = vmul.f32 %v11334_v22, %v11819_v32  ;;  %v4815_v63 = vmax.f32 %v4733_v13, 0.0  ;;  %v11836_v31 = vmul.f32 %v11334_v22, %v11815_v20 }
 0x519   : > { %13981 = vst [vmem:[#allocation19_spill] sm:$0xff] %v11830_v30  ;;  %v11832_v49 = vadd.f32 %v5050_v0, %v5014_v60  ;;  %v4814_v40 = vmax.f32 %v4728_v41, 0.0  ;;  %vm13983_vm5 = vnez %v13876_v35  ;;  %vm13985_vm8 = vcmask 523264  }
 0x51a   : > { %13980 = vst [vmem:[#allocation43_spill] sm:$0xff] %v11826_v37  ;;  %13982 = vst [vmem:[#allocation108_spill] sm:$0xff] %v11836_v31  ;;  %v5015_v58 = vadd.f32 %v4983_v19, %v4883_v57  ;;  %v11842_v37 = vsel %vm13983_vm5, %v4815_v63, 0.0  ;;  %6931 = vmatprep.mubr.msk.f32.mxu0 %vm13985_vm8, %v5647_v42  ;;  %v5409_v13 = vadd.f32 %v5377_v39, %v5341_v25  ;;  %vm13986_vm10 = vnez %v13874_v53 }
 0x51b   : > { %13984 = vst [vmem:[#allocation119_spill] sm:$0xff] %v11842_v37  ;;  %v4885_v0 = vmul.f32 %v11313_v21, %v11842_v37  ;;  %v4917_v60 = vrot.slane %v11842_v37, 7  ;;  %v5054_v41 = vmul.f32 %v11320_v3, %v11842_v37  ;;  %v4984_v5 = vmul.f32 %v11310_v18, %v11815_v20 }
 0x51c   : > { %v6890_v33 = vpop.f32.mrb[66].mxu1  ;;  %v11853_v57 = vadd.f32 %v5051_v7, %v5015_v58  ;;  %v11858_v19 = vsel %vm13986_vm10, %v4814_v40, 0.0  ;;  %v11862_v39 = vmul.f32 %v11360_v6, %v11842_v37  ;;  %vm13989_vm8 = vnez %v13881_v55 }
 0x51d   : > { %v4743_v32 = vadd.f32 %v6890_v33, %v11302_v8  ;;  %v4737_v30 = vpop.f32.mrb[67].mxu1  ;;  %13987 = vst [vmem:[#allocation34_spill] sm:$0xff] %v11858_v19  ;;  %v4884_v33 = vmul.f32 %v11313_v21, %v11858_v19  ;;  %v4916_v42 = vrot.slane %v11858_v19, 7  ;;  %v5053_v7 = vmul.f32 %v11320_v3, %v11858_v19 }
 0x51e   : > { %13988 = vst [vmem:[#allocation120_spill] sm:$0xff] %v11862_v39  ;;  %v11886_v63 = vmul.f32 %v11360_v6, %v11858_v19  ;;  %v14000_v19 = vrot.slane %v11617_v38, 1  ;;  %v14001_v55 = vrot.slane %v11540_v10, 1 }
 0x51f   : > { %v4817_v25 = vmax.f32 %v4743_v32, 0.0  ;;  %v4738_v32 = vadd.f32 %v11302_v8, %v4737_v30  ;;  %v11878_v53 = vsel %vm13991_vm14, %v4916_v42, %v4917_v60  ;;  %v11882_v39 = vsel %vm13993_vm9, %v4915_v9, %v4916_v42 }
 0x520   : > { %v6893_v58 = vpop.f32.mrb[68].mxu1  ;;  %13992 = vst [vmem:[#allocation76_spill] sm:$0xff] %v11878_v53  ;;  %13994 = vst [vmem:[#allocation30_spill] sm:$0xff] %v11882_v39  ;;  %v5016_v31 = vadd.f32 %v4984_v5, %v4884_v33  ;;  %v11892_v30 = vmul.f32 %v11334_v22, %v11882_v39  ;;  %vm14002_vm9 = vcmp.lt.s32.totalorder %v7458_v52, 7  ;;  %vm14003_vm14 = vnez %v13879_v44 }
 0x521   : > { %v11872_v40 = vsel %vm13989_vm8, %v4817_v25, 0.0  ;;  %v4753_v50 = vadd.f32 %v6893_v58, %v11302_v8  ;;  %v4747_v35 = vpop.f32.mrb[69].mxu1  ;;  %13995 = vst [vmem:[#allocation86_spill] sm:$0xff] %v11886_v63  ;;  %v4985_v25 = vmul.f32 %v11310_v18, %v11882_v39  ;;  %v11896_v58 = vmul.f32 %v11334_v22, %v11878_v53 }
 0x522   : > { %13990 = vst [vmem:[#allocation20_spill] sm:$0xff] %v11872_v40  ;;  %13996 = vst [vmem:[#allocation44_spill] sm:$0xff] %v11892_v30  ;;  %v4887_v9 = vmul.f32 %v11313_v21, %v11872_v40  ;;  %v11900_v42 = vadd.f32 %v5052_v34, %v5016_v31  ;;  %v4919_v5 = vrot.slane %v11872_v40, 7  ;;  %v11905_v33 = vmul.f32 %v11320_v3, %v11872_v40 }
 0x523   : > { %13997 = vst [vmem:[#allocation39_spill] sm:$0xff] %v11896_v58  ;;  %v5017_v39 = vadd.f32 %v4985_v25, %v4885_v0  ;;  %v11910_v30 = vmul.f32 %v11360_v6, %v11872_v40  ;;  %v4816_v58 = vmax.f32 %v4738_v32, 0.0  ;;  %v4819_v37 = vmax.f32 %v4753_v50, 0.0 }
 0x524   : > { %13998 = vst [vmem:[#allocation111_spill] sm:$0xff] %v11900_v42  ;;  %v6896_v63 = vpop.f32.mrb[70].mxu1  ;;  %v4986_v34 = vmul.f32 %v11310_v18, %v11878_v53  ;;  %v4748_v31 = vadd.f32 %v11302_v8, %v4747_v35  ;;  %v5477_v42 = vadd.f32 %v11586_v12, %v5409_v13  ;;  %v5151_v0 = vsel %vm14002_vm9, %v14001_v55, %v14000_v19 }
 0x525   : > { %13999 = vst [vmem:[#allocation96_spill] sm:$0xff] %v11910_v30  ;;  %v4757_v20 = vpop.f32.mrb[71].mxu1  ;;  %v11922_v63 = vadd.f32 %v5053_v7, %v5017_v39  ;;  %v11926_v50 = vsel %vm14003_vm14, %v4816_v58, 0.0  ;;  %vm14004_vm8 = vnez %v13886_v15  ;;  %v5513_v35 = vmul.f32 %v11394_v2, %v11605_v17 }
 0x526   : > { %v11930_v32 = vsel %vm14004_vm8, %v4819_v37, 0.0  ;;  %v4886_v12 = vmul.f32 %v11313_v21, %v11926_v50  ;;  %v4918_v10 = vrot.slane %v11926_v50, 7  ;;  %v5055_v55 = vmul.f32 %v11320_v3, %v11926_v50 }
 0x527   : > { %v5176_v13 = vmul.f32 %v11331_v47, %v5151_v0  ;;  %v11943_v37 = vmul.f32 %v11360_v6, %v11926_v50  ;;  %v4889_v17 = vmul.f32 %v11313_v21, %v11930_v32  ;;  %vm14006_vm9 = vcmp.lt.s32.totalorder %v7458_v52, 1 }
 0x528   : > { %v6899_v19 = vpop.f32.mrb[72].mxu1  ;;  %v11950_v58 = vsel %vm14006_vm9, %v4918_v10, %v4919_v5  ;;  %vm14007_vm8 = vmmov %vm14006_vm9  ;;  %v11958_v39 = vmul.f32 %v11320_v3, %v11930_v32  ;;  %v5121_v30 = vrot.slane %v11930_v32, 1  ;;  %vm14014_vm14 = vcmp.lt.s32.totalorder %v7458_v52, 7 }
 0x529   : > { %14005 = vst [vmem:[#allocation41_spill] sm:$0xff] %v11943_v37  ;;  %v4767_v25 = vpop.f32.mrb[73].mxu1  ;;  %v11954_v15 = vsel %vm14007_vm8, %v4917_v60, %v4918_v10  ;;  %v5018_v19 = vadd.f32 %v4986_v34, %v4886_v12  ;;  %v11975_v34 = vmul.f32 %v11360_v6, %v11930_v32  ;;  %v4818_v12 = vmax.f32 %v4748_v31, 0.0 }
 0x52a   : > { %14008 = vst [vmem:[#allocation89_spill] sm:$0xff] %v11954_v15  ;;  %v4987_v44 = vmul.f32 %v11310_v18, %v11954_v15  ;;  %v11964_v7 = vmul.f32 %v11334_v22, %v11954_v15  ;;  %v11968_v25 = vmul.f32 %v11334_v22, %v11950_v58  ;;  %v5545_v10 = vadd.f32 %v5513_v35, %v5477_v42 }
 0x52b   : > { %v11971_v60 = vadd.f32 %v5054_v41, %v5018_v19  ;;  %v4988_v15 = vmul.f32 %v11310_v18, %v11950_v58  ;;  %vm14011_vm8 = vnez %v13884_v29  ;;  %v5311_v42 = vmul.f32 %v11351_v45, %v5151_v0 }
 0x52c   : > { %14009 = vst [vmem:[#allocation112_spill] sm:$0xff] %v11964_v7  ;;  %14010 = vst [vmem:[#allocation102_spill] sm:$0xff] %v11968_v25  ;;  %v6902_v37 = vpop.f32.mrb[74].mxu1  ;;  %v5019_v40 = vadd.f32 %v4987_v44, %v4887_v9  ;;  %v11980_v7 = vadd.f32 %v5176_v13, %v11654_v54  ;;  %v5274_v25 = vadd.f32 %v11583_v62, %v11660_v28  ;;  %v11986_v41 = vsel %vm14011_vm8, %v4818_v12, 0.0 }
 0x52d   : > { %v4777_v53 = vpop.f32.mrb[75].mxu1  ;;  %v5584_v19 = vadd.f32 %v11410_v51, %v5545_v10  ;;  %v5378_v44 = vmul.f32 %v11356_v43, %v11570_v61  ;;  %v4888_v54 = vmul.f32 %v11313_v21, %v11986_v41  ;;  %v4920_v31 = vrot.slane %v11986_v41, 7  ;;  %vm14013_vm8 = vmmov %vm14006_vm9 }
 0x52e   : > { %v11992_v9 = vadd.f32 %v5055_v55, %v5019_v40  ;;  %v5514_v53 = vmul.f32 %v11394_v2, %v5151_v0  ;;  %v5057_v62 = vmul.f32 %v11320_v3, %v11986_v41  ;;  %v5120_v28 = vrot.slane %v11986_v41, 1 }
 0x52f   : > { %v5616_v35 = vmax.f32 %v5584_v19, 0.0  ;;  %v5342_v13 = vadd.f32 %v11755_v1, %v5274_v25  ;;  %v12004_v61 = vsel %vm14006_vm9, %v4919_v5, %v4920_v31  ;;  %v5020_v40 = vadd.f32 %v4988_v15, %v4888_v54 }
 0x530   : > { %v6905_v37 = vpop.f32.mrb[76].mxu1  ;;  %v4758_v55 = vadd.f32 %v11302_v8, %v4757_v20  ;;  %v14012_v12 = vrot.slane %v11930_v32, 7  ;;  %v4989_v10 = vmul.f32 %v11310_v18, %v12004_v61  ;;  %v12019_v1 = vsel %vm14014_vm14, %v5120_v28, %v5121_v30 }
 0x531   : > { %v4787_v3 = vpop.f32.mrb[77].mxu1  ;;  %v12023_v15 = vmul.f32 %v11360_v6, %v11986_v41  ;;  %v5648_v8 = vsel %vm13929_vm4, %v5616_v35, 0.0  ;;  %v12028_v20 = vadd.f32 %v11905_v33, %v5020_v40  ;;  %v12032_v5 = vmul.f32 %v11334_v22, %v12004_v61 }
 0x532   : > { %v12011_v0 = vsel %vm14013_vm8, %v4920_v31, %v14012_v12  ;;  %vm14015_vm8 = vcmask 523264   ;;  %v5410_v25 = vadd.f32 %v5378_v44, %v5342_v13  ;;  %v4820_v19 = vmax.f32 %v4758_v55, 0.0 }
 0x533   : > { %6932 = vmatmul.mubr.msk.f32.gmra.mrb[56].mxu0 %vm14015_vm8, %v5648_v8  ;;  %v5021_v54 = vadd.f32 %v4989_v10, %v4889_v17  ;;  %v5189_v31 = vmul.f32 %v11331_v47, %v12019_v1  ;;  %v4990_v37 = vmul.f32 %v11310_v18, %v12011_v0  ;;  %v14016_v35 = vrot.slane %v11595_v36, 1 }
 0x534   : > { %v14017_v33 = vrot.slane %v11617_v38, 1  ;;  %v5478_v12 = vadd.f32 %v11562_v59, %v5410_v25  ;;  %vm14018_vm9 = vnez %v13771_v26  ;;  %v5275_v13 = vadd.f32 %v11591_v4, %v11704_v23  ;;  %v14019_v25 = vld [vmem:[#allocation85_spill] sm:$0xff] }
 0x535   : > { %v12048_v44 = vsel %vm14018_vm9, %v4820_v19, 0.0  ;;  %v5089_v55 = vadd.f32 %v5057_v62, %v5021_v54  ;;  %v5257_v59 = vmul.f32 %v11334_v22, %v12011_v0  ;;  %v14020_v23 = vrot.slane %v11930_v32, 7 }
 0x536   : > { %v5150_v40 = vsel %vm14014_vm14, %v14017_v33, %v14016_v35  ;;  %v4890_v18 = vmul.f32 %v11313_v21, %v12048_v44  ;;  %v4922_v38 = vrot.slane %v12048_v44, 7  ;;  %v5122_v3 = vrot.slane %v12048_v44, 1 }
 0x537   : > { %v5177_v17 = vmul.f32 %v11331_v47, %v5150_v40  ;;  %v5546_v10 = vadd.f32 %v5514_v53, %v5478_v12  ;;  %v5461_v8 = vmul.f32 %v11360_v6, %v12048_v44  ;;  %v5221_v35 = vadd.f32 %v5189_v31, %v5089_v55  ;;  %v14022_v53 = vld [vmem:[#allocation13_spill] sm:$0xff] }
 0x538   : > { %vm14021_vm8 = vcmp.lt.s32.totalorder %v7458_v52, 1  ;;  %v5022_v21 = vadd.f32 %v4990_v37, %v4890_v18  ;;  %v5312_v62 = vmul.f32 %v11351_v45, %v5150_v40  ;;  %vm14024_vm4 = vcmp.lt.s32.totalorder %v7458_v52, 7 }
 0x539   : > { %v5209_v19 = vadd.f32 %v5177_v17, %v14019_v25  ;;  %v4937_v4 = vsel %vm14021_vm8, %v14020_v23, %v4922_v38  ;;  %v5585_v54 = vadd.f32 %v11410_v51, %v5546_v10  ;;  %vm14023_vm14 = vmmov %vm14021_vm8  ;;  %v12075_v6 = vsel %vm14024_vm4, %v5121_v30, %v5122_v3  ;;  %v14025_v10 = vld [vmem:[#allocation45_spill] sm:$0xff] }
 0x53a   : > { %v4936_v33 = vsel %vm14023_vm14, %v4922_v38, %v14022_v53  ;;  %v5258_v32 = vmul.f32 %v11334_v22, %v4937_v4  ;;  %v5090_v31 = vadd.f32 %v11958_v39, %v5022_v21  ;;  %v5190_v37 = vmul.f32 %v11331_v47, %v12075_v6  ;;  %vm14036_vm14 = vmmov %vm14024_vm4 }
 0x53b   : > { %v5289_v12 = vadd.f32 %v5257_v59, %v5221_v35  ;;  %v5325_v17 = vmul.f32 %v11351_v45, %v12075_v6  ;;  %v5617_v55 = vmax.f32 %v5585_v54, 0.0  ;;  %v5393_v18 = vmul.f32 %v11356_v43, %v4937_v4 }
 0x53c   : > { %v5343_v38 = vadd.f32 %v5311_v42, %v5275_v13  ;;  %v5379_v25 = vmul.f32 %v11356_v43, %v14025_v10  ;;  %v5222_v30 = vadd.f32 %v5190_v37, %v5090_v31  ;;  %v12087_v22 = vmul.f32 %v11356_v43, %v4936_v33  ;;  %v14029_v13 = vld [vmem:[#allocation66_spill] sm:$0xff] }
 0x53d   : > { %v5357_v23 = vadd.f32 %v5325_v17, %v5289_v12  ;;  %v14026_v39 = vrot.slane %v11681_v14, 1  ;;  %v14027_v21 = vrot.slane %v11595_v36, 1  ;;  %v5649_v54 = vsel %vm7843_vm13, %v5617_v55, 0.0  ;;  %v14031_v12 = vld [vmem:[#allocation80_spill] sm:$0xff] }
 0x53e   : > { %v5411_v4 = vadd.f32 %v5379_v25, %v5343_v38  ;;  %v5276_v53 = vadd.f32 %v14029_v13, %v11980_v7  ;;  %vm14030_vm8 = vcmask 523264   ;;  %v12101_v33 = vadd.f32 %v5258_v32, %v5222_v30  ;;  %v14032_v38 = vld [vmem:[#allocation75_spill] sm:$0xff] }
 0x53f   : > { %v5149_v59 = vsel %vm14024_vm4, %v14027_v21, %v14026_v39  ;;  %6934 = vmatprep.mubr.msk.f32.mxu0 %vm14030_vm8, %v5649_v54  ;;  %v5425_v31 = vadd.f32 %v5393_v18, %v5357_v23  ;;  %v5515_v37 = vmul.f32 %v11394_v2, %v5150_v40  ;;  %v5380_v25 = vmul.f32 %v11356_v43, %v14032_v38  ;;  %v14033_v21 = vld [vmem:[#allocation69_spill] sm:$0xff]  ;;  %v14037_v30 = vld [vmem:[#allocation63_spill] sm:$0xff]  ;;  %vm14048_vm8 = vmmov %vm14024_vm4 }
 0x540   : > { %v5178_v42 = vmul.f32 %v11331_v47, %v5149_v59  ;;  %v5313_v36 = vmul.f32 %v11351_v45, %v5149_v59  ;;  %v5479_v17 = vadd.f32 %v14031_v12, %v5411_v4  ;;  %v5344_v55 = vadd.f32 %v5312_v62, %v5276_v53  ;;  %v14040_v53 = vld [vmem:[#allocation105_spill] sm:$0xff] }
 0x541   : > { %v12109_v39 = vadd.f32 %v5461_v8, %v5425_v31  ;;  %v5516_v7 = vmul.f32 %v11394_v2, %v5149_v59  ;;  %v14034_v32 = vrot.slane %v14033_v21, 1  ;;  %v14035_v18 = vrot.slane %v11681_v14, 1 }
 0x542   : > { %v5210_v10 = vadd.f32 %v5178_v42, %v11720_v27  ;;  %v5277_v23 = vadd.f32 %v14037_v30, %v5209_v19  ;;  %v5547_v54 = vadd.f32 %v5515_v37, %v5479_v17  ;;  %v5412_v4 = vadd.f32 %v5380_v25, %v5344_v55  ;;  %v14041_v37 = vld [vmem:[#allocation65_spill] sm:$0xff]  ;;  %v14042_v17 = vld [vmem:[#allocation106_spill] sm:$0xff] }
 0x543   : > { %v5148_v40 = vsel %vm14036_vm14, %v14035_v18, %v14034_v32  ;;  %v5381_v62 = vmul.f32 %v11356_v43, %v11702_v56  ;;  %v14038_v59 = vrot.slane %v11745_v11, 1  ;;  %v14039_v13 = vmov %v14034_v32  ;;  %v14043_v32 = vld [vmem:[#allocation72_spill] sm:$0xff] }
 0x544   : > { %v5179_v27 = vmul.f32 %v11331_v47, %v5148_v40  ;;  %v5314_v8 = vmul.f32 %v11351_v45, %v5148_v40  ;;  %v5345_v42 = vadd.f32 %v5313_v36, %v5277_v23  ;;  %v5278_v31 = vadd.f32 %v14040_v53, %v5210_v10 }
 0x545   : > { %v5147_v14 = vsel %vm14024_vm4, %v14039_v13, %v14038_v59  ;;  %v5586_v19 = vadd.f32 %v11410_v51, %v5547_v54  ;;  %v5480_v12 = vadd.f32 %v14041_v37, %v5412_v4  ;;  %v5517_v36 = vmul.f32 %v11394_v2, %v5148_v40  ;;  %v14044_v54 = vld [vmem:[#allocation94_spill] sm:$0xff] }
 0x546   : > { %v5211_v55 = vadd.f32 %v5179_v27, %v14042_v17  ;;  %v5180_v56 = vmul.f32 %v11331_v47, %v5147_v14  ;;  %v5413_v38 = vadd.f32 %v5381_v62, %v5345_v42  ;;  %v5346_v25 = vadd.f32 %v5314_v8, %v5278_v31  ;;  %v14045_v13 = vld [vmem:[#allocation70_spill] sm:$0xff] }
 0x547   : > { %v5382_v21 = vmul.f32 %v11356_v43, %v14043_v32  ;;  %v5618_v18 = vmax.f32 %v5586_v19, 0.0  ;;  %v5548_v30 = vadd.f32 %v5516_v7, %v5480_v12  ;;  %v5315_v10 = vmul.f32 %v11351_v45, %v5147_v14  ;;  %v14049_v62 = vld [vmem:[#allocation90_spill] sm:$0xff] }
 0x548   : > { %v5212_v23 = vadd.f32 %v5180_v56, %v11782_v46  ;;  %v5481_v59 = vadd.f32 %v14044_v54, %v5413_v38  ;;  %v14046_v27 = vrot.slane %v14045_v13, 1  ;;  %v14047_v53 = vrot.slane %v11745_v11, 1  ;;  %v14052_v12 = vld [vmem:[#allocation78_spill] sm:$0xff]  ;;  %v14057_v13 = vld [vmem:[#allocation83_spill] sm:$0xff] }
 0x549   : > { %v5414_v4 = vadd.f32 %v5382_v21, %v5346_v25  ;;  %v5279_v8 = vadd.f32 %v14049_v62, %v5211_v55  ;;  %v5650_v31 = vsel %vm7788_vm12, %v5618_v18, 0.0  ;;  %v5587_v7 = vadd.f32 %v11410_v51, %v5548_v30  ;;  %v14053_v55 = vld [vmem:[#allocation88_spill] sm:$0xff] }
 0x54a   : > { %v5146_v40 = vsel %vm14048_vm8, %v14047_v53, %v14046_v27  ;;  %v5518_v46 = vmul.f32 %v11394_v2, %v5147_v14  ;;  %vm14051_vm14 = vcmask 523264   ;;  %v5549_v37 = vadd.f32 %v5517_v36, %v5481_v59  ;;  %v12171_v59 = vld [vmem:[%s12558_s15 + $0x8] ss:$0 sm:$0xff] }
 0x54b   : > { %v5181_v19 = vmul.f32 %v11331_v47, %v5146_v40  ;;  %6935 = vmatmul.mubr.msk.f32.gmra.mrb[58].mxu0 %vm14051_vm14, %v5650_v31  ;;  %v5482_v17 = vadd.f32 %v14052_v12, %v5414_v4  ;;  %v5347_v11 = vadd.f32 %v5315_v10, %v5279_v8  ;;  %v5383_v56 = vmul.f32 %v11356_v43, %v11768_v16  ;;  %vm14058_vm8 = vmmov %vm14051_vm14  ;;  %v14059_v31 = vld [vmem:[#allocation118_spill] sm:$0xff] }
 0x54c   : > { %v5619_v38 = vmax.f32 %v5587_v7, 0.0  ;;  %v5316_v32 = vmul.f32 %v11351_v45, %v5146_v40  ;;  %v14054_v21 = vrot.slane %v11796_v48, 1  ;;  %v14055_v2 = vmov %v14046_v27  ;;  %vm14064_vm14 = vmmov %vm14024_vm4 }
 0x54d   : > { %v5213_v25 = vadd.f32 %v5181_v19, %v14053_v55  ;;  %v5588_v36 = vadd.f32 %v11410_v51, %v5549_v37  ;;  %v5550_v18 = vadd.f32 %v5518_v46, %v5482_v17  ;;  %v5415_v30 = vadd.f32 %v5383_v56, %v5347_v11  ;;  %v14060_v37 = vld [vmem:[#allocation79_spill] sm:$0xff]  ;;  %v14061_v17 = vld [vmem:[#allocation84_spill] sm:$0xff] }
 0x54e   : > { %v5145_v14 = vsel %vm14024_vm4, %v14055_v2, %v14054_v21  ;;  %v5651_v16 = vsel %vm13419_vm2, %v5619_v38, 0.0  ;;  %v5519_v4 = vmul.f32 %v12171_v59, %v5146_v40  ;;  %v5280_v27 = vadd.f32 %v14057_v13, %v5212_v23  ;;  %v14065_v56 = vld [vmem:[#allocation104_spill] sm:$0xff]  ;;  %vm14067_vm4 = vmmov %vm14058_vm8 }
 0x54f   : > { %v5182_v10 = vmul.f32 %v11331_v47, %v5145_v14  ;;  %v5317_v53 = vmul.f32 %v11351_v45, %v5145_v14  ;;  %6937 = vmatprep.mubr.msk.f32.mxu0 %vm14058_vm8, %v5651_v16  ;;  %v5620_v62 = vmax.f32 %v5588_v36, 0.0  ;;  %v5589_v8 = vadd.f32 %v11410_v51, %v5550_v18  ;;  %vm14070_vm8 = vmmov %vm14067_vm4 }
 0x550   : > { %v5483_v7 = vadd.f32 %v14059_v31, %v5415_v30  ;;  %v5348_v19 = vadd.f32 %v5316_v32, %v5280_v27  ;;  %v5384_v12 = vmul.f32 %v11356_v43, %v14060_v37  ;;  %v14062_v11 = vrot.slane %v14061_v17, 1  ;;  %v14068_v30 = vld [vmem:[#allocation33_spill] sm:$0xff]  ;;  %v14075_v37 = vld [vmem:[#allocation43_spill] sm:$0xff] }
 0x551   : > { %v5214_v46 = vadd.f32 %v5182_v10, %v11832_v49  ;;  %v14063_v40 = vmov %v14054_v21  ;;  %v5281_v38 = vadd.f32 %v14065_v56, %v5213_v25  ;;  %v5652_v51 = vsel %vm13282_vm7, %v5620_v62, 0.0  ;;  %v12201_v25 = vld [vmem:[%s12559_s16] ss:$0 sm:$0xff] }
 0x552   : > { %v5144_v23 = vsel %vm14064_vm14, %v14063_v40, %v14062_v11  ;;  %v5621_v21 = vmax.f32 %v5589_v8, 0.0  ;;  %v5551_v2 = vadd.f32 %v5519_v4, %v5483_v7  ;;  %6938 = vmatmul.mubr.msk.f32.gmra.mrb[60].mxu0 %vm14067_vm4, %v5652_v51  ;;  %v5416_v32 = vadd.f32 %v5384_v12, %v5348_v19  ;;  %v14072_v8 = vld [vmem:[#allocation34_spill] sm:$0xff]  ;;  %v14076_v51 = vld [vmem:[#allocation19_spill] sm:$0xff]  ;;  %vm14083_vm4 = vmmov %vm14064_vm14 }
 0x553   : > { %v5183_v49 = vmul.f32 %v11331_v47, %v5144_v23  ;;  %v5520_v36 = vmul.f32 %v12171_v59, %v5145_v14  ;;  %v5349_v18 = vadd.f32 %v5317_v53, %v5281_v38  ;;  %v5385_v48 = vmul.f32 %v11356_v43, %v14068_v30  ;;  %v14071_v14 = vld [vmem:[#allocation74_spill] sm:$0xff]  ;;  %v14079_v30 = vld [vmem:[#allocation111_spill] sm:$0xff] }
 0x554   : > { %v5653_v16 = vsel %vm13431_vm6, %v5621_v21, 0.0  ;;  %v5590_v4 = vadd.f32 %v12201_v25, %v5551_v2  ;;  %v5318_v27 = vmul.f32 %v11351_v45, %v5144_v23  ;;  %v5484_v53 = vadd.f32 %v14071_v14, %v5416_v32  ;;  %v14084_v14 = vld [vmem:[#allocation108_spill] sm:$0xff] }
 0x555   : > { %v5215_v13 = vadd.f32 %v5183_v49, %v11853_v57  ;;  %6940 = vmatprep.mubr.msk.f32.mxu0 %vm14070_vm8, %v5653_v16  ;;  %v5417_v62 = vadd.f32 %v5385_v48, %v5349_v18  ;;  %v14073_v31 = vrot.slane %v14072_v8, 1  ;;  %v14074_v7 = vmov %v14062_v11  ;;  %v14077_v49 = vld [vmem:[#allocation110_spill] sm:$0xff] }
 0x556   : > { %v5282_v12 = vadd.f32 %v14075_v37, %v5214_v46  ;;  %v5622_v11 = vmax.f32 %v5590_v4, 0.0  ;;  %v5521_v40 = vmul.f32 %v12171_v59, %v5144_v23  ;;  %v5552_v38 = vadd.f32 %v5520_v36, %v5484_v53  ;;  %v14080_v46 = vld [vmem:[#allocation119_spill] sm:$0xff] }
 0x557   : > { %v5143_v19 = vsel %vm14064_vm14, %v14074_v7, %v14073_v31  ;;  %v5485_v21 = vadd.f32 %v14076_v51, %v5417_v62  ;;  %v5386_v32 = vmul.f32 %v11356_v43, %v14077_v49  ;;  %v14081_v16 = vrot.slane %v14080_v46, 1  ;;  %vm14089_vm14 = vmmov %vm14083_vm4  ;;  %v14094_v46 = vld [vmem:[#allocation76_spill] sm:$0xff] }
 0x558   : > { %v5184_v57 = vmul.f32 %v11331_v47, %v5143_v19  ;;  %v5319_v56 = vmul.f32 %v11351_v45, %v5143_v19  ;;  %v5350_v2 = vadd.f32 %v5318_v27, %v5282_v12  ;;  %v5654_v18 = vsel %vm13427_vm15, %v5622_v11, 0.0  ;;  %v14085_v11 = vld [vmem:[#allocation30_spill] sm:$0xff] }
 0x559   : > { %v14082_v23 = vmov %v14073_v31  ;;  %v5283_v36 = vadd.f32 %v14084_v14, %v5215_v13  ;;  %6941 = vmatmul.mubr.msk.f32.gmra.mrb[62].mxu0 %vm14070_vm8, %v5654_v18  ;;  %v5591_v27 = vadd.f32 %v12201_v25, %v5552_v38  ;;  %v5553_v53 = vadd.f32 %v5521_v40, %v5485_v21  ;;  %v14086_v13 = vld [vmem:[#allocation121_spill] sm:$0xff] }
 0x55a   : > { %v5216_v48 = vadd.f32 %v5184_v57, %v14079_v30  ;;  %v5142_v4 = vsel %vm14083_vm4, %v14082_v23, %v14081_v16  ;;  %v5418_v62 = vadd.f32 %v5386_v32, %v5350_v2  ;;  %v5522_v7 = vmul.f32 %v12171_v59, %v5143_v19  ;;  %v14090_v2 = vld [vmem:[#allocation44_spill] sm:$0xff]  ;;  %vm14092_vm4 = vmmov %vm14070_vm8 }
 0x55b   : > { %v5185_v31 = vmul.f32 %v11331_v47, %v5142_v4  ;;  %v5320_v37 = vmul.f32 %v11351_v45, %v5142_v4  ;;  %v5351_v12 = vadd.f32 %v5319_v56, %v5283_v36  ;;  %v5387_v8 = vmul.f32 %v11356_v43, %v14085_v11  ;;  %vm14099_vm8 = vmmov %vm14089_vm14 }
 0x55c   : > { %v5623_v57 = vmax.f32 %v5591_v27, 0.0  ;;  %v5592_v51 = vadd.f32 %v12201_v25, %v5553_v53  ;;  %v5486_v49 = vadd.f32 %v14086_v13, %v5418_v62  ;;  %v5523_v40 = vmul.f32 %v12171_v59, %v5142_v4 }
 0x55d   : > { %v5217_v18 = vadd.f32 %v5185_v31, %v11922_v63  ;;  %v5419_v38 = vadd.f32 %v5387_v8, %v5351_v12  ;;  %v14087_v21 = vrot.slane %v11926_v50, 1  ;;  %v14088_v19 = vmov %v14081_v16  ;;  %v14093_v63 = vld [vmem:[#allocation86_spill] sm:$0xff] }
 0x55e   : > { %v5284_v32 = vadd.f32 %v14090_v2, %v5216_v48  ;;  %v5655_v16 = vsel %vm13966_vm11, %v5623_v57, 0.0  ;;  %v5624_v23 = vmax.f32 %v5592_v51, 0.0  ;;  %v5554_v14 = vadd.f32 %v5522_v7, %v5486_v49  ;;  %v14096_v7 = vld [vmem:[#allocation20_spill] sm:$0xff] }
 0x55f   : > { %v5141_v56 = vsel %vm14089_vm14, %v14088_v19, %v14087_v21  ;;  %6943 = vmatprep.mubr.msk.f32.mxu0 %vm14092_vm4, %v5655_v16  ;;  %v5487_v4 = vadd.f32 %v14093_v63, %v5419_v38  ;;  %v5388_v62 = vmul.f32 %v11356_v43, %v14094_v46  ;;  %v14097_v8 = vrot.slane %v14096_v7, 1  ;;  %vm14100_vm14 = vmmov %vm14092_vm4  ;;  %v14101_v38 = vld [vmem:[#allocation39_spill] sm:$0xff]  ;;  %v14107_v46 = vld [vmem:[#allocation112_spill] sm:$0xff] }
 0x560   : > { %v5186_v36 = vmul.f32 %v11331_v47, %v5141_v56  ;;  %v5321_v27 = vmul.f32 %v11351_v45, %v5141_v56  ;;  %v5352_v53 = vadd.f32 %v5320_v37, %v5284_v32  ;;  %v5656_v48 = vsel %vm13327_vm1, %v5624_v23, 0.0  ;;  %v14102_v32 = vld [vmem:[#allocation89_spill] sm:$0xff]  ;;  %v14103_v23 = vld [vmem:[#allocation120_spill] sm:$0xff]  ;;  %v14104_v63 = vld [vmem:[#allocation27_spill] sm:$0xff] }
 0x561   : > { %v5593_v12 = vadd.f32 %v12201_v25, %v5554_v14  ;;  %v14098_v57 = vmov %v14087_v21  ;;  %6944 = vmatmul.mubr.msk.f32.gmra.mrb[64].mxu0 %vm14100_vm14, %v5656_v48  ;;  %v5555_v37 = vadd.f32 %v5523_v40, %v5487_v4  ;;  %v5285_v21 = vadd.f32 %v14101_v38, %v5217_v18  ;;  %vm14106_vm4 = vmmov %vm14099_vm8 }
 0x562   : > { %v5218_v11 = vadd.f32 %v5186_v36, %v11971_v60  ;;  %v5140_v51 = vsel %vm14099_vm8, %v14098_v57, %v14097_v8  ;;  %v5420_v13 = vadd.f32 %v5388_v62, %v5352_v53  ;;  %v5524_v2 = vmul.f32 %v12171_v59, %v5141_v56  ;;  %vm14108_vm8 = vmmov %vm14100_vm14 }
 0x563   : > { %v5187_v49 = vmul.f32 %v11331_v47, %v5140_v51  ;;  %v5625_v19 = vmax.f32 %v5593_v12, 0.0  ;;  %v5322_v60 = vmul.f32 %v11351_v45, %v5140_v51  ;;  %v5389_v16 = vmul.f32 %v11356_v43, %v14102_v32  ;;  %vm14112_vm14 = vmmov %vm14108_vm8 }
 0x564   : > { %v5594_v50 = vadd.f32 %v12201_v25, %v5555_v37  ;;  %v5488_v14 = vadd.f32 %v14103_v23, %v5420_v13  ;;  %v5353_v40 = vadd.f32 %v5321_v27, %v5285_v21  ;;  %v5525_v18 = vmul.f32 %v12171_v59, %v5140_v51  ;;  %v14109_v51 = vld [vmem:[#allocation102_spill] sm:$0xff]  ;;  %v14111_v13 = vld [vmem:[#allocation41_spill] sm:$0xff] }
 0x565   : > { %v5219_v36 = vadd.f32 %v5187_v49, %v11992_v9  ;;  %v5657_v4 = vsel %vm13974_vm3, %v5625_v19, 0.0  ;;  %v14105_v56 = vmov %v14097_v8  ;;  %v5286_v62 = vadd.f32 %v14107_v46, %v5218_v11  ;;  %vm14127_vm3 = vmmov %vm14108_vm8 }
 0x566   : > { %v5139_v53 = vsel %vm14106_vm4, %v14105_v56, %v5120_v28  ;;  %6946 = vmatprep.mubr.msk.f32.mxu0 %vm14108_vm8, %v5657_v4  ;;  %v5626_v48 = vmax.f32 %v5594_v50, 0.0  ;;  %v5556_v12 = vadd.f32 %v5524_v2, %v5488_v14  ;;  %v5421_v9 = vadd.f32 %v5389_v16, %v5353_v40  ;;  %v14113_v50 = vld [vmem:[#allocation96_spill] sm:$0xff]  ;;  %v14114_v40 = vld [vmem:[#allocation62_spill] sm:$0xff] }
 0x567   : > { %v5188_v27 = vmul.f32 %v11331_v47, %v5139_v53  ;;  %v5323_v8 = vmul.f32 %v11351_v45, %v5139_v53  ;;  %v5354_v57 = vadd.f32 %v5322_v60, %v5286_v62  ;;  %v5390_v41 = vmul.f32 %v11356_v43, %v11950_v58 }
 0x568   : > { %v5287_v7 = vadd.f32 %v14109_v51, %v5219_v36  ;;  %v5658_v28 = vsel %vm13971_vm0, %v5626_v48, 0.0  ;;  %v5595_v11 = vadd.f32 %v12201_v25, %v5556_v12  ;;  %v5489_v49 = vadd.f32 %v14111_v13, %v5421_v9 }
 0x569   : > { %v5220_v38 = vadd.f32 %v5188_v27, %v12028_v20  ;;  %6947 = vmatmul.mubr.msk.f32.gmra.mrb[66].mxu0 %vm14112_vm14, %v5658_v28  ;;  %v5422_v47 = vadd.f32 %v5390_v41, %v5354_v57  ;;  %v5526_v21 = vmul.f32 %v12171_v59, %v5139_v53  ;;  %v5391_v58 = vmul.f32 %v11356_v43, %v12004_v61  ;;  %v6143_v61 = vld [vmem:[%s12562_s19] sm:$0xff]  ;;  %vm14117_vm14 = vmmov %vm14108_vm8 }
 0x56a   : > { %v5355_v19 = vadd.f32 %v5323_v8, %v5287_v7  ;;  %v5627_v2 = vmax.f32 %v5595_v11, 0.0  ;;  %v5557_v60 = vadd.f32 %v5525_v18, %v5489_v49  ;;  %v5324_v16 = vmul.f32 %v11351_v45, %v12019_v1  ;;  %v14115_v53 = vld [vmem:[#allocation16_spill] sm:$0xff]  ;;  %v14116_v57 = vld [vmem:[#allocation25_spill] sm:$0xff] }
 0x56b   : > { %v5288_v32 = vadd.f32 %v12032_v5, %v5220_v38  ;;  %v5490_v23 = vadd.f32 %v14113_v50, %v5422_v47  ;;  %v5527_v20 = vmul.f32 %v12171_v59, %v12019_v1  ;;  %v5392_v36 = vmul.f32 %v11356_v43, %v12011_v0  ;;  %v6144_v5 = vld [vmem:[%s12562_s19 + $0x8] sm:$0xff]  ;;  %v14120_v38 = vld [vmem:[#allocation68_spill] sm:$0xff] }
 0x56c   : > { %v5423_v14 = vadd.f32 %v5391_v58, %v5355_v19  ;;  %v5659_v4 = vsel %vm13986_vm10, %v5627_v2, 0.0  ;;  %v5596_v18 = vadd.f32 %v12201_v25, %v5557_v60  ;;  %v5136_v43 = vsel %vm14106_vm4, %v5122_v3, %v14115_v53  ;;  %vm14123_vm10 = vmmov %vm14108_vm8  ;;  %v14124_v2 = vld [vmem:[#allocation97_spill] sm:$0xff] }
 0x56d   : > { %v5356_v56 = vadd.f32 %v5324_v16, %v5288_v32  ;;  %6949 = vmatprep.mubr.msk.f32.mxu0 %vm14108_vm8, %v5659_v4  ;;  %v5558_v0 = vadd.f32 %v5526_v21, %v5490_v23  ;;  %v5326_v46 = vmul.f32 %v11351_v45, %v5136_v43  ;;  %v5529_v62 = vmul.f32 %v12171_v59, %v5136_v43  ;;  %v14121_v21 = vld [vmem:[#allocation73_spill] sm:$0xff] }
 0x56e   : > { %v5491_v1 = vadd.f32 %v12023_v15, %v5423_v14  ;;  %v5628_v48 = vmax.f32 %v5596_v18, 0.0  ;;  %v7062_v9 = vpack.c.bf16 %v6144_v5, %v6143_v61  ;;  %v7192_v3 = vmov 0.0|0.0  }
 0x56f   : > { %v5424_v12 = vadd.f32 %v5392_v36, %v5356_v56  ;;  %v5597_v27 = vadd.f32 %v12201_v25, %v5558_v0  ;;  %v5561_v44 = vadd.f32 %v5529_v62, %v12109_v39  ;;  %v5358_v52 = vadd.f32 %v5326_v46, %v12101_v33  ;;  %7061 = vmatprep.subr.bf16.mxu1 %v7192_v3  ;;  %v14131_v56 = vld [vmem:[#allocation21_spill] sm:$0xff]  ;;  %v14133_v0 = vld [vmem:[#allocation23_spill] sm:$0xff] }
 0x570   : > { %v5559_v8 = vadd.f32 %v5527_v20, %v5491_v1  ;;  %v5660_v15 = vsel %vm13983_vm5, %v5628_v48, 0.0  ;;  %v5528_v41 = vmul.f32 %v12171_v59, %v12075_v6  ;;  %v5530_v51 = vmul.f32 %v12171_v59, %v14115_v53  ;;  %7063 = vmatpush3.bf16.msra.mxu1 %v7062_v9 }
 0x571   : > { %v5492_v45 = vadd.f32 %v11975_v34, %v5424_v12  ;;  %6950 = vmatmul.mubr.msk.f32.gmra.mrb[68].mxu0 %vm14117_vm14, %v5660_v15  ;;  %v5629_v39 = vmax.f32 %v5597_v27, 0.0  ;;  %v5600_v7 = vadd.f32 %v12201_v25, %v5561_v44  ;;  %v5426_v28 = vadd.f32 %v12087_v22, %v5358_v52  ;;  %7064 = vmatprep.subr.bf16.mxu1 %v7192_v3  ;;  %v14118_v34 = vld [vmem:[#allocation82_spill] sm:$0xff]  ;;  %v14136_v52 = vld [vmem:[#allocation24_spill] sm:$0xff] }
 0x572   : > { %v5598_v33 = vadd.f32 %v12201_v25, %v5559_v8  ;;  %vm14119_vm4 = vnez %v14118_v34  ;;  %vm14122_vm14 = vnez %v14121_v21  ;;  %vm14125_vm5 = vnez %v14124_v2 }
 0x573   : > { %v5560_v11 = vadd.f32 %v5528_v41, %v5492_v45  ;;  %v5661_v13 = vsel %vm14119_vm4, %v5629_v39, 0.0  ;;  %v5632_v49 = vmax.f32 %v5600_v7, 0.0  ;;  %v5494_v59 = vadd.f32 %v14120_v38, %v5426_v28  ;;  %v14138_v45 = vld [vmem:[#allocation29_spill] sm:$0xff]  ;;  %v6145_v28 = vld [vmem:[%s12562_s19 + $0x10] sm:$0xff] }
 0x574   : > { %v5630_v6 = vmax.f32 %v5598_v33, 0.0  ;;  %6952 = vmatprep.mubr.msk.f32.mxu0 %vm14108_vm8, %v5661_v13  ;;  %vm14126_vm4 = vnez %v13884_v29  ;;  %vm14128_vm8 = vmmov %vm14127_vm3  ;;  %v14130_v14 = vmov 0.0  }
 0x575   : > { %v5599_v47 = vadd.f32 %v12201_v25, %v5560_v11  ;;  %v5562_v58 = vadd.f32 %v5530_v51, %v5494_v59  ;;  %v5664_v60 = vsel %vm14125_vm5, %v5632_v49, 0.0  ;;  %v6146_v11 = vld [vmem:[%s12562_s19 + $0x18] sm:$0xff]  ;;  %v6148_v49 = vld [vmem:[%s12562_s19 + $0x28] sm:$0xff] }
 0x576   : > { %v5662_v19 = vsel %vm14122_vm14, %v5630_v6, 0.0  ;;  %vm14129_vm14 = vmmov %vm14127_vm3  ;;  %v7065_v13 = vpack.c.bf16 %v6146_v11, %v6145_v28  ;;  %v6147_v6 = vld [vmem:[%s12562_s19 + $0x20] sm:$0xff] }
 0x577   : > { %6953 = vmatmul.mubr.msk.f32.gmra.mrb[70].mxu0 %vm14123_vm10, %v5662_v19  ;;  %v5631_v22 = vmax.f32 %v5599_v47, 0.0  ;;  %v5601_v32 = vadd.f32 %v12201_v25, %v5562_v58  ;;  %v12372_v25 = vld [vmem:[%s12561_s18] ss:$0 sm:$0xff]  ;;  %v6924_v20 = vpop.f32.mrb[50].mxu0  ;;  %vm14132_vm10 = vnez %v14131_v56  ;;  %v7068_v38 = vpack.c.bf16 %v6148_v49, %v6147_v6 }
 0x578   : > { %v5856_v36 = vadd.f32 %v6924_v20, %v12372_v25  ;;  %v5850_v61 = vpop.f32.mrb[51].mxu0  ;;  %7066 = vmatpush3.bf16.msra.mxu1 %v7065_v13 }
 0x579   : > { %v5663_v16 = vsel %vm14126_vm4, %v5631_v22, 0.0  ;;  %v5633_v50 = vmax.f32 %v5601_v32, 0.0  ;;  %v5851_v5 = vadd.f32 %v12372_v25, %v5850_v61  ;;  %7067 = vmatprep.subr.bf16.mxu1 %v7192_v3  ;;  %v14141_v32 = vld [vmem:[#allocation31_spill] sm:$0xff] }
 0x57a   : > { %6955 = vmatprep.mubr.msk.f32.mxu0 %vm14127_vm3, %v5663_v16  ;;  %v6010_v4 = vmax.f32 %v5856_v36, 0.0 }
 0x57b   : > { %6956 = vmatmul.mubr.msk.f32.gmra.mrb[72].mxu0 %vm14128_vm8, %v5664_v60  ;;  %v5665_v23 = vsel %vm14018_vm9, %v5633_v50, 0.0  ;;  %v6009_v18 = vmax.f32 %v5851_v5, 0.0  ;;  %vm14135_vm8 = vmmov %vm14127_vm3  ;;  %vm14137_vm9 = vnez %v14136_v52  ;;  %v14143_v50 = vld [vmem:[#allocation37_spill] sm:$0xff]  ;;  %v6149_v5 = vld [vmem:[%s12562_s19 + $0x30] sm:$0xff] }
 0x57c   : > { %6958 = vmatprep.mubr.msk.f32.mxu0 %vm14129_vm14, %v5665_v23  ;;  %v6042_v53 = vsel %vm14132_vm10, %v6010_v4, 0.0  ;;  %vm14134_vm14 = vnez %v14133_v0  ;;  %vm14139_vm10 = vnez %v14138_v45  ;;  %7069 = vmatpush3.bf16.msra.mxu1 %v7068_v38  ;;  %v6150_v4 = vld [vmem:[%s12562_s19 + $0x38] sm:$0xff] }
 0x57d   : > { %v6074_v43 = vsel %vm14127_vm3, %v6042_v53, 0.0  ;;  %v6041_v1 = vsel %vm14134_vm14, %v6009_v18, 0.0  ;;  %vm14140_vm14 = vmmov %vm14127_vm3  ;;  %7070 = vmatprep.subr.bf16.mxu1 %v7192_v3  ;;  %v7071_v18 = vpack.c.bf16 %v6150_v4, %v6149_v5 }
 0x57e   : > { %v6073_v46 = vsel %vm14135_vm8, %v6041_v1, 0.0  ;;  %vm14144_vm8 = vnez %v14143_v50 }
 0x57f   : > { %6959 = vmatmul.mubr.f32.gmra.mrb[74].mxu0 %v14130_v14  ;;  %v6075_v62 = vadd.f32 %v6074_v43, %v6073_v46 }
 0x580   : > { %6961 = vmatprep.mubr.f32.mxu0 %v14130_v14  ;;  %7072 = vmatpush3.bf16.msra.mxu1 %v7071_v18 }
 0x583   : > { %6962 = vmatmul.mubr.f32.gmra.mrb[76].mxu0 %v14130_v14 }
 0x584   : > { %6964 = vmatprep.mubr.f32.mxu0 %v14130_v14 }
 0x587   : > { %6965 = vmatmul.mubr.f32.gmra.mrb[78].mxu0 %v14130_v14 }
 0x588   : > { %6967 = vmatprep.mubr.f32.mxu0 %v14130_v14 }
 0x58b   : > { %6968 = vmatmul.mubr.f32.gmra.mrb[80].mxu0 %v14130_v14 }
 0x58e   : > { %v6927_v48 = vpop.f32.mrb[52].mxu0 }
 0x58f   : > { %v5866_v12 = vadd.f32 %v6927_v48, %v12372_v25  ;;  %v5860_v9 = vpop.f32.mrb[53].mxu0  ;;  %v14147_v48 = vld [vmem:[#allocation40_spill] sm:$0xff] }
 0x590   : > { %v5861_v27 = vadd.f32 %v12372_v25, %v5860_v9 }
 0x591   : > { %v6012_v8 = vmax.f32 %v5866_v12, 0.0 }
 0x592   : > { %v6011_v44 = vmax.f32 %v5861_v27, 0.0 }
 0x593   : > { %v6044_v15 = vsel %vm14137_vm9, %v6012_v8, 0.0  ;;  %vm14142_vm9 = vnez %v14141_v32 }
 0x594   : > { %v6043_v41 = vsel %vm14139_vm10, %v6011_v44, 0.0  ;;  %v6078_v33 = vsel %vm14140_vm14, %v6044_v15, 0.0  ;;  %vm14145_vm10 = vmmov %vm14127_vm3  ;;  %vm7193_vm14 = vmmov 0  }
 0x595   : > { %v6076_v51 = vsel %vm14127_vm3, %v6043_v41, 0.0  ;;  %6986 = vmatprep.mubr.msk.f32.mxu1 %vm7193_vm14, %v14130_v14  ;;  %vm14150_vm14 = vmmov %vm14127_vm3 }
 0x596   : > { %v6077_v39 = vadd.f32 %v6076_v51, %v6075_v62 }
 0x598   : > { %v6079_v7 = vadd.f32 %v6078_v33, %v6077_v39 }
 0x5cf   : > { %v6930_v59 = vpop.f32.mrb[54].mxu0 }
 0x5d0   : > { %v5876_v47 = vadd.f32 %v6930_v59, %v12372_v25  ;;  %v5870_v19 = vpop.f32.mrb[55].mxu0 }
 0x5d1   : > { %v5871_v58 = vadd.f32 %v12372_v25, %v5870_v19 }
 0x5d2   : > { %v6014_v22 = vmax.f32 %v5876_v47, 0.0 }
 0x5d3   : > { %v6013_v60 = vmax.f32 %v5871_v58, 0.0 }
 0x5d4   : > { %v6046_v16 = vsel %vm14142_vm9, %v6014_v22, 0.0  ;;  %vm14146_vm9 = vnez %v13773_v24 }
 0x5d5   : > { %v6045_v23 = vsel %vm14144_vm8, %v6013_v60, 0.0  ;;  %v6082_v61 = vsel %vm14127_vm3, %v6046_v16, 0.0  ;;  %vm14148_vm8 = vnez %v14147_v48 }
 0x5d6   : > { %v6080_v20 = vsel %vm14145_vm10, %v6045_v23, 0.0  ;;  %vm14149_vm10 = vmmov %vm14127_vm3 }
 0x5d7   : > { %v6081_v36 = vadd.f32 %v6080_v20, %v6079_v7 }
 0x5d9   : > { %v6083_v3 = vadd.f32 %v6082_v61, %v6081_v36 }
 0x606   : > { %v6933_v56 = vpop.f32.mrb[56].mxu0 }
 0x607   : > { %v5886_v53 = vadd.f32 %v6933_v56, %v12372_v25  ;;  %v5880_v43 = vpop.f32.mrb[57].mxu0 }
 0x608   : > { %v5881_v0 = vadd.f32 %v12372_v25, %v5880_v43 }
 0x609   : > { %v6016_v1 = vmax.f32 %v5886_v53, 0.0 }
 0x60a   : > { %v6015_v46 = vmax.f32 %v5881_v0, 0.0 }
 0x60b   : > { %v6048_v62 = vsel %vm14146_vm9, %v6016_v1, 0.0  ;;  %vm14151_vm9 = vmmov %vm14127_vm3 }
 0x60c   : > { %v6047_v12 = vsel %vm14148_vm8, %v6015_v46, 0.0  ;;  %v6086_v14 = vsel %vm14127_vm3, %v6048_v62, 0.0 }
 0x60d   : > { %v6084_v9 = vsel %vm14149_vm10, %v6047_v12, 0.0  ;;  %vm14162_vm10 = vnez %v14114_v40 }
 0x60e   : > { %v6085_v27 = vadd.f32 %v6084_v9, %v6083_v3 }
 0x610   : > { %v6087_v8 = vadd.f32 %v6086_v14, %v6085_v27 }
 0x61e   : > { %v6936_v44 = vpop.f32.mrb[58].mxu0 }
 0x61f   : > { %v5896_v52 = vadd.f32 %v6936_v44, %v12372_v25  ;;  %v5890_v15 = vpop.f32.mrb[59].mxu0 }
 0x620   : > { %v5891_v45 = vadd.f32 %v12372_v25, %v5890_v15 }
 0x621   : > { %v6018_v41 = vmax.f32 %v5896_v52, 0.0 }
 0x622   : > { %v6017_v51 = vmax.f32 %v5891_v45, 0.0 }
 0x623   : > { %v6050_v24 = vsel %vm7788_vm12, %v6018_v41, 0.0  ;;  %vm14152_vm12 = vmmov %vm14127_vm3 }
 0x624   : > { %v6049_v39 = vsel %vm7843_vm13, %v6017_v51, 0.0  ;;  %v6090_v6 = vsel %vm14151_vm9, %v6050_v24, 0.0  ;;  %vm14153_vm13 = vmmov %vm14127_vm3  ;;  %vm14165_vm9 = vnez %v14121_v21 }
 0x625   : > { %v6088_v33 = vsel %vm14150_vm14, %v6049_v39, 0.0  ;;  %v6939_v7 = vpop.f32.mrb[60].mxu0 }
 0x626   : > { %v6089_v28 = vadd.f32 %v6088_v33, %v6087_v8  ;;  %v5906_v11 = vadd.f32 %v6939_v7, %v12372_v25  ;;  %v5900_v13 = vpop.f32.mrb[61].mxu0 }
 0x627   : > { %v5901_v49 = vadd.f32 %v12372_v25, %v5900_v13 }
 0x628   : > { %v6020_v38 = vmax.f32 %v5906_v11, 0.0  ;;  %v6091_v59 = vadd.f32 %v6090_v6, %v6089_v28 }
 0x629   : > { %v6019_v47 = vmax.f32 %v5901_v49, 0.0 }
 0x62a   : > { %v6052_v42 = vsel %vm13282_vm7, %v6020_v38, 0.0  ;;  %vm14154_vm7 = vmmov %vm14127_vm3 }
 0x62b   : > { %v6051_v35 = vsel %vm13419_vm2, %v6019_v47, 0.0  ;;  %v6094_v50 = vsel %vm14153_vm13, %v6052_v42, 0.0  ;;  %vm14155_vm2 = vmmov %vm14127_vm3 }
 0x62c   : > { %v6942_v19 = vpop.f32.mrb[62].mxu0  ;;  %v6092_v58 = vsel %vm14152_vm12, %v6051_v35, 0.0  ;;  %vm14160_vm8 = vmmov %vm14155_vm2  ;;  %vm14166_vm12 = vnez %v14118_v34 }
 0x62d   : > { %v5916_v22 = vadd.f32 %v6942_v19, %v12372_v25  ;;  %v5910_v60 = vpop.f32.mrb[63].mxu0  ;;  %v6093_v32 = vadd.f32 %v6092_v58, %v6091_v59  ;;  %vm14163_vm3 = vmmov %vm14155_vm2 }
 0x62e   : > { %v5911_v16 = vadd.f32 %v12372_v25, %v5910_v60  ;;  %vm14164_vm14 = vmmov %vm14155_vm2 }
 0x62f   : > { %v6022_v23 = vmax.f32 %v5916_v22, 0.0  ;;  %v6095_v36 = vadd.f32 %v6094_v50, %v6093_v32  ;;  %vm14167_vm13 = vmmov %vm14155_vm2 }
 0x630   : > { %v6021_v20 = vmax.f32 %v5911_v16, 0.0 }
 0x631   : > { %v6054_v55 = vsel %vm13427_vm15, %v6022_v23, 0.0  ;;  %vm14156_vm15 = vmmov %vm14155_vm2 }
 0x632   : > { %v6053_v54 = vsel %vm13431_vm6, %v6021_v20, 0.0  ;;  %v6098_v56 = vsel %vm14155_vm2, %v6054_v55, 0.0  ;;  %vm14157_vm6 = vmmov %vm14155_vm2 }
 0x633   : > { %v6096_v61 = vsel %vm14154_vm7, %v6053_v54, 0.0  ;;  %vm14168_vm7 = vmmov %vm14155_vm2 }
 0x634   : > { %v6945_v3 = vpop.f32.mrb[64].mxu0  ;;  %v6097_v5 = vadd.f32 %v6096_v61, %v6095_v36 }
 0x635   : > { %v5926_v4 = vadd.f32 %v6945_v3, %v12372_v25  ;;  %v5920_v18 = vpop.f32.mrb[65].mxu0 }
 0x636   : > { %v5921_v53 = vadd.f32 %v12372_v25, %v5920_v18  ;;  %v6099_v0 = vadd.f32 %v6098_v56, %v6097_v5 }
 0x637   : > { %v6024_v43 = vmax.f32 %v5926_v4, 0.0 }
 0x638   : > { %v6023_v1 = vmax.f32 %v5921_v53, 0.0 }
 0x639   : > { %v6056_v17 = vsel %vm13327_vm1, %v6024_v43, 0.0  ;;  %vm14158_vm1 = vnez %v14104_v63 }
 0x63a   : > { %v6055_v10 = vsel %vm13966_vm11, %v6023_v1, 0.0  ;;  %v6102_v27 = vsel %vm14157_vm6, %v6056_v17, 0.0  ;;  %vm14159_vm11 = vmmov %vm14155_vm2  ;;  %vm14170_vm6 = vnez %v13771_v26 }
 0x63b   : > { %v6100_v46 = vsel %vm14156_vm15, %v6055_v10, 0.0  ;;  %vm14169_vm15 = vmmov %vm14155_vm2 }
 0x63c   : > { %v6948_v62 = vpop.f32.mrb[66].mxu0  ;;  %v6101_v48 = vadd.f32 %v6100_v46, %v6099_v0 }
 0x63d   : > { %v5936_v12 = vadd.f32 %v6948_v62, %v12372_v25  ;;  %v5930_v9 = vpop.f32.mrb[67].mxu0 }
 0x63e   : > { %v5931_v14 = vadd.f32 %v12372_v25, %v5930_v9  ;;  %v6103_v44 = vadd.f32 %v6102_v27, %v6101_v48 }
 0x63f   : > { %v6026_v8 = vmax.f32 %v5936_v12, 0.0 }
 0x640   : > { %v6025_v52 = vmax.f32 %v5931_v14, 0.0 }
 0x641   : > { %v6058_v31 = vsel %vm13971_vm0, %v6026_v8, 0.0  ;;  %vm14161_vm0 = vnez %v14116_v57 }
 0x642   : > { %v6057_v30 = vsel %vm14158_vm1, %v6025_v52, 0.0  ;;  %v6106_v51 = vsel %vm14160_vm8, %v6058_v31, 0.0  ;;  %vm6224_vm1 = vcmask 90112  }
 0x643   : > { %v6104_v15 = vsel %vm14159_vm11, %v6057_v30, 0.0 }
 0x644   : > { %v6105_v45 = vadd.f32 %v6104_v15, %v6103_v44  ;;  %v6951_v41 = vpop.f32.mrb[68].mxu0 }
 0x645   : > { %v5946_v24 = vadd.f32 %v6951_v41, %v12372_v25  ;;  %v5940_v39 = vpop.f32.mrb[69].mxu0 }
 0x646   : > { %v5941_v33 = vadd.f32 %v12372_v25, %v5940_v39  ;;  %v6107_v7 = vadd.f32 %v6106_v51, %v6105_v45 }
 0x647   : > { %v6028_v28 = vmax.f32 %v5946_v24, 0.0 }
 0x648   : > { %v6027_v11 = vmax.f32 %v5941_v33, 0.0 }
 0x649   : > { %v6060_v37 = vsel %vm14161_vm0, %v6028_v28, 0.0 }
 0x64a   : > { %v6954_v13 = vpop.f32.mrb[70].mxu0  ;;  %v6059_v63 = vsel %vm14162_vm10, %v6027_v11, 0.0  ;;  %v6110_v35 = vsel %vm14164_vm14, %v6060_v37, 0.0 }
 0x64b   : > { %v5956_v6 = vadd.f32 %v6954_v13, %v12372_v25  ;;  %v5950_v49 = vpop.f32.mrb[71].mxu0  ;;  %v6108_v38 = vsel %vm14163_vm3, %v6059_v63, 0.0 }
 0x64c   : > { %v5951_v59 = vadd.f32 %v12372_v25, %v5950_v49  ;;  %v6109_v47 = vadd.f32 %v6108_v38, %v6107_v7 }
 0x64d   : > { %v6030_v42 = vmax.f32 %v5956_v6, 0.0 }
 0x64e   : > { %v6029_v19 = vmax.f32 %v5951_v59, 0.0  ;;  %v6957_v58 = vpop.f32.mrb[72].mxu0  ;;  %v6111_v22 = vadd.f32 %v6110_v35, %v6109_v47 }
 0x64f   : > { %v5966_v57 = vadd.f32 %v6957_v58, %v12372_v25  ;;  %v5960_v60 = vpop.f32.mrb[73].mxu0  ;;  %v6062_v40 = vsel %vm14165_vm9, %v6030_v42, 0.0 }
 0x650   : > { %v6061_v32 = vsel %vm14166_vm12, %v6029_v19, 0.0  ;;  %v5961_v16 = vadd.f32 %v12372_v25, %v5960_v60  ;;  %v6114_v54 = vsel %vm14168_vm7, %v6062_v40, 0.0 }
 0x651   : > { %v6112_v50 = vsel %vm14167_vm13, %v6061_v32, 0.0  ;;  %v6032_v23 = vmax.f32 %v5966_v57, 0.0 }
 0x652   : > { %v6113_v20 = vadd.f32 %v6112_v50, %v6111_v22  ;;  %v6031_v36 = vmax.f32 %v5961_v16, 0.0  ;;  %v6960_v55 = vpop.f32.mrb[74].mxu0 }
 0x653   : > { %v5970_v61 = vpop.f32.mrb[75].mxu0  ;;  %v6064_v3 = vsel %vm14125_vm5, %v6032_v23, 0.0  ;;  %vm14171_vm5 = vmmov %vm14155_vm2 }
 0x654   : > { %v6063_v21 = vsel %vm14126_vm4, %v6031_v36, 0.0  ;;  %v6115_v5 = vadd.f32 %v6114_v54, %v6113_v20  ;;  %v5971_v34 = vadd.f32 %v12372_v25, %v5970_v61  ;;  %v6118_v43 = vsel %vm14169_vm15, %v6064_v3, 0.0  ;;  %vm14172_vm4 = vmmov %vm14155_vm2 }
 0x655   : > { %v6116_v4 = vsel %vm14155_vm2, %v6063_v21, 0.0 }
 0x656   : > { %v6117_v18 = vadd.f32 %v6116_v4, %v6115_v5  ;;  %v6033_v56 = vmax.f32 %v5971_v34, 0.0  ;;  %v6963_v53 = vpop.f32.mrb[76].mxu0 }
 0x657   : > { %v5980_v0 = vpop.f32.mrb[77].mxu0 }
 0x658   : > { %v6065_v1 = vsel %vm14170_vm6, %v6033_v56, 0.0  ;;  %v6119_v2 = vadd.f32 %v6118_v43, %v6117_v18 }
 0x659   : > { %v6120_v29 = vsel %vm14171_vm5, %v6065_v1, 0.0 }
 0x65a   : > { %v6121_v17 = vadd.f32 %v6120_v29, %v6119_v2  ;;  %v6966_v10 = vpop.f32.mrb[78].mxu0 }
 0x65b   : > { %v5990_v46 = vpop.f32.mrb[79].mxu0 }
 0x65c   : > { %v6136_v25 = vrot.slane %v6121_v17, 4 }
 0x65e   : > { %v6137_v62 = vadd.f32 %v6136_v25, %v6121_v17  ;;  %v6969_v48 = vpop.f32.mrb[80].mxu0 }
 0x65f   : > { %v6000_v12 = vpop.f32.mrb[81].mxu0 }
 0x660   : > { %v6138_v9 = vrot.slane %v6137_v62, 2 }
 0x662   : > { %v6139_v27 = vadd.f32 %v6138_v9, %v6137_v62 }
 0x664   : > { %v6140_v14 = vrot.slane %v6139_v27, 1 }
 0x666   : > { %v6141_v8 = vadd.f32 %v6140_v14, %v6139_v27 }
 0x668   : > { %v6142_v44 = vmul.f32 0.008, %v6141_v8 }
 0x66a   : > { %6987 = vmatmul.mubr.msk.f32.vlgmr.msra.gmra.mrb[78].mxu1 %vm14172_vm4, %v6142_v44 }
 0x73d   : > { %v6220_v26 = vpop.f32.mrb[78].mxu1 }
 0x73e   : > { %6225 = vst.msk [vmem:[%s621_s28] sm:$0x1] %vm6224_vm1, %v6220_v26  ;;  %v6988_v52 = vpop.f32.mrb[79].mxu1 }
 0x73f   : > { %7140 = shalt.err (!%p7137_p3)
}
 0x740   : > { %s7141_s29 = scalar_lea.hbm %s12501_s23, 16  ;;  %s7145_s26 = scalar_lea.hbm %s12563_s20, 32 }
 0x741   : > { %p7142_p4 = scmp.ne.s32.totalorder %s12501_s23, %s7141_s29  ;;  %p7146_p9 = scmp.lt.u32.totalorder %s12501_s23, %s12563_s20 }
 0x742   : > { %p7147_p10 = scmp.lt.u32.totalorder %s7145_s26, %s7141_s29  ;;  %p7149_p12 = scmp.lt.u32.totalorder %s7141_s29, %s12501_s23 }
 0x743   : > { %p7143_p7 = pnand %p7142_p4, %p7338_p5 }
 0x744   : > { %p7148_p11 = por %p7147_p10, %p7146_p9 }
 0x745   : > { %p7144_p8 = pneg %p7143_p7 }
 0x746   : > { %p7150_p13 = por %p7149_p12, %p7148_p11 }
 0x748   : > { %p7151_p0 = pnand %p7150_p13, %p7144_p8 }
 0x74a   : > { %7154 = shalt.err (!%p7151_p0)
}
 0x74b   : > { %7079 = dma.vmem_to_hbm [thread:$0]  (%p7338_p5), %s12503_s0, 16, %s12501_s23, %s6227_s3  }
 0x74c PF: > { %p7085_p1 = scmp.ge.s32.totalorder %s7189_s24, 2  ;;  %s6251_s25 = sand.u32 1, %s7177_s1  }
 0x74d   : > { %s6252_s27 = scalar_lea.sflag [#allocation3], %s6251_s25 }
 0x74e   : > { %p7082_p2 = pnand %p7085_p1, %p7342_p6 }
 0x750   : > { %7172 = dma.done.wait (!%p7082_p2), %s6252_s27, 16  }
 0x751   : > { %7174 = vsyncadd (!%p7082_p2), %s6252_s27, 4294967280  ;;  %s14174_s24 = sld [smem:[#allocation6_spill]]  ;;  %s14175_s29 = sld [smem:[#allocation5_spill]] }
 0x752   : > { %s14176_s23 = sld [smem:[#allocation7_spill]]  ;;  %s14177_s1 = smov %s7181_s22 }
 0x757   : > { %p30_p3 = scmp.ge.s32.totalorder %s14174_s24, 4   ;;  %s14178_s22 = smov %s14175_s29 }
 0x759   :  { %32 = sbr.rel (!%p30_p3) target bundleno = 11 (0xb), region = 135 }
 0x760   :  { %6256 = vsyncpa [#allocation3], 1 }
 0x761   :  { %6258 = vsyncpa [#allocation3 + $0x1], 1 }

</bundles_post_ra>
